<compile_context>
chip_gen: v5e
topology: v5e:2x2
jax: 0.10.0
libtpu: 0.0.40
codegen_flags: <defaults>
</compile_context>

<pallas_src>
import functools

import jax
import jax.numpy as jnp
from jax import lax
from jax.experimental import pallas as pl
from jax.experimental.pallas import tpu as pltpu

# ----------------------------------------------------------------------------
# Config (original module: num_filters=128, latent=16, input 1x32x32).
# num_filters reduced so the synthetic script runs quickly; architecture,
# strides, kernel sizes and axis conventions are identical.
# ----------------------------------------------------------------------------
NUM_FILTERS = 16      # original: 128
LATENT = 16
IMG = 32              # input spatial size implied by encoder fc (C4 * 2 * 2)
BATCH = 2
BN_EPS = 1e-5


def _round_up(x, m):
    return (x + m - 1) // m * m


# ----------------------------------------------------------------------------
# Pallas kernel: out = act((A @ B) + shift), shift per column, BN scale folded
# into B.  Grid (M tiles, N tiles, K tiles); K last, f32 VMEM accumulator.
# A, B in bf16 (MXU native), f32 accumulate + f32 epilogue.
# ----------------------------------------------------------------------------
def _mm_bias_act_kernel(a_ref, b_ref, shift_ref, o_ref, acc_ref, *, act):
    k = pl.program_id(2)

    @pl.when(k == 0)
    def _():
        acc_ref[...] = jnp.zeros_like(acc_ref)

    acc_ref[...] += jnp.dot(a_ref[...], b_ref[...],
                            preferred_element_type=jnp.float32)

    @pl.when(k == pl.num_programs(2) - 1)
    def _():
        y = acc_ref[...] + shift_ref[...]
        if act == "relu":
            y = jnp.maximum(y, 0.0)
        elif act == "sigmoid":
            y = jax.nn.sigmoid(y)
        o_ref[...] = y.astype(o_ref.dtype)


def matmul_bias_act(a, b_pad, shift_pad, n_real, act, out_dtype=jnp.float32):
    """a: (M, K); b_pad: (K, Np) bf16 with Np % 128 == 0 (BN scale folded in);
       shift_pad: (1, Np) f32  ->  (M, n_real) in out_dtype."""
    M, K = a.shape
    Kb, Np = b_pad.shape
    assert K == Kb and Np % 128 == 0

    # M tiling: round tiny M up to 8 (single block); TM=256 for large M
    # (matches 256-wide v6e/v7x MXU; two 128-row pushes on v5e).
    m8 = _round_up(M, 8)
    tm = m8 if m8 <= 256 else 256
    m_pad = _round_up(m8, tm)

    # K tiling: whole-K block when small enough to sit comfortably in VMEM;
    # otherwise 512-deep accumulation steps (keeps production NUM_FILTERS=128
    # weights off-VMEM and pipelines their DMA under MXU compute).
    if K > 1024:
        tk = 512
        k_pad = _round_up(K, tk)
    else:
        tk, k_pad = K, K

    # N tiling: largest of {512, 256, 128} dividing Np; if the parallel grid
    # would collapse to a single point, split N once more (v7x megacore).
    tn = 128
    for cand in (512, 256):
        if cand <= Np and Np % cand == 0:
            tn = cand
            break
    if (m_pad // tm) * (Np // tn) == 1 and tn >= 256:
        tn //= 2

    a_p = a.astype(jnp.bfloat16)
    if (m_pad, k_pad) != (M, K):
        a_p = jnp.pad(a_p, ((0, m_pad - M), (0, k_pad - K)))
    b_p = b_pad if k_pad == K else jnp.pad(b_pad, ((0, k_pad - K), (0, 0)))

    grid = (m_pad // tm, Np // tn, k_pad // tk)
    out_isize = jnp.dtype(out_dtype).itemsize
    cost = pl.CostEstimate(
        flops=2 * m_pad * k_pad * Np,
        transcendentals=(m_pad * Np) if act == "sigmoid" else 0,
        bytes_accessed=(m_pad * k_pad * 2 + k_pad * Np * 2 + Np * 4
                        + m_pad * Np * out_isize),
    )

    out = pl.pallas_call(
        functools.partial(_mm_bias_act_kernel, act=act),
        out_shape=jax.ShapeDtypeStruct((m_pad, Np), out_dtype),
        grid=grid,
        in_specs=[
            pl.BlockSpec((tm, tk), lambda i, j, k: (i, k)),
            pl.BlockSpec((tk, tn), lambda i, j, k: (k, j)),
            pl.BlockSpec((1, tn), lambda i, j, k: (0, j)),
        ],
        out_specs=pl.BlockSpec((tm, tn), lambda i, j, k: (i, j)),
        scratch_shapes=[pltpu.VMEM((tm, tn), jnp.float32)],
        compiler_params=pltpu.CompilerParams(
            dimension_semantics=("parallel", "parallel", "arbitrary")),
        cost_estimate=cost,
    )(a_p, b_p, shift_pad)
    return out[:M, :n_real]


# ----------------------------------------------------------------------------
# Conv / ConvTranspose lowered to im2col + one fused Pallas GEMM per layer.
# ----------------------------------------------------------------------------
def _im2col(xp, kh, kw, stride):
    """xp: padded NHWC -> (N*Ho*Wo, kh*kw*C), K ordered (kh, kw, ci)."""
    N, Hp, Wp, C = xp.shape
    Ho = (Hp - kh) // stride + 1
    Wo = (Wp - kw) // stride + 1
    cols = []
    for i in range(kh):
        for j in range(kw):
            cols.append(
                xp[:, i:i + stride * (Ho - 1) + 1:stride,
                      j:j + stride * (Wo - 1) + 1:stride, :])
    patches = jnp.stack(cols, axis=3)                  # (N, Ho, Wo, kh*kw, C)
    return patches.reshape(N * Ho * Wo, kh * kw * C), Ho, Wo


def conv2d_pallas(x_nhwc, layer, act, kh, kw, stride, pad, out_dtype):
    wm, sh, n_real = layer
    N = x_nhwc.shape[0]
    xp = jnp.pad(x_nhwc, ((0, 0), (pad, pad), (pad, pad), (0, 0)))
    patches, Ho, Wo = _im2col(xp, kh, kw, stride)
    out = matmul_bias_act(patches, wm, sh, n_real, act, out_dtype)
    return out.reshape(N, Ho, Wo, n_real)


def deconv_s2k4p1_pallas(x_nhwc, layer, act, out_dtype):
    """ConvTranspose2d(k=4, s=2, p=1) via stride-phase (subpixel) decomposition:
    one GEMM over shared 3x3 patches of the UN-dilated input computes all 4
    output phases at once (columns are phase-major); output is interleaved."""
    wm, sh, n4 = layer
    cout = n4 // 4
    N, H, W, _ = x_nhwc.shape
    xp = jnp.pad(x_nhwc, ((0, 0), (1, 1), (1, 1), (0, 0)))
    patches, _, _ = _im2col(xp, 3, 3, 1)               # Ho == H, Wo == W
    out = matmul_bias_act(patches, wm, sh, n4, act, out_dtype)
    out = out.reshape(N, H, W, 2, 2, cout)             # (..., r, c, cout)
    out = out.transpose(0, 1, 3, 2, 4, 5).reshape(N, 2 * H, 2 * W, cout)
    return out


# ----------------------------------------------------------------------------
# Parameter preparation: fold bias + eval-mode BN into per-column affine, fold
# the BN scale into the bf16 weight columns, fold flatten permutations into fc
# weights, pre-pack GEMM weights (bf16, N padded to a multiple of 128).
# ----------------------------------------------------------------------------
def bn_fold(bias, bn_params, eps=BN_EPS):
    gamma, beta, mean, var = bn_params
    s = gamma / jnp.sqrt(var + eps)
    return s, beta - mean * s + bias * s


def _gemm_ready(wm, scale, shift):
    """Pack (K, N) weight + per-column scale/shift -> lane-dense operands.
    Scale is folded into the weight (f32) before the bf16 cast."""
    K, N = wm.shape
    np_ = _round_up(N, 128)
    w = wm.astype(jnp.float32) * scale.astype(jnp.float32).reshape(1, N)
    w = jnp.pad(w, ((0, 0), (0, np_ - N))).astype(jnp.bfloat16)
    sh = jnp.pad(shift.astype(jnp.float32).reshape(1, N),
                 ((0, 0), (0, np_ - N)))
    return (w, sh, N)


def _deconv_phase_weight(w_iohw):
    """(Cin, Cout, 4, 4) ConvTranspose weight -> (9*Cin, 4*Cout) GEMM weight
    for the stride-2 phase decomposition over shared 3x3 patches.
      out[2m+r] uses taps: r=0 -> {w[3]@off0, w[1]@off1}; r=1 -> {w[2]@off1, w[0]@off2}
    (per spatial axis), phase index = r*2 + c is column-major over Cout blocks."""
    cin, cout, kh, kw = w_iohw.shape
    assert (kh, kw) == (4, 4)
    taps = [[3, 1, -1], [-1, 2, 0]]        # [phase][patch offset] -> kernel tap
    B = jnp.zeros((3, 3, cin, 4 * cout), jnp.float32)
    for r in range(2):
        for c in range(2):
            ph = r * 2 + c
            for a in range(3):
                for b in range(3):
                    ki, kj = taps[r][a], taps[c][b]
                    if ki < 0 or kj < 0:
                        continue
                    B = B.at[a, b, :, ph * cout:(ph + 1) * cout].set(
                        w_iohw[:, :, ki, kj])
    return B.reshape(9 * cin, 4 * cout)


def prepare_params(p):
    nf, L = NUM_FILTERS, LATENT
    C4 = 8 * nf
    es, ds = IMG // 16, IMG // 4
    q = {}

    # Encoder convs.
    for i in (1, 2, 3, 4):
        w, b, bn = p[f"e_w{i}"], p[f"e_b{i}"], p[f"e_bn{i}"]
        cout, cin, kh, kw = w.shape
        wm = jnp.transpose(w, (2, 3, 1, 0)).reshape(kh * kw * cin, cout)
        s, t = bn_fold(b, bn)
        q[f"enc{i}"] = _gemm_ready(wm, s, t)

    # Encoder fc: permute input features (c,h,w) -> (h,w,c) so the NHWC
    # flatten feeds it directly (no transpose between pallas_calls).
    W = p["e_fcw"]                                     # (L, C4*es*es)
    B = W.reshape(L, C4, es, es).transpose(2, 3, 1, 0).reshape(es * es * C4, L)
    q["enc_fc"] = _gemm_ready(B, jnp.ones((L,), jnp.float32), p["e_fcb"])

    # Decoder fc: permute output features (c,h,w) -> (h,w,c) so the GEMM output
    # is already NHWC; fold fc bias + BatchNorm2d(C4) into column scale/shift.
    Wd = p["d_fcw"]                                    # (ds*ds*C4, L)
    Bd = Wd.reshape(C4, ds, ds, L).transpose(1, 2, 0, 3)
    Bd = Bd.reshape(ds * ds * C4, L).T                 # (L, ds*ds*C4), (h,w,c)
    b_hwc = p["d_fcb"].reshape(C4, ds, ds).transpose(1, 2, 0).reshape(-1)
    gamma, beta, mean, var = p["d_bn0"]
    sc = gamma / jnp.sqrt(var + BN_EPS)
    sh = beta - mean * sc
    scale_col = jnp.tile(sc, ds * ds)
    shift_col = jnp.tile(sh, ds * ds) + b_hwc * scale_col
    q["dec_fc"] = _gemm_ready(Bd, scale_col, shift_col)

    # Decoder transposed convs (k=4, s=2, p=1): phase-decomposed GEMM weights.
    for i in (1, 2):
        w, b, bn = p[f"d_w{i}"], p[f"d_b{i}"], p[f"d_bn{i}"]
        s, t = bn_fold(b, bn)
        wg = _deconv_phase_weight(w)                   # (9*Cin, 4*Cout)
        q[f"dec{i}"] = _gemm_ready(wg, jnp.tile(s, 4), jnp.tile(t, 4))

    # Final ConvTranspose2d(k=5, s=1, p=2) == conv with flipped/swapped kernel.
    w3 = p["d_w3"]                                     # (Cin, 1, 5, 5)
    w_eq = jnp.transpose(w3[:, :, ::-1, ::-1], (1, 0, 2, 3))
    wm3 = jnp.transpose(w_eq, (2, 3, 1, 0)).reshape(25 * w3.shape[0], 1)
    q["dec3"] = _gemm_ready(wm3, jnp.ones((1,), jnp.float32), p["d_b3"])
    return q


# ----------------------------------------------------------------------------
# WAE forward (Encoder + Decoder) using the prepared GEMM-ready params.
# ----------------------------------------------------------------------------
def wae_forward(x_nchw, q):
    N = x_nchw.shape[0]
    ds = IMG // 4
    C4 = 8 * NUM_FILTERS

    x = jnp.transpose(x_nchw, (0, 2, 3, 1)).astype(jnp.bfloat16)   # NHWC, bf16

    # ---------------- Encoder ----------------
    for i in (1, 2, 3, 4):
        x = conv2d_pallas(x, q[f"enc{i}"], "relu", 4, 4, 2, 1, jnp.bfloat16)
    flat = x.reshape(N, -1)                      # (h,w,c) order, matches enc_fc
    z = matmul_bias_act(flat, *q["enc_fc"], "none", jnp.float32)

    # ---------------- Decoder ----------------
    y = matmul_bias_act(z.astype(jnp.bfloat16), *q["dec_fc"],
                        "relu", jnp.bfloat16)
    y = y.reshape(N, ds, ds, C4)                 # already NHWC (folded permute)
    y = deconv_s2k4p1_pallas(y, q["dec1"], "relu", jnp.bfloat16)
    y = deconv_s2k4p1_pallas(y, q["dec2"], "relu", jnp.bfloat16)
    # Cout=1: keep the padded GEMM output in bf16 (halves writeback traffic).
    y = conv2d_pallas(y, q["dec3"], "sigmoid", 5, 5, 1, 2, jnp.bfloat16)

    return jnp.transpose(y, (0, 3, 1, 2)).astype(jnp.float32)   # NCHW f32


# ----------------------------------------------------------------------------
# Pure-JAX reference (eval-mode BN), mirrors the PyTorch module, for checking.
# ----------------------------------------------------------------------------
def _ref_bn(x, bn):
    g, b, m, v = bn
    rs = lambda a: a.reshape(1, -1, 1, 1)
    return (x - rs(m)) / jnp.sqrt(rs(v) + BN_EPS) * rs(g) + rs(b)


def _ref_conv(x, w, b, stride, pad):
    y = lax.conv_general_dilated(x, w, (stride, stride),
                                 [(pad, pad), (pad, pad)],
                                 dimension_numbers=("NCHW", "OIHW", "NCHW"))
    return y + b.reshape(1, -1, 1, 1)


def _ref_convT(x, w_iohw, b, stride, pad):
    k = w_iohw.shape[2]
    w_eq = jnp.transpose(w_iohw[:, :, ::-1, ::-1], (1, 0, 2, 3))
    y = lax.conv_general_dilated(x, w_eq, (1, 1),
                                 [(k - 1 - pad, k - 1 - pad)] * 2,
                                 lhs_dilation=(stride, stride),
                                 dimension_numbers=("NCHW", "OIHW", "NCHW"))
    return y + b.reshape(1, -1, 1, 1)


def wae_reference(x, p):
    C4 = 8 * NUM_FILTERS
    ds = IMG // 4
    h = x
    for i in (1, 2, 3, 4):
        h = jax.nn.relu(_ref_bn(_ref_conv(h, p[f"e_w{i}"], p[f"e_b{i}"], 2, 1),
                                p[f"e_bn{i}"]))
    z = h.reshape(h.shape[0], -1) @ p["e_fcw"].T + p["e_fcb"]
    y = z @ p["d_fcw"].T + p["d_fcb"]
    y = jax.nn.relu(_ref_bn(y.reshape(-1, C4, ds, ds), p["d_bn0"]))
    y = jax.nn.relu(_ref_bn(_ref_convT(y, p["d_w1"], p["d_b1"], 2, 1),
                            p["d_bn1"]))
    y = jax.nn.relu(_ref_bn(_ref_convT(y, p["d_w2"], p["d_b2"], 2, 1),
                            p["d_bn2"]))
    y = jax.nn.sigmoid(_ref_convT(y, p["d_w3"], p["d_b3"], 1, 2))
    return y


# ----------------------------------------------------------------------------
# Deterministic parameter init (shapes follow the PyTorch module __init__).
# ----------------------------------------------------------------------------
def init_params(key):
    nf, L = NUM_FILTERS, LATENT
    C4 = 8 * nf
    es = IMG // 16
    ds = IMG // 4
    keys = iter(jax.random.split(key, 64))

    def w(shape, scale=0.05):
        return jax.random.normal(next(keys), shape, jnp.float32) * scale

    def bn(c):
        gamma = jax.random.uniform(next(keys), (c,), jnp.float32, 0.5, 1.5)
        beta = w((c,), 0.1)
        mean = w((c,), 0.1)
        var = jax.random.uniform(next(keys), (c,), jnp.float32, 0.5, 1.5)
        return (gamma, beta, mean, var)

    p = {}
    # Encoder
    p["e_w1"], p["e_b1"] = w((nf, 1, 4, 4)), w((nf,), 0.01)
    p["e_bn1"] = bn(nf)
    p["e_w2"], p["e_b2"] = w((2 * nf, nf, 4, 4)), w((2 * nf,), 0.01)
    p["e_bn2"] = bn(2 * nf)
    p["e_w3"], p["e_b3"] = w((4 * nf, 2 * nf, 4, 4)), w((4 * nf,), 0.01)
    p["e_bn3"] = bn(4 * nf)
    p["e_w4"], p["e_b4"] = w((8 * nf, 4 * nf, 4, 4)), w((8 * nf,), 0.01)
    p["e_bn4"] = bn(8 * nf)
    p["e_fcw"], p["e_fcb"] = w((L, C4 * es * es)), w((L,), 0.01)
    # Decoder
    p["d_fcw"], p["d_fcb"] = w((ds * ds * C4, L)), w((ds * ds * C4,), 0.01)
    p["d_bn0"] = bn(C4)
    p["d_w1"], p["d_b1"] = w((C4, 4 * nf, 4, 4)), w((4 * nf,), 0.01)
    p["d_bn1"] = bn(4 * nf)
    p["d_w2"], p["d_b2"] = w((4 * nf, 2 * nf, 4, 4)), w((2 * nf,), 0.01)
    p["d_bn2"] = bn(2 * nf)
    p["d_w3"], p["d_b3"] = w((2 * nf, 1, 5, 5)), w((1,), 0.01)
    return p


if __name__ == "__main__":
    key = jax.random.PRNGKey(0)
    pkey, xkey = jax.random.split(key)
    params = init_params(pkey)
    prepped = prepare_params(params)
    x = jax.random.uniform(xkey, (BATCH, 1, IMG, IMG), jnp.float32)  # MNIST-like

    fwd = jax.jit(lambda inp: wae_forward(inp, prepped))
    out = jax.block_until_ready(fwd(x))

    assert out.shape == (BATCH, 1, IMG, IMG), out.shape
    assert bool(jnp.all(jnp.isfinite(out)))
    assert bool(jnp.all((out >= 0.0) & (out <= 1.0)))   # sigmoid output range

    # Numerical check vs. pure-JAX reference (bf16 MXU inputs -> loose tol).
    ref = wae_reference(x, params)
    max_err = float(jnp.max(jnp.abs(out - ref)))
    assert max_err < 5e-2, f"mismatch vs reference: {max_err}"

    print("KERNEL_OK")
</pallas_src>

<mosaic_0001>
module attributes {stable_mosaic.version = 11 : i64} {
  func.func @_mm_bias_act_kernel(%arg0: i32, %arg1: i32, %arg2: i32, %arg3: memref<256x16xbf16, #tpu.memory_space<vmem>>, %arg4: memref<16x128xbf16, #tpu.memory_space<vmem>>, %arg5: memref<1x128xf32, #tpu.memory_space<vmem>>, %arg6: memref<256x128xbf16, #tpu.memory_space<vmem>>, %arg7: memref<256x128xf32, #tpu.memory_space<vmem>>) attributes {dimension_semantics = [#tpu.dimension_semantics<parallel>, #tpu.dimension_semantics<parallel>, #tpu.dimension_semantics<arbitrary>], iteration_bounds = array<i64: 2, 1, 1>, scalar_prefetch = 0 : i64, scratch_operands = 1 : i64, tpu.core_type = #tpu.core_type<tc>, window_params = [{transform_indices = @transform_0, window_bounds = array<i64: 256, 16>}, {transform_indices = @transform_1, window_bounds = array<i64: 16, 128>}, {transform_indices = @transform_2, window_bounds = array<i64: 1, 128>}, {transform_indices = @transform_3, window_bounds = array<i64: 256, 128>}]} {
    %c0_i32 = arith.constant 0 : i32
    %0 = arith.cmpi eq, %arg2, %c0_i32 : i32
    %1 = arith.extui %0 : i1 to i32
    %c0_i32_0 = arith.constant 0 : i32
    %2 = arith.cmpi ne, %1, %c0_i32_0 : i32
    scf.if %2 {
      %cst_10 = arith.constant 0.000000e+00 : f32
      %12 = vector.broadcast %cst_10 : f32 to vector<256x128xf32>
      %c0_11 = arith.constant 0 : index
      %c0_12 = arith.constant 0 : index
      %13 = vector.load %arg7[%c0_11, %c0_12] : memref<256x128xf32, #tpu.memory_space<vmem>>, vector<256x128xf32>
      tpu.vector_store %arg7[%c0_11, %c0_12], %12 {strides = array<i32>} : memref<256x128xf32, #tpu.memory_space<vmem>>, vector<256x128xf32>,
    } else {
    }
    %c0 = arith.constant 0 : index
    %c0_1 = arith.constant 0 : index
    %3 = vector.load %arg7[%c0, %c0_1] : memref<256x128xf32, #tpu.memory_space<vmem>>, vector<256x128xf32>
    %c0_2 = arith.constant 0 : index
    %c0_3 = arith.constant 0 : index
    %4 = vector.load %arg3[%c0_2, %c0_3] : memref<256x16xbf16, #tpu.memory_space<vmem>>, vector<256x16xbf16>
    %c0_4 = arith.constant 0 : index
    %c0_5 = arith.constant 0 : index
    %5 = vector.load %arg4[%c0_4, %c0_5] : memref<16x128xbf16, #tpu.memory_space<vmem>>, vector<16x128xbf16>
    %cst = arith.constant dense<0.000000e+00> : vector<256x128xf32>
    %6 = tpu.matmul %4, %5, %cst {dimension_numbers = #tpu.dot_dimension_numbers<[1], [0], [0], [1], [0, 0, 1, 1], [], []>} : vector<256x16xbf16>, vector<16x128xbf16>, vector<256x128xf32> -> vector<256x128xf32>
    %7 = arith.addf %3, %6 : vector<256x128xf32>
    %c0_6 = arith.constant 0 : index
    %c0_7 = arith.constant 0 : index
    %8 = vector.load %arg7[%c0_6, %c0_7] : memref<256x128xf32, #tpu.memory_space<vmem>>, vector<256x128xf32>
    tpu.vector_store %arg7[%c0_6, %c0_7], %7 {strides = array<i32>} : memref<256x128xf32, #tpu.memory_space<vmem>>, vector<256x128xf32>,
    %c0_i32_8 = arith.constant 0 : i32
    %9 = arith.cmpi eq, %arg2, %c0_i32_8 : i32
    %10 = arith.extui %9 : i1 to i32
    %c0_i32_9 = arith.constant 0 : i32
    %11 = arith.cmpi ne, %10, %c0_i32_9 : i32
    scf.if %11 {
      %c0_10 = arith.constant 0 : index
      %c0_11 = arith.constant 0 : index
      %12 = vector.load %arg7[%c0_10, %c0_11] : memref<256x128xf32, #tpu.memory_space<vmem>>, vector<256x128xf32>
      %c0_12 = arith.constant 0 : index
      %c0_13 = arith.constant 0 : index
      %13 = vector.load %arg5[%c0_12, %c0_13] : memref<1x128xf32, #tpu.memory_space<vmem>>, vector<1x128xf32>
      %14 = vector.broadcast %13 : vector<1x128xf32> to vector<256x128xf32>
      %15 = arith.addf %12, %14 : vector<256x128xf32>
      %cst_14 = arith.constant 0.000000e+00 : f32
      %16 = vector.broadcast %cst_14 : f32 to vector<256x128xf32>
      %17 = arith.maximumf %15, %16 : vector<256x128xf32>
      %18 = arith.truncf %17 : vector<256x128xf32> to vector<256x128xbf16>
      %c0_15 = arith.constant 0 : index
      %c0_16 = arith.constant 0 : index
      %19 = vector.load %arg6[%c0_15, %c0_16] : memref<256x128xbf16, #tpu.memory_space<vmem>>, vector<256x128xbf16>
      tpu.vector_store %arg6[%c0_15, %c0_16], %18 {strides = array<i32>} : memref<256x128xbf16, #tpu.memory_space<vmem>>, vector<256x128xbf16>,
    } else {
    }
    return
  }
  func.func @transform_0(%arg0: i32, %arg1: i32, %arg2: i32) -> (i32, i32) {
    %c0_i32 = arith.constant 0 : i32
    return %arg0, %arg2 : i32, i32
  }
  func.func @transform_1(%arg0: i32, %arg1: i32, %arg2: i32) -> (i32, i32) {
    %c0_i32 = arith.constant 0 : i32
    return %arg2, %arg1 : i32, i32
  }
  func.func @transform_2(%arg0: i32, %arg1: i32, %arg2: i32) -> (i32, i32) {
    %c0_i32 = arith.constant 0 : i32
    %c0_i32_0 = arith.constant 0 : i32
    return %c0_i32, %arg1 : i32, i32
  }
  func.func @transform_3(%arg0: i32, %arg1: i32, %arg2: i32) -> (i32, i32) {
    %c0_i32 = arith.constant 0 : i32
    return %arg0, %arg1 : i32, i32
  }
}

module attributes {stable_mosaic.version = 11 : i64} {
  func.func @_mm_bias_act_kernel(%arg0: i32, %arg1: i32, %arg2: i32, %arg3: memref<128x256xbf16, #tpu.memory_space<vmem>>, %arg4: memref<256x128xbf16, #tpu.memory_space<vmem>>, %arg5: memref<1x128xf32, #tpu.memory_space<vmem>>, %arg6: memref<128x128xbf16, #tpu.memory_space<vmem>>, %arg7: memref<128x128xf32, #tpu.memory_space<vmem>>) attributes {dimension_semantics = [#tpu.dimension_semantics<parallel>, #tpu.dimension_semantics<parallel>, #tpu.dimension_semantics<arbitrary>], iteration_bounds = array<i64: 1, 1, 1>, scalar_prefetch = 0 : i64, scratch_operands = 1 : i64, tpu.core_type = #tpu.core_type<tc>, window_params = [{transform_indices = @transform_0, window_bounds = array<i64: 128, 256>}, {transform_indices = @transform_1, window_bounds = array<i64: 256, 128>}, {transform_indices = @transform_2, window_bounds = array<i64: 1, 128>}, {transform_indices = @transform_3, window_bounds = array<i64: 128, 128>}]} {
    %c0_i32 = arith.constant 0 : i32
    %0 = arith.cmpi eq, %arg2, %c0_i32 : i32
    %1 = arith.extui %0 : i1 to i32
    %c0_i32_0 = arith.constant 0 : i32
    %2 = arith.cmpi ne, %1, %c0_i32_0 : i32
    scf.if %2 {
      %cst_10 = arith.constant 0.000000e+00 : f32
      %12 = vector.broadcast %cst_10 : f32 to vector<128x128xf32>
      %c0_11 = arith.constant 0 : index
      %c0_12 = arith.constant 0 : index
      %13 = vector.load %arg7[%c0_11, %c0_12] : memref<128x128xf32, #tpu.memory_space<vmem>>, vector<128x128xf32>
      tpu.vector_store %arg7[%c0_11, %c0_12], %12 {strides = array<i32>} : memref<128x128xf32, #tpu.memory_space<vmem>>, vector<128x128xf32>,
    } else {
    }
    %c0 = arith.constant 0 : index
    %c0_1 = arith.constant 0 : index
    %3 = vector.load %arg7[%c0, %c0_1] : memref<128x128xf32, #tpu.memory_space<vmem>>, vector<128x128xf32>
    %c0_2 = arith.constant 0 : index
    %c0_3 = arith.constant 0 : index
    %4 = vector.load %arg3[%c0_2, %c0_3] : memref<128x256xbf16, #tpu.memory_space<vmem>>, vector<128x256xbf16>
    %c0_4 = arith.constant 0 : index
    %c0_5 = arith.constant 0 : index
    %5 = vector.load %arg4[%c0_4, %c0_5] : memref<256x128xbf16, #tpu.memory_space<vmem>>, vector<256x128xbf16>
    %cst = arith.constant dense<0.000000e+00> : vector<128x128xf32>
    %6 = tpu.matmul %4, %5, %cst {dimension_numbers = #tpu.dot_dimension_numbers<[1], [0], [0], [1], [0, 0, 1, 1], [], []>} : vector<128x256xbf16>, vector<256x128xbf16>, vector<128x128xf32> -> vector<128x128xf32>
    %7 = arith.addf %3, %6 : vector<128x128xf32>
    %c0_6 = arith.constant 0 : index
    %c0_7 = arith.constant 0 : index
    %8 = vector.load %arg7[%c0_6, %c0_7] : memref<128x128xf32, #tpu.memory_space<vmem>>, vector<128x128xf32>
    tpu.vector_store %arg7[%c0_6, %c0_7], %7 {strides = array<i32>} : memref<128x128xf32, #tpu.memory_space<vmem>>, vector<128x128xf32>,
    %c0_i32_8 = arith.constant 0 : i32
    %9 = arith.cmpi eq, %arg2, %c0_i32_8 : i32
    %10 = arith.extui %9 : i1 to i32
    %c0_i32_9 = arith.constant 0 : i32
    %11 = arith.cmpi ne, %10, %c0_i32_9 : i32
    scf.if %11 {
      %c0_10 = arith.constant 0 : index
      %c0_11 = arith.constant 0 : index
      %12 = vector.load %arg7[%c0_10, %c0_11] : memref<128x128xf32, #tpu.memory_space<vmem>>, vector<128x128xf32>
      %c0_12 = arith.constant 0 : index
      %c0_13 = arith.constant 0 : index
      %13 = vector.load %arg5[%c0_12, %c0_13] : memref<1x128xf32, #tpu.memory_space<vmem>>, vector<1x128xf32>
      %14 = vector.broadcast %13 : vector<1x128xf32> to vector<128x128xf32>
      %15 = arith.addf %12, %14 : vector<128x128xf32>
      %cst_14 = arith.constant 0.000000e+00 : f32
      %16 = vector.broadcast %cst_14 : f32 to vector<128x128xf32>
      %17 = arith.maximumf %15, %16 : vector<128x128xf32>
      %18 = arith.truncf %17 : vector<128x128xf32> to vector<128x128xbf16>
      %c0_15 = arith.constant 0 : index
      %c0_16 = arith.constant 0 : index
      %19 = vector.load %arg6[%c0_15, %c0_16] : memref<128x128xbf16, #tpu.memory_space<vmem>>, vector<128x128xbf16>
      tpu.vector_store %arg6[%c0_15, %c0_16], %18 {strides = array<i32>} : memref<128x128xbf16, #tpu.memory_space<vmem>>, vector<128x128xbf16>,
    } else {
    }
    return
  }
  func.func @transform_0(%arg0: i32, %arg1: i32, %arg2: i32) -> (i32, i32) {
    %c0_i32 = arith.constant 0 : i32
    return %arg0, %arg2 : i32, i32
  }
  func.func @transform_1(%arg0: i32, %arg1: i32, %arg2: i32) -> (i32, i32) {
    %c0_i32 = arith.constant 0 : i32
    return %arg2, %arg1 : i32, i32
  }
  func.func @transform_2(%arg0: i32, %arg1: i32, %arg2: i32) -> (i32, i32) {
    %c0_i32 = arith.constant 0 : i32
    %c0_i32_0 = arith.constant 0 : i32
    return %c0_i32, %arg1 : i32, i32
  }
  func.func @transform_3(%arg0: i32, %arg1: i32, %arg2: i32) -> (i32, i32) {
    %c0_i32 = arith.constant 0 : i32
    return %arg0, %arg1 : i32, i32
  }
}

module attributes {stable_mosaic.version = 11 : i64} {
  func.func @_mm_bias_act_kernel(%arg0: i32, %arg1: i32, %arg2: i32, %arg3: memref<32x512xbf16, #tpu.memory_space<vmem>>, %arg4: memref<512x128xbf16, #tpu.memory_space<vmem>>, %arg5: memref<1x128xf32, #tpu.memory_space<vmem>>, %arg6: memref<32x128xbf16, #tpu.memory_space<vmem>>, %arg7: memref<32x128xf32, #tpu.memory_space<vmem>>) attributes {dimension_semantics = [#tpu.dimension_semantics<parallel>, #tpu.dimension_semantics<parallel>, #tpu.dimension_semantics<arbitrary>], iteration_bounds = array<i64: 1, 1, 1>, scalar_prefetch = 0 : i64, scratch_operands = 1 : i64, tpu.core_type = #tpu.core_type<tc>, window_params = [{transform_indices = @transform_0, window_bounds = array<i64: 32, 512>}, {transform_indices = @transform_1, window_bounds = array<i64: 512, 128>}, {transform_indices = @transform_2, window_bounds = array<i64: 1, 128>}, {transform_indices = @transform_3, window_bounds = array<i64: 32, 128>}]} {
    %c0_i32 = arith.constant 0 : i32
    %0 = arith.cmpi eq, %arg2, %c0_i32 : i32
    %1 = arith.extui %0 : i1 to i32
    %c0_i32_0 = arith.constant 0 : i32
    %2 = arith.cmpi ne, %1, %c0_i32_0 : i32
    scf.if %2 {
      %cst_10 = arith.constant 0.000000e+00 : f32
      %12 = vector.broadcast %cst_10 : f32 to vector<32x128xf32>
      %c0_11 = arith.constant 0 : index
      %c0_12 = arith.constant 0 : index
      %13 = vector.load %arg7[%c0_11, %c0_12] : memref<32x128xf32, #tpu.memory_space<vmem>>, vector<32x128xf32>
      tpu.vector_store %arg7[%c0_11, %c0_12], %12 {strides = array<i32>} : memref<32x128xf32, #tpu.memory_space<vmem>>, vector<32x128xf32>,
    } else {
    }
    %c0 = arith.constant 0 : index
    %c0_1 = arith.constant 0 : index
    %3 = vector.load %arg7[%c0, %c0_1] : memref<32x128xf32, #tpu.memory_space<vmem>>, vector<32x128xf32>
    %c0_2 = arith.constant 0 : index
    %c0_3 = arith.constant 0 : index
    %4 = vector.load %arg3[%c0_2, %c0_3] : memref<32x512xbf16, #tpu.memory_space<vmem>>, vector<32x512xbf16>
    %c0_4 = arith.constant 0 : index
    %c0_5 = arith.constant 0 : index
    %5 = vector.load %arg4[%c0_4, %c0_5] : memref<512x128xbf16, #tpu.memory_space<vmem>>, vector<512x128xbf16>
    %cst = arith.constant dense<0.000000e+00> : vector<32x128xf32>
    %6 = tpu.matmul %4, %5, %cst {dimension_numbers = #tpu.dot_dimension_numbers<[1], [0], [0], [1], [0, 0, 1, 1], [], []>} : vector<32x512xbf16>, vector<512x128xbf16>, vector<32x128xf32> -> vector<32x128xf32>
    %7 = arith.addf %3, %6 : vector<32x128xf32>
    %c0_6 = arith.constant 0 : index
    %c0_7 = arith.constant 0 : index
    %8 = vector.load %arg7[%c0_6, %c0_7] : memref<32x128xf32, #tpu.memory_space<vmem>>, vector<32x128xf32>
    tpu.vector_store %arg7[%c0_6, %c0_7], %7 {strides = array<i32>} : memref<32x128xf32, #tpu.memory_space<vmem>>, vector<32x128xf32>,
    %c0_i32_8 = arith.constant 0 : i32
    %9 = arith.cmpi eq, %arg2, %c0_i32_8 : i32
    %10 = arith.extui %9 : i1 to i32
    %c0_i32_9 = arith.constant 0 : i32
    %11 = arith.cmpi ne, %10, %c0_i32_9 : i32
    scf.if %11 {
      %c0_10 = arith.constant 0 : index
      %c0_11 = arith.constant 0 : index
      %12 = vector.load %arg7[%c0_10, %c0_11] : memref<32x128xf32, #tpu.memory_space<vmem>>, vector<32x128xf32>
      %c0_12 = arith.constant 0 : index
      %c0_13 = arith.constant 0 : index
      %13 = vector.load %arg5[%c0_12, %c0_13] : memref<1x128xf32, #tpu.memory_space<vmem>>, vector<1x128xf32>
      %14 = vector.broadcast %13 : vector<1x128xf32> to vector<32x128xf32>
      %15 = arith.addf %12, %14 : vector<32x128xf32>
      %cst_14 = arith.constant 0.000000e+00 : f32
      %16 = vector.broadcast %cst_14 : f32 to vector<32x128xf32>
      %17 = arith.maximumf %15, %16 : vector<32x128xf32>
      %18 = arith.truncf %17 : vector<32x128xf32> to vector<32x128xbf16>
      %c0_15 = arith.constant 0 : index
      %c0_16 = arith.constant 0 : index
      %19 = vector.load %arg6[%c0_15, %c0_16] : memref<32x128xbf16, #tpu.memory_space<vmem>>, vector<32x128xbf16>
      tpu.vector_store %arg6[%c0_15, %c0_16], %18 {strides = array<i32>} : memref<32x128xbf16, #tpu.memory_space<vmem>>, vector<32x128xbf16>,
    } else {
    }
    return
  }
  func.func @transform_0(%arg0: i32, %arg1: i32, %arg2: i32) -> (i32, i32) {
    %c0_i32 = arith.constant 0 : i32
    return %arg0, %arg2 : i32, i32
  }
  func.func @transform_1(%arg0: i32, %arg1: i32, %arg2: i32) -> (i32, i32) {
    %c0_i32 = arith.constant 0 : i32
    return %arg2, %arg1 : i32, i32
  }
  func.func @transform_2(%arg0: i32, %arg1: i32, %arg2: i32) -> (i32, i32) {
    %c0_i32 = arith.constant 0 : i32
    %c0_i32_0 = arith.constant 0 : i32
    return %c0_i32, %arg1 : i32, i32
  }
  func.func @transform_3(%arg0: i32, %arg1: i32, %arg2: i32) -> (i32, i32) {
    %c0_i32 = arith.constant 0 : i32
    return %arg0, %arg1 : i32, i32
  }
}

module attributes {stable_mosaic.version = 11 : i64} {
  func.func @_mm_bias_act_kernel(%arg0: i32, %arg1: i32, %arg2: i32, %arg3: memref<8x16xbf16, #tpu.memory_space<vmem>>, %arg4: memref<16x512xbf16, #tpu.memory_space<vmem>>, %arg5: memref<1x512xf32, #tpu.memory_space<vmem>>, %arg6: memref<8x512xbf16, #tpu.memory_space<vmem>>, %arg7: memref<8x512xf32, #tpu.memory_space<vmem>>) attributes {dimension_semantics = [#tpu.dimension_semantics<parallel>, #tpu.dimension_semantics<parallel>, #tpu.dimension_semantics<arbitrary>], iteration_bounds = array<i64: 1, 16, 1>, scalar_prefetch = 0 : i64, scratch_operands = 1 : i64, tpu.core_type = #tpu.core_type<tc>, window_params = [{transform_indices = @transform_0, window_bounds = array<i64: 8, 16>}, {transform_indices = @transform_1, window_bounds = array<i64: 16, 512>}, {transform_indices = @transform_2, window_bounds = array<i64: 1, 512>}, {transform_indices = @transform_3, window_bounds = array<i64: 8, 512>}]} {
    %c0_i32 = arith.constant 0 : i32
    %0 = arith.cmpi eq, %arg2, %c0_i32 : i32
    %1 = arith.extui %0 : i1 to i32
    %c0_i32_0 = arith.constant 0 : i32
    %2 = arith.cmpi ne, %1, %c0_i32_0 : i32
    scf.if %2 {
      %cst_10 = arith.constant 0.000000e+00 : f32
      %12 = vector.broadcast %cst_10 : f32 to vector<8x512xf32>
      %c0_11 = arith.constant 0 : index
      %c0_12 = arith.constant 0 : index
      %13 = vector.load %arg7[%c0_11, %c0_12] : memref<8x512xf32, #tpu.memory_space<vmem>>, vector<8x512xf32>
      tpu.vector_store %arg7[%c0_11, %c0_12], %12 {strides = array<i32>} : memref<8x512xf32, #tpu.memory_space<vmem>>, vector<8x512xf32>,
    } else {
    }
    %c0 = arith.constant 0 : index
    %c0_1 = arith.constant 0 : index
    %3 = vector.load %arg7[%c0, %c0_1] : memref<8x512xf32, #tpu.memory_space<vmem>>, vector<8x512xf32>
    %c0_2 = arith.constant 0 : index
    %c0_3 = arith.constant 0 : index
    %4 = vector.load %arg3[%c0_2, %c0_3] : memref<8x16xbf16, #tpu.memory_space<vmem>>, vector<8x16xbf16>
    %c0_4 = arith.constant 0 : index
    %c0_5 = arith.constant 0 : index
    %5 = vector.load %arg4[%c0_4, %c0_5] : memref<16x512xbf16, #tpu.memory_space<vmem>>, vector<16x512xbf16>
    %cst = arith.constant dense<0.000000e+00> : vector<8x512xf32>
    %6 = tpu.matmul %4, %5, %cst {dimension_numbers = #tpu.dot_dimension_numbers<[1], [0], [0], [1], [0, 0, 1, 1], [], []>} : vector<8x16xbf16>, vector<16x512xbf16>, vector<8x512xf32> -> vector<8x512xf32>
    %7 = arith.addf %3, %6 : vector<8x512xf32>
    %c0_6 = arith.constant 0 : index
    %c0_7 = arith.constant 0 : index
    %8 = vector.load %arg7[%c0_6, %c0_7] : memref<8x512xf32, #tpu.memory_space<vmem>>, vector<8x512xf32>
    tpu.vector_store %arg7[%c0_6, %c0_7], %7 {strides = array<i32>} : memref<8x512xf32, #tpu.memory_space<vmem>>, vector<8x512xf32>,
    %c0_i32_8 = arith.constant 0 : i32
    %9 = arith.cmpi eq, %arg2, %c0_i32_8 : i32
    %10 = arith.extui %9 : i1 to i32
    %c0_i32_9 = arith.constant 0 : i32
    %11 = arith.cmpi ne, %10, %c0_i32_9 : i32
    scf.if %11 {
      %c0_10 = arith.constant 0 : index
      %c0_11 = arith.constant 0 : index
      %12 = vector.load %arg7[%c0_10, %c0_11] : memref<8x512xf32, #tpu.memory_space<vmem>>, vector<8x512xf32>
      %c0_12 = arith.constant 0 : index
      %c0_13 = arith.constant 0 : index
      %13 = vector.load %arg5[%c0_12, %c0_13] : memref<1x512xf32, #tpu.memory_space<vmem>>, vector<1x512xf32>
      %14 = vector.broadcast %13 : vector<1x512xf32> to vector<8x512xf32>
      %15 = arith.addf %12, %14 : vector<8x512xf32>
      %cst_14 = arith.constant 0.000000e+00 : f32
      %16 = vector.broadcast %cst_14 : f32 to vector<8x512xf32>
      %17 = arith.maximumf %15, %16 : vector<8x512xf32>
      %18 = arith.truncf %17 : vector<8x512xf32> to vector<8x512xbf16>
      %c0_15 = arith.constant 0 : index
      %c0_16 = arith.constant 0 : index
      %19 = vector.load %arg6[%c0_15, %c0_16] : memref<8x512xbf16, #tpu.memory_space<vmem>>, vector<8x512xbf16>
      tpu.vector_store %arg6[%c0_15, %c0_16], %18 {strides = array<i32>} : memref<8x512xbf16, #tpu.memory_space<vmem>>, vector<8x512xbf16>,
    } else {
    }
    return
  }
  func.func @transform_0(%arg0: i32, %arg1: i32, %arg2: i32) -> (i32, i32) {
    %c0_i32 = arith.constant 0 : i32
    return %arg0, %arg2 : i32, i32
  }
  func.func @transform_1(%arg0: i32, %arg1: i32, %arg2: i32) -> (i32, i32) {
    %c0_i32 = arith.constant 0 : i32
    return %arg2, %arg1 : i32, i32
  }
  func.func @transform_2(%arg0: i32, %arg1: i32, %arg2: i32) -> (i32, i32) {
    %c0_i32 = arith.constant 0 : i32
    %c0_i32_0 = arith.constant 0 : i32
    return %c0_i32, %arg1 : i32, i32
  }
  func.func @transform_3(%arg0: i32, %arg1: i32, %arg2: i32) -> (i32, i32) {
    %c0_i32 = arith.constant 0 : i32
    return %arg0, %arg1 : i32, i32
  }
}

module attributes {stable_mosaic.version = 11 : i64} {
  func.func @_mm_bias_act_kernel(%arg0: i32, %arg1: i32, %arg2: i32, %arg3: memref<8x1024xbf16, #tpu.memory_space<vmem>>, %arg4: memref<1024x128xbf16, #tpu.memory_space<vmem>>, %arg5: memref<1x128xf32, #tpu.memory_space<vmem>>, %arg6: memref<8x128xbf16, #tpu.memory_space<vmem>>, %arg7: memref<8x128xf32, #tpu.memory_space<vmem>>) attributes {dimension_semantics = [#tpu.dimension_semantics<parallel>, #tpu.dimension_semantics<parallel>, #tpu.dimension_semantics<arbitrary>], iteration_bounds = array<i64: 1, 1, 1>, scalar_prefetch = 0 : i64, scratch_operands = 1 : i64, tpu.core_type = #tpu.core_type<tc>, window_params = [{transform_indices = @transform_0, window_bounds = array<i64: 8, 1024>}, {transform_indices = @transform_1, window_bounds = array<i64: 1024, 128>}, {transform_indices = @transform_2, window_bounds = array<i64: 1, 128>}, {transform_indices = @transform_3, window_bounds = array<i64: 8, 128>}]} {
    %c0_i32 = arith.constant 0 : i32
    %0 = arith.cmpi eq, %arg2, %c0_i32 : i32
    %1 = arith.extui %0 : i1 to i32
    %c0_i32_0 = arith.constant 0 : i32
    %2 = arith.cmpi ne, %1, %c0_i32_0 : i32
    scf.if %2 {
      %cst_10 = arith.constant 0.000000e+00 : f32
      %12 = vector.broadcast %cst_10 : f32 to vector<8x128xf32>
      %c0_11 = arith.constant 0 : index
      %c0_12 = arith.constant 0 : index
      %13 = vector.load %arg7[%c0_11, %c0_12] : memref<8x128xf32, #tpu.memory_space<vmem>>, vector<8x128xf32>
      tpu.vector_store %arg7[%c0_11, %c0_12], %12 {strides = array<i32>} : memref<8x128xf32, #tpu.memory_space<vmem>>, vector<8x128xf32>,
    } else {
    }
    %c0 = arith.constant 0 : index
    %c0_1 = arith.constant 0 : index
    %3 = vector.load %arg7[%c0, %c0_1] : memref<8x128xf32, #tpu.memory_space<vmem>>, vector<8x128xf32>
    %c0_2 = arith.constant 0 : index
    %c0_3 = arith.constant 0 : index
    %4 = vector.load %arg3[%c0_2, %c0_3] : memref<8x1024xbf16, #tpu.memory_space<vmem>>, vector<8x1024xbf16>
    %c0_4 = arith.constant 0 : index
    %c0_5 = arith.constant 0 : index
    %5 = vector.load %arg4[%c0_4, %c0_5] : memref<1024x128xbf16, #tpu.memory_space<vmem>>, vector<1024x128xbf16>
    %cst = arith.constant dense<0.000000e+00> : vector<8x128xf32>
    %6 = tpu.matmul %4, %5, %cst {dimension_numbers = #tpu.dot_dimension_numbers<[1], [0], [0], [1], [0, 0, 1, 1], [], []>} : vector<8x1024xbf16>, vector<1024x128xbf16>, vector<8x128xf32> -> vector<8x128xf32>
    %7 = arith.addf %3, %6 : vector<8x128xf32>
    %c0_6 = arith.constant 0 : index
    %c0_7 = arith.constant 0 : index
    %8 = vector.load %arg7[%c0_6, %c0_7] : memref<8x128xf32, #tpu.memory_space<vmem>>, vector<8x128xf32>
    tpu.vector_store %arg7[%c0_6, %c0_7], %7 {strides = array<i32>} : memref<8x128xf32, #tpu.memory_space<vmem>>, vector<8x128xf32>,
    %c0_i32_8 = arith.constant 0 : i32
    %9 = arith.cmpi eq, %arg2, %c0_i32_8 : i32
    %10 = arith.extui %9 : i1 to i32
    %c0_i32_9 = arith.constant 0 : i32
    %11 = arith.cmpi ne, %10, %c0_i32_9 : i32
    scf.if %11 {
      %c0_10 = arith.constant 0 : index
      %c0_11 = arith.constant 0 : index
      %12 = vector.load %arg7[%c0_10, %c0_11] : memref<8x128xf32, #tpu.memory_space<vmem>>, vector<8x128xf32>
      %c0_12 = arith.constant 0 : index
      %c0_13 = arith.constant 0 : index
      %13 = vector.load %arg5[%c0_12, %c0_13] : memref<1x128xf32, #tpu.memory_space<vmem>>, vector<1x128xf32>
      %14 = vector.broadcast %13 : vector<1x128xf32> to vector<8x128xf32>
      %15 = arith.addf %12, %14 : vector<8x128xf32>
      %cst_14 = arith.constant 0.000000e+00 : f32
      %16 = vector.broadcast %cst_14 : f32 to vector<8x128xf32>
      %17 = arith.maximumf %15, %16 : vector<8x128xf32>
      %18 = arith.truncf %17 : vector<8x128xf32> to vector<8x128xbf16>
      %c0_15 = arith.constant 0 : index
      %c0_16 = arith.constant 0 : index
      %19 = vector.load %arg6[%c0_15, %c0_16] : memref<8x128xbf16, #tpu.memory_space<vmem>>, vector<8x128xbf16>
      tpu.vector_store %arg6[%c0_15, %c0_16], %18 {strides = array<i32>} : memref<8x128xbf16, #tpu.memory_space<vmem>>, vector<8x128xbf16>,
    } else {
    }
    return
  }
  func.func @transform_0(%arg0: i32, %arg1: i32, %arg2: i32) -> (i32, i32) {
    %c0_i32 = arith.constant 0 : i32
    return %arg0, %arg2 : i32, i32
  }
  func.func @transform_1(%arg0: i32, %arg1: i32, %arg2: i32) -> (i32, i32) {
    %c0_i32 = arith.constant 0 : i32
    return %arg2, %arg1 : i32, i32
  }
  func.func @transform_2(%arg0: i32, %arg1: i32, %arg2: i32) -> (i32, i32) {
    %c0_i32 = arith.constant 0 : i32
    %c0_i32_0 = arith.constant 0 : i32
    return %c0_i32, %arg1 : i32, i32
  }
  func.func @transform_3(%arg0: i32, %arg1: i32, %arg2: i32) -> (i32, i32) {
    %c0_i32 = arith.constant 0 : i32
    return %arg0, %arg1 : i32, i32
  }
}

module attributes {stable_mosaic.version = 11 : i64} {
  func.func @_mm_bias_act_kernel(%arg0: i32, %arg1: i32, %arg2: i32, %arg3: memref<8x512xbf16, #tpu.memory_space<vmem>>, %arg4: memref<512x128xbf16, #tpu.memory_space<vmem>>, %arg5: memref<1x128xf32, #tpu.memory_space<vmem>>, %arg6: memref<8x128xf32, #tpu.memory_space<vmem>>, %arg7: memref<8x128xf32, #tpu.memory_space<vmem>>) attributes {dimension_semantics = [#tpu.dimension_semantics<parallel>, #tpu.dimension_semantics<parallel>, #tpu.dimension_semantics<arbitrary>], iteration_bounds = array<i64: 1, 1, 1>, scalar_prefetch = 0 : i64, scratch_operands = 1 : i64, tpu.core_type = #tpu.core_type<tc>, window_params = [{transform_indices = @transform_0, window_bounds = array<i64: 8, 512>}, {transform_indices = @transform_1, window_bounds = array<i64: 512, 128>}, {transform_indices = @transform_2, window_bounds = array<i64: 1, 128>}, {transform_indices = @transform_3, window_bounds = array<i64: 8, 128>}]} {
    %c0_i32 = arith.constant 0 : i32
    %0 = arith.cmpi eq, %arg2, %c0_i32 : i32
    %1 = arith.extui %0 : i1 to i32
    %c0_i32_0 = arith.constant 0 : i32
    %2 = arith.cmpi ne, %1, %c0_i32_0 : i32
    scf.if %2 {
      %cst_10 = arith.constant 0.000000e+00 : f32
      %12 = vector.broadcast %cst_10 : f32 to vector<8x128xf32>
      %c0_11 = arith.constant 0 : index
      %c0_12 = arith.constant 0 : index
      %13 = vector.load %arg7[%c0_11, %c0_12] : memref<8x128xf32, #tpu.memory_space<vmem>>, vector<8x128xf32>
      tpu.vector_store %arg7[%c0_11, %c0_12], %12 {strides = array<i32>} : memref<8x128xf32, #tpu.memory_space<vmem>>, vector<8x128xf32>,
    } else {
    }
    %c0 = arith.constant 0 : index
    %c0_1 = arith.constant 0 : index
    %3 = vector.load %arg7[%c0, %c0_1] : memref<8x128xf32, #tpu.memory_space<vmem>>, vector<8x128xf32>
    %c0_2 = arith.constant 0 : index
    %c0_3 = arith.constant 0 : index
    %4 = vector.load %arg3[%c0_2, %c0_3] : memref<8x512xbf16, #tpu.memory_space<vmem>>, vector<8x512xbf16>
    %c0_4 = arith.constant 0 : index
    %c0_5 = arith.constant 0 : index
    %5 = vector.load %arg4[%c0_4, %c0_5] : memref<512x128xbf16, #tpu.memory_space<vmem>>, vector<512x128xbf16>
    %cst = arith.constant dense<0.000000e+00> : vector<8x128xf32>
    %6 = tpu.matmul %4, %5, %cst {dimension_numbers = #tpu.dot_dimension_numbers<[1], [0], [0], [1], [0, 0, 1, 1], [], []>} : vector<8x512xbf16>, vector<512x128xbf16>, vector<8x128xf32> -> vector<8x128xf32>
    %7 = arith.addf %3, %6 : vector<8x128xf32>
    %c0_6 = arith.constant 0 : index
    %c0_7 = arith.constant 0 : index
    %8 = vector.load %arg7[%c0_6, %c0_7] : memref<8x128xf32, #tpu.memory_space<vmem>>, vector<8x128xf32>
    tpu.vector_store %arg7[%c0_6, %c0_7], %7 {strides = array<i32>} : memref<8x128xf32, #tpu.memory_space<vmem>>, vector<8x128xf32>,
    %c0_i32_8 = arith.constant 0 : i32
    %9 = arith.cmpi eq, %arg2, %c0_i32_8 : i32
    %10 = arith.extui %9 : i1 to i32
    %c0_i32_9 = arith.constant 0 : i32
    %11 = arith.cmpi ne, %10, %c0_i32_9 : i32
    scf.if %11 {
      %c0_10 = arith.constant 0 : index
      %c0_11 = arith.constant 0 : index
      %12 = vector.load %arg7[%c0_10, %c0_11] : memref<8x128xf32, #tpu.memory_space<vmem>>, vector<8x128xf32>
      %c0_12 = arith.constant 0 : index
      %c0_13 = arith.constant 0 : index
      %13 = vector.load %arg5[%c0_12, %c0_13] : memref<1x128xf32, #tpu.memory_space<vmem>>, vector<1x128xf32>
      %14 = vector.broadcast %13 : vector<1x128xf32> to vector<8x128xf32>
      %15 = arith.addf %12, %14 : vector<8x128xf32>
      %c0_14 = arith.constant 0 : index
      %c0_15 = arith.constant 0 : index
      %16 = vector.load %arg6[%c0_14, %c0_15] : memref<8x128xf32, #tpu.memory_space<vmem>>, vector<8x128xf32>
      tpu.vector_store %arg6[%c0_14, %c0_15], %15 {strides = array<i32>} : memref<8x128xf32, #tpu.memory_space<vmem>>, vector<8x128xf32>,
    } else {
    }
    return
  }
  func.func @transform_0(%arg0: i32, %arg1: i32, %arg2: i32) -> (i32, i32) {
    %c0_i32 = arith.constant 0 : i32
    return %arg0, %arg2 : i32, i32
  }
  func.func @transform_1(%arg0: i32, %arg1: i32, %arg2: i32) -> (i32, i32) {
    %c0_i32 = arith.constant 0 : i32
    return %arg2, %arg1 : i32, i32
  }
  func.func @transform_2(%arg0: i32, %arg1: i32, %arg2: i32) -> (i32, i32) {
    %c0_i32 = arith.constant 0 : i32
    %c0_i32_0 = arith.constant 0 : i32
    return %c0_i32, %arg1 : i32, i32
  }
  func.func @transform_3(%arg0: i32, %arg1: i32, %arg2: i32) -> (i32, i32) {
    %c0_i32 = arith.constant 0 : i32
    return %arg0, %arg1 : i32, i32
  }
}

module attributes {stable_mosaic.version = 11 : i64} {
  func.func @_mm_bias_act_kernel(%arg0: i32, %arg1: i32, %arg2: i32, %arg3: memref<128x512xbf16, #tpu.memory_space<vmem>>, %arg4: memref<512x128xbf16, #tpu.memory_space<vmem>>, %arg5: memref<1x128xf32, #tpu.memory_space<vmem>>, %arg6: memref<128x128xbf16, #tpu.memory_space<vmem>>, %arg7: memref<128x128xf32, #tpu.memory_space<vmem>>) attributes {dimension_semantics = [#tpu.dimension_semantics<parallel>, #tpu.dimension_semantics<parallel>, #tpu.dimension_semantics<arbitrary>], iteration_bounds = array<i64: 1, 2, 3>, scalar_prefetch = 0 : i64, scratch_operands = 1 : i64, tpu.core_type = #tpu.core_type<tc>, window_params = [{transform_indices = @transform_0, window_bounds = array<i64: 128, 512>}, {transform_indices = @transform_1, window_bounds = array<i64: 512, 128>}, {transform_indices = @transform_2, window_bounds = array<i64: 1, 128>}, {transform_indices = @transform_3, window_bounds = array<i64: 128, 128>}]} {
    %c0_i32 = arith.constant 0 : i32
    %0 = arith.cmpi eq, %arg2, %c0_i32 : i32
    %1 = arith.extui %0 : i1 to i32
    %c0_i32_0 = arith.constant 0 : i32
    %2 = arith.cmpi ne, %1, %c0_i32_0 : i32
    scf.if %2 {
      %cst_9 = arith.constant 0.000000e+00 : f32
      %12 = vector.broadcast %cst_9 : f32 to vector<128x128xf32>
      %c0_10 = arith.constant 0 : index
      %c0_11 = arith.constant 0 : index
      %13 = vector.load %arg7[%c0_10, %c0_11] : memref<128x128xf32, #tpu.memory_space<vmem>>, vector<128x128xf32>
      tpu.vector_store %arg7[%c0_10, %c0_11], %12 {strides = array<i32>} : memref<128x128xf32, #tpu.memory_space<vmem>>, vector<128x128xf32>,
    } else {
    }
    %c0 = arith.constant 0 : index
    %c0_1 = arith.constant 0 : index
    %3 = vector.load %arg7[%c0, %c0_1] : memref<128x128xf32, #tpu.memory_space<vmem>>, vector<128x128xf32>
    %c0_2 = arith.constant 0 : index
    %c0_3 = arith.constant 0 : index
    %4 = vector.load %arg3[%c0_2, %c0_3] : memref<128x512xbf16, #tpu.memory_space<vmem>>, vector<128x512xbf16>
    %c0_4 = arith.constant 0 : index
    %c0_5 = arith.constant 0 : index
    %5 = vector.load %arg4[%c0_4, %c0_5] : memref<512x128xbf16, #tpu.memory_space<vmem>>, vector<512x128xbf16>
    %cst = arith.constant dense<0.000000e+00> : vector<128x128xf32>
    %6 = tpu.matmul %4, %5, %cst {dimension_numbers = #tpu.dot_dimension_numbers<[1], [0], [0], [1], [0, 0, 1, 1], [], []>} : vector<128x512xbf16>, vector<512x128xbf16>, vector<128x128xf32> -> vector<128x128xf32>
    %7 = arith.addf %3, %6 : vector<128x128xf32>
    %c0_6 = arith.constant 0 : index
    %c0_7 = arith.constant 0 : index
    %8 = vector.load %arg7[%c0_6, %c0_7] : memref<128x128xf32, #tpu.memory_space<vmem>>, vector<128x128xf32>
    tpu.vector_store %arg7[%c0_6, %c0_7], %7 {strides = array<i32>} : memref<128x128xf32, #tpu.memory_space<vmem>>, vector<128x128xf32>,
    %c2_i32 = arith.constant 2 : i32
    %9 = arith.cmpi eq, %arg2, %c2_i32 : i32
    %10 = arith.extui %9 : i1 to i32
    %c0_i32_8 = arith.constant 0 : i32
    %11 = arith.cmpi ne, %10, %c0_i32_8 : i32
    scf.if %11 {
      %c0_9 = arith.constant 0 : index
      %c0_10 = arith.constant 0 : index
      %12 = vector.load %arg7[%c0_9, %c0_10] : memref<128x128xf32, #tpu.memory_space<vmem>>, vector<128x128xf32>
      %c0_11 = arith.constant 0 : index
      %c0_12 = arith.constant 0 : index
      %13 = vector.load %arg5[%c0_11, %c0_12] : memref<1x128xf32, #tpu.memory_space<vmem>>, vector<1x128xf32>
      %14 = vector.broadcast %13 : vector<1x128xf32> to vector<128x128xf32>
      %15 = arith.addf %12, %14 : vector<128x128xf32>
      %cst_13 = arith.constant 0.000000e+00 : f32
      %16 = vector.broadcast %cst_13 : f32 to vector<128x128xf32>
      %17 = arith.maximumf %15, %16 : vector<128x128xf32>
      %18 = arith.truncf %17 : vector<128x128xf32> to vector<128x128xbf16>
      %c0_14 = arith.constant 0 : index
      %c0_15 = arith.constant 0 : index
      %19 = vector.load %arg6[%c0_14, %c0_15] : memref<128x128xbf16, #tpu.memory_space<vmem>>, vector<128x128xbf16>
      tpu.vector_store %arg6[%c0_14, %c0_15], %18 {strides = array<i32>} : memref<128x128xbf16, #tpu.memory_space<vmem>>, vector<128x128xbf16>,
    } else {
    }
    return
  }
  func.func @transform_0(%arg0: i32, %arg1: i32, %arg2: i32) -> (i32, i32) {
    %c0_i32 = arith.constant 0 : i32
    return %arg0, %arg2 : i32, i32
  }
  func.func @transform_1(%arg0: i32, %arg1: i32, %arg2: i32) -> (i32, i32) {
    %c0_i32 = arith.constant 0 : i32
    return %arg2, %arg1 : i32, i32
  }
  func.func @transform_2(%arg0: i32, %arg1: i32, %arg2: i32) -> (i32, i32) {
    %c0_i32 = arith.constant 0 : i32
    %c0_i32_0 = arith.constant 0 : i32
    return %c0_i32, %arg1 : i32, i32
  }
  func.func @transform_3(%arg0: i32, %arg1: i32, %arg2: i32) -> (i32, i32) {
    %c0_i32 = arith.constant 0 : i32
    return %arg0, %arg1 : i32, i32
  }
}

module attributes {stable_mosaic.version = 11 : i64} {
  func.func @_mm_bias_act_kernel(%arg0: i32, %arg1: i32, %arg2: i32, %arg3: memref<256x576xbf16, #tpu.memory_space<vmem>>, %arg4: memref<576x128xbf16, #tpu.memory_space<vmem>>, %arg5: memref<1x128xf32, #tpu.memory_space<vmem>>, %arg6: memref<256x128xbf16, #tpu.memory_space<vmem>>, %arg7: memref<256x128xf32, #tpu.memory_space<vmem>>) attributes {dimension_semantics = [#tpu.dimension_semantics<parallel>, #tpu.dimension_semantics<parallel>, #tpu.dimension_semantics<arbitrary>], iteration_bounds = array<i64: 2, 1, 1>, scalar_prefetch = 0 : i64, scratch_operands = 1 : i64, tpu.core_type = #tpu.core_type<tc>, window_params = [{transform_indices = @transform_0, window_bounds = array<i64: 256, 576>}, {transform_indices = @transform_1, window_bounds = array<i64: 576, 128>}, {transform_indices = @transform_2, window_bounds = array<i64: 1, 128>}, {transform_indices = @transform_3, window_bounds = array<i64: 256, 128>}]} {
    %c0_i32 = arith.constant 0 : i32
    %0 = arith.cmpi eq, %arg2, %c0_i32 : i32
    %1 = arith.extui %0 : i1 to i32
    %c0_i32_0 = arith.constant 0 : i32
    %2 = arith.cmpi ne, %1, %c0_i32_0 : i32
    scf.if %2 {
      %cst_10 = arith.constant 0.000000e+00 : f32
      %12 = vector.broadcast %cst_10 : f32 to vector<256x128xf32>
      %c0_11 = arith.constant 0 : index
      %c0_12 = arith.constant 0 : index
      %13 = vector.load %arg7[%c0_11, %c0_12] : memref<256x128xf32, #tpu.memory_space<vmem>>, vector<256x128xf32>
      tpu.vector_store %arg7[%c0_11, %c0_12], %12 {strides = array<i32>} : memref<256x128xf32, #tpu.memory_space<vmem>>, vector<256x128xf32>,
    } else {
    }
    %c0 = arith.constant 0 : index
    %c0_1 = arith.constant 0 : index
    %3 = vector.load %arg7[%c0, %c0_1] : memref<256x128xf32, #tpu.memory_space<vmem>>, vector<256x128xf32>
    %c0_2 = arith.constant 0 : index
    %c0_3 = arith.constant 0 : index
    %4 = vector.load %arg3[%c0_2, %c0_3] : memref<256x576xbf16, #tpu.memory_space<vmem>>, vector<256x576xbf16>
    %c0_4 = arith.constant 0 : index
    %c0_5 = arith.constant 0 : index
    %5 = vector.load %arg4[%c0_4, %c0_5] : memref<576x128xbf16, #tpu.memory_space<vmem>>, vector<576x128xbf16>
    %cst = arith.constant dense<0.000000e+00> : vector<256x128xf32>
    %6 = tpu.matmul %4, %5, %cst {dimension_numbers = #tpu.dot_dimension_numbers<[1], [0], [0], [1], [0, 0, 1, 1], [], []>} : vector<256x576xbf16>, vector<576x128xbf16>, vector<256x128xf32> -> vector<256x128xf32>
    %7 = arith.addf %3, %6 : vector<256x128xf32>
    %c0_6 = arith.constant 0 : index
    %c0_7 = arith.constant 0 : index
    %8 = vector.load %arg7[%c0_6, %c0_7] : memref<256x128xf32, #tpu.memory_space<vmem>>, vector<256x128xf32>
    tpu.vector_store %arg7[%c0_6, %c0_7], %7 {strides = array<i32>} : memref<256x128xf32, #tpu.memory_space<vmem>>, vector<256x128xf32>,
    %c0_i32_8 = arith.constant 0 : i32
    %9 = arith.cmpi eq, %arg2, %c0_i32_8 : i32
    %10 = arith.extui %9 : i1 to i32
    %c0_i32_9 = arith.constant 0 : i32
    %11 = arith.cmpi ne, %10, %c0_i32_9 : i32
    scf.if %11 {
      %c0_10 = arith.constant 0 : index
      %c0_11 = arith.constant 0 : index
      %12 = vector.load %arg7[%c0_10, %c0_11] : memref<256x128xf32, #tpu.memory_space<vmem>>, vector<256x128xf32>
      %c0_12 = arith.constant 0 : index
      %c0_13 = arith.constant 0 : index
      %13 = vector.load %arg5[%c0_12, %c0_13] : memref<1x128xf32, #tpu.memory_space<vmem>>, vector<1x128xf32>
      %14 = vector.broadcast %13 : vector<1x128xf32> to vector<256x128xf32>
      %15 = arith.addf %12, %14 : vector<256x128xf32>
      %cst_14 = arith.constant 0.000000e+00 : f32
      %16 = vector.broadcast %cst_14 : f32 to vector<256x128xf32>
      %17 = arith.maximumf %15, %16 : vector<256x128xf32>
      %18 = arith.truncf %17 : vector<256x128xf32> to vector<256x128xbf16>
      %c0_15 = arith.constant 0 : index
      %c0_16 = arith.constant 0 : index
      %19 = vector.load %arg6[%c0_15, %c0_16] : memref<256x128xbf16, #tpu.memory_space<vmem>>, vector<256x128xbf16>
      tpu.vector_store %arg6[%c0_15, %c0_16], %18 {strides = array<i32>} : memref<256x128xbf16, #tpu.memory_space<vmem>>, vector<256x128xbf16>,
    } else {
    }
    return
  }
  func.func @transform_0(%arg0: i32, %arg1: i32, %arg2: i32) -> (i32, i32) {
    %c0_i32 = arith.constant 0 : i32
    return %arg0, %arg2 : i32, i32
  }
  func.func @transform_1(%arg0: i32, %arg1: i32, %arg2: i32) -> (i32, i32) {
    %c0_i32 = arith.constant 0 : i32
    return %arg2, %arg1 : i32, i32
  }
  func.func @transform_2(%arg0: i32, %arg1: i32, %arg2: i32) -> (i32, i32) {
    %c0_i32 = arith.constant 0 : i32
    %c0_i32_0 = arith.constant 0 : i32
    return %c0_i32, %arg1 : i32, i32
  }
  func.func @transform_3(%arg0: i32, %arg1: i32, %arg2: i32) -> (i32, i32) {
    %c0_i32 = arith.constant 0 : i32
    return %arg0, %arg1 : i32, i32
  }
}

module attributes {stable_mosaic.version = 11 : i64} {
  func.func @_mm_bias_act_kernel(%arg0: i32, %arg1: i32, %arg2: i32, %arg3: memref<256x800xbf16, #tpu.memory_space<vmem>>, %arg4: memref<800x128xbf16, #tpu.memory_space<vmem>>, %arg5: memref<1x128xf32, #tpu.memory_space<vmem>>, %arg6: memref<256x128xbf16, #tpu.memory_space<vmem>>, %arg7: memref<256x128xf32, #tpu.memory_space<vmem>>) attributes {dimension_semantics = [#tpu.dimension_semantics<parallel>, #tpu.dimension_semantics<parallel>, #tpu.dimension_semantics<arbitrary>], iteration_bounds = array<i64: 8, 1, 1>, scalar_prefetch = 0 : i64, scratch_operands = 1 : i64, tpu.core_type = #tpu.core_type<tc>, window_params = [{transform_indices = @transform_0, window_bounds = array<i64: 256, 800>}, {transform_indices = @transform_1, window_bounds = array<i64: 800, 128>}, {transform_indices = @transform_2, window_bounds = array<i64: 1, 128>}, {transform_indices = @transform_3, window_bounds = array<i64: 256, 128>}]} {
    %c0_i32 = arith.constant 0 : i32
    %0 = arith.cmpi eq, %arg2, %c0_i32 : i32
    %1 = arith.extui %0 : i1 to i32
    %c0_i32_0 = arith.constant 0 : i32
    %2 = arith.cmpi ne, %1, %c0_i32_0 : i32
    scf.if %2 {
      %cst_10 = arith.constant 0.000000e+00 : f32
      %12 = vector.broadcast %cst_10 : f32 to vector<256x128xf32>
      %c0_11 = arith.constant 0 : index
      %c0_12 = arith.constant 0 : index
      %13 = vector.load %arg7[%c0_11, %c0_12] : memref<256x128xf32, #tpu.memory_space<vmem>>, vector<256x128xf32>
      tpu.vector_store %arg7[%c0_11, %c0_12], %12 {strides = array<i32>} : memref<256x128xf32, #tpu.memory_space<vmem>>, vector<256x128xf32>,
    } else {
    }
    %c0 = arith.constant 0 : index
    %c0_1 = arith.constant 0 : index
    %3 = vector.load %arg7[%c0, %c0_1] : memref<256x128xf32, #tpu.memory_space<vmem>>, vector<256x128xf32>
    %c0_2 = arith.constant 0 : index
    %c0_3 = arith.constant 0 : index
    %4 = vector.load %arg3[%c0_2, %c0_3] : memref<256x800xbf16, #tpu.memory_space<vmem>>, vector<256x800xbf16>
    %c0_4 = arith.constant 0 : index
    %c0_5 = arith.constant 0 : index
    %5 = vector.load %arg4[%c0_4, %c0_5] : memref<800x128xbf16, #tpu.memory_space<vmem>>, vector<800x128xbf16>
    %cst = arith.constant dense<0.000000e+00> : vector<256x128xf32>
    %6 = tpu.matmul %4, %5, %cst {dimension_numbers = #tpu.dot_dimension_numbers<[1], [0], [0], [1], [0, 0, 1, 1], [], []>} : vector<256x800xbf16>, vector<800x128xbf16>, vector<256x128xf32> -> vector<256x128xf32>
    %7 = arith.addf %3, %6 : vector<256x128xf32>
    %c0_6 = arith.constant 0 : index
    %c0_7 = arith.constant 0 : index
    %8 = vector.load %arg7[%c0_6, %c0_7] : memref<256x128xf32, #tpu.memory_space<vmem>>, vector<256x128xf32>
    tpu.vector_store %arg7[%c0_6, %c0_7], %7 {strides = array<i32>} : memref<256x128xf32, #tpu.memory_space<vmem>>, vector<256x128xf32>,
    %c0_i32_8 = arith.constant 0 : i32
    %9 = arith.cmpi eq, %arg2, %c0_i32_8 : i32
    %10 = arith.extui %9 : i1 to i32
    %c0_i32_9 = arith.constant 0 : i32
    %11 = arith.cmpi ne, %10, %c0_i32_9 : i32
    scf.if %11 {
      %c0_10 = arith.constant 0 : index
      %c0_11 = arith.constant 0 : index
      %12 = vector.load %arg7[%c0_10, %c0_11] : memref<256x128xf32, #tpu.memory_space<vmem>>, vector<256x128xf32>
      %c0_12 = arith.constant 0 : index
      %c0_13 = arith.constant 0 : index
      %13 = vector.load %arg5[%c0_12, %c0_13] : memref<1x128xf32, #tpu.memory_space<vmem>>, vector<1x128xf32>
      %14 = vector.broadcast %13 : vector<1x128xf32> to vector<256x128xf32>
      %15 = arith.addf %12, %14 : vector<256x128xf32>
      %16 = arith.negf %15 : vector<256x128xf32>
      %17 = math.exp %16 : vector<256x128xf32>
      %cst_14 = arith.constant 1.000000e+00 : f32
      %18 = vector.broadcast %cst_14 : f32 to vector<256x128xf32>
      %19 = arith.addf %18, %17 : vector<256x128xf32>
      %20 = arith.divf %18, %19 : vector<256x128xf32>
      %21 = arith.truncf %20 : vector<256x128xf32> to vector<256x128xbf16>
      %c0_15 = arith.constant 0 : index
      %c0_16 = arith.constant 0 : index
      %22 = vector.load %arg6[%c0_15, %c0_16] : memref<256x128xbf16, #tpu.memory_space<vmem>>, vector<256x128xbf16>
      tpu.vector_store %arg6[%c0_15, %c0_16], %21 {strides = array<i32>} : memref<256x128xbf16, #tpu.memory_space<vmem>>, vector<256x128xbf16>,
    } else {
    }
    return
  }
  func.func @transform_0(%arg0: i32, %arg1: i32, %arg2: i32) -> (i32, i32) {
    %c0_i32 = arith.constant 0 : i32
    return %arg0, %arg2 : i32, i32
  }
  func.func @transform_1(%arg0: i32, %arg1: i32, %arg2: i32) -> (i32, i32) {
    %c0_i32 = arith.constant 0 : i32
    return %arg2, %arg1 : i32, i32
  }
  func.func @transform_2(%arg0: i32, %arg1: i32, %arg2: i32) -> (i32, i32) {
    %c0_i32 = arith.constant 0 : i32
    %c0_i32_0 = arith.constant 0 : i32
    return %c0_i32, %arg1 : i32, i32
  }
  func.func @transform_3(%arg0: i32, %arg1: i32, %arg2: i32) -> (i32, i32) {
    %c0_i32 = arith.constant 0 : i32
    return %arg0, %arg1 : i32, i32
  }
}

</mosaic_0001>

<bundles_post_ra>
// kernel: _lambda_.9
= control target key start
LH: loop header
LB: loop body
LE: loop exit
PB: predicated region body
PF: predicated region fallthrough
CT: control target
= control target key end

     0   :  { %8 = vsyncpa [#allocation4], 0  ;;  %s1464_s0 = inlined_call_operand.vmem [shape: bf16[512,16], index: 0, kind: input, shape index: {}]   ;;  %s1465_s1 = inlined_call_operand.hbm [shape: bf16[16,128], index: 1, kind: input, shape index: {}]   ;;  %s1466_s2 = inlined_call_operand.hbm [shape: f32[1,128], index: 2, kind: input, shape index: {}]   ;;  %s1467_s3 = inlined_call_operand.vmem [shape: bf16[512,128], index: 3, kind: output, shape index: {}]  }
   0x1   :  { %9 = vsyncpa [#allocation6], 0  ;;  %s1306_s12 = smov 0   ;;  %s1308_s13 = smov 0  }
   0x2   :  { %s1310_s14 = smov 0  }
   0x3 LB: > { %s928_s15 = sadd.s32 4294967295, %s1280_s14   ;;  %s34_s16 = sadd.s32 1, %s1276_s13  ;;  %s1280_s14 = sphi %s1310_s14, %s15_s14   ;;  %s1276_s13 = sphi %s1308_s13, %s1471_s13   ;;  %s1272_s12 = sphi %s1306_s12, %s1470_s12  }
   0x4   : > { %p36_p0 = scmp.ge.s32.totalorder %s34_s16, 2  ;;  %p930_p1 = scmp.ge.s32.totalorder %s1280_s14, 1 }
   0x5   : > { %p149_p2 = scmp.lt.s32.totalorder %s1280_s14, 3  ;;  %p1331_p4 = scmp.eq.s32.totalorder %s928_s15, 0 }
   0x6   : > { %s1473_s16 = smov (%p36_p0, %s34_s16), 0  ;;  %s164_s21 = sshll.u32 %s1465_s1, 4  ;;  %s165_s21 = int_to_ptr.hbm [resolvable:$true] %s164_s21 }
   0x7   : > { %p1327_p3 = pnand %p930_p1, %p149_p2  ;;  %s1282_s22 = smov [#allocation3]  }
   0x8   : > { %s166_s23 = sshll.u32 %s1282_s22, 4  ;;  %s180_s26 = sshll.u32 %s1466_s2, 4  ;;  %s167_s23 = int_to_ptr.vmem [resolvable:$true] %s166_s23  ;;  %s181_s26 = int_to_ptr.hbm [resolvable:$true] %s180_s26 }
   0x9   : > { %p1150_p5 = pneg %p1327_p3  ;;  %s1283_s27 = smov 64  }
   0xa   : > { %s1284_s28 = smov 4   ;;  %s1285_s29 = smov [#allocation5]  }
   0xb   : > { %p1151_p6 = pnand %p1331_p4, %p1150_p5  ;;  %s182_s30 = sshll.u32 %s1285_s29, 4  ;;  %s183_s30 = int_to_ptr.vmem [resolvable:$true] %s182_s30 }
   0xc   : > { %207 = sbr.rel (%p1327_p3) target bundleno = 225 (0xe1), region = 32 }
   0xd   : > { %1153 = dma.hbm_to_vmem [thread:$0]  (!%p1151_p6), %s165_s21, 128, %s167_s23, [#allocation4], %s1283_s27, %s1283_s27, %s1284_s28  }
   0xe   : > { %1156 = dma.hbm_to_vmem [thread:$0]  (!%p1151_p6), %s181_s26, 16, %s183_s30, [#allocation6]  }
  0x11   : > { %1263 = dma.done.wait (%p1331_p4), [#allocation4], 128  }
  0x12   : > { %1265 = vsyncadd (%p1331_p4), [#allocation4], 4294967168 }
  0x13   : > { %1267 = dma.done.wait (%p1331_p4), [#allocation6], 16  }
  0x14   : > { %1269 = vsyncadd (%p1331_p4), [#allocation6], 4294967280  ;;  %s937_s4 = sshll.u32 %s1272_s12, 5  ;;  %v1043_v0 = vld [vmem:[#allocation3] sm:$0xff]  ;;  %vm451_vm0 = vcmask 130048  }
  0x15   : > { %p244_p7 = scmp.lt.s32.totalorder %s937_s4, 63  ;;  %507 = vmatpush.bf16.msra.mxu0 %v1043_v0  ;;  %1139 = vmatpush.bf16.msra.mxu1 %v1043_v0  ;;  %v1398_v19 = vld [vmem:[#allocation5] ss:$0 sm:$0xff] }
  0x16   : > { %1140 = vmatpush.bf16.msra.mxu2 %v1043_v0  ;;  %1141 = vmatpush.bf16.msra.mxu3 %v1043_v0 }
  0x17   : > { %s1475_s4 = smov (!%p244_p7, %s937_s4), 63 }
  0x18   : > { %s938_s5 = sshll.u32 %s1475_s4, 2 }
  0x19   : > { %s1364_s8 = scalar_lea.vmem %s1464_s0, %s938_s5  ;;  %s1409_s11 = scalar_lea.vmem %s1467_s3, %s938_s5 }
  0x1a   : > { %v1027_v1 = vld [vmem:[%s1364_s8] sm:$0xff]  ;;  %v1028_v5 = vld [vmem:[%s1364_s8 + $0x8] sm:$0xff]  ;;  %v1029_v9 = vld [vmem:[%s1364_s8 + $0x10] sm:$0xff] }
  0x1b   : > { %v1031_v2 = vld [vmem:[%s1364_s8 + $0x20] sm:$0xff]  ;;  %1009 = vmatmul.msk.bf16.vlgmr.msra.gmra.mxu0 %vm451_vm0, %v1027_v1  ;;  %v1032_v6 = vld [vmem:[%s1364_s8 + $0x28] sm:$0xff]  ;;  %v1033_v10 = vld [vmem:[%s1364_s8 + $0x30] sm:$0xff] }
  0x1c   : > { %v1035_v3 = vld [vmem:[%s1364_s8 + $0x40] sm:$0xff]  ;;  %1013 = vmatmul.msk.bf16.vlgmr.msra.gmra.mxu1 %vm451_vm0, %v1031_v2  ;;  %v1036_v7 = vld [vmem:[%s1364_s8 + $0x48] sm:$0xff]  ;;  %v1037_v11 = vld [vmem:[%s1364_s8 + $0x50] sm:$0xff] }
  0x1d   : > { %v1039_v4 = vld [vmem:[%s1364_s8 + $0x60] sm:$0xff]  ;;  %1017 = vmatmul.msk.bf16.vlgmr.msra.gmra.mxu2 %vm451_vm0, %v1035_v3  ;;  %v1040_v8 = vld [vmem:[%s1364_s8 + $0x68] sm:$0xff]  ;;  %v1041_v12 = vld [vmem:[%s1364_s8 + $0x70] sm:$0xff] }
  0x1e   : > { %1021 = vmatmul.msk.bf16.vlgmr.msra.gmra.mxu3 %vm451_vm0, %v1039_v4  ;;  %v1030_v13 = vld [vmem:[%s1364_s8 + $0x18] sm:$0xff] }
  0x1f   : > { %v1034_v14 = vld [vmem:[%s1364_s8 + $0x38] sm:$0xff] }
  0x20   : > { %v1038_v15 = vld [vmem:[%s1364_s8 + $0x58] sm:$0xff] }
  0x21   : > { %v1042_v16 = vld [vmem:[%s1364_s8 + $0x78] sm:$0xff] }
  0x2b   : > { %1010 = vmatmul.msk.bf16.gmra.mxu0 %vm451_vm0, %v1028_v5 }
  0x2c   : > { %1014 = vmatmul.msk.bf16.gmra.mxu1 %vm451_vm0, %v1032_v6 }
  0x2d   : > { %1018 = vmatmul.msk.bf16.gmra.mxu2 %vm451_vm0, %v1036_v7 }
  0x2e   : > { %1022 = vmatmul.msk.bf16.gmra.mxu3 %vm451_vm0, %v1040_v8 }
  0x3b   : > { %1011 = vmatmul.msk.bf16.gmra.mxu0 %vm451_vm0, %v1029_v9 }
  0x3c   : > { %1015 = vmatmul.msk.bf16.gmra.mxu1 %vm451_vm0, %v1033_v10 }
  0x3d   : > { %1019 = vmatmul.msk.bf16.gmra.mxu2 %vm451_vm0, %v1037_v11 }
  0x3e   : > { %1023 = vmatmul.msk.bf16.gmra.mxu3 %vm451_vm0, %v1041_v12 }
  0x4b   : > { %1012 = vmatmul.msk.bf16.gmra.mxu0 %vm451_vm0, %v1030_v13 }
  0x4c   : > { %1016 = vmatmul.msk.bf16.gmra.mxu1 %vm451_vm0, %v1034_v14 }
  0x4d   : > { %1020 = vmatmul.msk.bf16.gmra.mxu2 %vm451_vm0, %v1038_v15 }
  0x4e   : > { %1024 = vmatmul.msk.bf16.gmra.mxu3 %vm451_vm0, %v1042_v16 }
  0x98   : > { %v509_v17 = vpop.f32.mrf.mxu0 }
  0x99   : > { %v529_v18 = vpop.f32.mrf.mxu1  ;;  %v692_v20 = vadd.f32 %v1398_v19, %v509_v17 }
  0x9a   : > { %v700_v21 = vadd.f32 %v1398_v19, %v529_v18 }
  0x9b   : > { %v724_v28 = vmax.f32 %v692_v20, 0.0 }
  0x9c   : > { %v732_v29 = vmax.f32 %v700_v21, 0.0 }
  0xa0   : > { %v549_v22 = vpop.f32.mrf.mxu2  ;;  %v511_v24 = vpop.f32.mrf.mxu0 }
  0xa1   : > { %v569_v23 = vpop.f32.mrf.mxu3  ;;  %v531_v25 = vpop.f32.mrf.mxu1  ;;  %v693_v26 = vadd.f32 %v1398_v19, %v511_v24  ;;  %v708_v34 = vadd.f32 %v1398_v19, %v549_v22 }
  0xa2   : > { %v701_v27 = vadd.f32 %v1398_v19, %v531_v25  ;;  %v716_v35 = vadd.f32 %v1398_v19, %v569_v23 }
  0xa3   : > { %v725_v30 = vmax.f32 %v693_v26, 0.0  ;;  %v740_v42 = vmax.f32 %v708_v34, 0.0 }
  0xa4   : > { %v733_v31 = vmax.f32 %v701_v27, 0.0  ;;  %v748_v43 = vmax.f32 %v716_v35, 0.0 }
  0xa5   : > { %v1047_v32 = vpack.c.bf16 %v725_v30, %v724_v28 }
  0xa6   : > { %v1067_v33 = vpack.c.bf16 %v733_v31, %v732_v29 }
  0xa7   : > { %1048 = vst [vmem:[%s1409_s11] sm:$0xff] %v1047_v32  }
  0xa8   : > { %v551_v36 = vpop.f32.mrf.mxu2  ;;  %1127 = vst [vmem:[%s1409_s11 + $0x20] sm:$0xff] %v1067_v33   ;;  %v514_v40 = vpop.f32.mrf.mxu0 }
  0xa9   : > { %v571_v37 = vpop.f32.mrf.mxu3  ;;  %v709_v38 = vadd.f32 %v1398_v19, %v551_v36  ;;  %v534_v41 = vpop.f32.mrf.mxu1  ;;  %v694_v48 = vadd.f32 %v1398_v19, %v514_v40 }
  0xaa   : > { %v717_v39 = vadd.f32 %v1398_v19, %v571_v37  ;;  %v702_v49 = vadd.f32 %v1398_v19, %v534_v41 }
  0xab   : > { %v741_v44 = vmax.f32 %v709_v38, 0.0  ;;  %v726_v56 = vmax.f32 %v694_v48, 0.0 }
  0xac   : > { %v749_v45 = vmax.f32 %v717_v39, 0.0  ;;  %v734_v57 = vmax.f32 %v702_v49, 0.0 }
  0xad   : > { %v1087_v46 = vpack.c.bf16 %v741_v44, %v740_v42 }
  0xae   : > { %v1107_v47 = vpack.c.bf16 %v749_v45, %v748_v43 }
  0xaf   : > { %1131 = vst [vmem:[%s1409_s11 + $0x40] sm:$0xff] %v1087_v46  }
  0xb0   : > { %1135 = vst [vmem:[%s1409_s11 + $0x60] sm:$0xff] %v1107_v47   ;;  %v554_v50 = vpop.f32.mrf.mxu2  ;;  %v516_v52 = vpop.f32.mrf.mxu0 }
  0xb1   : > { %v574_v51 = vpop.f32.mrf.mxu3  ;;  %v536_v53 = vpop.f32.mrf.mxu1  ;;  %v695_v54 = vadd.f32 %v1398_v19, %v516_v52  ;;  %v710_v62 = vadd.f32 %v1398_v19, %v554_v50 }
  0xb2   : > { %v703_v55 = vadd.f32 %v1398_v19, %v536_v53  ;;  %v718_v63 = vadd.f32 %v1398_v19, %v574_v51 }
  0xb3   : > { %v727_v58 = vmax.f32 %v695_v54, 0.0  ;;  %v742_v6 = vmax.f32 %v710_v62, 0.0 }
  0xb4   : > { %v735_v59 = vmax.f32 %v703_v55, 0.0  ;;  %v750_v7 = vmax.f32 %v718_v63, 0.0 }
  0xb5   : > { %v1052_v60 = vpack.c.bf16 %v727_v58, %v726_v56 }
  0xb6   : > { %v1072_v61 = vpack.c.bf16 %v735_v59, %v734_v57 }
  0xb7   : > { %1124 = vst [vmem:[%s1409_s11 + $0x8] sm:$0xff] %v1052_v60  }
  0xb8   : > { %v556_v0 = vpop.f32.mrf.mxu2  ;;  %1128 = vst [vmem:[%s1409_s11 + $0x28] sm:$0xff] %v1072_v61   ;;  %v519_v4 = vpop.f32.mrf.mxu0 }
  0xb9   : > { %v576_v1 = vpop.f32.mrf.mxu3  ;;  %v711_v2 = vadd.f32 %v1398_v19, %v556_v0  ;;  %v539_v5 = vpop.f32.mrf.mxu1  ;;  %v696_v12 = vadd.f32 %v1398_v19, %v519_v4 }
  0xba   : > { %v719_v3 = vadd.f32 %v1398_v19, %v576_v1  ;;  %v704_v13 = vadd.f32 %v1398_v19, %v539_v5 }
  0xbb   : > { %v743_v8 = vmax.f32 %v711_v2, 0.0  ;;  %v728_v21 = vmax.f32 %v696_v12, 0.0 }
  0xbc   : > { %v751_v9 = vmax.f32 %v719_v3, 0.0  ;;  %v736_v22 = vmax.f32 %v704_v13, 0.0 }
  0xbd   : > { %v1092_v10 = vpack.c.bf16 %v743_v8, %v742_v6 }
  0xbe   : > { %v1112_v11 = vpack.c.bf16 %v751_v9, %v750_v7 }
  0xbf   : > { %1132 = vst [vmem:[%s1409_s11 + $0x48] sm:$0xff] %v1092_v10  }
  0xc0   : > { %1136 = vst [vmem:[%s1409_s11 + $0x68] sm:$0xff] %v1112_v11   ;;  %v559_v14 = vpop.f32.mrf.mxu2  ;;  %v521_v16 = vpop.f32.mrf.mxu0 }
  0xc1   : > { %v579_v15 = vpop.f32.mrf.mxu3  ;;  %v541_v17 = vpop.f32.mrf.mxu1  ;;  %v697_v18 = vadd.f32 %v1398_v19, %v521_v16  ;;  %v712_v27 = vadd.f32 %v1398_v19, %v559_v14 }
  0xc2   : > { %v705_v20 = vadd.f32 %v1398_v19, %v541_v17  ;;  %v720_v28 = vadd.f32 %v1398_v19, %v579_v15 }
  0xc3   : > { %v729_v23 = vmax.f32 %v697_v18, 0.0  ;;  %v744_v35 = vmax.f32 %v712_v27, 0.0 }
  0xc4   : > { %v737_v24 = vmax.f32 %v705_v20, 0.0  ;;  %v752_v36 = vmax.f32 %v720_v28, 0.0 }
  0xc5   : > { %v1057_v25 = vpack.c.bf16 %v729_v23, %v728_v21 }
  0xc6   : > { %v1077_v26 = vpack.c.bf16 %v737_v24, %v736_v22 }
  0xc7   : > { %1125 = vst [vmem:[%s1409_s11 + $0x10] sm:$0xff] %v1057_v25  }
  0xc8   : > { %v561_v29 = vpop.f32.mrf.mxu2  ;;  %1129 = vst [vmem:[%s1409_s11 + $0x30] sm:$0xff] %v1077_v26   ;;  %v524_v33 = vpop.f32.mrf.mxu0 }
  0xc9   : > { %v581_v30 = vpop.f32.mrf.mxu3  ;;  %v713_v31 = vadd.f32 %v1398_v19, %v561_v29  ;;  %v544_v34 = vpop.f32.mrf.mxu1  ;;  %v698_v41 = vadd.f32 %v1398_v19, %v524_v33 }
  0xca   : > { %v721_v32 = vadd.f32 %v1398_v19, %v581_v30  ;;  %v706_v42 = vadd.f32 %v1398_v19, %v544_v34 }
  0xcb   : > { %v745_v37 = vmax.f32 %v713_v31, 0.0  ;;  %v730_v49 = vmax.f32 %v698_v41, 0.0 }
  0xcc   : > { %v753_v38 = vmax.f32 %v721_v32, 0.0  ;;  %v738_v50 = vmax.f32 %v706_v42, 0.0 }
  0xcd   : > { %v1097_v39 = vpack.c.bf16 %v745_v37, %v744_v35 }
  0xce   : > { %v1117_v40 = vpack.c.bf16 %v753_v38, %v752_v36 }
  0xcf   : > { %1133 = vst [vmem:[%s1409_s11 + $0x50] sm:$0xff] %v1097_v39  }
  0xd0   : > { %1137 = vst [vmem:[%s1409_s11 + $0x70] sm:$0xff] %v1117_v40   ;;  %v564_v43 = vpop.f32.mrf.mxu2  ;;  %v526_v45 = vpop.f32.mrf.mxu0 }
  0xd1   : > { %v584_v44 = vpop.f32.mrf.mxu3  ;;  %v546_v46 = vpop.f32.mrf.mxu1  ;;  %v699_v47 = vadd.f32 %v1398_v19, %v526_v45  ;;  %v714_v55 = vadd.f32 %v1398_v19, %v564_v43 }
  0xd2   : > { %v707_v48 = vadd.f32 %v1398_v19, %v546_v46  ;;  %v722_v56 = vadd.f32 %v1398_v19, %v584_v44 }
  0xd3   : > { %v731_v51 = vmax.f32 %v699_v47, 0.0  ;;  %v746_v61 = vmax.f32 %v714_v55, 0.0 }
  0xd4   : > { %v739_v52 = vmax.f32 %v707_v48, 0.0  ;;  %v754_v62 = vmax.f32 %v722_v56, 0.0 }
  0xd5   : > { %v1062_v53 = vpack.c.bf16 %v731_v51, %v730_v49 }
  0xd6   : > { %v1082_v54 = vpack.c.bf16 %v739_v52, %v738_v50 }
  0xd7   : > { %1126 = vst [vmem:[%s1409_s11 + $0x18] sm:$0xff] %v1062_v53  }
  0xd8   : > { %v566_v57 = vpop.f32.mrf.mxu2  ;;  %1130 = vst [vmem:[%s1409_s11 + $0x38] sm:$0xff] %v1082_v54  }
  0xd9   : > { %v586_v58 = vpop.f32.mrf.mxu3  ;;  %v715_v59 = vadd.f32 %v1398_v19, %v566_v57 }
  0xda   : > { %v723_v60 = vadd.f32 %v1398_v19, %v586_v58 }
  0xdb   : > { %v747_v63 = vmax.f32 %v715_v59, 0.0 }
  0xdc   : > { %v755_v0 = vmax.f32 %v723_v60, 0.0 }
  0xdd   : > { %v1102_v1 = vpack.c.bf16 %v747_v63, %v746_v61 }
  0xde   : > { %v1122_v2 = vpack.c.bf16 %v755_v0, %v754_v62 }
  0xdf   : > { %1134 = vst [vmem:[%s1409_s11 + $0x58] sm:$0xff] %v1102_v1  }
  0xe0   : > { %1138 = vst [vmem:[%s1409_s11 + $0x78] sm:$0xff] %v1122_v2  }
  0xe1 PF: > { %s15_s14 = sadd.s32 1, %s1280_s14   ;;  %s1470_s12 = smov %s1276_s13 }
  0xe2   : > { %p12_p8 = scmp.ge.s32.totalorder %s15_s14, 4   ;;  %s1471_s13 = smov %s1473_s16 }
  0xe4   :  { %14 = sbr.rel (!%p12_p8) target bundleno = 3 (0x3), region = 81 }
  0xe9   :  { %848 = vsyncpa [#allocation4], 1 }
  0xea   :  { %850 = vsyncpa [#allocation4 + $0x1], 1 }
  0xeb   :  { %851 = vsyncpa [#allocation6], 1 }

// kernel: _lambda_.10
= control target key start
LH: loop header
LB: loop body
LE: loop exit
PB: predicated region body
PF: predicated region fallthrough
CT: control target
= control target key end

     0   :  { %8 = vsyncpa [#allocation4], 0  ;;  %s975_s0 = inlined_call_operand.vmem [shape: bf16[128,256], index: 0, kind: input, shape index: {}]   ;;  %s976_s1 = inlined_call_operand.hbm [shape: bf16[256,128], index: 1, kind: input, shape index: {}]   ;;  %s977_s2 = inlined_call_operand.hbm [shape: f32[1,128], index: 2, kind: input, shape index: {}]   ;;  %s978_s3 = inlined_call_operand.vmem [shape: bf16[128,128], index: 3, kind: output, shape index: {}]  }
   0x1   :  { %s16_s14 = sshll.u32 %s976_s1, 4  ;;  %s17_s14 = int_to_ptr.hbm [resolvable:$true] %s16_s14 }
   0x2   :  { %9 = vsyncpa [#allocation6], 0  ;;  %s807_s15 = smov [#allocation3]   ;;  %s30_s19 = sshll.u32 %s977_s2, 4  ;;  %s31_s19 = int_to_ptr.hbm [resolvable:$true] %s30_s19 }
   0x3   :  { %s18_s16 = sshll.u32 %s807_s15, 4  ;;  %s808_s20 = smov 64   ;;  %s19_s16 = int_to_ptr.vmem [resolvable:$true] %s18_s16 }
   0x4   :  { %s809_s21 = smov 4   ;;  %s810_s22 = smov [#allocation5]  }
   0x5   :  { %24 = dma.hbm_to_vmem [thread:$0]  %s17_s14, 2048, %s19_s16, [#allocation4], %s808_s20, %s808_s20, %s809_s21  }
   0x6   :  { %s32_s23 = sshll.u32 %s810_s22, 4  ;;  %s33_s23 = int_to_ptr.vmem [resolvable:$true] %s32_s23 }
   0x7   :  { %35 = dma.hbm_to_vmem [thread:$0]  %s31_s19, 16, %s33_s23, [#allocation6]  }
   0x8   :  { %803 = dma.done.wait [#allocation4], 2048  }
   0x9   :  { %804 = vsyncadd [#allocation4], 4294965248 }
   0xa   :  { %805 = dma.done.wait [#allocation6], 16  }
   0xb   :  { %806 = vsyncadd [#allocation6], 4294967280  ;;  %v678_v0 = vld [vmem:[#allocation3 + $0x38] sm:$0xff]  ;;  %v677_v2 = vld [vmem:[#allocation3 + $0x30] sm:$0xff] }
   0xc   :  { %v686_v1 = vld [vmem:[#allocation3 + $0x78] sm:$0xff]  ;;  %304 = vmatpush.bf16.msra.mxu0 %v678_v0  ;;  %734 = vmatpush.bf16.msra.mxu2 %v678_v0  ;;  %v685_v3 = vld [vmem:[#allocation3 + $0x70] sm:$0xff]  ;;  %v676_v4 = vld [vmem:[#allocation3 + $0x28] sm:$0xff] }
   0xd   :  { %353 = vmatpush.bf16.msra.mxu1 %v686_v1  ;;  %742 = vmatpush.bf16.msra.mxu3 %v686_v1  ;;  %v684_v5 = vld [vmem:[#allocation3 + $0x68] sm:$0xff]  ;;  %v675_v6 = vld [vmem:[#allocation3 + $0x20] sm:$0xff]  ;;  %v674_v8 = vld [vmem:[#allocation3 + $0x18] sm:$0xff] }
   0xe   :  { %v683_v7 = vld [vmem:[#allocation3 + $0x60] sm:$0xff]  ;;  %v682_v9 = vld [vmem:[#allocation3 + $0x58] sm:$0xff]  ;;  %v673_v10 = vld [vmem:[#allocation3 + $0x10] sm:$0xff] }
   0xf   :  { %v681_v11 = vld [vmem:[#allocation3 + $0x50] sm:$0xff]  ;;  %v672_v12 = vld [vmem:[#allocation3 + $0x8] sm:$0xff]  ;;  %v671_v14 = vld [vmem:[#allocation3] sm:$0xff] }
  0x10   :  { %305 = vmatpush.bf16.msra.mxu0 %v677_v2  ;;  %735 = vmatpush.bf16.msra.mxu2 %v677_v2  ;;  %v680_v13 = vld [vmem:[#allocation3 + $0x48] sm:$0xff]  ;;  %v679_v15 = vld [vmem:[#allocation3 + $0x40] sm:$0xff]  ;;  %v537_v28 = vld [vmem:[%s975_s0 + $0x10] sm:$0xf] }
  0x11   :  { %354 = vmatpush.bf16.msra.mxu1 %v685_v3  ;;  %743 = vmatpush.bf16.msra.mxu3 %v685_v3  ;;  %v529_v16 = vld [vmem:[%s975_s0] sm:$0xf]  ;;  %v656_v17 = vld [vmem:[%s975_s0 + $0x4] sm:$0xf0]  ;;  %v655_v20 = vld [vmem:[%s975_s0 + $0x4] sm:$0xf] }
  0x12   :  { %v561_v18 = vld [vmem:[%s975_s0 + $0x40] sm:$0xf]  ;;  %v664_v19 = vld [vmem:[%s975_s0 + $0x44] sm:$0xf0]  ;;  %v531_v21 = vld [vmem:[%s975_s0 + $0x8] sm:$0xf0]  ;;  %v530_v24 = vor.u32 %v656_v17, %v529_v16 }
  0x13   :  { %v663_v22 = vld [vmem:[%s975_s0 + $0x44] sm:$0xf]  ;;  %v563_v23 = vld [vmem:[%s975_s0 + $0x48] sm:$0xf0]  ;;  %v562_v25 = vor.u32 %v664_v19, %v561_v18  ;;  %v534_v26 = vor.u32 %v655_v20, %v531_v21  ;;  %v658_v29 = vld [vmem:[%s975_s0 + $0x14] sm:$0xf0] }
  0x14   :  { %306 = vmatpush.bf16.msra.mxu0 %v676_v4  ;;  %736 = vmatpush.bf16.msra.mxu2 %v676_v4  ;;  %v566_v27 = vor.u32 %v663_v22, %v563_v23  ;;  %v569_v30 = vld [vmem:[%s975_s0 + $0x50] sm:$0xf]  ;;  %v666_v31 = vld [vmem:[%s975_s0 + $0x54] sm:$0xf0]  ;;  %v657_v32 = vld [vmem:[%s975_s0 + $0x14] sm:$0xf]  ;;  %v538_v36 = vor.u32 %v658_v29, %v537_v28 }
  0x15   :  { %355 = vmatpush.bf16.msra.mxu1 %v684_v5  ;;  %744 = vmatpush.bf16.msra.mxu3 %v684_v5  ;;  %v539_v33 = vld [vmem:[%s975_s0 + $0x18] sm:$0xf0]  ;;  %v665_v34 = vld [vmem:[%s975_s0 + $0x54] sm:$0xf]  ;;  %v570_v37 = vor.u32 %v666_v31, %v569_v30  ;;  %v545_v40 = vld [vmem:[%s975_s0 + $0x20] sm:$0xf] }
  0x16   :  { %v571_v35 = vld [vmem:[%s975_s0 + $0x58] sm:$0xf0]  ;;  %v542_v38 = vor.u32 %v657_v32, %v539_v33  ;;  %v660_v41 = vld [vmem:[%s975_s0 + $0x24] sm:$0xf0]  ;;  %v577_v42 = vld [vmem:[%s975_s0 + $0x60] sm:$0xf] }
  0x17   :  { %v574_v39 = vor.u32 %v665_v34, %v571_v35  ;;  %v668_v43 = vld [vmem:[%s975_s0 + $0x64] sm:$0xf0]  ;;  %v659_v44 = vld [vmem:[%s975_s0 + $0x24] sm:$0xf]  ;;  %v547_v45 = vld [vmem:[%s975_s0 + $0x28] sm:$0xf0]  ;;  %v546_v48 = vor.u32 %v660_v41, %v545_v40 }
  0x18   :  { %307 = vmatpush.bf16.msra.mxu0 %v675_v6  ;;  %737 = vmatpush.bf16.msra.mxu2 %v675_v6  ;;  %v667_v46 = vld [vmem:[%s975_s0 + $0x64] sm:$0xf]  ;;  %v579_v47 = vld [vmem:[%s975_s0 + $0x68] sm:$0xf0]  ;;  %v578_v49 = vor.u32 %v668_v43, %v577_v42  ;;  %v550_v50 = vor.u32 %v659_v44, %v547_v45  ;;  %v553_v52 = vld [vmem:[%s975_s0 + $0x30] sm:$0xf] }
  0x19   :  { %356 = vmatpush.bf16.msra.mxu1 %v683_v7  ;;  %745 = vmatpush.bf16.msra.mxu3 %v683_v7  ;;  %v582_v51 = vor.u32 %v667_v46, %v579_v47  ;;  %v662_v53 = vld [vmem:[%s975_s0 + $0x34] sm:$0xf0]  ;;  %v585_v54 = vld [vmem:[%s975_s0 + $0x70] sm:$0xf]  ;;  %v661_v56 = vld [vmem:[%s975_s0 + $0x34] sm:$0xf] }
  0x1a   :  { %v670_v55 = vld [vmem:[%s975_s0 + $0x74] sm:$0xf0]  ;;  %v555_v57 = vld [vmem:[%s975_s0 + $0x38] sm:$0xf0]  ;;  %v669_v58 = vld [vmem:[%s975_s0 + $0x74] sm:$0xf]  ;;  %v554_v60 = vor.u32 %v662_v53, %v553_v52 }
  0x1b   :  { %v587_v59 = vld [vmem:[%s975_s0 + $0x78] sm:$0xf0]  ;;  %v586_v61 = vor.u32 %v670_v55, %v585_v54  ;;  %v558_v62 = vor.u32 %v661_v56, %v555_v57  ;;  %v933_v3 = vld [vmem:[#allocation5] ss:$0 sm:$0xff] }
  0x1c   :  { %308 = vmatpush.bf16.msra.mxu0 %v674_v8  ;;  %738 = vmatpush.bf16.msra.mxu2 %v674_v8  ;;  %v590_v63 = vor.u32 %v669_v58, %v587_v59 }
  0x1d   :  { %357 = vmatpush.bf16.msra.mxu1 %v682_v9  ;;  %746 = vmatpush.bf16.msra.mxu3 %v682_v9 }
  0x20   :  { %309 = vmatpush.bf16.msra.mxu0 %v673_v10  ;;  %739 = vmatpush.bf16.msra.mxu2 %v673_v10 }
  0x21   :  { %358 = vmatpush.bf16.msra.mxu1 %v681_v11  ;;  %747 = vmatpush.bf16.msra.mxu3 %v681_v11 }
  0x24   :  { %310 = vmatpush.bf16.msra.mxu0 %v672_v12  ;;  %740 = vmatpush.bf16.msra.mxu2 %v672_v12 }
  0x25   :  { %359 = vmatpush.bf16.msra.mxu1 %v680_v13  ;;  %748 = vmatpush.bf16.msra.mxu3 %v680_v13 }
  0x28   :  { %311 = vmatpush.bf16.msra.mxu0 %v671_v14  ;;  %741 = vmatpush.bf16.msra.mxu2 %v671_v14 }
  0x29   :  { %360 = vmatpush.bf16.msra.mxu1 %v679_v15  ;;  %749 = vmatpush.bf16.msra.mxu3 %v679_v15 }
  0x2b   :  { %312 = vmatmul.bf16.vlgmr.msra.gmra.mxu0 %v530_v24  ;;  %332 = vmatmul.bf16.vlgmr.msra.gmra.mxu2 %v562_v25 }
  0x2c   :  { %361 = vmatmul.bf16.vlgmr.msra.gmra.mxu1 %v534_v26  ;;  %381 = vmatmul.bf16.vlgmr.msra.gmra.mxu3 %v566_v27 }
  0x3b   :  { %317 = vmatmul.bf16.gmra.mxu0 %v538_v36  ;;  %337 = vmatmul.bf16.gmra.mxu2 %v570_v37 }
  0x3c   :  { %366 = vmatmul.bf16.gmra.mxu1 %v542_v38  ;;  %386 = vmatmul.bf16.gmra.mxu3 %v574_v39 }
  0x4b   :  { %322 = vmatmul.bf16.gmra.mxu0 %v546_v48  ;;  %342 = vmatmul.bf16.gmra.mxu2 %v578_v49 }
  0x4c   :  { %371 = vmatmul.bf16.gmra.mxu1 %v550_v50  ;;  %391 = vmatmul.bf16.gmra.mxu3 %v582_v51 }
  0x5b   :  { %327 = vmatmul.bf16.gmra.mxu0 %v554_v60  ;;  %347 = vmatmul.bf16.gmra.mxu2 %v586_v61 }
  0x5c   :  { %376 = vmatmul.bf16.gmra.mxu1 %v558_v62  ;;  %396 = vmatmul.bf16.gmra.mxu3 %v590_v63 }
  0xa8   :  { %v313_v0 = vpop.f32.mrf.mxu0 }
  0xa9   :  { %v362_v1 = vpop.f32.mrf.mxu1 }
  0xaa   :  { %v363_v2 = vadd.f32 %v362_v1, %v313_v0 }
  0xac   :  { %v457_v8 = vadd.f32 %v933_v3, %v363_v2 }
  0xae   :  { %v333_v4 = vpop.f32.mrf.mxu2  ;;  %v473_v12 = vmax.f32 %v457_v8, 0.0 }
  0xaf   :  { %v382_v5 = vpop.f32.mrf.mxu3 }
  0xb0   :  { %v315_v6 = vpop.f32.mrf.mxu0  ;;  %v383_v10 = vadd.f32 %v382_v5, %v333_v4 }
  0xb1   :  { %v364_v7 = vpop.f32.mrf.mxu1 }
  0xb2   :  { %v365_v9 = vadd.f32 %v364_v7, %v315_v6  ;;  %v465_v16 = vadd.f32 %v933_v3, %v383_v10 }
  0xb4   :  { %v458_v11 = vadd.f32 %v933_v3, %v365_v9  ;;  %v481_v22 = vmax.f32 %v465_v16, 0.0 }
  0xb6   :  { %v474_v13 = vmax.f32 %v458_v11, 0.0  ;;  %v335_v14 = vpop.f32.mrf.mxu2 }
  0xb7   :  { %v384_v15 = vpop.f32.mrf.mxu3 }
  0xb8   :  { %v690_v17 = vpack.c.bf16 %v474_v13, %v473_v12  ;;  %v385_v18 = vadd.f32 %v384_v15, %v335_v14  ;;  %v318_v19 = vpop.f32.mrf.mxu0 }
  0xb9   :  { %v367_v20 = vpop.f32.mrf.mxu1 }
  0xba   :  { %691 = vst [vmem:[%s978_s3] sm:$0xff] %v690_v17   ;;  %v466_v21 = vadd.f32 %v933_v3, %v385_v18  ;;  %v368_v25 = vadd.f32 %v367_v20, %v318_v19 }
  0xbc   :  { %v482_v23 = vmax.f32 %v466_v21, 0.0  ;;  %v459_v30 = vadd.f32 %v933_v3, %v368_v25 }
  0xbe   :  { %v710_v24 = vpack.c.bf16 %v482_v23, %v481_v22  ;;  %v338_v26 = vpop.f32.mrf.mxu2  ;;  %v475_v34 = vmax.f32 %v459_v30, 0.0 }
  0xbf   :  { %v387_v27 = vpop.f32.mrf.mxu3 }
  0xc0   :  { %730 = vst [vmem:[%s978_s3 + $0x20] sm:$0xff] %v710_v24   ;;  %v320_v28 = vpop.f32.mrf.mxu0  ;;  %v388_v32 = vadd.f32 %v387_v27, %v338_v26 }
  0xc1   :  { %v369_v29 = vpop.f32.mrf.mxu1 }
  0xc2   :  { %v370_v31 = vadd.f32 %v369_v29, %v320_v28  ;;  %v467_v38 = vadd.f32 %v933_v3, %v388_v32 }
  0xc4   :  { %v460_v33 = vadd.f32 %v933_v3, %v370_v31  ;;  %v483_v44 = vmax.f32 %v467_v38, 0.0 }
  0xc6   :  { %v476_v35 = vmax.f32 %v460_v33, 0.0  ;;  %v340_v36 = vpop.f32.mrf.mxu2 }
  0xc7   :  { %v389_v37 = vpop.f32.mrf.mxu3 }
  0xc8   :  { %v695_v39 = vpack.c.bf16 %v476_v35, %v475_v34  ;;  %v390_v40 = vadd.f32 %v389_v37, %v340_v36  ;;  %v323_v41 = vpop.f32.mrf.mxu0 }
  0xc9   :  { %v372_v42 = vpop.f32.mrf.mxu1 }
  0xca   :  { %727 = vst [vmem:[%s978_s3 + $0x8] sm:$0xff] %v695_v39   ;;  %v468_v43 = vadd.f32 %v933_v3, %v390_v40  ;;  %v373_v47 = vadd.f32 %v372_v42, %v323_v41 }
  0xcc   :  { %v484_v45 = vmax.f32 %v468_v43, 0.0  ;;  %v461_v52 = vadd.f32 %v933_v3, %v373_v47 }
  0xce   :  { %v715_v46 = vpack.c.bf16 %v484_v45, %v483_v44  ;;  %v343_v48 = vpop.f32.mrf.mxu2  ;;  %v477_v56 = vmax.f32 %v461_v52, 0.0 }
  0xcf   :  { %v392_v49 = vpop.f32.mrf.mxu3 }
  0xd0   :  { %731 = vst [vmem:[%s978_s3 + $0x28] sm:$0xff] %v715_v46   ;;  %v325_v50 = vpop.f32.mrf.mxu0  ;;  %v393_v54 = vadd.f32 %v392_v49, %v343_v48 }
  0xd1   :  { %v374_v51 = vpop.f32.mrf.mxu1 }
  0xd2   :  { %v375_v53 = vadd.f32 %v374_v51, %v325_v50  ;;  %v469_v60 = vadd.f32 %v933_v3, %v393_v54 }
  0xd4   :  { %v462_v55 = vadd.f32 %v933_v3, %v375_v53  ;;  %v485_v2 = vmax.f32 %v469_v60, 0.0 }
  0xd6   :  { %v478_v57 = vmax.f32 %v462_v55, 0.0  ;;  %v345_v58 = vpop.f32.mrf.mxu2 }
  0xd7   :  { %v394_v59 = vpop.f32.mrf.mxu3 }
  0xd8   :  { %v700_v61 = vpack.c.bf16 %v478_v57, %v477_v56  ;;  %v395_v62 = vadd.f32 %v394_v59, %v345_v58  ;;  %v328_v63 = vpop.f32.mrf.mxu0 }
  0xd9   :  { %v377_v0 = vpop.f32.mrf.mxu1 }
  0xda   :  { %728 = vst [vmem:[%s978_s3 + $0x10] sm:$0xff] %v700_v61   ;;  %v470_v1 = vadd.f32 %v933_v3, %v395_v62  ;;  %v378_v6 = vadd.f32 %v377_v0, %v328_v63 }
  0xdc   :  { %v486_v4 = vmax.f32 %v470_v1, 0.0  ;;  %v463_v11 = vadd.f32 %v933_v3, %v378_v6 }
  0xde   :  { %v720_v5 = vpack.c.bf16 %v486_v4, %v485_v2  ;;  %v348_v7 = vpop.f32.mrf.mxu2  ;;  %v479_v15 = vmax.f32 %v463_v11, 0.0 }
  0xdf   :  { %v397_v8 = vpop.f32.mrf.mxu3 }
  0xe0   :  { %732 = vst [vmem:[%s978_s3 + $0x30] sm:$0xff] %v720_v5   ;;  %v330_v9 = vpop.f32.mrf.mxu0  ;;  %v398_v13 = vadd.f32 %v397_v8, %v348_v7 }
  0xe1   :  { %v379_v10 = vpop.f32.mrf.mxu1 }
  0xe2   :  { %v380_v12 = vadd.f32 %v379_v10, %v330_v9  ;;  %v471_v19 = vadd.f32 %v933_v3, %v398_v13 }
  0xe4   :  { %v464_v14 = vadd.f32 %v933_v3, %v380_v12  ;;  %v487_v23 = vmax.f32 %v471_v19, 0.0 }
  0xe6   :  { %v480_v16 = vmax.f32 %v464_v14, 0.0  ;;  %v350_v17 = vpop.f32.mrf.mxu2 }
  0xe7   :  { %v399_v18 = vpop.f32.mrf.mxu3 }
  0xe8   :  { %v705_v20 = vpack.c.bf16 %v480_v16, %v479_v15  ;;  %v400_v21 = vadd.f32 %v399_v18, %v350_v17 }
  0xea   :  { %729 = vst [vmem:[%s978_s3 + $0x18] sm:$0xff] %v705_v20   ;;  %v472_v22 = vadd.f32 %v933_v3, %v400_v21 }
  0xec   :  { %v488_v24 = vmax.f32 %v472_v22, 0.0 }
  0xee   :  { %v725_v25 = vpack.c.bf16 %v488_v24, %v487_v23 }
  0xf0   :  { %733 = vst [vmem:[%s978_s3 + $0x38] sm:$0xff] %v725_v25  }
  0xf1   :  { %525 = vsyncpa [#allocation4], 1 }
  0xf2   :  { %526 = vsyncpa [#allocation6], 1 }

// kernel: _lambda_.11
= control target key start
LH: loop header
LB: loop body
LE: loop exit
PB: predicated region body
PF: predicated region fallthrough
CT: control target
= control target key end

     0   :  { %8 = vsyncpa [#allocation4], 0  ;;  %s829_s0 = inlined_call_operand.vmem [shape: bf16[32,512], index: 0, kind: input, shape index: {}]   ;;  %s830_s1 = inlined_call_operand.hbm [shape: bf16[512,128], index: 1, kind: input, shape index: {}]   ;;  %s831_s2 = inlined_call_operand.hbm [shape: f32[1,128], index: 2, kind: input, shape index: {}]   ;;  %s832_s3 = inlined_call_operand.vmem [shape: bf16[32,128], index: 3, kind: output, shape index: {}]  }
   0x1   :  { %s16_s14 = sshll.u32 %s830_s1, 4  ;;  %s17_s14 = int_to_ptr.hbm [resolvable:$true] %s16_s14 }
   0x2   :  { %9 = vsyncpa [#allocation6], 0  ;;  %s745_s15 = smov [#allocation3]   ;;  %s30_s19 = sshll.u32 %s831_s2, 4  ;;  %s31_s19 = int_to_ptr.hbm [resolvable:$true] %s30_s19 }
   0x3   :  { %s18_s16 = sshll.u32 %s745_s15, 4  ;;  %s746_s20 = smov 64   ;;  %s19_s16 = int_to_ptr.vmem [resolvable:$true] %s18_s16 }
   0x4   :  { %s747_s21 = smov 4   ;;  %s748_s22 = smov [#allocation5]  }
   0x5   :  { %24 = dma.hbm_to_vmem [thread:$0]  %s17_s14, 4096, %s19_s16, [#allocation4], %s746_s20, %s746_s20, %s747_s21  }
   0x6   :  { %s32_s23 = sshll.u32 %s748_s22, 4  ;;  %s33_s23 = int_to_ptr.vmem [resolvable:$true] %s32_s23 }
   0x7   :  { %35 = dma.hbm_to_vmem [thread:$0]  %s31_s19, 16, %s33_s23, [#allocation6]  }
   0x8   :  { %741 = dma.done.wait [#allocation4], 4096  }
   0x9   :  { %742 = vsyncadd [#allocation4], 4294963200 }
   0xa   :  { %743 = dma.done.wait [#allocation6], 16  }
   0xb   :  { %744 = vsyncadd [#allocation6], 4294967280  ;;  %v652_v0 = vld [vmem:[#allocation3 + $0x38] sm:$0xff]  ;;  %v651_v4 = vld [vmem:[#allocation3 + $0x30] sm:$0xff] }
   0xc   :  { %v660_v1 = vld [vmem:[#allocation3 + $0x78] sm:$0xff]  ;;  %360 = vmatpush.bf16.msra.mxu0 %v652_v0  ;;  %v659_v5 = vld [vmem:[#allocation3 + $0x70] sm:$0xff]  ;;  %v650_v8 = vld [vmem:[#allocation3 + $0x28] sm:$0xff] }
   0xd   :  { %v668_v2 = vld [vmem:[#allocation3 + $0xb8] sm:$0xff]  ;;  %379 = vmatpush.bf16.msra.mxu1 %v660_v1  ;;  %v667_v6 = vld [vmem:[#allocation3 + $0xb0] sm:$0xff]  ;;  %v658_v9 = vld [vmem:[#allocation3 + $0x68] sm:$0xff] }
   0xe   :  { %v676_v3 = vld [vmem:[#allocation3 + $0xf8] sm:$0xff]  ;;  %398 = vmatpush.bf16.msra.mxu2 %v668_v2  ;;  %v675_v7 = vld [vmem:[#allocation3 + $0xf0] sm:$0xff]  ;;  %v666_v10 = vld [vmem:[#allocation3 + $0xa8] sm:$0xff] }
   0xf   :  { %417 = vmatpush.bf16.msra.mxu3 %v676_v3  ;;  %v674_v11 = vld [vmem:[#allocation3 + $0xe8] sm:$0xff]  ;;  %v649_v12 = vld [vmem:[#allocation3 + $0x20] sm:$0xff]  ;;  %v648_v16 = vld [vmem:[#allocation3 + $0x18] sm:$0xff] }
  0x10   :  { %361 = vmatpush.bf16.msra.mxu0 %v651_v4  ;;  %v657_v13 = vld [vmem:[#allocation3 + $0x60] sm:$0xff]  ;;  %v656_v17 = vld [vmem:[#allocation3 + $0x58] sm:$0xff]  ;;  %v647_v20 = vld [vmem:[#allocation3 + $0x10] sm:$0xff] }
  0x11   :  { %380 = vmatpush.bf16.msra.mxu1 %v659_v5  ;;  %v665_v14 = vld [vmem:[#allocation3 + $0xa0] sm:$0xff]  ;;  %v664_v18 = vld [vmem:[#allocation3 + $0x98] sm:$0xff]  ;;  %v655_v21 = vld [vmem:[#allocation3 + $0x50] sm:$0xff] }
  0x12   :  { %399 = vmatpush.bf16.msra.mxu2 %v667_v6  ;;  %v673_v15 = vld [vmem:[#allocation3 + $0xe0] sm:$0xff]  ;;  %v672_v19 = vld [vmem:[#allocation3 + $0xd8] sm:$0xff]  ;;  %v663_v22 = vld [vmem:[#allocation3 + $0x90] sm:$0xff] }
  0x13   :  { %418 = vmatpush.bf16.msra.mxu3 %v675_v7  ;;  %v671_v23 = vld [vmem:[#allocation3 + $0xd0] sm:$0xff]  ;;  %v646_v24 = vld [vmem:[#allocation3 + $0x8] sm:$0xff]  ;;  %v645_v28 = vld [vmem:[#allocation3] sm:$0xff] }
  0x14   :  { %362 = vmatpush.bf16.msra.mxu0 %v650_v8  ;;  %v654_v25 = vld [vmem:[#allocation3 + $0x48] sm:$0xff]  ;;  %v653_v29 = vld [vmem:[#allocation3 + $0x40] sm:$0xff]  ;;  %v639_v33 = vld [vmem:[%s829_s0 + $0xc] sm:$0xf0] }
  0x15   :  { %381 = vmatpush.bf16.msra.mxu1 %v658_v9  ;;  %v662_v26 = vld [vmem:[#allocation3 + $0x88] sm:$0xff]  ;;  %v661_v30 = vld [vmem:[#allocation3 + $0x80] sm:$0xff]  ;;  %v481_v35 = vld [vmem:[%s829_s0 + $0x10] sm:$0xf0] }
  0x16   :  { %400 = vmatpush.bf16.msra.mxu2 %v666_v10  ;;  %v670_v27 = vld [vmem:[#allocation3 + $0xc8] sm:$0xff]  ;;  %v669_v31 = vld [vmem:[#allocation3 + $0xc0] sm:$0xff]  ;;  %v640_v37 = vld [vmem:[%s829_s0 + $0x14] sm:$0xf0] }
  0x17   :  { %419 = vmatpush.bf16.msra.mxu3 %v674_v11  ;;  %v479_v32 = vld [vmem:[%s829_s0] sm:$0xf]  ;;  %v637_v34 = vld [vmem:[%s829_s0 + $0x4] sm:$0xf]  ;;  %v487_v36 = vld [vmem:[%s829_s0 + $0x8] sm:$0xf] }
  0x18   :  { %363 = vmatpush.bf16.msra.mxu0 %v649_v12  ;;  %v638_v38 = vld [vmem:[%s829_s0 + $0xc] sm:$0xf]  ;;  %v489_v39 = vld [vmem:[%s829_s0 + $0x18] sm:$0xf0]  ;;  %v480_v40 = vor.u32 %v639_v33, %v479_v32  ;;  %v484_v41 = vor.u32 %v637_v34, %v481_v35  ;;  %v488_v42 = vor.u32 %v640_v37, %v487_v36  ;;  %v495_v44 = vld [vmem:[%s829_s0 + $0x20] sm:$0xf] }
  0x19   :  { %382 = vmatpush.bf16.msra.mxu1 %v657_v13  ;;  %v492_v43 = vor.u32 %v638_v38, %v489_v39  ;;  %v643_v45 = vld [vmem:[%s829_s0 + $0x2c] sm:$0xf0]  ;;  %v641_v46 = vld [vmem:[%s829_s0 + $0x24] sm:$0xf]  ;;  %v497_v47 = vld [vmem:[%s829_s0 + $0x30] sm:$0xf0] }
  0x1a   :  { %401 = vmatpush.bf16.msra.mxu2 %v665_v14  ;;  %v503_v48 = vld [vmem:[%s829_s0 + $0x28] sm:$0xf]  ;;  %v644_v49 = vld [vmem:[%s829_s0 + $0x34] sm:$0xf0]  ;;  %v642_v50 = vld [vmem:[%s829_s0 + $0x2c] sm:$0xf]  ;;  %v496_v52 = vor.u32 %v643_v45, %v495_v44  ;;  %v500_v53 = vor.u32 %v641_v46, %v497_v47 }
  0x1b   :  { %420 = vmatpush.bf16.msra.mxu3 %v673_v15  ;;  %v505_v51 = vld [vmem:[%s829_s0 + $0x38] sm:$0xf0]  ;;  %v504_v54 = vor.u32 %v644_v49, %v503_v48  ;;  %v692_v1 = vld [vmem:[#allocation5] ss:$0 sm:$0xff] }
  0x1c   :  { %364 = vmatpush.bf16.msra.mxu0 %v648_v16  ;;  %v508_v55 = vor.u32 %v642_v50, %v505_v51 }
  0x1d   :  { %383 = vmatpush.bf16.msra.mxu1 %v656_v17 }
  0x1e   :  { %402 = vmatpush.bf16.msra.mxu2 %v664_v18 }
  0x1f   :  { %421 = vmatpush.bf16.msra.mxu3 %v672_v19 }
  0x20   :  { %365 = vmatpush.bf16.msra.mxu0 %v647_v20 }
  0x21   :  { %384 = vmatpush.bf16.msra.mxu1 %v655_v21 }
  0x22   :  { %403 = vmatpush.bf16.msra.mxu2 %v663_v22 }
  0x23   :  { %422 = vmatpush.bf16.msra.mxu3 %v671_v23 }
  0x24   :  { %366 = vmatpush.bf16.msra.mxu0 %v646_v24 }
  0x25   :  { %385 = vmatpush.bf16.msra.mxu1 %v654_v25 }
  0x26   :  { %404 = vmatpush.bf16.msra.mxu2 %v662_v26 }
  0x27   :  { %423 = vmatpush.bf16.msra.mxu3 %v670_v27 }
  0x28   :  { %367 = vmatpush.bf16.msra.mxu0 %v645_v28 }
  0x29   :  { %386 = vmatpush.bf16.msra.mxu1 %v653_v29 }
  0x2a   :  { %405 = vmatpush.bf16.msra.mxu2 %v661_v30 }
  0x2b   :  { %424 = vmatpush.bf16.msra.mxu3 %v669_v31  ;;  %368 = vmatmul.bf16.vlgmr.msra.gmra.mxu0 %v480_v40 }
  0x2c   :  { %387 = vmatmul.bf16.vlgmr.msra.gmra.mxu1 %v484_v41 }
  0x2d   :  { %406 = vmatmul.bf16.vlgmr.msra.gmra.mxu2 %v488_v42 }
  0x2e   :  { %425 = vmatmul.bf16.vlgmr.msra.gmra.mxu3 %v492_v43 }
  0x3b   :  { %373 = vmatmul.bf16.gmra.mxu0 %v496_v52 }
  0x3c   :  { %392 = vmatmul.bf16.gmra.mxu1 %v500_v53 }
  0x3d   :  { %411 = vmatmul.bf16.gmra.mxu2 %v504_v54 }
  0x3e   :  { %430 = vmatmul.bf16.gmra.mxu3 %v508_v55 }
  0xa8   :  { %v369_v56 = vpop.f32.mrf.mxu0 }
  0xa9   :  { %v388_v57 = vpop.f32.mrf.mxu1 }
  0xaa   :  { %v389_v58 = vadd.f32 %v388_v57, %v369_v56 }
  0xb0   :  { %v407_v59 = vpop.f32.mrf.mxu2  ;;  %v371_v61 = vpop.f32.mrf.mxu0 }
  0xb1   :  { %v426_v60 = vpop.f32.mrf.mxu3  ;;  %v390_v62 = vpop.f32.mrf.mxu1  ;;  %v408_v63 = vadd.f32 %v407_v59, %v389_v58 }
  0xb2   :  { %v391_v2 = vadd.f32 %v390_v62, %v371_v61 }
  0xb3   :  { %v427_v0 = vadd.f32 %v426_v60, %v408_v63 }
  0xb5   :  { %v455_v8 = vadd.f32 %v692_v1, %v427_v0 }
  0xb7   :  { %v459_v11 = vmax.f32 %v455_v8, 0.0 }
  0xb8   :  { %v409_v3 = vpop.f32.mrf.mxu2  ;;  %v374_v6 = vpop.f32.mrf.mxu0 }
  0xb9   :  { %v428_v4 = vpop.f32.mrf.mxu3  ;;  %v410_v5 = vadd.f32 %v409_v3, %v391_v2  ;;  %v393_v7 = vpop.f32.mrf.mxu1 }
  0xba   :  { %v394_v13 = vadd.f32 %v393_v7, %v374_v6 }
  0xbb   :  { %v429_v9 = vadd.f32 %v428_v4, %v410_v5 }
  0xbd   :  { %v456_v10 = vadd.f32 %v692_v1, %v429_v9 }
  0xbf   :  { %v460_v12 = vmax.f32 %v456_v10, 0.0 }
  0xc0   :  { %v412_v14 = vpop.f32.mrf.mxu2  ;;  %v376_v18 = vpop.f32.mrf.mxu0 }
  0xc1   :  { %v431_v15 = vpop.f32.mrf.mxu3  ;;  %v680_v16 = vpack.c.bf16 %v460_v12, %v459_v11  ;;  %v413_v17 = vadd.f32 %v412_v14, %v394_v13  ;;  %v395_v19 = vpop.f32.mrf.mxu1 }
  0xc2   :  { %v396_v21 = vadd.f32 %v395_v19, %v376_v18 }
  0xc3   :  { %681 = vst [vmem:[%s832_s3] sm:$0xff] %v680_v16   ;;  %v432_v20 = vadd.f32 %v431_v15, %v413_v17 }
  0xc5   :  { %v457_v25 = vadd.f32 %v692_v1, %v432_v20 }
  0xc7   :  { %v461_v28 = vmax.f32 %v457_v25, 0.0 }
  0xc8   :  { %v414_v22 = vpop.f32.mrf.mxu2 }
  0xc9   :  { %v415_v23 = vadd.f32 %v414_v22, %v396_v21  ;;  %v433_v24 = vpop.f32.mrf.mxu3 }
  0xcb   :  { %v434_v26 = vadd.f32 %v433_v24, %v415_v23 }
  0xcd   :  { %v458_v27 = vadd.f32 %v692_v1, %v434_v26 }
  0xcf   :  { %v462_v29 = vmax.f32 %v458_v27, 0.0 }
  0xd1   :  { %v685_v30 = vpack.c.bf16 %v462_v29, %v461_v28 }
  0xd3   :  { %687 = vst [vmem:[%s832_s3 + $0x8] sm:$0xff] %v685_v30  }
  0xd4   :  { %475 = vsyncpa [#allocation4], 1 }
  0xd5   :  { %476 = vsyncpa [#allocation6], 1 }

// kernel: _lambda_.14
= control target key start
LH: loop header
LB: loop body
LE: loop exit
PB: predicated region body
PF: predicated region fallthrough
CT: control target
= control target key end

     0   :  { %8 = vsyncpa [#allocation4], 0  ;;  %s924_s0 = inlined_call_operand.vmem [shape: bf16[8,16], index: 0, kind: input, shape index: {}]   ;;  %s925_s1 = inlined_call_operand.hbm [shape: bf16[16,8192], index: 1, kind: input, shape index: {}]   ;;  %s926_s2 = inlined_call_operand.hbm [shape: f32[1,8192], index: 2, kind: input, shape index: {}]   ;;  %s927_s3 = inlined_call_operand.vmem [shape: bf16[8,8192], index: 3, kind: output, shape index: {}]  }
   0x1   :  { %10 = vsyncpa [#allocation4 + $0x1], 0 }
   0x2   :  { %11 = vsyncpa [#allocation6], 0 }
   0x3   :  { %13 = vsyncpa [#allocation6 + $0x1], 0  ;;  %s812_s12 = smov 0   ;;  %s814_s13 = smov 0  }
   0x4   :  { %s816_s14 = smov 0   ;;  %s818_s15 = smov 0  }
   0x5   :  { %s820_s16 = smov 0   ;;  %s822_s17 = smov 0  }
   0x6 LB: > { %s568_s18 = sadd.s32 4294967295, %s787_s17   ;;  %s34_s19 = sadd.s32 1, %s783_s16  ;;  %s787_s17 = sphi %s822_s17, %s19_s17   ;;  %s783_s16 = sphi %s820_s16, %s935_s16   ;;  %s779_s15 = sphi %s818_s15, %s934_s15   ;;  %s775_s14 = sphi %s816_s14, %s933_s14   ;;  %s771_s13 = sphi %s814_s13, %s932_s13   ;;  %s767_s12 = sphi %s812_s12, %s931_s12  }
   0x7   : > { %p36_p0 = scmp.ge.s32.totalorder %s34_s19, 16  ;;  %s75_s20 = sadd.s32 1, %s775_s14 }
   0x8   : > { %p82_p1 = scmp.ne.s32.totalorder %s775_s14, %s771_s13  ;;  %p83_p2 = scmp.eq.s32.totalorder %s787_s17, 0 }
   0x9   : > { %s937_s19 = smov (%p36_p0, %s34_s19), 0  ;;  %p88_p4 = scmp.ne.s32.totalorder %s771_s13, %s767_s12 }
   0xa   : > { %p848_p3 = por %p83_p2, %p82_p1  ;;  %s71_s22 = ssub.s32 %s783_s16, %s937_s19 }
   0xb   : > { %p89_p5 = scmp.eq.s32.totalorder %s568_s18, 0  ;;  %p73_p6 = scmp.eq.s32.totalorder %s71_s22, 0 }
   0xc   : > { %p621_p8 = scmp.lt.s32.totalorder %s787_s17, 16  ;;  %s864_s25 = sand.u32 1, %s775_s14  }
   0xd   : > { %p855_p7 = por %p89_p5, %p88_p4  ;;  %s605_s26 = sshll.u32 %s783_s16, 4 }
   0xe   : > { %s861_s24 = scalar_select %p73_p6, %s775_s14, %s75_s20  }
   0xf   : > { %s573_s27 = sshll.u32 %s864_s25, 5  ;;  %s188_s30 = scalar_lea.hbm %s925_s1, %s605_s26 }
  0x10   : > { %s189_s4 = sshll.u32 %s188_s30, 4  ;;  %s180_s5 = scalar_lea.vmem [#allocation3], %s573_s27  ;;  %s190_s4 = int_to_ptr.hbm [resolvable:$true] %s189_s4 }
  0x11   : > { %s191_s6 = sshll.u32 %s180_s5, 4  ;;  %p873_p9 = pnand %p621_p8, %p848_p3  ;;  %s192_s6 = int_to_ptr.vmem [resolvable:$true] %s191_s6 }
  0x12   : > { %p578_p10 = scmp.ge.s32.totalorder %s787_s17, 1  ;;  %s177_s8 = scalar_lea.sflag [#allocation4], %s864_s25 }
  0x13   : > { %s789_s9 = smov 4096   ;;  %s790_s10 = smov 256  }
  0x14   : > { %s791_s11 = smov 16   ;;  %p218_p11 = scmp.lt.s32.totalorder %s787_s17, 17 }
  0x15   : > { %617 = dma.hbm_to_vmem [thread:$0]  (!%p873_p9), %s190_s4, 512, %s192_s6, %s177_s8, %s789_s9, %s790_s10, %s791_s11  }
  0x16   : > { %s576_s12 = sshll.u32 %s864_s25, 2  ;;  %s577_s18 = sshll.u32 %s783_s16, 2 }
  0x17   : > { %p219_p12 = pnand %p578_p10, %p218_p11  ;;  %s209_s22 = scalar_lea.hbm %s926_s2, %s577_s18 }
  0x18   : > { %s205_s26 = scalar_lea.vmem [#allocation5], %s576_s12  ;;  %s211_s28 = sshll.u32 %s209_s22, 4  ;;  %s212_s28 = int_to_ptr.hbm [resolvable:$true] %s211_s28 }
  0x19   : > { %s213_s27 = sshll.u32 %s205_s26, 4  ;;  %s202_s29 = scalar_lea.sflag [#allocation6], %s864_s25  ;;  %s214_s27 = int_to_ptr.vmem [resolvable:$true] %s213_s27 }
  0x1a   : > { %620 = dma.hbm_to_vmem [thread:$0]  (!%p873_p9), %s212_s28, 64, %s214_s27, %s202_s29  }
  0x1b   : > { %222 = sbr.rel (%p219_p12) target bundleno = 184 (0xb8), region = 32  ;;  %s224_s30 = sand.u32 (!%p219_p12), 1, %s771_s13  }
  0x1c   : > { %s579_s4 = sshll.u32 (!%p219_p12), %s224_s30, 5  ;;  %s225_s5 = scalar_lea.sflag (!%p219_p12), [#allocation4], %s224_s30 }
  0x1d   : > { %s228_s6 = scalar_lea.vmem (!%p219_p12), [#allocation3], %s579_s4 }
  0x20   : > { %758 = dma.done.wait (%p855_p7), %s225_s5, 512  }
  0x21   : > { %760 = vsyncadd (%p855_p7), %s225_s5, 4294966784  ;;  %s580_s8 = sshll.u32 %s224_s30, 2  ;;  %s235_s9 = scalar_lea.sflag [#allocation6], %s224_s30 }
  0x22   : > { %s238_s10 = scalar_lea.vmem [#allocation5], %s580_s8 }
  0x23   : > { %762 = dma.done.wait (%p855_p7), %s235_s9, 64  }
  0x24   : > { %764 = vsyncadd (%p855_p7), %s235_s9, 4294967232  ;;  %v585_v0 = vld [vmem:[%s228_s6] sm:$0xf]  ;;  %v608_v1 = vld [vmem:[%s228_s6 + $0xc] sm:$0xf0]  ;;  %vm336_vm0 = vcmask 130048  }
  0x25   : > { %v606_v2 = vld [vmem:[%s228_s6 + $0x4] sm:$0xf]  ;;  %v586_v3 = vor.u32 %v608_v1, %v585_v0  ;;  %v587_v4 = vld [vmem:[%s228_s6 + $0x10] sm:$0xf0]  ;;  %v593_v5 = vld [vmem:[%s228_s6 + $0x8] sm:$0xf] }
  0x26   : > { %v609_v6 = vld [vmem:[%s228_s6 + $0x14] sm:$0xf0]  ;;  %v590_v7 = vor.u32 %v606_v2, %v587_v4  ;;  %v607_v9 = vld [vmem:[%s228_s6 + $0xc] sm:$0xf]  ;;  %v595_v10 = vld [vmem:[%s228_s6 + $0x18] sm:$0xf0] }
  0x27   : > { %v594_v8 = vor.u32 %v609_v6, %v593_v5  ;;  %347 = vmatpush.bf16.msra.mxu0 %v586_v3  ;;  %v598_v11 = vor.u32 %v607_v9, %v595_v10  ;;  %v311_v12 = vld [vmem:[%s924_s0] sm:$0xf]  ;;  %s581_s23 = sshll.u32 %s779_s15, 2 }
  0x28   : > { %360 = vmatpush.bf16.msra.mxu1 %v590_v7  ;;  %v407_v13 = vld [vmem:[%s238_s10] sm:$0xf]  ;;  %p291_p13 = scmp.lt.s32.totalorder %s581_s23, 63 }
  0x29   : > { %373 = vmatpush.bf16.msra.mxu2 %v594_v8  ;;  %386 = vmatpush.bf16.msra.mxu3 %v598_v11  ;;  %v409_v14 = vperm.slane %v407_v13, 0  ;;  %v410_v15 = vperm.slane %v407_v13, 1  ;;  %v411_v22 = vperm.slane %v407_v13, 2  ;;  %v412_v23 = vperm.slane %v407_v13, 3 }
  0x2a   : > { %599 = vmatmul.msk.bf16.vlgmr.msra.gmra.mxu0 %vm336_vm0, %v311_v12  ;;  %s939_s23 = smov (!%p291_p13, %s581_s23), 63 }
  0x2b   : > { %600 = vmatmul.msk.bf16.vlgmr.msra.gmra.mxu1 %vm336_vm0, %v311_v12  ;;  %s582_s11 = sshll.u32 %s939_s23, 2 }
  0x2c   : > { %601 = vmatmul.msk.bf16.vlgmr.msra.gmra.mxu2 %vm336_vm0, %v311_v12  ;;  %602 = vmatmul.msk.bf16.vlgmr.msra.gmra.mxu3 %vm336_vm0, %v311_v12  ;;  %s296_s20 = scalar_lea.vmem %s927_s3, %s582_s11 }
  0xa7   : > { %v349_v16 = vpop.f32.mrf.mxu0 }
  0xa8   : > { %v417_v17 = vadd.f32 %v409_v14, %v349_v16  ;;  %v362_v18 = vpop.f32.mrf.mxu1 }
  0xa9   : > { %v418_v19 = vadd.f32 %v410_v15, %v362_v18 }
  0xaa   : > { %v421_v20 = vmax.f32 %v417_v17, 0.0 }
  0xab   : > { %v422_v21 = vmax.f32 %v418_v19, 0.0 }
  0xad   : > { %v425_v24 = vpack.c.bf16 %v422_v21, %v421_v20 }
  0xaf   : > { %v375_v25 = vpop.f32.mrf.mxu2  ;;  %427 = vst [vmem:[%s296_s20] sm:$0xff] %v425_v24  ;;  %v388_v27 = vpop.f32.mrf.mxu3 }
  0xb0   : > { %v419_v26 = vadd.f32 %v411_v22, %v375_v25  ;;  %v351_v28 = vpop.f32.mrf.mxu0  ;;  %v420_v29 = vadd.f32 %v412_v23, %v388_v27  ;;  %v364_v30 = vpop.f32.mrf.mxu1 }
  0xb2   : > { %v423_v31 = vmax.f32 %v419_v26, 0.0  ;;  %v424_v32 = vmax.f32 %v420_v29, 0.0 }
  0xb4   : > { %v426_v33 = vpack.c.bf16 %v424_v32, %v423_v31 }
  0xb6   : > { %428 = vst [vmem:[%s296_s20 + $0x8] sm:$0xff] %v426_v33 }
  0xb7   : > { %v377_v34 = vpop.f32.mrf.mxu2  ;;  %v390_v35 = vpop.f32.mrf.mxu3 }
  0xb8 PF: > { %s19_s17 = sadd.s32 1, %s787_s17   ;;  %s931_s12 = smov %s771_s13 }
  0xb9   : > { %p16_p0 = scmp.ge.s32.totalorder %s19_s17, 18   ;;  %s932_s13 = smov %s775_s14 }
  0xba   : > { %s933_s14 = smov %s861_s24  ;;  %s934_s15 = smov %s783_s16 }
  0xbb   : > { %s935_s16 = smov %s937_s19  ;;  %18 = sbr.rel (!%p16_p0) target bundleno = 6 (0x6), region = 96 }
  0xc0   :  { %459 = vsyncpa [#allocation4], 1 }
  0xc1   :  { %461 = vsyncpa [#allocation4 + $0x1], 1 }
  0xc2   :  { %462 = vsyncpa [#allocation6], 1 }
  0xc3   :  { %464 = vsyncpa [#allocation6 + $0x1], 1 }

// kernel: _lambda_.13
= control target key start
LH: loop header
LB: loop body
LE: loop exit
PB: predicated region body
PF: predicated region fallthrough
CT: control target
= control target key end

     0   :  { %8 = vsyncpa [#allocation4], 0  ;;  %s648_s0 = inlined_call_operand.vmem [shape: bf16[8,512], index: 0, kind: input, shape index: {}]   ;;  %s649_s1 = inlined_call_operand.hbm [shape: bf16[512,128], index: 1, kind: input, shape index: {}]   ;;  %s650_s2 = inlined_call_operand.hbm [shape: f32[1,128], index: 2, kind: input, shape index: {}]   ;;  %s651_s3 = inlined_call_operand.vmem [shape: f32[8,128], index: 3, kind: output, shape index: {}]  }
   0x1   :  { %s16_s14 = sshll.u32 %s649_s1, 4  ;;  %s17_s14 = int_to_ptr.hbm [resolvable:$true] %s16_s14 }
   0x2   :  { %9 = vsyncpa [#allocation6], 0  ;;  %s609_s15 = smov [#allocation3]   ;;  %s30_s19 = sshll.u32 %s650_s2, 4  ;;  %s31_s19 = int_to_ptr.hbm [resolvable:$true] %s30_s19 }
   0x3   :  { %s18_s16 = sshll.u32 %s609_s15, 4  ;;  %s610_s20 = smov 64   ;;  %s19_s16 = int_to_ptr.vmem [resolvable:$true] %s18_s16 }
   0x4   :  { %s611_s21 = smov 4   ;;  %s612_s22 = smov [#allocation5]  }
   0x5   :  { %24 = dma.hbm_to_vmem [thread:$0]  %s17_s14, 4096, %s19_s16, [#allocation4], %s610_s20, %s610_s20, %s611_s21  }
   0x6   :  { %s32_s23 = sshll.u32 %s612_s22, 4  ;;  %s33_s23 = int_to_ptr.vmem [resolvable:$true] %s32_s23 }
   0x7   :  { %35 = dma.hbm_to_vmem [thread:$0]  %s31_s19, 16, %s33_s23, [#allocation6]  }
   0x8   :  { %605 = dma.done.wait [#allocation4], 4096  }
   0x9   :  { %606 = vsyncadd [#allocation4], 4294963200 }
   0xa   :  { %607 = dma.done.wait [#allocation6], 16  }
   0xb   :  { %608 = vsyncadd [#allocation6], 4294967280  ;;  %v527_v0 = vld [vmem:[#allocation3 + $0x38] sm:$0xff]  ;;  %v526_v4 = vld [vmem:[#allocation3 + $0x30] sm:$0xff] }
   0xc   :  { %v535_v1 = vld [vmem:[#allocation3 + $0x78] sm:$0xff]  ;;  %322 = vmatpush.bf16.msra.mxu0 %v527_v0  ;;  %v534_v5 = vld [vmem:[#allocation3 + $0x70] sm:$0xff]  ;;  %v525_v8 = vld [vmem:[#allocation3 + $0x28] sm:$0xff] }
   0xd   :  { %v543_v2 = vld [vmem:[#allocation3 + $0xb8] sm:$0xff]  ;;  %335 = vmatpush.bf16.msra.mxu1 %v535_v1  ;;  %v542_v6 = vld [vmem:[#allocation3 + $0xb0] sm:$0xff]  ;;  %v533_v9 = vld [vmem:[#allocation3 + $0x68] sm:$0xff] }
   0xe   :  { %v551_v3 = vld [vmem:[#allocation3 + $0xf8] sm:$0xff]  ;;  %348 = vmatpush.bf16.msra.mxu2 %v543_v2  ;;  %v550_v7 = vld [vmem:[#allocation3 + $0xf0] sm:$0xff]  ;;  %v541_v10 = vld [vmem:[#allocation3 + $0xa8] sm:$0xff] }
   0xf   :  { %361 = vmatpush.bf16.msra.mxu3 %v551_v3  ;;  %v549_v11 = vld [vmem:[#allocation3 + $0xe8] sm:$0xff]  ;;  %v524_v12 = vld [vmem:[#allocation3 + $0x20] sm:$0xff]  ;;  %v523_v16 = vld [vmem:[#allocation3 + $0x18] sm:$0xff] }
  0x10   :  { %323 = vmatpush.bf16.msra.mxu0 %v526_v4  ;;  %v532_v13 = vld [vmem:[#allocation3 + $0x60] sm:$0xff]  ;;  %v531_v17 = vld [vmem:[#allocation3 + $0x58] sm:$0xff]  ;;  %v522_v20 = vld [vmem:[#allocation3 + $0x10] sm:$0xff] }
  0x11   :  { %336 = vmatpush.bf16.msra.mxu1 %v534_v5  ;;  %v540_v14 = vld [vmem:[#allocation3 + $0xa0] sm:$0xff]  ;;  %v539_v18 = vld [vmem:[#allocation3 + $0x98] sm:$0xff]  ;;  %v530_v21 = vld [vmem:[#allocation3 + $0x50] sm:$0xff] }
  0x12   :  { %349 = vmatpush.bf16.msra.mxu2 %v542_v6  ;;  %v548_v15 = vld [vmem:[#allocation3 + $0xe0] sm:$0xff]  ;;  %v547_v19 = vld [vmem:[#allocation3 + $0xd8] sm:$0xff]  ;;  %v538_v22 = vld [vmem:[#allocation3 + $0x90] sm:$0xff] }
  0x13   :  { %362 = vmatpush.bf16.msra.mxu3 %v550_v7  ;;  %v546_v23 = vld [vmem:[#allocation3 + $0xd0] sm:$0xff]  ;;  %v521_v24 = vld [vmem:[#allocation3 + $0x8] sm:$0xff]  ;;  %v50_v26 = vld [vmem:[%s648_s0] sm:$0xff] }
  0x14   :  { %324 = vmatpush.bf16.msra.mxu0 %v525_v8  ;;  %v529_v25 = vld [vmem:[#allocation3 + $0x48] sm:$0xff]  ;;  %v118_v30 = vunpack.c.l.b16 %v50_v26  ;;  %v119_v31 = vunpack.c.h.b16 %v50_v26  ;;  %v520_v32 = vld [vmem:[#allocation3] sm:$0xff] }
  0x15   :  { %337 = vmatpush.bf16.msra.mxu1 %v533_v9  ;;  %v537_v27 = vld [vmem:[#allocation3 + $0x88] sm:$0xff]  ;;  %v528_v33 = vld [vmem:[#allocation3 + $0x40] sm:$0xff] }
  0x16   :  { %350 = vmatpush.bf16.msra.mxu2 %v541_v10  ;;  %v545_v28 = vld [vmem:[#allocation3 + $0xc8] sm:$0xff]  ;;  %v536_v36 = vld [vmem:[#allocation3 + $0x80] sm:$0xff]  ;;  %v122_v38 = vpack.c.b16 %v118_v30, %v118_v30  ;;  %v123_v39 = vpack.c.b16 %v119_v31, %v119_v31 }
  0x17   :  { %363 = vmatpush.bf16.msra.mxu3 %v549_v11  ;;  %v51_v29 = vld [vmem:[%s648_s0 + $0x8] sm:$0xff]  ;;  %v544_v37 = vld [vmem:[#allocation3 + $0xc0] sm:$0xff] }
  0x18   :  { %325 = vmatpush.bf16.msra.mxu0 %v524_v12  ;;  %v120_v34 = vunpack.c.l.b16 %v51_v29  ;;  %v121_v35 = vunpack.c.h.b16 %v51_v29  ;;  %v556_v48 = vld [vmem:[#allocation5] ss:$0 sm:$0xff] }
  0x19   :  { %338 = vmatpush.bf16.msra.mxu1 %v532_v13 }
  0x1a   :  { %351 = vmatpush.bf16.msra.mxu2 %v540_v14  ;;  %v124_v40 = vpack.c.b16 %v120_v34, %v120_v34  ;;  %v125_v41 = vpack.c.b16 %v121_v35, %v121_v35 }
  0x1b   :  { %364 = vmatpush.bf16.msra.mxu3 %v548_v15 }
  0x1c   :  { %326 = vmatpush.bf16.msra.mxu0 %v523_v16 }
  0x1d   :  { %339 = vmatpush.bf16.msra.mxu1 %v531_v17 }
  0x1e   :  { %352 = vmatpush.bf16.msra.mxu2 %v539_v18 }
  0x1f   :  { %365 = vmatpush.bf16.msra.mxu3 %v547_v19 }
  0x20   :  { %327 = vmatpush.bf16.msra.mxu0 %v522_v20 }
  0x21   :  { %340 = vmatpush.bf16.msra.mxu1 %v530_v21 }
  0x22   :  { %353 = vmatpush.bf16.msra.mxu2 %v538_v22 }
  0x23   :  { %366 = vmatpush.bf16.msra.mxu3 %v546_v23 }
  0x24   :  { %328 = vmatpush.bf16.msra.mxu0 %v521_v24 }
  0x25   :  { %341 = vmatpush.bf16.msra.mxu1 %v529_v25 }
  0x26   :  { %354 = vmatpush.bf16.msra.mxu2 %v537_v27 }
  0x27   :  { %367 = vmatpush.bf16.msra.mxu3 %v545_v28 }
  0x28   :  { %329 = vmatpush.bf16.msra.mxu0 %v520_v32 }
  0x29   :  { %342 = vmatpush.bf16.msra.mxu1 %v528_v33 }
  0x2a   :  { %355 = vmatpush.bf16.msra.mxu2 %v536_v36 }
  0x2b   :  { %368 = vmatpush.bf16.msra.mxu3 %v544_v37  ;;  %330 = vmatmul.bf16.vlgmr.msra.gmra.mxu0 %v122_v38 }
  0x2c   :  { %343 = vmatmul.bf16.vlgmr.msra.gmra.mxu1 %v123_v39 }
  0x2d   :  { %356 = vmatmul.bf16.vlgmr.msra.gmra.mxu2 %v124_v40 }
  0x2e   :  { %369 = vmatmul.bf16.vlgmr.msra.gmra.mxu3 %v125_v41 }
  0xa8   :  { %v331_v42 = vpop.f32.mrf.mxu0 }
  0xa9   :  { %v344_v43 = vpop.f32.mrf.mxu1 }
  0xaa   :  { %v345_v44 = vadd.f32 %v344_v43, %v331_v42 }
  0xb0   :  { %v357_v45 = vpop.f32.mrf.mxu2  ;;  %v333_v49 = vpop.f32.mrf.mxu0 }
  0xb1   :  { %v370_v46 = vpop.f32.mrf.mxu3  ;;  %v358_v47 = vadd.f32 %v357_v45, %v345_v44  ;;  %v346_v50 = vpop.f32.mrf.mxu1 }
  0xb3   :  { %v371_v51 = vadd.f32 %v370_v46, %v358_v47 }
  0xb5   :  { %v384_v52 = vadd.f32 %v556_v48, %v371_v51 }
  0xb7   :  { %385 = vst [vmem:[%s651_s3] sm:$0xff] %v384_v52 }
  0xb8   :  { %v359_v53 = vpop.f32.mrf.mxu2 }
  0xb9   :  { %v372_v54 = vpop.f32.mrf.mxu3 }
  0xba   :  { %390 = vsyncpa [#allocation4], 1 }
  0xbb   :  { %391 = vsyncpa [#allocation6], 1 }

// kernel: _lambda_.12
= control target key start
LH: loop header
LB: loop body
LE: loop exit
PB: predicated region body
PF: predicated region fallthrough
CT: control target
= control target key end

     0   :  { %8 = vsyncpa [#allocation4], 0  ;;  %s1140_s0 = inlined_call_operand.vmem [shape: bf16[8,1024], index: 0, kind: input, shape index: {}]   ;;  %s1141_s1 = inlined_call_operand.hbm [shape: bf16[1024,128], index: 1, kind: input, shape index: {}]   ;;  %s1142_s2 = inlined_call_operand.hbm [shape: f32[1,128], index: 2, kind: input, shape index: {}]   ;;  %s1143_s3 = inlined_call_operand.vmem [shape: bf16[8,128], index: 3, kind: output, shape index: {}]  }
   0x1   :  { %s16_s14 = sshll.u32 %s1141_s1, 4  ;;  %s17_s14 = int_to_ptr.hbm [resolvable:$true] %s16_s14 }
   0x2   :  { %9 = vsyncpa [#allocation6], 0  ;;  %s1095_s15 = smov [#allocation3]   ;;  %s30_s19 = sshll.u32 %s1142_s2, 4  ;;  %s31_s19 = int_to_ptr.hbm [resolvable:$true] %s30_s19 }
   0x3   :  { %s18_s16 = sshll.u32 %s1095_s15, 4  ;;  %s1096_s20 = smov 64   ;;  %s19_s16 = int_to_ptr.vmem [resolvable:$true] %s18_s16 }
   0x4   :  { %s1097_s21 = smov 4   ;;  %s1098_s22 = smov [#allocation5]  }
   0x5   :  { %24 = dma.hbm_to_vmem [thread:$0]  %s17_s14, 8192, %s19_s16, [#allocation4], %s1096_s20, %s1096_s20, %s1097_s21  }
   0x6   :  { %s32_s23 = sshll.u32 %s1098_s22, 4  ;;  %s33_s23 = int_to_ptr.vmem [resolvable:$true] %s32_s23 }
   0x7   :  { %35 = dma.hbm_to_vmem [thread:$0]  %s31_s19, 16, %s33_s23, [#allocation6]  }
   0x8   :  { %1091 = dma.done.wait [#allocation4], 8192  }
   0x9   :  { %1092 = vsyncadd [#allocation4], 4294959104 }
   0xa   :  { %1093 = dma.done.wait [#allocation6], 16  }
   0xb   :  { %1094 = vsyncadd [#allocation6], 4294967280  ;;  %v981_v0 = vld [vmem:[#allocation3 + $0x38] sm:$0xff]  ;;  %v980_v4 = vld [vmem:[#allocation3 + $0x30] sm:$0xff] }
   0xc   :  { %v989_v1 = vld [vmem:[#allocation3 + $0x78] sm:$0xff]  ;;  %594 = vmatpush.bf16.msra.mxu0 %v981_v0  ;;  %v988_v5 = vld [vmem:[#allocation3 + $0x70] sm:$0xff]  ;;  %v979_v8 = vld [vmem:[#allocation3 + $0x28] sm:$0xff] }
   0xd   :  { %v997_v2 = vld [vmem:[#allocation3 + $0xb8] sm:$0xff]  ;;  %607 = vmatpush.bf16.msra.mxu1 %v989_v1  ;;  %v996_v6 = vld [vmem:[#allocation3 + $0xb0] sm:$0xff]  ;;  %v987_v9 = vld [vmem:[#allocation3 + $0x68] sm:$0xff] }
   0xe   :  { %v1005_v3 = vld [vmem:[#allocation3 + $0xf8] sm:$0xff]  ;;  %620 = vmatpush.bf16.msra.mxu2 %v997_v2  ;;  %v1004_v7 = vld [vmem:[#allocation3 + $0xf0] sm:$0xff]  ;;  %v995_v10 = vld [vmem:[#allocation3 + $0xa8] sm:$0xff] }
   0xf   :  { %633 = vmatpush.bf16.msra.mxu3 %v1005_v3  ;;  %v1003_v11 = vld [vmem:[#allocation3 + $0xe8] sm:$0xff]  ;;  %v978_v12 = vld [vmem:[#allocation3 + $0x20] sm:$0xff]  ;;  %v977_v16 = vld [vmem:[#allocation3 + $0x18] sm:$0xff] }
  0x10   :  { %595 = vmatpush.bf16.msra.mxu0 %v980_v4  ;;  %v986_v13 = vld [vmem:[#allocation3 + $0x60] sm:$0xff]  ;;  %v985_v17 = vld [vmem:[#allocation3 + $0x58] sm:$0xff]  ;;  %v976_v20 = vld [vmem:[#allocation3 + $0x10] sm:$0xff] }
  0x11   :  { %608 = vmatpush.bf16.msra.mxu1 %v988_v5  ;;  %v994_v14 = vld [vmem:[#allocation3 + $0xa0] sm:$0xff]  ;;  %v993_v18 = vld [vmem:[#allocation3 + $0x98] sm:$0xff]  ;;  %v984_v21 = vld [vmem:[#allocation3 + $0x50] sm:$0xff] }
  0x12   :  { %621 = vmatpush.bf16.msra.mxu2 %v996_v6  ;;  %v1002_v15 = vld [vmem:[#allocation3 + $0xe0] sm:$0xff]  ;;  %v1001_v19 = vld [vmem:[#allocation3 + $0xd8] sm:$0xff]  ;;  %v992_v22 = vld [vmem:[#allocation3 + $0x90] sm:$0xff] }
  0x13   :  { %634 = vmatpush.bf16.msra.mxu3 %v1004_v7  ;;  %v1000_v23 = vld [vmem:[#allocation3 + $0xd0] sm:$0xff]  ;;  %v975_v24 = vld [vmem:[#allocation3 + $0x8] sm:$0xff]  ;;  %v50_v29 = vld [vmem:[%s1140_s0] sm:$0xff] }
  0x14   :  { %596 = vmatpush.bf16.msra.mxu0 %v979_v8  ;;  %v983_v25 = vld [vmem:[#allocation3 + $0x48] sm:$0xff]  ;;  %v974_v30 = vld [vmem:[#allocation3] sm:$0xff]  ;;  %v186_v33 = vunpack.c.l.b16 %v50_v29  ;;  %v187_v37 = vunpack.c.h.b16 %v50_v29  ;;  %v1013_v38 = vld [vmem:[#allocation3 + $0x138] sm:$0xff] }
  0x15   :  { %609 = vmatpush.bf16.msra.mxu1 %v987_v9  ;;  %v991_v26 = vld [vmem:[#allocation3 + $0x88] sm:$0xff]  ;;  %v982_v31 = vld [vmem:[#allocation3 + $0x40] sm:$0xff]  ;;  %v1021_v39 = vld [vmem:[#allocation3 + $0x178] sm:$0xff] }
  0x16   :  { %622 = vmatpush.bf16.msra.mxu2 %v995_v10  ;;  %v999_v27 = vld [vmem:[#allocation3 + $0xc8] sm:$0xff]  ;;  %v990_v34 = vld [vmem:[#allocation3 + $0x80] sm:$0xff]  ;;  %v1029_v40 = vld [vmem:[#allocation3 + $0x1b8] sm:$0xff]  ;;  %v194_v43 = vpack.c.b16 %v186_v33, %v186_v33  ;;  %v195_v45 = vpack.c.b16 %v187_v37, %v187_v37 }
  0x17   :  { %635 = vmatpush.bf16.msra.mxu3 %v1003_v11  ;;  %v51_v28 = vld [vmem:[%s1140_s0 + $0x8] sm:$0xff]  ;;  %v998_v35 = vld [vmem:[#allocation3 + $0xc0] sm:$0xff]  ;;  %v1037_v41 = vld [vmem:[#allocation3 + $0x1f8] sm:$0xff] }
  0x18   :  { %597 = vmatpush.bf16.msra.mxu0 %v978_v12  ;;  %v188_v32 = vunpack.c.l.b16 %v51_v28  ;;  %v189_v36 = vunpack.c.h.b16 %v51_v28  ;;  %v1012_v46 = vld [vmem:[#allocation3 + $0x130] sm:$0xff]  ;;  %v1011_v50 = vld [vmem:[#allocation3 + $0x128] sm:$0xff]  ;;  %v1010_v54 = vld [vmem:[#allocation3 + $0x120] sm:$0xff] }
  0x19   :  { %610 = vmatpush.bf16.msra.mxu1 %v986_v13  ;;  %v1020_v47 = vld [vmem:[#allocation3 + $0x170] sm:$0xff]  ;;  %v1019_v51 = vld [vmem:[#allocation3 + $0x168] sm:$0xff]  ;;  %v1018_v55 = vld [vmem:[#allocation3 + $0x160] sm:$0xff] }
  0x1a   :  { %623 = vmatpush.bf16.msra.mxu2 %v994_v14  ;;  %v196_v42 = vpack.c.b16 %v188_v32, %v188_v32  ;;  %v197_v44 = vpack.c.b16 %v189_v36, %v189_v36  ;;  %v1028_v48 = vld [vmem:[#allocation3 + $0x1b0] sm:$0xff]  ;;  %v1027_v52 = vld [vmem:[#allocation3 + $0x1a8] sm:$0xff]  ;;  %v1026_v56 = vld [vmem:[#allocation3 + $0x1a0] sm:$0xff] }
  0x1b   :  { %636 = vmatpush.bf16.msra.mxu3 %v1002_v15  ;;  %v1036_v49 = vld [vmem:[#allocation3 + $0x1f0] sm:$0xff]  ;;  %v1035_v53 = vld [vmem:[#allocation3 + $0x1e8] sm:$0xff]  ;;  %v1034_v57 = vld [vmem:[#allocation3 + $0x1e0] sm:$0xff] }
  0x1c   :  { %598 = vmatpush.bf16.msra.mxu0 %v977_v16  ;;  %v1009_v58 = vld [vmem:[#allocation3 + $0x118] sm:$0xff]  ;;  %v1008_v62 = vld [vmem:[#allocation3 + $0x110] sm:$0xff]  ;;  %v1007_v2 = vld [vmem:[#allocation3 + $0x108] sm:$0xff] }
  0x1d   :  { %611 = vmatpush.bf16.msra.mxu1 %v985_v17  ;;  %v1017_v59 = vld [vmem:[#allocation3 + $0x158] sm:$0xff]  ;;  %v1016_v63 = vld [vmem:[#allocation3 + $0x150] sm:$0xff]  ;;  %v1015_v3 = vld [vmem:[#allocation3 + $0x148] sm:$0xff] }
  0x1e   :  { %624 = vmatpush.bf16.msra.mxu2 %v993_v18  ;;  %v1025_v60 = vld [vmem:[#allocation3 + $0x198] sm:$0xff]  ;;  %v1024_v0 = vld [vmem:[#allocation3 + $0x190] sm:$0xff]  ;;  %v1023_v5 = vld [vmem:[#allocation3 + $0x188] sm:$0xff] }
  0x1f   :  { %637 = vmatpush.bf16.msra.mxu3 %v1001_v19  ;;  %v1033_v61 = vld [vmem:[#allocation3 + $0x1d8] sm:$0xff]  ;;  %v1032_v1 = vld [vmem:[#allocation3 + $0x1d0] sm:$0xff]  ;;  %v1031_v6 = vld [vmem:[#allocation3 + $0x1c8] sm:$0xff] }
  0x20   :  { %599 = vmatpush.bf16.msra.mxu0 %v976_v20  ;;  %v52_v4 = vld [vmem:[%s1140_s0 + $0x10] sm:$0xff]  ;;  %v53_v7 = vld [vmem:[%s1140_s0 + $0x18] sm:$0xff]  ;;  %v1006_v10 = vld [vmem:[#allocation3 + $0x100] sm:$0xff] }
  0x21   :  { %612 = vmatpush.bf16.msra.mxu1 %v984_v21  ;;  %v190_v8 = vunpack.c.l.b16 %v52_v4  ;;  %v191_v9 = vunpack.c.h.b16 %v52_v4  ;;  %v1014_v11 = vld [vmem:[#allocation3 + $0x140] sm:$0xff]  ;;  %v192_v12 = vunpack.c.l.b16 %v53_v7  ;;  %v193_v13 = vunpack.c.h.b16 %v53_v7 }
  0x22   :  { %625 = vmatpush.bf16.msra.mxu2 %v992_v22  ;;  %v1022_v14 = vld [vmem:[#allocation3 + $0x180] sm:$0xff] }
  0x23   :  { %638 = vmatpush.bf16.msra.mxu3 %v1000_v23  ;;  %v1030_v15 = vld [vmem:[#allocation3 + $0x1c0] sm:$0xff]  ;;  %v198_v16 = vpack.c.b16 %v190_v8, %v190_v8  ;;  %v199_v17 = vpack.c.b16 %v191_v9, %v191_v9  ;;  %v200_v18 = vpack.c.b16 %v192_v12, %v192_v12  ;;  %v201_v19 = vpack.c.b16 %v193_v13, %v193_v13 }
  0x24   :  { %600 = vmatpush.bf16.msra.mxu0 %v975_v24 }
  0x25   :  { %613 = vmatpush.bf16.msra.mxu1 %v983_v25 }
  0x26   :  { %626 = vmatpush.bf16.msra.mxu2 %v991_v26 }
  0x27   :  { %639 = vmatpush.bf16.msra.mxu3 %v999_v27 }
  0x28   :  { %601 = vmatpush.bf16.msra.mxu0 %v974_v30 }
  0x29   :  { %614 = vmatpush.bf16.msra.mxu1 %v982_v31 }
  0x2a   :  { %627 = vmatpush.bf16.msra.mxu2 %v990_v34 }
  0x2b   :  { %640 = vmatpush.bf16.msra.mxu3 %v998_v35  ;;  %602 = vmatmul.bf16.vlgmr.msra.gmra.mxu0 %v194_v43 }
  0x2c   :  { %646 = vmatpush.bf16.msrb.mxu0 %v1013_v38  ;;  %615 = vmatmul.bf16.vlgmr.msra.gmra.mxu1 %v195_v45  ;;  %v1042_v38 = vld [vmem:[#allocation5] ss:$0 sm:$0xff] }
  0x2d   :  { %659 = vmatpush.bf16.msrb.mxu1 %v1021_v39  ;;  %628 = vmatmul.bf16.vlgmr.msra.gmra.mxu2 %v196_v42 }
  0x2e   :  { %672 = vmatpush.bf16.msrb.mxu2 %v1029_v40  ;;  %641 = vmatmul.bf16.vlgmr.msra.gmra.mxu3 %v197_v44 }
  0x2f   :  { %685 = vmatpush.bf16.msrb.mxu3 %v1037_v41 }
  0x30   :  { %647 = vmatpush.bf16.msrb.mxu0 %v1012_v46 }
  0x31   :  { %660 = vmatpush.bf16.msrb.mxu1 %v1020_v47 }
  0x32   :  { %673 = vmatpush.bf16.msrb.mxu2 %v1028_v48 }
  0x33   :  { %686 = vmatpush.bf16.msrb.mxu3 %v1036_v49 }
  0x34   :  { %648 = vmatpush.bf16.msrb.mxu0 %v1011_v50 }
  0x35   :  { %661 = vmatpush.bf16.msrb.mxu1 %v1019_v51 }
  0x36   :  { %674 = vmatpush.bf16.msrb.mxu2 %v1027_v52 }
  0x37   :  { %687 = vmatpush.bf16.msrb.mxu3 %v1035_v53 }
  0x38   :  { %649 = vmatpush.bf16.msrb.mxu0 %v1010_v54 }
  0x39   :  { %662 = vmatpush.bf16.msrb.mxu1 %v1018_v55 }
  0x3a   :  { %675 = vmatpush.bf16.msrb.mxu2 %v1026_v56 }
  0x3b   :  { %688 = vmatpush.bf16.msrb.mxu3 %v1034_v57 }
  0x3c   :  { %650 = vmatpush.bf16.msrb.mxu0 %v1009_v58 }
  0x3d   :  { %663 = vmatpush.bf16.msrb.mxu1 %v1017_v59 }
  0x3e   :  { %676 = vmatpush.bf16.msrb.mxu2 %v1025_v60 }
  0x3f   :  { %689 = vmatpush.bf16.msrb.mxu3 %v1033_v61 }
  0x40   :  { %651 = vmatpush.bf16.msrb.mxu0 %v1008_v62 }
  0x41   :  { %664 = vmatpush.bf16.msrb.mxu1 %v1016_v63 }
  0x42   :  { %677 = vmatpush.bf16.msrb.mxu2 %v1024_v0 }
  0x43   :  { %690 = vmatpush.bf16.msrb.mxu3 %v1032_v1 }
  0x44   :  { %652 = vmatpush.bf16.msrb.mxu0 %v1007_v2 }
  0x45   :  { %665 = vmatpush.bf16.msrb.mxu1 %v1015_v3 }
  0x46   :  { %678 = vmatpush.bf16.msrb.mxu2 %v1023_v5 }
  0x47   :  { %691 = vmatpush.bf16.msrb.mxu3 %v1031_v6 }
  0x48   :  { %653 = vmatpush.bf16.msrb.mxu0 %v1006_v10 }
  0x49   :  { %666 = vmatpush.bf16.msrb.mxu1 %v1014_v11 }
  0x4a   :  { %679 = vmatpush.bf16.msrb.mxu2 %v1022_v14 }
  0x4b   :  { %692 = vmatpush.bf16.msrb.mxu3 %v1030_v15  ;;  %654 = vmatmul.bf16.vlgmr.msrb.gmra.mxu0 %v198_v16 }
  0x4c   :  { %667 = vmatmul.bf16.vlgmr.msrb.gmra.mxu1 %v199_v17 }
  0x4d   :  { %680 = vmatmul.bf16.vlgmr.msrb.gmra.mxu2 %v200_v18 }
  0x4e   :  { %693 = vmatmul.bf16.vlgmr.msrb.gmra.mxu3 %v201_v19 }
  0xa8   :  { %v603_v20 = vpop.f32.mrf.mxu0 }
  0xa9   :  { %v616_v21 = vpop.f32.mrf.mxu1 }
  0xaa   :  { %v617_v28 = vadd.f32 %v616_v21, %v603_v20 }
  0xb0   :  { %v629_v22 = vpop.f32.mrf.mxu2  ;;  %v605_v24 = vpop.f32.mrf.mxu0 }
  0xb1   :  { %v642_v23 = vpop.f32.mrf.mxu3  ;;  %v618_v25 = vpop.f32.mrf.mxu1  ;;  %v630_v29 = vadd.f32 %v629_v22, %v617_v28 }
  0xb3   :  { %v643_v30 = vadd.f32 %v642_v23, %v630_v29 }
  0xb8   :  { %v631_v26 = vpop.f32.mrf.mxu2 }
  0xb9   :  { %v644_v27 = vpop.f32.mrf.mxu3 }
  0xc8   :  { %v655_v31 = vpop.f32.mrf.mxu0 }
  0xc9   :  { %v668_v32 = vpop.f32.mrf.mxu1  ;;  %v656_v33 = vadd.f32 %v655_v31, %v643_v30 }
  0xcb   :  { %v669_v34 = vadd.f32 %v668_v32, %v656_v33 }
  0xd0   :  { %v681_v35 = vpop.f32.mrf.mxu2  ;;  %v657_v39 = vpop.f32.mrf.mxu0 }
  0xd1   :  { %v694_v36 = vpop.f32.mrf.mxu3  ;;  %v682_v37 = vadd.f32 %v681_v35, %v669_v34  ;;  %v670_v40 = vpop.f32.mrf.mxu1 }
  0xd3   :  { %v695_v41 = vadd.f32 %v694_v36, %v682_v37 }
  0xd5   :  { %v708_v42 = vadd.f32 %v1042_v38, %v695_v41 }
  0xd7   :  { %v709_v43 = vmax.f32 %v708_v42, 0.0 }
  0xd8   :  { %v683_v44 = vpop.f32.mrf.mxu2 }
  0xd9   :  { %v696_v45 = vpop.f32.mrf.mxu3  ;;  %v710_v46 = vpack.c.bf16 %v709_v43, %v709_v43 }
  0xdb   :  { %711 = vst [vmem:[%s1143_s3] sm:$0xf] %v710_v46 }
  0xdc   :  { %716 = vsyncpa [#allocation4], 1 }
  0xdd   :  { %717 = vsyncpa [#allocation6], 1 }

// kernel: _lambda_.15
= control target key start
LH: loop header
LB: loop body
LE: loop exit
PB: predicated region body
PF: predicated region fallthrough
CT: control target
= control target key end

     0   :  { %s2510_s0 = inlined_call_operand.vmem [shape: bf16[128,1536], index: 0, kind: input, shape index: {}]   ;;  %s2511_s1 = inlined_call_operand.hbm [shape: bf16[1536,256], index: 1, kind: input, shape index: {}]   ;;  %s2512_s2 = inlined_call_operand.hbm [shape: f32[1,256], index: 2, kind: input, shape index: {}]   ;;  %s2513_s3 = inlined_call_operand.vmem [shape: bf16[128,256], index: 3, kind: output, shape index: {}]  }
   0x1   :  { %2520 = sst [smem:[#allocation21_spill]] %s2510_s0 }
   0x2   :  { %2521 = sst [smem:[#allocation22_spill]] %s2513_s3 }
   0x3   :  { %8 = vsyncpa [#allocation5], 0 }
   0x4   :  { %10 = vsyncpa [#allocation5 + $0x1], 0 }
   0x5   :  { %11 = vsyncpa [#allocation7], 0 }
   0x6   :  { %13 = vsyncpa [#allocation7 + $0x1], 0  ;;  %s2086_s12 = smov 0   ;;  %s2088_s13 = smov 0  }
   0x7   :  { %s2090_s14 = smov 0   ;;  %s2092_s15 = smov 0  }
   0x8   :  { %s2094_s16 = smov 0   ;;  %s2096_s17 = smov 0  }
   0x9   :  { %s2098_s18 = smov 0   ;;  %s2100_s19 = smov 0  }
   0xa   :  { %s2102_s20 = smov 0   ;;  %s2104_s21 = smov 0  }
   0xb   :  { %s2106_s22 = smov 0   ;;  %s2108_s23 = smov 0  }
   0xc   :  { %s2110_s24 = smov 0  }
   0xd LB: > { %2522 = sst [smem:[#allocation11_spill]] %s2032_s17  ;;  %s1391_s25 = sadd.s32 4294967295, %s2060_s24   ;;  %s2060_s24 = sphi %s2110_s24, %s19_s24   ;;  %s2056_s23 = sphi %s2108_s23, %s2557_s23   ;;  %s2052_s22 = sphi %s2106_s22, %s2549_s22   ;;  %s2048_s21 = sphi %s2104_s21, %s2556_s21   ;;  %s2044_s20 = sphi %s2102_s20, %s2548_s20   ;;  %s2040_s19 = sphi %s2100_s19, %s2547_s19   ;;  %s2036_s18 = sphi %s2098_s18, %s2546_s18   ;;  %s2032_s17 = sphi %s2096_s17, %s2545_s17   ;;  %s2028_s16 = sphi %s2094_s16, %s2555_s16   ;;  %s2024_s15 = sphi %s2092_s15, %s2554_s15   ;;  %s2020_s14 = sphi %s2090_s14, %s2553_s14   ;;  %s2016_s13 = sphi %s2088_s13, %s2552_s13   ;;  %s2012_s12 = sphi %s2086_s12, %s2551_s12  }
   0xe   : > { %2523 = sst [smem:[#allocation12_spill]] %s2040_s19  ;;  %s31_s26 = sadd.s32 1, %s2052_s22 }
   0xf   : > { %2524 = sst [smem:[#allocation13_spill]] %s2048_s21  ;;  %p32_p0 = scmp.ge.s32.totalorder %s31_s26, 3 }
  0x10   : > { %2525 = sst [smem:[#allocation14_spill]] %s2052_s22  ;;  %s34_s27 = sadd.s32 1, %s2056_s23 }
  0x11   : > { %s47_s28 = sadd.s32 1, %s2040_s19  ;;  %p54_p1 = scmp.ne.s32.totalorder %s2040_s19, %s2036_s18 }
  0x12   : > { %s2559_s26 = smov (%p32_p0, %s31_s26), 0  ;;  %s2561_s27 = smov (!%p32_p0, %s34_s27), %s2056_s23 }
  0x13   : > { %2526 = sst [smem:[#allocation15_spill]] %s2559_s26  ;;  %s43_s29 = ssub.s32 %s2052_s22, %s2559_s26 }
  0x14   : > { %p55_p2 = scmp.eq.s32.totalorder %s2060_s24, 0  ;;  %p36_p3 = scmp.ge.s32.totalorder %s2561_s27, 2 }
  0x15   : > { %p45_p4 = scmp.eq.s32.totalorder %s43_s29, 0  ;;  %s75_s4 = sadd.s32 1, %s2032_s17 }
  0x16   : > { %p2165_p5 = por %p55_p2, %p54_p1  ;;  %s2563_s27 = smov (%p36_p3, %s2561_s27), 0 }
  0x17   : > { %2528 = sst [smem:[#allocation16_spill]] %s2563_s27  ;;  %s71_s6 = ssub.s32 %s2056_s23, %s2563_s27 }
  0x18   : > { %s2173_s5 = scalar_select %p45_p4, %s2040_s19, %s47_s28  }
  0x19   : > { %p82_p6 = scmp.ne.s32.totalorder %s2032_s17, %s2028_s16  ;;  %s72_s7 = sor.u32 %s71_s6, %s43_s29 }
  0x1a   : > { %2529 = sst [smem:[#allocation17_spill]] %s2173_s5  ;;  %p88_p7 = scmp.ne.s32.totalorder %s2028_s16, %s2024_s15 }
  0x1b   : > { %p73_p8 = scmp.eq.s32.totalorder %s72_s7, 0  ;;  %p2183_p9 = por %p82_p6, %p55_p2 }
  0x1c   : > { %p89_p10 = scmp.eq.s32.totalorder %s1391_s25, 0  ;;  %p99_p11 = scmp.eq.s32.totalorder %s71_s6, 0 }
  0x1d   : > { %s2190_s9 = scalar_select %p73_p8, %s2032_s17, %s75_s4  }
  0x1e   : > { %p2192_p12 = por %p89_p10, %p88_p7  ;;  %s101_s11 = sadd.s32 1, %s2020_s14 }
  0x1f   : > { %2531 = sst [smem:[#allocation18_spill]] %s2190_s9  ;;  %p108_p13 = scmp.ne.s32.totalorder %s2020_s14, %s2016_s13 }
  0x20   : > { %s2198_s28 = scalar_select %p99_p11, %s2020_s14, %s101_s11  }
  0x21   : > { %p114_p0 = scmp.ne.s32.totalorder %s2016_s13, %s2012_s12  ;;  %p140_p1 = scmp.eq.s32.totalorder %s1391_s25, 5 }
  0x22   : > { %2533 = sst [smem:[#allocation19_spill]] %s2198_s28  ;;  %p2208_p3 = por %p108_p13, %p55_p2 }
  0x23   : > { %p2212_p4 = por %p114_p0, %p89_p10  ;;  %p2216_p6 = por %p140_p1, %p108_p13 }
  0x24   : > { %p1394_p7 = scmp.ge.s32.totalorder %s2060_s24, 6 }
  0x25   : > { %s2536_s4 = scalar_select %p2216_p6, 1, 0 }
  0x26   : > { %162 = sbr.rel (%p1394_p7) target bundleno = 97 (0x61), region = 16 }
  0x27   : > { %2537 = sst [smem:[#allocation20_spill]] %s2536_s4 }
  0x2b   : > { %165 = sbr.rel (!%p2165_p5) target bundleno = 85 (0x55), region = 20  ;;  %s167_s12 = sand.u32 (%p2165_p5), 1, %s2040_s19  }
  0x2c   : > { %s1668_s25 = sshll.u32 (%p2165_p5), %s2052_s22, 4  ;;  %s1395_s6 = sshll.u32 (%p2165_p5), %s167_s12, 8 }
  0x2d   : > { %s2538_s0 = sld [smem:[#allocation21_spill]] (%p2165_p5)  ;;  %s2233_s30 = scalar_lea.vmem (%p2165_p5), [#allocation3], %s1395_s6 }
  0x33   : > { %s2228_s27 = scalar_lea.vmem %s2538_s0, %s1668_s25 }
  0x34   : > { %v188_v0 = vld [vmem:[%s2228_s27] sm:$0xff]  ;;  %v190_v1 = vld [vmem:[%s2228_s27 + $0x8] sm:$0xff]  ;;  %v192_v2 = vld [vmem:[%s2228_s27 + $0x30] sm:$0xff] }
  0x35   : > { %189 = vst [vmem:[%s2233_s30] sm:$0xff] %v188_v0  ;;  %v194_v3 = vld [vmem:[%s2228_s27 + $0x38] sm:$0xff]  ;;  %v196_v4 = vld [vmem:[%s2228_s27 + $0x60] sm:$0xff]  ;;  %v198_v5 = vld [vmem:[%s2228_s27 + $0x68] sm:$0xff] }
  0x36   : > { %191 = vst [vmem:[%s2233_s30 + $0x8] sm:$0xff] %v190_v1  ;;  %v200_v6 = vld [vmem:[%s2228_s27 + $0x90] sm:$0xff]  ;;  %v202_v7 = vld [vmem:[%s2228_s27 + $0x98] sm:$0xff]  ;;  %v204_v8 = vld [vmem:[%s2228_s27 + $0xc0] sm:$0xff] }
  0x37   : > { %193 = vst [vmem:[%s2233_s30 + $0x10] sm:$0xff] %v192_v2  ;;  %v206_v9 = vld [vmem:[%s2228_s27 + $0xc8] sm:$0xff]  ;;  %v208_v10 = vld [vmem:[%s2228_s27 + $0xf0] sm:$0xff]  ;;  %v210_v11 = vld [vmem:[%s2228_s27 + $0xf8] sm:$0xff] }
  0x38   : > { %195 = vst [vmem:[%s2233_s30 + $0x18] sm:$0xff] %v194_v3  ;;  %v212_v12 = vld [vmem:[%s2228_s27 + $0x120] sm:$0xff]  ;;  %v214_v13 = vld [vmem:[%s2228_s27 + $0x128] sm:$0xff]  ;;  %v216_v14 = vld [vmem:[%s2228_s27 + $0x150] sm:$0xff] }
  0x39   : > { %197 = vst [vmem:[%s2233_s30 + $0x20] sm:$0xff] %v196_v4  ;;  %v218_v15 = vld [vmem:[%s2228_s27 + $0x158] sm:$0xff]  ;;  %v220_v16 = vld [vmem:[%s2228_s27 + $0x180] sm:$0xff]  ;;  %v222_v17 = vld [vmem:[%s2228_s27 + $0x188] sm:$0xff] }
  0x3a   : > { %199 = vst [vmem:[%s2233_s30 + $0x28] sm:$0xff] %v198_v5  ;;  %v224_v18 = vld [vmem:[%s2228_s27 + $0x1b0] sm:$0xff]  ;;  %v226_v19 = vld [vmem:[%s2228_s27 + $0x1b8] sm:$0xff]  ;;  %v228_v20 = vld [vmem:[%s2228_s27 + $0x1e0] sm:$0xff] }
  0x3b   : > { %201 = vst [vmem:[%s2233_s30 + $0x30] sm:$0xff] %v200_v6  ;;  %v230_v21 = vld [vmem:[%s2228_s27 + $0x1e8] sm:$0xff]  ;;  %v232_v22 = vld [vmem:[%s2228_s27 + $0x210] sm:$0xff]  ;;  %v234_v23 = vld [vmem:[%s2228_s27 + $0x218] sm:$0xff] }
  0x3c   : > { %203 = vst [vmem:[%s2233_s30 + $0x38] sm:$0xff] %v202_v7  ;;  %v236_v24 = vld [vmem:[%s2228_s27 + $0x240] sm:$0xff]  ;;  %v238_v25 = vld [vmem:[%s2228_s27 + $0x248] sm:$0xff]  ;;  %v240_v26 = vld [vmem:[%s2228_s27 + $0x270] sm:$0xff] }
  0x3d   : > { %205 = vst [vmem:[%s2233_s30 + $0x40] sm:$0xff] %v204_v8  ;;  %v242_v27 = vld [vmem:[%s2228_s27 + $0x278] sm:$0xff]  ;;  %v244_v28 = vld [vmem:[%s2228_s27 + $0x2a0] sm:$0xff]  ;;  %v246_v29 = vld [vmem:[%s2228_s27 + $0x2a8] sm:$0xff] }
  0x3e   : > { %207 = vst [vmem:[%s2233_s30 + $0x48] sm:$0xff] %v206_v9  ;;  %v248_v30 = vld [vmem:[%s2228_s27 + $0x2d0] sm:$0xff]  ;;  %v250_v31 = vld [vmem:[%s2228_s27 + $0x2d8] sm:$0xff] }
  0x3f   : > { %209 = vst [vmem:[%s2233_s30 + $0x50] sm:$0xff] %v208_v10 }
  0x40   : > { %211 = vst [vmem:[%s2233_s30 + $0x58] sm:$0xff] %v210_v11 }
  0x41   : > { %213 = vst [vmem:[%s2233_s30 + $0x60] sm:$0xff] %v212_v12 }
  0x42   : > { %215 = vst [vmem:[%s2233_s30 + $0x68] sm:$0xff] %v214_v13 }
  0x43   : > { %217 = vst [vmem:[%s2233_s30 + $0x70] sm:$0xff] %v216_v14 }
  0x44   : > { %219 = vst [vmem:[%s2233_s30 + $0x78] sm:$0xff] %v218_v15 }
  0x45   : > { %221 = vst [vmem:[%s2233_s30 + $0x80] sm:$0xff] %v220_v16 }
  0x46   : > { %223 = vst [vmem:[%s2233_s30 + $0x88] sm:$0xff] %v222_v17 }
  0x47   : > { %225 = vst [vmem:[%s2233_s30 + $0x90] sm:$0xff] %v224_v18 }
  0x48   : > { %227 = vst [vmem:[%s2233_s30 + $0x98] sm:$0xff] %v226_v19 }
  0x49   : > { %229 = vst [vmem:[%s2233_s30 + $0xa0] sm:$0xff] %v228_v20 }
  0x4a   : > { %231 = vst [vmem:[%s2233_s30 + $0xa8] sm:$0xff] %v230_v21 }
  0x4b   : > { %233 = vst [vmem:[%s2233_s30 + $0xb0] sm:$0xff] %v232_v22 }
  0x4c   : > { %235 = vst [vmem:[%s2233_s30 + $0xb8] sm:$0xff] %v234_v23 }
  0x4d   : > { %237 = vst [vmem:[%s2233_s30 + $0xc0] sm:$0xff] %v236_v24 }
  0x4e   : > { %239 = vst [vmem:[%s2233_s30 + $0xc8] sm:$0xff] %v238_v25 }
  0x4f   : > { %241 = vst [vmem:[%s2233_s30 + $0xd0] sm:$0xff] %v240_v26 }
  0x50   : > { %243 = vst [vmem:[%s2233_s30 + $0xd8] sm:$0xff] %v242_v27 }
  0x51   : > { %245 = vst [vmem:[%s2233_s30 + $0xe0] sm:$0xff] %v244_v28 }
  0x52   : > { %247 = vst [vmem:[%s2233_s30 + $0xe8] sm:$0xff] %v246_v29 }
  0x53   : > { %249 = vst [vmem:[%s2233_s30 + $0xf0] sm:$0xff] %v248_v30 }
  0x54   : > { %251 = vst [vmem:[%s2233_s30 + $0xf8] sm:$0xff] %v250_v31 }
  0x55 PF: > { %s258_s12 = sand.u32 1, %s2032_s17   ;;  %s1669_s25 = sshll.u32 %s2052_s22, 7 }
  0x56   : > { %s1398_s6 = sshll.u32 %s258_s12, 8  ;;  %s267_s7 = sadd.s32 %s2056_s23, %s1669_s25 }
  0x57   : > { %s1401_s11 = sshll.u32 %s267_s7, 2  ;;  %s262_s0 = scalar_lea.vmem [#allocation4], %s1398_s6 }
  0x58   : > { %s272_s26 = sshll.u32 %s262_s0, 4  ;;  %s269_s27 = scalar_lea.hbm %s2511_s1, %s1401_s11  ;;  %s273_s26 = int_to_ptr.vmem [resolvable:$true] %s272_s26 }
  0x59   : > { %s270_s30 = sshll.u32 %s269_s27, 4  ;;  %s282_s9 = sand.u32 1, %s2020_s14   ;;  %s271_s30 = int_to_ptr.hbm [resolvable:$true] %s270_s30 }
  0x5a   : > { %s259_s28 = scalar_lea.sflag [#allocation5], %s258_s12  ;;  %s2062_s3 = smov 128  }
  0x5b   : > { %s2063_s17 = smov 64   ;;  %s2064_s21 = smov 4  }
  0x5c   : > { %1781 = dma.hbm_to_vmem [thread:$0]  (%p2183_p9), %s271_s30, 4096, %s273_s26, %s259_s28, %s2062_s3, %s2063_s17, %s2064_s21  }
  0x5d   : > { %s288_s6 = scalar_lea.hbm %s2512_s2, %s2056_s23  ;;  %s285_s0 = scalar_lea.vmem [#allocation6], %s282_s9 }
  0x5e   : > { %s292_s7 = sshll.u32 %s285_s0, 4  ;;  %s290_s4 = sshll.u32 %s288_s6, 4  ;;  %s293_s7 = int_to_ptr.vmem [resolvable:$true] %s292_s7  ;;  %s291_s4 = int_to_ptr.hbm [resolvable:$true] %s290_s4 }
  0x5f   : > { %s283_s19 = scalar_lea.sflag [#allocation7], %s282_s9 }
  0x60   : > { %1782 = dma.hbm_to_vmem [thread:$0]  (%p2208_p3), %s291_s4, 16, %s293_s7, %s283_s19  }
  0x61 PF: > { %p1402_p2 = scmp.ge.s32.totalorder %s2060_s24, 1  ;;  %p297_p5 = scmp.lt.s32.totalorder %s2060_s24, 7 }
  0x63   : > { %p298_p8 = pnand %p1402_p2, %p297_p5 }
  0x64   : > { %s304_s3 = sand.u32 (!%p298_p8), 1, %s2036_s18   ;;  %s310_s17 = sand.u32 (!%p298_p8), 1, %s2028_s16  }
  0x65   : > { %301 = sbr.rel (%p298_p8) target bundleno = 467 (0x1d3), region = 51  ;;  %s1403_s21 = sshll.u32 (!%p298_p8), %s304_s3, 8 }
  0x66   : > { %s1404_s22 = sshll.u32 (!%p298_p8), %s310_s17, 8  ;;  %s2315_s26 = scalar_lea.vmem (!%p298_p8), [#allocation3], %s1403_s21 }
  0x67   : > { %s311_s5 = scalar_lea.sflag (!%p298_p8), [#allocation5], %s310_s17  ;;  %s2317_s8 = scalar_lea.vmem (!%p298_p8), [#allocation4], %s1404_s22 }
  0x6a   : > { %2003 = dma.done.wait (%p2192_p12), %s311_s5, 4096  }
  0x6b   : > { %2005 = vsyncadd (%p2192_p12), %s311_s5, 4294963200  ;;  %s2324_s9 = sand.u32 1, %s2016_s13  }
  0x6c   : > { %s321_s18 = scalar_lea.sflag [#allocation7], %s2324_s9  ;;  %s323_s28 = scalar_lea.vmem [#allocation6], %s2324_s9 }
  0x6d   : > { %2007 = dma.done.wait (%p2212_p4), %s321_s18, 16  }
  0x6e   : > { %2009 = vsyncadd (%p2212_p4), %s321_s18, 4294967280  ;;  %s1405_s15 = sshll.u32 %s2324_s9, 6  ;;  %p1406_p9 = scmp.ne.s32.totalorder %s2044_s20, 0 }
  0x6f   : > { %s2333_s4 = scalar_lea.vmem [#allocation8], %s1405_s15 }
  0x70   : > { %361 = sbr.rel (%p1406_p9) target bundleno = 134 (0x86), region = 67 }
  0x75   : > { %v2065_v32 = vmov 0.0  }
  0x76   : > { %362 = vst [vmem:[#allocation2 + $0x30] sm:$0xff] %v2065_v32 }
  0x77   : > { %363 = vst [vmem:[#allocation2] sm:$0xff] %v2065_v32 }
  0x78   : > { %364 = vst [vmem:[#allocation2 + $0x58] sm:$0xff] %v2065_v32 }
  0x79   : > { %365 = vst [vmem:[#allocation2 + $0x18] sm:$0xff] %v2065_v32 }
  0x7a   : > { %366 = vst [vmem:[#allocation2 + $0x50] sm:$0xff] %v2065_v32 }
  0x7b   : > { %367 = vst [vmem:[#allocation2 + $0x68] sm:$0xff] %v2065_v32 }
  0x7c   : > { %368 = vst [vmem:[#allocation2 + $0x8] sm:$0xff] %v2065_v32 }
  0x7d   : > { %369 = vst [vmem:[#allocation2 + $0x48] sm:$0xff] %v2065_v32 }
  0x7e   : > { %370 = vst [vmem:[#allocation2 + $0x40] sm:$0xff] %v2065_v32 }
  0x7f   : > { %371 = vst [vmem:[#allocation2 + $0x20] sm:$0xff] %v2065_v32 }
  0x80   : > { %372 = vst [vmem:[#allocation2 + $0x10] sm:$0xff] %v2065_v32 }
  0x81   : > { %373 = vst [vmem:[#allocation2 + $0x38] sm:$0xff] %v2065_v32 }
  0x82   : > { %374 = vst [vmem:[#allocation2 + $0x60] sm:$0xff] %v2065_v32 }
  0x83   : > { %375 = vst [vmem:[#allocation2 + $0x70] sm:$0xff] %v2065_v32 }
  0x84   : > { %376 = vst [vmem:[#allocation2 + $0x78] sm:$0xff] %v2065_v32 }
  0x85   : > { %377 = vst [vmem:[#allocation2 + $0x28] sm:$0xff] %v2065_v32 }
  0x86 PF: > { %v1709_v33 = vld [vmem:[%s2317_s8 + $0x38] sm:$0xff]  ;;  %v1708_v37 = vld [vmem:[%s2317_s8 + $0x30] sm:$0xff]  ;;  %v1707_v41 = vld [vmem:[%s2317_s8 + $0x28] sm:$0xff]  ;;  %p1663_p10 = scmp.ne.s32.totalorder %s2044_s20, 2 }
  0x87   : > { %v1717_v34 = vld [vmem:[%s2317_s8 + $0x78] sm:$0xff]  ;;  %842 = vmatpush.bf16.msra.mxu0 %v1709_v33  ;;  %v1716_v38 = vld [vmem:[%s2317_s8 + $0x70] sm:$0xff]  ;;  %v1715_v42 = vld [vmem:[%s2317_s8 + $0x68] sm:$0xff] }
  0x88   : > { %v1725_v35 = vld [vmem:[%s2317_s8 + $0xb8] sm:$0xff]  ;;  %891 = vmatpush.bf16.msra.mxu1 %v1717_v34  ;;  %v1724_v39 = vld [vmem:[%s2317_s8 + $0xb0] sm:$0xff]  ;;  %v1723_v43 = vld [vmem:[%s2317_s8 + $0xa8] sm:$0xff] }
  0x89   : > { %v1733_v36 = vld [vmem:[%s2317_s8 + $0xf8] sm:$0xff]  ;;  %940 = vmatpush.bf16.msra.mxu2 %v1725_v35  ;;  %v1732_v40 = vld [vmem:[%s2317_s8 + $0xf0] sm:$0xff]  ;;  %v1731_v44 = vld [vmem:[%s2317_s8 + $0xe8] sm:$0xff] }
  0x8a   : > { %989 = vmatpush.bf16.msra.mxu3 %v1733_v36  ;;  %v1706_v45 = vld [vmem:[%s2317_s8 + $0x20] sm:$0xff]  ;;  %v1705_v49 = vld [vmem:[%s2317_s8 + $0x18] sm:$0xff]  ;;  %v1704_v53 = vld [vmem:[%s2317_s8 + $0x10] sm:$0xff] }
  0x8b   : > { %843 = vmatpush.bf16.msra.mxu0 %v1708_v37  ;;  %v1714_v46 = vld [vmem:[%s2317_s8 + $0x60] sm:$0xff]  ;;  %v1713_v50 = vld [vmem:[%s2317_s8 + $0x58] sm:$0xff]  ;;  %v1712_v54 = vld [vmem:[%s2317_s8 + $0x50] sm:$0xff] }
  0x8c   : > { %892 = vmatpush.bf16.msra.mxu1 %v1716_v38  ;;  %v1722_v47 = vld [vmem:[%s2317_s8 + $0xa0] sm:$0xff]  ;;  %v1721_v51 = vld [vmem:[%s2317_s8 + $0x98] sm:$0xff]  ;;  %v1720_v55 = vld [vmem:[%s2317_s8 + $0x90] sm:$0xff] }
  0x8d   : > { %941 = vmatpush.bf16.msra.mxu2 %v1724_v39  ;;  %v1730_v48 = vld [vmem:[%s2317_s8 + $0xe0] sm:$0xff]  ;;  %v1729_v52 = vld [vmem:[%s2317_s8 + $0xd8] sm:$0xff]  ;;  %v1728_v56 = vld [vmem:[%s2317_s8 + $0xd0] sm:$0xff] }
  0x8e   : > { %990 = vmatpush.bf16.msra.mxu3 %v1732_v40  ;;  %v1703_v57 = vld [vmem:[%s2317_s8 + $0x8] sm:$0xff]  ;;  %v1702_v61 = vld [vmem:[%s2317_s8] sm:$0xff]  ;;  %v1672_v2 = vld [vmem:[%s2315_s26 + $0xc] sm:$0xf0] }
  0x8f   : > { %844 = vmatpush.bf16.msra.mxu0 %v1707_v41  ;;  %v1711_v58 = vld [vmem:[%s2317_s8 + $0x48] sm:$0xff]  ;;  %v1710_v62 = vld [vmem:[%s2317_s8 + $0x40] sm:$0xff]  ;;  %v1411_v4 = vld [vmem:[%s2315_s26 + $0x10] sm:$0xf0] }
  0x90   : > { %893 = vmatpush.bf16.msra.mxu1 %v1715_v42  ;;  %v1719_v59 = vld [vmem:[%s2317_s8 + $0x88] sm:$0xff]  ;;  %v1718_v63 = vld [vmem:[%s2317_s8 + $0x80] sm:$0xff]  ;;  %v1673_v6 = vld [vmem:[%s2315_s26 + $0x14] sm:$0xf0] }
  0x91   : > { %942 = vmatpush.bf16.msra.mxu2 %v1723_v43  ;;  %v1727_v60 = vld [vmem:[%s2317_s8 + $0xc8] sm:$0xff]  ;;  %v1726_v0 = vld [vmem:[%s2317_s8 + $0xc0] sm:$0xff]  ;;  %v1419_v8 = vld [vmem:[%s2315_s26 + $0x18] sm:$0xf0] }
  0x92   : > { %991 = vmatpush.bf16.msra.mxu3 %v1731_v44  ;;  %v1409_v1 = vld [vmem:[%s2315_s26] sm:$0xf]  ;;  %v1670_v3 = vld [vmem:[%s2315_s26 + $0x4] sm:$0xf]  ;;  %v1417_v5 = vld [vmem:[%s2315_s26 + $0x8] sm:$0xf] }
  0x93   : > { %845 = vmatpush.bf16.msra.mxu0 %v1706_v45  ;;  %v1671_v7 = vld [vmem:[%s2315_s26 + $0xc] sm:$0xf]  ;;  %v1410_v9 = vor.u32 %v1672_v2, %v1409_v1  ;;  %v1414_v10 = vor.u32 %v1670_v3, %v1411_v4  ;;  %v1418_v11 = vor.u32 %v1673_v6, %v1417_v5  ;;  %v1425_v13 = vld [vmem:[%s2315_s26 + $0x20] sm:$0xf]  ;;  %v1676_v14 = vld [vmem:[%s2315_s26 + $0x2c] sm:$0xf0] }
  0x94   : > { %894 = vmatpush.bf16.msra.mxu1 %v1714_v46  ;;  %v1422_v12 = vor.u32 %v1671_v7, %v1419_v8  ;;  %v1674_v15 = vld [vmem:[%s2315_s26 + $0x24] sm:$0xf]  ;;  %v1427_v16 = vld [vmem:[%s2315_s26 + $0x30] sm:$0xf0]  ;;  %v1433_v17 = vld [vmem:[%s2315_s26 + $0x28] sm:$0xf]  ;;  %v1426_v21 = vor.u32 %v1676_v14, %v1425_v13 }
  0x95   : > { %943 = vmatpush.bf16.msra.mxu2 %v1722_v47  ;;  %v1677_v18 = vld [vmem:[%s2315_s26 + $0x34] sm:$0xf0]  ;;  %v1675_v19 = vld [vmem:[%s2315_s26 + $0x2c] sm:$0xf]  ;;  %v1435_v20 = vld [vmem:[%s2315_s26 + $0x38] sm:$0xf0]  ;;  %v1430_v22 = vor.u32 %v1674_v15, %v1427_v16 }
  0x96   : > { %992 = vmatpush.bf16.msra.mxu3 %v1730_v48  ;;  %v1434_v23 = vor.u32 %v1677_v18, %v1433_v17  ;;  %v1438_v24 = vor.u32 %v1675_v19, %v1435_v20  ;;  %v1441_v25 = vld [vmem:[%s2315_s26 + $0x40] sm:$0xf]  ;;  %v1680_v26 = vld [vmem:[%s2315_s26 + $0x4c] sm:$0xf0]  ;;  %v1678_v27 = vld [vmem:[%s2315_s26 + $0x44] sm:$0xf] }
  0x97   : > { %846 = vmatpush.bf16.msra.mxu0 %v1705_v49  ;;  %v1443_v28 = vld [vmem:[%s2315_s26 + $0x50] sm:$0xf0]  ;;  %v1449_v29 = vld [vmem:[%s2315_s26 + $0x48] sm:$0xf]  ;;  %v1681_v30 = vld [vmem:[%s2315_s26 + $0x54] sm:$0xf0]  ;;  %v1442_v33 = vor.u32 %v1680_v26, %v1441_v25 }
  0x98   : > { %895 = vmatpush.bf16.msra.mxu1 %v1713_v50  ;;  %v1679_v31 = vld [vmem:[%s2315_s26 + $0x4c] sm:$0xf]  ;;  %v1451_v32 = vld [vmem:[%s2315_s26 + $0x58] sm:$0xf0]  ;;  %v1446_v34 = vor.u32 %v1678_v27, %v1443_v28  ;;  %v1450_v35 = vor.u32 %v1681_v30, %v1449_v29  ;;  %v1457_v37 = vld [vmem:[%s2315_s26 + $0x60] sm:$0xf] }
  0x99   : > { %944 = vmatpush.bf16.msra.mxu2 %v1721_v51  ;;  %v1454_v36 = vor.u32 %v1679_v31, %v1451_v32  ;;  %v1684_v38 = vld [vmem:[%s2315_s26 + $0x6c] sm:$0xf0]  ;;  %v1682_v39 = vld [vmem:[%s2315_s26 + $0x64] sm:$0xf]  ;;  %v1459_v40 = vld [vmem:[%s2315_s26 + $0x70] sm:$0xf0] }
  0x9a   : > { %993 = vmatpush.bf16.msra.mxu3 %v1729_v52  ;;  %v1465_v41 = vld [vmem:[%s2315_s26 + $0x68] sm:$0xf]  ;;  %v1685_v42 = vld [vmem:[%s2315_s26 + $0x74] sm:$0xf0]  ;;  %v1683_v43 = vld [vmem:[%s2315_s26 + $0x6c] sm:$0xf]  ;;  %v1458_v45 = vor.u32 %v1684_v38, %v1457_v37  ;;  %v1462_v46 = vor.u32 %v1682_v39, %v1459_v40 }
  0x9b   : > { %847 = vmatpush.bf16.msra.mxu0 %v1704_v53  ;;  %v1467_v44 = vld [vmem:[%s2315_s26 + $0x78] sm:$0xf0]  ;;  %v1466_v47 = vor.u32 %v1685_v42, %v1465_v41  ;;  %v1473_v49 = vld [vmem:[%s2315_s26 + $0x80] sm:$0xf]  ;;  %v1688_v50 = vld [vmem:[%s2315_s26 + $0x8c] sm:$0xf0] }
  0x9c   : > { %896 = vmatpush.bf16.msra.mxu1 %v1712_v54  ;;  %v1470_v48 = vor.u32 %v1683_v43, %v1467_v44  ;;  %v1686_v51 = vld [vmem:[%s2315_s26 + $0x84] sm:$0xf]  ;;  %v1475_v52 = vld [vmem:[%s2315_s26 + $0x90] sm:$0xf0]  ;;  %v1481_v53 = vld [vmem:[%s2315_s26 + $0x88] sm:$0xf] }
  0x9d   : > { %945 = vmatpush.bf16.msra.mxu2 %v1720_v55  ;;  %v1689_v54 = vld [vmem:[%s2315_s26 + $0x94] sm:$0xf0]  ;;  %v1687_v55 = vld [vmem:[%s2315_s26 + $0x8c] sm:$0xf]  ;;  %v1497_v1 = vld [vmem:[%s2315_s26 + $0xa8] sm:$0xf] }
  0x9e   : > { %994 = vmatpush.bf16.msra.mxu3 %v1728_v56  ;;  %v1483_v56 = vld [vmem:[%s2315_s26 + $0x98] sm:$0xf0]  ;;  %v1693_v2 = vld [vmem:[%s2315_s26 + $0xb4] sm:$0xf0]  ;;  %v1691_v3 = vld [vmem:[%s2315_s26 + $0xac] sm:$0xf] }
  0x9f   : > { %848 = vmatpush.bf16.msra.mxu0 %v1703_v57  ;;  %v1474_v57 = vor.u32 %v1688_v50, %v1473_v49  ;;  %v1499_v4 = vld [vmem:[%s2315_s26 + $0xb8] sm:$0xf0]  ;;  %v1498_v7 = vor.u32 %v1693_v2, %v1497_v1  ;;  %v1513_v13 = vld [vmem:[%s2315_s26 + $0xc8] sm:$0xf]  ;;  %v1697_v14 = vld [vmem:[%s2315_s26 + $0xd4] sm:$0xf0] }
  0xa0   : > { %897 = vmatpush.bf16.msra.mxu1 %v1711_v58  ;;  %v1478_v58 = vor.u32 %v1686_v51, %v1475_v52  ;;  %v1502_v8 = vor.u32 %v1691_v3, %v1499_v4  ;;  %v1695_v15 = vld [vmem:[%s2315_s26 + $0xcc] sm:$0xf]  ;;  %v1515_v16 = vld [vmem:[%s2315_s26 + $0xd8] sm:$0xf0]  ;;  %v1514_v19 = vor.u32 %v1697_v14, %v1513_v13  ;;  %v1529_v25 = vld [vmem:[%s2315_s26 + $0xe8] sm:$0xf] }
  0xa1   : > { %946 = vmatpush.bf16.msra.mxu2 %v1719_v59  ;;  %v1482_v59 = vor.u32 %v1689_v54, %v1481_v53  ;;  %v1518_v20 = vor.u32 %v1695_v15, %v1515_v16  ;;  %v1701_v26 = vld [vmem:[%s2315_s26 + $0xf4] sm:$0xf0]  ;;  %v1699_v27 = vld [vmem:[%s2315_s26 + $0xec] sm:$0xf]  ;;  %v1531_v28 = vld [vmem:[%s2315_s26 + $0xf8] sm:$0xf0] }
  0xa2   : > { %995 = vmatpush.bf16.msra.mxu3 %v1727_v60  ;;  %v1486_v60 = vor.u32 %v1687_v55, %v1483_v56  ;;  %v1530_v31 = vor.u32 %v1701_v26, %v1529_v25  ;;  %v1534_v32 = vor.u32 %v1699_v27, %v1531_v28  ;;  %v378_v41 = vld [vmem:[#allocation2 + $0x30] sm:$0xff]  ;;  %v379_v50 = vld [vmem:[#allocation2] sm:$0xff]  ;;  %v381_v4 = vld [vmem:[#allocation2 + $0x18] sm:$0xff] }
  0xa3   : > { %849 = vmatpush.bf16.msra.mxu0 %v1702_v61  ;;  %v1489_v61 = vld [vmem:[%s2315_s26 + $0xa0] sm:$0xf]  ;;  %v382_v13 = vld [vmem:[#allocation2 + $0x50] sm:$0xff] }
  0xa4   : > { %898 = vmatpush.bf16.msra.mxu1 %v1710_v62  ;;  %v1692_v62 = vld [vmem:[%s2315_s26 + $0xac] sm:$0xf0] }
  0xa5   : > { %947 = vmatpush.bf16.msra.mxu2 %v1718_v63  ;;  %v1690_v63 = vld [vmem:[%s2315_s26 + $0xa4] sm:$0xf]  ;;  %v1490_v5 = vor.u32 %v1692_v62, %v1489_v61 }
  0xa6   : > { %996 = vmatpush.bf16.msra.mxu3 %v1726_v0  ;;  %850 = vmatmul.bf16.vlgmr.msra.gmra.mxu0 %v1410_v9  ;;  %v1491_v0 = vld [vmem:[%s2315_s26 + $0xb0] sm:$0xf0]  ;;  %v1505_v9 = vld [vmem:[%s2315_s26 + $0xc0] sm:$0xf] }
  0xa7   : > { %899 = vmatmul.bf16.vlgmr.msra.gmra.mxu1 %v1414_v10  ;;  %v1494_v6 = vor.u32 %v1690_v63, %v1491_v0  ;;  %v1696_v10 = vld [vmem:[%s2315_s26 + $0xcc] sm:$0xf0] }
  0xa8   : > { %948 = vmatmul.bf16.vlgmr.msra.gmra.mxu2 %v1418_v11  ;;  %v1694_v11 = vld [vmem:[%s2315_s26 + $0xc4] sm:$0xf]  ;;  %v1506_v17 = vor.u32 %v1696_v10, %v1505_v9 }
  0xa9   : > { %997 = vmatmul.bf16.vlgmr.msra.gmra.mxu3 %v1422_v12  ;;  %v1507_v12 = vld [vmem:[%s2315_s26 + $0xd0] sm:$0xf0] }
  0xaa   : > { %v1510_v18 = vor.u32 %v1694_v11, %v1507_v12 }
  0xb6   : > { %855 = vmatmul.bf16.gmra.mxu0 %v1426_v21  ;;  %v1521_v21 = vld [vmem:[%s2315_s26 + $0xe0] sm:$0xf] }
  0xb7   : > { %904 = vmatmul.bf16.gmra.mxu1 %v1430_v22  ;;  %v1700_v22 = vld [vmem:[%s2315_s26 + $0xec] sm:$0xf0] }
  0xb8   : > { %953 = vmatmul.bf16.gmra.mxu2 %v1434_v23  ;;  %v1698_v23 = vld [vmem:[%s2315_s26 + $0xe4] sm:$0xf]  ;;  %v1522_v29 = vor.u32 %v1700_v22, %v1521_v21  ;;  %v383_v22 = vld [vmem:[#allocation2 + $0x68] sm:$0xff] }
  0xb9   : > { %1002 = vmatmul.bf16.gmra.mxu3 %v1438_v24  ;;  %v1523_v24 = vld [vmem:[%s2315_s26 + $0xf0] sm:$0xf0] }
  0xba   : > { %v1526_v30 = vor.u32 %v1698_v23, %v1523_v24 }
  0xc6   : > { %860 = vmatmul.bf16.gmra.mxu0 %v1442_v33 }
  0xc7   : > { %909 = vmatmul.bf16.gmra.mxu1 %v1446_v34 }
  0xc8   : > { %958 = vmatmul.bf16.gmra.mxu2 %v1450_v35 }
  0xc9   : > { %1007 = vmatmul.bf16.gmra.mxu3 %v1454_v36 }
  0xd6   : > { %865 = vmatmul.bf16.gmra.mxu0 %v1458_v45 }
  0xd7   : > { %914 = vmatmul.bf16.gmra.mxu1 %v1462_v46 }
  0xd8   : > { %963 = vmatmul.bf16.gmra.mxu2 %v1466_v47 }
  0xd9   : > { %1012 = vmatmul.bf16.gmra.mxu3 %v1470_v48 }
  0xe6   : > { %870 = vmatmul.bf16.gmra.mxu0 %v1474_v57 }
  0xe7   : > { %919 = vmatmul.bf16.gmra.mxu1 %v1478_v58 }
  0xe8   : > { %968 = vmatmul.bf16.gmra.mxu2 %v1482_v59  ;;  %v380_v59 = vld [vmem:[#allocation2 + $0x58] sm:$0xff] }
  0xe9   : > { %1017 = vmatmul.bf16.gmra.mxu3 %v1486_v60 }
  0xf6   : > { %875 = vmatmul.bf16.gmra.mxu0 %v1490_v5 }
  0xf7   : > { %924 = vmatmul.bf16.gmra.mxu1 %v1494_v6 }
  0xf8   : > { %973 = vmatmul.bf16.gmra.mxu2 %v1498_v7 }
  0xf9   : > { %1022 = vmatmul.bf16.gmra.mxu3 %v1502_v8 }
 0x106   : > { %880 = vmatmul.bf16.gmra.mxu0 %v1506_v17 }
 0x107   : > { %929 = vmatmul.bf16.gmra.mxu1 %v1510_v18 }
 0x108   : > { %978 = vmatmul.bf16.gmra.mxu2 %v1514_v19 }
 0x109   : > { %1027 = vmatmul.bf16.gmra.mxu3 %v1518_v20 }
 0x116   : > { %885 = vmatmul.bf16.gmra.mxu0 %v1522_v29 }
 0x117   : > { %934 = vmatmul.bf16.gmra.mxu1 %v1526_v30 }
 0x118   : > { %983 = vmatmul.bf16.gmra.mxu2 %v1530_v31  ;;  %v384_v31 = vld [vmem:[#allocation2 + $0x8] sm:$0xff] }
 0x119   : > { %1032 = vmatmul.bf16.gmra.mxu3 %v1534_v32 }
 0x123   : > { %v851_v33 = vpop.f32.mrf.mxu0 }
 0x124   : > { %v900_v34 = vpop.f32.mrf.mxu1 }
 0x125   : > { %v901_v35 = vadd.f32 %v900_v34, %v851_v33 }
 0x12b   : > { %v949_v36 = vpop.f32.mrf.mxu2  ;;  %v853_v39 = vpop.f32.mrf.mxu0 }
 0x12c   : > { %v998_v37 = vpop.f32.mrf.mxu3  ;;  %v950_v38 = vadd.f32 %v949_v36, %v901_v35  ;;  %v902_v40 = vpop.f32.mrf.mxu1 }
 0x12d   : > { %v903_v44 = vadd.f32 %v902_v40, %v853_v39  ;;  %v385_v40 = vld [vmem:[#allocation2 + $0x48] sm:$0xff] }
 0x12e   : > { %v999_v42 = vadd.f32 %v998_v37, %v950_v38 }
 0x130   : > { %v1038_v43 = vadd.f32 %v999_v42, %v378_v41 }
 0x132   : > { %1054 = vst [vmem:[#allocation2 + $0x30] sm:$0xff] %v1038_v43 }
 0x133   : > { %v951_v45 = vpop.f32.mrf.mxu2  ;;  %v856_v48 = vpop.f32.mrf.mxu0 }
 0x134   : > { %v1000_v46 = vpop.f32.mrf.mxu3  ;;  %v952_v47 = vadd.f32 %v951_v45, %v903_v44  ;;  %v905_v49 = vpop.f32.mrf.mxu1 }
 0x135   : > { %v906_v53 = vadd.f32 %v905_v49, %v856_v48  ;;  %v386_v49 = vld [vmem:[#allocation2 + $0x40] sm:$0xff] }
 0x136   : > { %v1001_v51 = vadd.f32 %v1000_v46, %v952_v47 }
 0x138   : > { %v1039_v52 = vadd.f32 %v1001_v51, %v379_v50 }
 0x13a   : > { %1055 = vst [vmem:[#allocation2] sm:$0xff] %v1039_v52 }
 0x13b   : > { %v954_v54 = vpop.f32.mrf.mxu2  ;;  %v858_v57 = vpop.f32.mrf.mxu0 }
 0x13c   : > { %v1003_v55 = vpop.f32.mrf.mxu3  ;;  %v955_v56 = vadd.f32 %v954_v54, %v906_v53  ;;  %v907_v58 = vpop.f32.mrf.mxu1 }
 0x13d   : > { %v908_v62 = vadd.f32 %v907_v58, %v858_v57  ;;  %v387_v58 = vld [vmem:[#allocation2 + $0x20] sm:$0xff] }
 0x13e   : > { %v1004_v60 = vadd.f32 %v1003_v55, %v955_v56 }
 0x140   : > { %v1040_v61 = vadd.f32 %v1004_v60, %v380_v59 }
 0x142   : > { %1056 = vst [vmem:[#allocation2 + $0x58] sm:$0xff] %v1040_v61 }
 0x143   : > { %v956_v63 = vpop.f32.mrf.mxu2  ;;  %v861_v2 = vpop.f32.mrf.mxu0 }
 0x144   : > { %v1005_v0 = vpop.f32.mrf.mxu3  ;;  %v957_v1 = vadd.f32 %v956_v63, %v908_v62  ;;  %v910_v3 = vpop.f32.mrf.mxu1 }
 0x145   : > { %v911_v7 = vadd.f32 %v910_v3, %v861_v2  ;;  %v388_v3 = vld [vmem:[#allocation2 + $0x10] sm:$0xff] }
 0x146   : > { %v1006_v5 = vadd.f32 %v1005_v0, %v957_v1 }
 0x148   : > { %v1041_v6 = vadd.f32 %v1006_v5, %v381_v4 }
 0x14a   : > { %1057 = vst [vmem:[#allocation2 + $0x18] sm:$0xff] %v1041_v6 }
 0x14b   : > { %v959_v8 = vpop.f32.mrf.mxu2  ;;  %v863_v11 = vpop.f32.mrf.mxu0 }
 0x14c   : > { %v1008_v9 = vpop.f32.mrf.mxu3  ;;  %v960_v10 = vadd.f32 %v959_v8, %v911_v7  ;;  %v912_v12 = vpop.f32.mrf.mxu1 }
 0x14d   : > { %v913_v16 = vadd.f32 %v912_v12, %v863_v11  ;;  %v389_v12 = vld [vmem:[#allocation2 + $0x38] sm:$0xff] }
 0x14e   : > { %v1009_v14 = vadd.f32 %v1008_v9, %v960_v10 }
 0x150   : > { %v1042_v15 = vadd.f32 %v1009_v14, %v382_v13 }
 0x152   : > { %1058 = vst [vmem:[#allocation2 + $0x50] sm:$0xff] %v1042_v15 }
 0x153   : > { %v961_v17 = vpop.f32.mrf.mxu2  ;;  %v866_v20 = vpop.f32.mrf.mxu0 }
 0x154   : > { %v1010_v18 = vpop.f32.mrf.mxu3  ;;  %v962_v19 = vadd.f32 %v961_v17, %v913_v16  ;;  %v915_v21 = vpop.f32.mrf.mxu1 }
 0x155   : > { %v916_v25 = vadd.f32 %v915_v21, %v866_v20  ;;  %v390_v21 = vld [vmem:[#allocation2 + $0x60] sm:$0xff] }
 0x156   : > { %v1011_v23 = vadd.f32 %v1010_v18, %v962_v19 }
 0x158   : > { %v1043_v24 = vadd.f32 %v1011_v23, %v383_v22 }
 0x15a   : > { %1059 = vst [vmem:[#allocation2 + $0x68] sm:$0xff] %v1043_v24 }
 0x15b   : > { %v964_v26 = vpop.f32.mrf.mxu2  ;;  %v868_v29 = vpop.f32.mrf.mxu0 }
 0x15c   : > { %v1013_v27 = vpop.f32.mrf.mxu3  ;;  %v965_v28 = vadd.f32 %v964_v26, %v916_v25  ;;  %v917_v30 = vpop.f32.mrf.mxu1 }
 0x15d   : > { %v918_v34 = vadd.f32 %v917_v30, %v868_v29 }
 0x15e   : > { %v1014_v32 = vadd.f32 %v1013_v27, %v965_v28  ;;  %v391_v28 = vld [vmem:[#allocation2 + $0x70] sm:$0xff] }
 0x160   : > { %v1044_v33 = vadd.f32 %v1014_v32, %v384_v31 }
 0x162   : > { %1060 = vst [vmem:[#allocation2 + $0x8] sm:$0xff] %v1044_v33 }
 0x163   : > { %v966_v35 = vpop.f32.mrf.mxu2  ;;  %v871_v38 = vpop.f32.mrf.mxu0 }
 0x164   : > { %v1015_v36 = vpop.f32.mrf.mxu3  ;;  %v967_v37 = vadd.f32 %v966_v35, %v918_v34  ;;  %v920_v39 = vpop.f32.mrf.mxu1 }
 0x165   : > { %v921_v43 = vadd.f32 %v920_v39, %v871_v38 }
 0x166   : > { %v1016_v41 = vadd.f32 %v1015_v36, %v967_v37  ;;  %v392_v37 = vld [vmem:[#allocation2 + $0x78] sm:$0xff] }
 0x168   : > { %v1045_v42 = vadd.f32 %v1016_v41, %v385_v40 }
 0x16a   : > { %1061 = vst [vmem:[#allocation2 + $0x48] sm:$0xff] %v1045_v42 }
 0x16b   : > { %v969_v44 = vpop.f32.mrf.mxu2  ;;  %v873_v47 = vpop.f32.mrf.mxu0 }
 0x16c   : > { %v1018_v45 = vpop.f32.mrf.mxu3  ;;  %v970_v46 = vadd.f32 %v969_v44, %v921_v43  ;;  %v922_v48 = vpop.f32.mrf.mxu1 }
 0x16d   : > { %v923_v52 = vadd.f32 %v922_v48, %v873_v47 }
 0x16e   : > { %v1019_v50 = vadd.f32 %v1018_v45, %v970_v46  ;;  %v393_v45 = vld [vmem:[#allocation2 + $0x28] sm:$0xff] }
 0x170   : > { %v1046_v51 = vadd.f32 %v1019_v50, %v386_v49 }
 0x172   : > { %1062 = vst [vmem:[#allocation2 + $0x40] sm:$0xff] %v1046_v51 }
 0x173   : > { %v971_v53 = vpop.f32.mrf.mxu2  ;;  %v876_v56 = vpop.f32.mrf.mxu0 }
 0x174   : > { %v1020_v54 = vpop.f32.mrf.mxu3  ;;  %v972_v55 = vadd.f32 %v971_v53, %v923_v52  ;;  %v925_v57 = vpop.f32.mrf.mxu1 }
 0x175   : > { %v926_v61 = vadd.f32 %v925_v57, %v876_v56 }
 0x176   : > { %v1021_v59 = vadd.f32 %v1020_v54, %v972_v55 }
 0x178   : > { %v1047_v60 = vadd.f32 %v1021_v59, %v387_v58 }
 0x17a   : > { %1063 = vst [vmem:[#allocation2 + $0x20] sm:$0xff] %v1047_v60 }
 0x17b   : > { %v974_v62 = vpop.f32.mrf.mxu2  ;;  %v878_v1 = vpop.f32.mrf.mxu0 }
 0x17c   : > { %v1023_v63 = vpop.f32.mrf.mxu3  ;;  %v975_v0 = vadd.f32 %v974_v62, %v926_v61  ;;  %v927_v2 = vpop.f32.mrf.mxu1 }
 0x17d   : > { %v928_v6 = vadd.f32 %v927_v2, %v878_v1 }
 0x17e   : > { %v1024_v4 = vadd.f32 %v1023_v63, %v975_v0 }
 0x180   : > { %v1048_v5 = vadd.f32 %v1024_v4, %v388_v3 }
 0x182   : > { %1064 = vst [vmem:[#allocation2 + $0x10] sm:$0xff] %v1048_v5 }
 0x183   : > { %v976_v7 = vpop.f32.mrf.mxu2  ;;  %v881_v10 = vpop.f32.mrf.mxu0 }
 0x184   : > { %v1025_v8 = vpop.f32.mrf.mxu3  ;;  %v977_v9 = vadd.f32 %v976_v7, %v928_v6  ;;  %v930_v11 = vpop.f32.mrf.mxu1 }
 0x185   : > { %v931_v15 = vadd.f32 %v930_v11, %v881_v10 }
 0x186   : > { %v1026_v13 = vadd.f32 %v1025_v8, %v977_v9 }
 0x188   : > { %v1049_v14 = vadd.f32 %v1026_v13, %v389_v12 }
 0x18a   : > { %1065 = vst [vmem:[#allocation2 + $0x38] sm:$0xff] %v1049_v14 }
 0x18b   : > { %v979_v16 = vpop.f32.mrf.mxu2  ;;  %v883_v19 = vpop.f32.mrf.mxu0 }
 0x18c   : > { %v1028_v17 = vpop.f32.mrf.mxu3  ;;  %v980_v18 = vadd.f32 %v979_v16, %v931_v15  ;;  %v932_v20 = vpop.f32.mrf.mxu1 }
 0x18d   : > { %v933_v24 = vadd.f32 %v932_v20, %v883_v19 }
 0x18e   : > { %v1029_v22 = vadd.f32 %v1028_v17, %v980_v18 }
 0x190   : > { %v1050_v23 = vadd.f32 %v1029_v22, %v390_v21 }
 0x192   : > { %1066 = vst [vmem:[#allocation2 + $0x60] sm:$0xff] %v1050_v23 }
 0x193   : > { %v981_v25 = vpop.f32.mrf.mxu2  ;;  %v886_v29 = vpop.f32.mrf.mxu0 }
 0x194   : > { %v1030_v26 = vpop.f32.mrf.mxu3  ;;  %v982_v27 = vadd.f32 %v981_v25, %v933_v24  ;;  %v935_v30 = vpop.f32.mrf.mxu1 }
 0x195   : > { %v936_v33 = vadd.f32 %v935_v30, %v886_v29 }
 0x196   : > { %v1031_v31 = vadd.f32 %v1030_v26, %v982_v27 }
 0x198   : > { %v1051_v32 = vadd.f32 %v1031_v31, %v391_v28 }
 0x19a   : > { %1067 = vst [vmem:[#allocation2 + $0x70] sm:$0xff] %v1051_v32 }
 0x19b   : > { %v984_v34 = vpop.f32.mrf.mxu2  ;;  %v888_v39 = vpop.f32.mrf.mxu0 }
 0x19c   : > { %v1033_v35 = vpop.f32.mrf.mxu3  ;;  %v985_v36 = vadd.f32 %v984_v34, %v936_v33  ;;  %v937_v40 = vpop.f32.mrf.mxu1 }
 0x19d   : > { %v938_v42 = vadd.f32 %v937_v40, %v888_v39 }
 0x19e   : > { %v1034_v38 = vadd.f32 %v1033_v35, %v985_v36 }
 0x1a0   : > { %v1052_v41 = vadd.f32 %v1034_v38, %v392_v37 }
 0x1a2   : > { %1068 = vst [vmem:[#allocation2 + $0x78] sm:$0xff] %v1052_v41 }
 0x1a3   : > { %v986_v43 = vpop.f32.mrf.mxu2 }
 0x1a4   : > { %v987_v44 = vadd.f32 %v986_v43, %v938_v42  ;;  %v1035_v46 = vpop.f32.mrf.mxu3 }
 0x1a6   : > { %v1036_v47 = vadd.f32 %v1035_v46, %v987_v44  ;;  %1073 = sbr.rel (%p1663_p10) target bundleno = 443 (0x1bb), region = 71 }
 0x1a8   : > { %v1053_v48 = vadd.f32 %v1036_v47, %v393_v45 }
 0x1aa   : > { %1069 = vst [vmem:[#allocation2 + $0x28] sm:$0xff] %v1053_v48 }
 0x1ab   : > { %v1074_v49 = vld [vmem:[#allocation2 + $0x30] sm:$0xff]  ;;  %v1075_v50 = vld [vmem:[#allocation2] sm:$0xff]  ;;  %v1076_v52 = vld [vmem:[#allocation2 + $0x58] sm:$0xff] }
 0x1ac   : > { %v1893_v51 = vld [vmem:[%s323_s28] ss:$0 sm:$0xff]  ;;  %v1077_v53 = vld [vmem:[#allocation2 + $0x18] sm:$0xff]  ;;  %v1078_v54 = vld [vmem:[#allocation2 + $0x50] sm:$0xff] }
 0x1ad   : > { %v1079_v55 = vld [vmem:[#allocation2 + $0x68] sm:$0xff]  ;;  %v1094_v57 = vadd.f32 %v1893_v51, %v1074_v49  ;;  %v1095_v58 = vadd.f32 %v1893_v51, %v1075_v50  ;;  %v1096_v59 = vadd.f32 %v1893_v51, %v1076_v52  ;;  %v1097_v60 = vadd.f32 %v1893_v51, %v1077_v53  ;;  %v1082_v2 = vld [vmem:[#allocation2 + $0x40] sm:$0xff]  ;;  %v1084_v8 = vld [vmem:[#allocation2 + $0x10] sm:$0xff] }
 0x1ae   : > { %v1080_v56 = vld [vmem:[#allocation2 + $0x8] sm:$0xff]  ;;  %v1098_v62 = vadd.f32 %v1893_v51, %v1078_v54  ;;  %v1099_v63 = vadd.f32 %v1893_v51, %v1079_v55  ;;  %v1083_v3 = vld [vmem:[#allocation2 + $0x20] sm:$0xff]  ;;  %v1085_v9 = vld [vmem:[#allocation2 + $0x38] sm:$0xff]  ;;  %v1102_v18 = vadd.f32 %v1893_v51, %v1082_v2  ;;  %v1104_v24 = vadd.f32 %v1893_v51, %v1084_v8 }
 0x1af   : > { %v1081_v61 = vld [vmem:[#allocation2 + $0x48] sm:$0xff]  ;;  %v1100_v0 = vadd.f32 %v1893_v51, %v1080_v56  ;;  %v1110_v4 = vmax.f32 %v1094_v57, 0.0  ;;  %v1111_v5 = vmax.f32 %v1095_v58, 0.0  ;;  %v1112_v6 = vmax.f32 %v1096_v59, 0.0  ;;  %v1086_v14 = vld [vmem:[#allocation2 + $0x60] sm:$0xff]  ;;  %v1087_v15 = vld [vmem:[#allocation2 + $0x70] sm:$0xff] }
 0x1b0   : > { %v1101_v1 = vadd.f32 %v1893_v51, %v1081_v61  ;;  %v1113_v7 = vmax.f32 %v1097_v60, 0.0  ;;  %v1114_v10 = vmax.f32 %v1098_v62, 0.0  ;;  %v1115_v11 = vmax.f32 %v1099_v63, 0.0  ;;  %v1088_v20 = vld [vmem:[#allocation2 + $0x78] sm:$0xff] }
 0x1b1   : > { %v1116_v12 = vmax.f32 %v1100_v0, 0.0  ;;  %v1737_v16 = vpack.c.bf16 %v1111_v5, %v1110_v4  ;;  %v1103_v19 = vadd.f32 %v1893_v51, %v1083_v3  ;;  %v1089_v21 = vld [vmem:[#allocation2 + $0x28] sm:$0xff]  ;;  %v1105_v25 = vadd.f32 %v1893_v51, %v1085_v9 }
 0x1b2   : > { %v1117_v13 = vmax.f32 %v1101_v1, 0.0  ;;  %v1742_v17 = vpack.c.bf16 %v1113_v7, %v1112_v6  ;;  %v1747_v22 = vpack.c.bf16 %v1115_v11, %v1114_v10  ;;  %v1118_v26 = vmax.f32 %v1102_v18, 0.0 }
 0x1b3   : > { %1738 = vst [vmem:[%s2333_s4] sm:$0xff] %v1737_v16   ;;  %v1119_v27 = vmax.f32 %v1103_v19, 0.0  ;;  %v1106_v28 = vadd.f32 %v1893_v51, %v1086_v14  ;;  %v1107_v29 = vadd.f32 %v1893_v51, %v1087_v15  ;;  %v1120_v30 = vmax.f32 %v1104_v24, 0.0 }
 0x1b4   : > { %v1752_v23 = vpack.c.bf16 %v1117_v13, %v1116_v12  ;;  %1774 = vst [vmem:[%s2333_s4 + $0x8] sm:$0xff] %v1742_v17   ;;  %v1121_v31 = vmax.f32 %v1105_v25, 0.0  ;;  %v1108_v32 = vadd.f32 %v1893_v51, %v1088_v20  ;;  %v1109_v33 = vadd.f32 %v1893_v51, %v1089_v21 }
 0x1b5   : > { %1775 = vst [vmem:[%s2333_s4 + $0x10] sm:$0xff] %v1747_v22   ;;  %v1757_v34 = vpack.c.bf16 %v1119_v27, %v1118_v26  ;;  %v1122_v35 = vmax.f32 %v1106_v28, 0.0  ;;  %v1123_v36 = vmax.f32 %v1107_v29, 0.0 }
 0x1b6   : > { %1776 = vst [vmem:[%s2333_s4 + $0x18] sm:$0xff] %v1752_v23   ;;  %v1762_v37 = vpack.c.bf16 %v1121_v31, %v1120_v30  ;;  %v1124_v38 = vmax.f32 %v1108_v32, 0.0  ;;  %v1125_v39 = vmax.f32 %v1109_v33, 0.0 }
 0x1b7   : > { %1777 = vst [vmem:[%s2333_s4 + $0x20] sm:$0xff] %v1757_v34   ;;  %v1767_v40 = vpack.c.bf16 %v1123_v36, %v1122_v35 }
 0x1b8   : > { %1778 = vst [vmem:[%s2333_s4 + $0x28] sm:$0xff] %v1762_v37   ;;  %v1772_v41 = vpack.c.bf16 %v1125_v39, %v1124_v38 }
 0x1b9   : > { %1779 = vst [vmem:[%s2333_s4 + $0x30] sm:$0xff] %v1767_v40  }
 0x1ba   : > { %1780 = vst [vmem:[%s2333_s4 + $0x38] sm:$0xff] %v1772_v41  }
 0x1bb PF: > { %1164 = sbr.rel (!%p2216_p6) target bundleno = 467 (0x1d3), region = 75  ;;  %s2540_s10 = sld [smem:[#allocation13_spill]] (%p2216_p6)  ;;  %v1186_v42 = vld [vmem:[%s2333_s4] sm:$0xf] (%p2216_p6)  ;;  %v1188_v43 = vld [vmem:[%s2333_s4 + $0x4] sm:$0xf] (%p2216_p6) }
 0x1bc   : > { %s2541_s27 = sld [smem:[#allocation22_spill]] (%p2216_p6)  ;;  %v1190_v44 = vld [vmem:[%s2333_s4 + $0x8] sm:$0xf] (%p2216_p6)  ;;  %v1192_v45 = vld [vmem:[%s2333_s4 + $0xc] sm:$0xf] (%p2216_p6) }
 0x1bd   : > { %v1194_v46 = vld [vmem:[%s2333_s4 + $0x10] sm:$0xf] (%p2216_p6)  ;;  %v1196_v47 = vld [vmem:[%s2333_s4 + $0x14] sm:$0xf] (%p2216_p6)  ;;  %v1198_v48 = vld [vmem:[%s2333_s4 + $0x18] sm:$0xf] (%p2216_p6) }
 0x1be   : > { %v1200_v49 = vld [vmem:[%s2333_s4 + $0x1c] sm:$0xf] (%p2216_p6)  ;;  %v1202_v50 = vld [vmem:[%s2333_s4 + $0x20] sm:$0xf] (%p2216_p6)  ;;  %v1204_v51 = vld [vmem:[%s2333_s4 + $0x24] sm:$0xf] (%p2216_p6) }
 0x1bf   : > { %v1206_v52 = vld [vmem:[%s2333_s4 + $0x28] sm:$0xf] (%p2216_p6)  ;;  %v1208_v53 = vld [vmem:[%s2333_s4 + $0x2c] sm:$0xf] (%p2216_p6) }
 0x1c0   : > { %v1210_v54 = vld [vmem:[%s2333_s4 + $0x30] sm:$0xf]  ;;  %v1212_v55 = vld [vmem:[%s2333_s4 + $0x34] sm:$0xf] }
 0x1c1   : > { %s1665_s29 = sshll.u32 %s2540_s10, 2  ;;  %v1214_v56 = vld [vmem:[%s2333_s4 + $0x38] sm:$0xf]  ;;  %v1216_v57 = vld [vmem:[%s2333_s4 + $0x3c] sm:$0xf] }
 0x1c2   : > { %s1169_s30 = scalar_lea.vmem %s2541_s27, %s1665_s29 }
 0x1c3   : > { %1187 = vst [vmem:[%s1169_s30] sm:$0xf] %v1186_v42 }
 0x1c4   : > { %1189 = vst [vmem:[%s1169_s30 + $0x8] sm:$0xf] %v1188_v43 }
 0x1c5   : > { %1191 = vst [vmem:[%s1169_s30 + $0x10] sm:$0xf] %v1190_v44 }
 0x1c6   : > { %1193 = vst [vmem:[%s1169_s30 + $0x18] sm:$0xf] %v1192_v45 }
 0x1c7   : > { %1195 = vst [vmem:[%s1169_s30 + $0x20] sm:$0xf] %v1194_v46 }
 0x1c8   : > { %1197 = vst [vmem:[%s1169_s30 + $0x28] sm:$0xf] %v1196_v47 }
 0x1c9   : > { %1199 = vst [vmem:[%s1169_s30 + $0x30] sm:$0xf] %v1198_v48 }
 0x1ca   : > { %1201 = vst [vmem:[%s1169_s30 + $0x38] sm:$0xf] %v1200_v49 }
 0x1cb   : > { %1203 = vst [vmem:[%s1169_s30 + $0x40] sm:$0xf] %v1202_v50 }
 0x1cc   : > { %1205 = vst [vmem:[%s1169_s30 + $0x48] sm:$0xf] %v1204_v51 }
 0x1cd   : > { %1207 = vst [vmem:[%s1169_s30 + $0x50] sm:$0xf] %v1206_v52 }
 0x1ce   : > { %1209 = vst [vmem:[%s1169_s30 + $0x58] sm:$0xf] %v1208_v53 }
 0x1cf   : > { %1211 = vst [vmem:[%s1169_s30 + $0x60] sm:$0xf] %v1210_v54 }
 0x1d0   : > { %1213 = vst [vmem:[%s1169_s30 + $0x68] sm:$0xf] %v1212_v55 }
 0x1d1   : > { %1215 = vst [vmem:[%s1169_s30 + $0x70] sm:$0xf] %v1214_v56 }
 0x1d2   : > { %1217 = vst [vmem:[%s1169_s30 + $0x78] sm:$0xf] %v1216_v57 }
 0x1d3 PF: > { %s19_s24 = sadd.s32 1, %s2060_s24   ;;  %s2543_s6 = sld [smem:[#allocation19_spill]] }
 0x1d4   : > { %p2466_p11 = scmp.ge.s32.totalorder %s19_s24, 8   ;;  %s2544_s0 = sld [smem:[#allocation11_spill]] }
 0x1d5   : > { %s2545_s17 = sld [smem:[#allocation18_spill]]  ;;  %s2551_s12 = smov %s2016_s13 }
 0x1d6   : > { %s2546_s18 = sld [smem:[#allocation12_spill]]  ;;  %s2552_s13 = smov %s2020_s14 }
 0x1d7   : > { %s2547_s19 = sld [smem:[#allocation17_spill]]  ;;  %s2554_s15 = smov %s2028_s16 }
 0x1d8   : > { %s2548_s20 = sld [smem:[#allocation14_spill]]  ;;  %s2556_s21 = smov %s2056_s23 }
 0x1d9   : > { %s2549_s22 = sld [smem:[#allocation15_spill]]  ;;  %s2553_s14 = smov %s2543_s6 }
 0x1da   : > { %s2550_s7 = sld [smem:[#allocation16_spill]]  ;;  %s2555_s16 = smov %s2544_s0 }
 0x1dc   :  { %18 = sbr.rel (!%p2466_p11) target bundleno = 13 (0xd), region = 165 }
 0x1e0   : > { %s2557_s23 = smov %s2550_s7 }
 0x1e1   :  { %1283 = vsyncpa [#allocation5], 1 }
 0x1e2   :  { %1285 = vsyncpa [#allocation5 + $0x1], 1 }
 0x1e3   :  { %1286 = vsyncpa [#allocation7], 1 }
 0x1e4   :  { %1288 = vsyncpa [#allocation7 + $0x1], 1 }

// kernel: _lambda_.16
= control target key start
LH: loop header
LB: loop body
LE: loop exit
PB: predicated region body
PF: predicated region fallthrough
CT: control target
= control target key end

     0   :  { %s2757_s12 = smov 0   ;;  %s2759_s13 = smov 0   ;;  %s3234_s0 = inlined_call_operand.vmem [shape: bf16[512,576], index: 0, kind: input, shape index: {}]   ;;  %s3235_s1 = inlined_call_operand.vmem [shape: bf16[576,128], index: 1, kind: input, shape index: {}]   ;;  %s3236_s2 = inlined_call_operand.vmem [shape: f32[1,128], index: 2, kind: input, shape index: {}]   ;;  %s3237_s3 = inlined_call_operand.vmem [shape: bf16[512,128], index: 3, kind: output, shape index: {}]  }
   0x1   :  { %s2761_s14 = smov 0  }
   0x2 LB: > { %s32_s15 = sadd.s32 1, %s2731_s13  ;;  %p1965_p0 = scmp.ge.s32.totalorder %s2735_s14, 1  ;;  %s2735_s14 = sphi %s2761_s14, %s13_s14   ;;  %s2731_s13 = sphi %s2759_s13, %s3239_s13   ;;  %s2727_s12 = sphi %s2757_s12, %s3238_s12  }
   0x3   : > { %p34_p1 = scmp.ge.s32.totalorder %s32_s15, 2  ;;  %p191_p2 = scmp.lt.s32.totalorder %s2735_s14, 3 }
   0x5   : > { %s3241_s15 = smov (%p34_p1, %s32_s15), 0  ;;  %p192_p3 = pnand %p1965_p0, %p191_p2 }
   0x6   : > { %s1966_s22 = sshll.u32 (!%p192_p3), %s2727_s12, 5 }
   0x7   : > { %195 = sbr.rel (%p192_p3) target bundleno = 501 (0x1f5), region = 32  ;;  %p236_p4 = scmp.lt.s32.totalorder (!%p192_p3), %s1966_s22, 63 }
   0xc   : > { %v2539_v0 = vld [vmem:[%s3235_s1 + $0x38] sm:$0xff]  ;;  %v2538_v1 = vld [vmem:[%s3235_s1 + $0x30] sm:$0xff]  ;;  %v2537_v2 = vld [vmem:[%s3235_s1 + $0x28] sm:$0xff]  ;;  %s3243_s22 = smov (!%p236_p4, %s1966_s22), 63  ;;  %vm1120_vm0 = vcmask 523264  }
   0xd   : > { %2663 = vmatpush.bf16.msra.mxu1 %v2539_v0  ;;  %2664 = vmatpush.bf16.msra.mxu2 %v2539_v0  ;;  %v2536_v3 = vld [vmem:[%s3235_s1 + $0x20] sm:$0xff]  ;;  %v2535_v4 = vld [vmem:[%s3235_s1 + $0x18] sm:$0xff]  ;;  %v2534_v5 = vld [vmem:[%s3235_s1 + $0x10] sm:$0xff]  ;;  %s2687_s29 = smul.u32 20, %s3243_s22  ;;  %s1969_s28 = sshll.u32 %s3243_s22, 2 }
   0xe   : > { %2665 = vmatpush.bf16.msra.mxu3 %v2539_v0  ;;  %1169 = vmatpush.bf16.msra.mxu0 %v2539_v0  ;;  %v2533_v6 = vld [vmem:[%s3235_s1 + $0x8] sm:$0xff]  ;;  %v2532_v7 = vld [vmem:[%s3235_s1] sm:$0xff]  ;;  %v2555_v16 = vld [vmem:[%s3235_s1 + $0xb8] sm:$0xff]  ;;  %s3094_s4 = scalar_lea.vmem %s3237_s3, %s1969_s28 }
   0xf   : > { %s2805_s7 = scalar_lea.vmem %s3234_s0, %s2687_s29  ;;  %v2563_v17 = vld [vmem:[%s3235_s1 + $0xf8] sm:$0xff]  ;;  %v2554_v24 = vld [vmem:[%s3235_s1 + $0xb0] sm:$0xff]  ;;  %v2553_v28 = vld [vmem:[%s3235_s1 + $0xa8] sm:$0xff] }
  0x10   : > { %v2052_v8 = vld [vmem:[%s2805_s7 + $0xa0] sm:$0xf]  ;;  %v2474_v9 = vld [vmem:[%s2805_s7 + $0xb0] sm:$0xf0]  ;;  %v2547_v22 = vld [vmem:[%s3235_s1 + $0x78] sm:$0xff] }
  0x11   : > { %2666 = vmatpush.bf16.msra.mxu1 %v2538_v1  ;;  %2667 = vmatpush.bf16.msra.mxu2 %v2538_v1  ;;  %v2132_v10 = vld [vmem:[%s2805_s7 + $0x140] sm:$0xf]  ;;  %v2494_v11 = vld [vmem:[%s2805_s7 + $0x150] sm:$0xf0]  ;;  %v2053_v18 = vor.u32 %v2474_v9, %v2052_v8  ;;  %v2567_v23 = vld [vmem:[%s3235_s1 + $0x118] sm:$0xff] }
  0x12   : > { %2668 = vmatpush.bf16.msra.mxu3 %v2538_v1  ;;  %1170 = vmatpush.bf16.msra.mxu0 %v2538_v1  ;;  %v2212_v12 = vld [vmem:[%s2805_s7 + $0x1e0] sm:$0xf]  ;;  %v2514_v13 = vld [vmem:[%s2805_s7 + $0x1f0] sm:$0xf0]  ;;  %v2133_v19 = vor.u32 %v2494_v11, %v2132_v10  ;;  %v2561_v29 = vld [vmem:[%s3235_s1 + $0xe8] sm:$0xff] }
  0x13   : > { %v1972_v14 = vld [vmem:[%s2805_s7] sm:$0xf]  ;;  %v2454_v15 = vld [vmem:[%s2805_s7 + $0x10] sm:$0xf0]  ;;  %v2213_v20 = vor.u32 %v2514_v13, %v2212_v12  ;;  %v2545_v30 = vld [vmem:[%s3235_s1 + $0x68] sm:$0xff] }
  0x14   : > { %v1973_v21 = vor.u32 %v2454_v15, %v1972_v14  ;;  %v2562_v25 = vld [vmem:[%s3235_s1 + $0xf0] sm:$0xff]  ;;  %v2565_v31 = vld [vmem:[%s3235_s1 + $0x108] sm:$0xff]  ;;  %v2552_v32 = vld [vmem:[%s3235_s1 + $0xa0] sm:$0xff] }
  0x15   : > { %2669 = vmatpush.bf16.msra.mxu1 %v2537_v2  ;;  %2670 = vmatpush.bf16.msra.mxu2 %v2537_v2  ;;  %v2546_v26 = vld [vmem:[%s3235_s1 + $0x70] sm:$0xff]  ;;  %v2560_v33 = vld [vmem:[%s3235_s1 + $0xe0] sm:$0xff]  ;;  %v2072_v34 = vld [vmem:[%s2805_s7 + $0xc8] sm:$0xf] }
  0x16   : > { %2671 = vmatpush.bf16.msra.mxu3 %v2537_v2  ;;  %1171 = vmatpush.bf16.msra.mxu0 %v2537_v2  ;;  %v2566_v27 = vld [vmem:[%s3235_s1 + $0x110] sm:$0xff]  ;;  %v2479_v35 = vld [vmem:[%s2805_s7 + $0xd8] sm:$0xf0]  ;;  %v2152_v36 = vld [vmem:[%s2805_s7 + $0x168] sm:$0xf] }
  0x17   : > { %v2499_v37 = vld [vmem:[%s2805_s7 + $0x178] sm:$0xf0]  ;;  %v2232_v38 = vld [vmem:[%s2805_s7 + $0x208] sm:$0xf]  ;;  %v2544_v42 = vld [vmem:[%s3235_s1 + $0x60] sm:$0xff]  ;;  %v2073_v45 = vor.u32 %v2479_v35, %v2072_v34 }
  0x18   : > { %v2519_v39 = vld [vmem:[%s2805_s7 + $0x218] sm:$0xf0]  ;;  %v1992_v40 = vld [vmem:[%s2805_s7 + $0x28] sm:$0xf]  ;;  %v2153_v46 = vor.u32 %v2499_v37, %v2152_v36  ;;  %v2550_v50 = vld [vmem:[%s3235_s1 + $0x90] sm:$0xff] }
  0x19   : > { %2672 = vmatpush.bf16.msra.mxu1 %v2536_v3  ;;  %2673 = vmatpush.bf16.msra.mxu2 %v2536_v3  ;;  %v2459_v41 = vld [vmem:[%s2805_s7 + $0x38] sm:$0xf0]  ;;  %v2233_v47 = vor.u32 %v2519_v39, %v2232_v38  ;;  %v2558_v51 = vld [vmem:[%s3235_s1 + $0xd0] sm:$0xff]  ;;  %v2564_v53 = vld [vmem:[%s3235_s1 + $0x100] sm:$0xff] }
  0x1a   : > { %2674 = vmatpush.bf16.msra.mxu3 %v2536_v3  ;;  %1172 = vmatpush.bf16.msra.mxu0 %v2536_v3  ;;  %v2551_v43 = vld [vmem:[%s3235_s1 + $0x98] sm:$0xff]  ;;  %v1993_v48 = vor.u32 %v2459_v41, %v1992_v40  ;;  %v2542_v52 = vld [vmem:[%s3235_s1 + $0x50] sm:$0xff]  ;;  %v2549_v54 = vld [vmem:[%s3235_s1 + $0x88] sm:$0xff] }
  0x1b   : > { %v2559_v44 = vld [vmem:[%s3235_s1 + $0xd8] sm:$0xff]  ;;  %v2557_v55 = vld [vmem:[%s3235_s1 + $0xc8] sm:$0xff]  ;;  %v2548_v57 = vld [vmem:[%s3235_s1 + $0x80] sm:$0xff] }
  0x1c   : > { %v2543_v49 = vld [vmem:[%s3235_s1 + $0x58] sm:$0xff]  ;;  %v2541_v56 = vld [vmem:[%s3235_s1 + $0x48] sm:$0xff]  ;;  %v2556_v58 = vld [vmem:[%s3235_s1 + $0xc0] sm:$0xff] }
  0x1d   : > { %2675 = vmatpush.bf16.msra.mxu1 %v2535_v4  ;;  %2676 = vmatpush.bf16.msra.mxu2 %v2535_v4  ;;  %v2092_v59 = vld [vmem:[%s2805_s7 + $0xf0] sm:$0xf]  ;;  %v2484_v60 = vld [vmem:[%s2805_s7 + $0x100] sm:$0xf0]  ;;  %v2112_v8 = vld [vmem:[%s2805_s7 + $0x118] sm:$0xf] }
  0x1e   : > { %2677 = vmatpush.bf16.msra.mxu3 %v2535_v4  ;;  %1173 = vmatpush.bf16.msra.mxu0 %v2535_v4  ;;  %v2172_v61 = vld [vmem:[%s2805_s7 + $0x190] sm:$0xf]  ;;  %v2504_v62 = vld [vmem:[%s2805_s7 + $0x1a0] sm:$0xf0]  ;;  %v2093_v4 = vor.u32 %v2484_v60, %v2092_v59  ;;  %v2489_v9 = vld [vmem:[%s2805_s7 + $0x128] sm:$0xf0] }
  0x1f   : > { %v2252_v63 = vld [vmem:[%s2805_s7 + $0x230] sm:$0xf]  ;;  %v2524_v0 = vld [vmem:[%s2805_s7 + $0x240] sm:$0xf0]  ;;  %v2192_v10 = vld [vmem:[%s2805_s7 + $0x1b8] sm:$0xf] }
  0x20   : > { %v2012_v1 = vld [vmem:[%s2805_s7 + $0x50] sm:$0xf]  ;;  %v2464_v2 = vld [vmem:[%s2805_s7 + $0x60] sm:$0xf0]  ;;  %v2509_v11 = vld [vmem:[%s2805_s7 + $0x1c8] sm:$0xf0] }
  0x21   : > { %2678 = vmatpush.bf16.msra.mxu1 %v2534_v5  ;;  %2679 = vmatpush.bf16.msra.mxu2 %v2534_v5  ;;  %v2540_v3 = vld [vmem:[%s3235_s1 + $0x40] sm:$0xff]  ;;  %v2272_v12 = vld [vmem:[%s2805_s7 + $0x258] sm:$0xf]  ;;  %v2529_v13 = vld [vmem:[%s2805_s7 + $0x268] sm:$0xf0] }
  0x22   : > { %2680 = vmatpush.bf16.msra.mxu3 %v2534_v5  ;;  %1174 = vmatpush.bf16.msra.mxu0 %v2534_v5  ;;  %v2173_v5 = vor.u32 %v2504_v62, %v2172_v61  ;;  %v2032_v14 = vld [vmem:[%s2805_s7 + $0x78] sm:$0xf]  ;;  %v2469_v15 = vld [vmem:[%s2805_s7 + $0x88] sm:$0xf0]  ;;  %v2000_v34 = vld [vmem:[%s2805_s7 + $0x30] sm:$0xf] }
  0x23   : > { %v2460_v35 = vld [vmem:[%s2805_s7 + $0x40] sm:$0xf0]  ;;  %v2458_v36 = vld [vmem:[%s2805_s7 + $0x34] sm:$0xf]  ;;  %v2002_v37 = vld [vmem:[%s2805_s7 + $0x44] sm:$0xf0] }
  0x24   : > { %v2008_v38 = vld [vmem:[%s2805_s7 + $0x38] sm:$0xf]  ;;  %v2461_v39 = vld [vmem:[%s2805_s7 + $0x48] sm:$0xf0]  ;;  %v2001_v41 = vor.u32 %v2460_v35, %v2000_v34  ;;  %v2470_v59 = vld [vmem:[%s2805_s7 + $0x90] sm:$0xf0] }
  0x25   : > { %2681 = vmatpush.bf16.msra.mxu1 %v2533_v6  ;;  %2682 = vmatpush.bf16.msra.mxu2 %v2533_v6  ;;  %v2468_v60 = vld [vmem:[%s2805_s7 + $0x84] sm:$0xf]  ;;  %v2042_v61 = vld [vmem:[%s2805_s7 + $0x94] sm:$0xf0]  ;;  %v2048_v62 = vld [vmem:[%s2805_s7 + $0x88] sm:$0xf] }
  0x26   : > { %2683 = vmatpush.bf16.msra.mxu3 %v2533_v6  ;;  %1175 = vmatpush.bf16.msra.mxu0 %v2533_v6  ;;  %v2253_v6 = vor.u32 %v2524_v0, %v2252_v63  ;;  %v2471_v63 = vld [vmem:[%s2805_s7 + $0x98] sm:$0xf0] }
  0x29   : > { %2684 = vmatpush.bf16.msra.mxu1 %v2532_v7  ;;  %2685 = vmatpush.bf16.msra.mxu2 %v2532_v7 }
  0x2a   : > { %2686 = vmatpush.bf16.msra.mxu3 %v2532_v7  ;;  %1176 = vmatpush.bf16.msra.mxu0 %v2532_v7  ;;  %v2013_v7 = vor.u32 %v2464_v2, %v2012_v1  ;;  %v2045_v2 = vor.u32 %v2468_v60, %v2042_v61 }
  0x2c   : > { %1197 = vmatmul.bf16.vlgmr.msra.gmra.mxu1 %v2053_v18  ;;  %1217 = vmatmul.bf16.vlgmr.msra.gmra.mxu2 %v2133_v19  ;;  %v2273_v18 = vor.u32 %v2529_v13, %v2272_v12  ;;  %v2033_v19 = vor.u32 %v2469_v15, %v2032_v14 }
  0x2d   : > { %1347 = vmatpush.bf16.msrb.mxu2 %v2555_v16  ;;  %1237 = vmatmul.bf16.vlgmr.msra.gmra.mxu3 %v2213_v20  ;;  %v2113_v16 = vor.u32 %v2489_v9, %v2112_v8  ;;  %v2452_v20 = vld [vmem:[%s2805_s7 + $0x4] sm:$0xf]  ;;  %v2473_v8 = vld [vmem:[%s2805_s7 + $0xac] sm:$0xf]  ;;  %v2062_v9 = vld [vmem:[%s2805_s7 + $0xbc] sm:$0xf0] }
  0x2e   : > { %1436 = vmatpush.bf16.msrb.mxu3 %v2563_v17  ;;  %1177 = vmatmul.bf16.vlgmr.msra.gmra.mxu0 %v1973_v21  ;;  %v2193_v17 = vor.u32 %v2509_v11, %v2192_v10  ;;  %v1974_v21 = vld [vmem:[%s2805_s7 + $0x14] sm:$0xf0]  ;;  %v2068_v10 = vld [vmem:[%s2805_s7 + $0xb0] sm:$0xf]  ;;  %v2476_v11 = vld [vmem:[%s2805_s7 + $0xc0] sm:$0xf0]  ;;  %v2065_v15 = vor.u32 %v2473_v8, %v2062_v9 }
  0x2f   : > { %1258 = vmatpush.bf16.msrb.mxu1 %v2547_v22  ;;  %1529 = vmatpush.bf16.msrb.mxu0 %v2567_v23  ;;  %v1980_v22 = vld [vmem:[%s2805_s7 + $0x8] sm:$0xf]  ;;  %v2455_v23 = vld [vmem:[%s2805_s7 + $0x18] sm:$0xf0] }
  0x31   : > { %1348 = vmatpush.bf16.msrb.mxu2 %v2554_v24  ;;  %v2453_v24 = vld [vmem:[%s2805_s7 + $0xc] sm:$0xf] }
  0x32   : > { %1437 = vmatpush.bf16.msrb.mxu3 %v2562_v25  ;;  %v1982_v25 = vld [vmem:[%s2805_s7 + $0x1c] sm:$0xf0] }
  0x33   : > { %1259 = vmatpush.bf16.msrb.mxu1 %v2546_v26  ;;  %1530 = vmatpush.bf16.msrb.mxu0 %v2566_v27  ;;  %v1988_v26 = vld [vmem:[%s2805_s7 + $0x10] sm:$0xf]  ;;  %v2456_v27 = vld [vmem:[%s2805_s7 + $0x20] sm:$0xf0] }
  0x35   : > { %1349 = vmatpush.bf16.msrb.mxu2 %v2553_v28  ;;  %v1977_v28 = vor.u32 %v2452_v20, %v1974_v21 }
  0x36   : > { %1438 = vmatpush.bf16.msrb.mxu3 %v2561_v29  ;;  %v1981_v29 = vor.u32 %v2455_v23, %v1980_v22  ;;  %v2477_v22 = vld [vmem:[%s2805_s7 + $0xcc] sm:$0xf]  ;;  %v2074_v23 = vld [vmem:[%s2805_s7 + $0xdc] sm:$0xf0] }
  0x37   : > { %1260 = vmatpush.bf16.msrb.mxu1 %v2545_v30  ;;  %1531 = vmatpush.bf16.msrb.mxu0 %v2565_v31  ;;  %v1985_v30 = vor.u32 %v2453_v24, %v1982_v25  ;;  %v1989_v31 = vor.u32 %v2456_v27, %v1988_v26  ;;  %v2080_v24 = vld [vmem:[%s2805_s7 + $0xd0] sm:$0xf]  ;;  %v2480_v25 = vld [vmem:[%s2805_s7 + $0xe0] sm:$0xf0]  ;;  %v2478_v26 = vld [vmem:[%s2805_s7 + $0xd4] sm:$0xf] }
  0x38   : > { %v2082_v27 = vld [vmem:[%s2805_s7 + $0xe4] sm:$0xf0] }
  0x39   : > { %1350 = vmatpush.bf16.msrb.mxu2 %v2552_v32  ;;  %v2457_v32 = vld [vmem:[%s2805_s7 + $0x2c] sm:$0xf]  ;;  %v2085_v35 = vor.u32 %v2478_v26, %v2082_v27  ;;  %v2140_v26 = vld [vmem:[%s2805_s7 + $0x148] sm:$0xf]  ;;  %v2495_v27 = vld [vmem:[%s2805_s7 + $0x158] sm:$0xf0] }
  0x3a   : > { %1439 = vmatpush.bf16.msrb.mxu3 %v2560_v33  ;;  %v1994_v33 = vld [vmem:[%s2805_s7 + $0x3c] sm:$0xf0] }
  0x3b   : > { %1261 = vmatpush.bf16.msrb.mxu1 %v2544_v42  ;;  %1532 = vmatpush.bf16.msrb.mxu0 %v2564_v53  ;;  %v1997_v40 = vor.u32 %v2457_v32, %v1994_v33  ;;  %v2005_v42 = vor.u32 %v2458_v36, %v2002_v37  ;;  %v2077_v32 = vor.u32 %v2477_v22, %v2074_v23 }
  0x3c   : > { %1202 = vmatmul.bf16.gmra.mxu1 %v2073_v45  ;;  %1222 = vmatmul.bf16.gmra.mxu2 %v2153_v46  ;;  %v2014_v45 = vld [vmem:[%s2805_s7 + $0x64] sm:$0xf0]  ;;  %v2020_v46 = vld [vmem:[%s2805_s7 + $0x58] sm:$0xf]  ;;  %v2081_v33 = vor.u32 %v2480_v25, %v2080_v24  ;;  %v2492_v24 = vld [vmem:[%s2805_s7 + $0x144] sm:$0xf] }
  0x3d   : > { %1351 = vmatpush.bf16.msrb.mxu2 %v2551_v43  ;;  %1242 = vmatmul.bf16.gmra.mxu3 %v2233_v47  ;;  %v2009_v43 = vor.u32 %v2461_v39, %v2008_v38  ;;  %v2465_v47 = vld [vmem:[%s2805_s7 + $0x68] sm:$0xf0]  ;;  %v2134_v25 = vld [vmem:[%s2805_s7 + $0x154] sm:$0xf0] }
  0x3e   : > { %1440 = vmatpush.bf16.msrb.mxu3 %v2559_v44  ;;  %1182 = vmatmul.bf16.gmra.mxu0 %v1993_v48  ;;  %v2462_v44 = vld [vmem:[%s2805_s7 + $0x54] sm:$0xf]  ;;  %v2463_v48 = vld [vmem:[%s2805_s7 + $0x5c] sm:$0xf]  ;;  %v2021_v53 = vor.u32 %v2465_v47, %v2020_v46  ;;  %v2102_v47 = vld [vmem:[%s2805_s7 + $0x10c] sm:$0xf0] }
  0x3f   : > { %1262 = vmatpush.bf16.msrb.mxu1 %v2543_v49  ;;  %v2022_v49 = vld [vmem:[%s2805_s7 + $0x6c] sm:$0xf0]  ;;  %v2483_v46 = vld [vmem:[%s2805_s7 + $0xfc] sm:$0xf] }
  0x41   : > { %1352 = vmatpush.bf16.msrb.mxu2 %v2550_v50  ;;  %v2028_v50 = vld [vmem:[%s2805_s7 + $0x60] sm:$0xf] }
  0x42   : > { %1441 = vmatpush.bf16.msrb.mxu3 %v2558_v51  ;;  %v2466_v51 = vld [vmem:[%s2805_s7 + $0x70] sm:$0xf0] }
  0x43   : > { %1263 = vmatpush.bf16.msrb.mxu1 %v2542_v52  ;;  %v2017_v52 = vor.u32 %v2462_v44, %v2014_v45  ;;  %v2100_v44 = vld [vmem:[%s2805_s7 + $0xf8] sm:$0xf]  ;;  %v2485_v45 = vld [vmem:[%s2805_s7 + $0x108] sm:$0xf0] }
  0x45   : > { %1353 = vmatpush.bf16.msrb.mxu2 %v2549_v54  ;;  %v2025_v54 = vor.u32 %v2463_v48, %v2022_v49  ;;  %v2108_v48 = vld [vmem:[%s2805_s7 + $0x100] sm:$0xf]  ;;  %v2486_v49 = vld [vmem:[%s2805_s7 + $0x110] sm:$0xf0] }
  0x46   : > { %1442 = vmatpush.bf16.msrb.mxu3 %v2557_v55  ;;  %v2029_v55 = vor.u32 %v2466_v51, %v2028_v50 }
  0x47   : > { %1264 = vmatpush.bf16.msrb.mxu1 %v2541_v56  ;;  %v2467_v56 = vld [vmem:[%s2805_s7 + $0x7c] sm:$0xf] }
  0x49   : > { %1354 = vmatpush.bf16.msrb.mxu2 %v2548_v57  ;;  %v2034_v57 = vld [vmem:[%s2805_s7 + $0x8c] sm:$0xf0] }
  0x4a   : > { %1443 = vmatpush.bf16.msrb.mxu3 %v2556_v58  ;;  %v2040_v58 = vld [vmem:[%s2805_s7 + $0x80] sm:$0xf]  ;;  %v2037_v0 = vor.u32 %v2467_v56, %v2034_v57  ;;  %v2109_v56 = vor.u32 %v2486_v49, %v2108_v48 }
  0x4b   : > { %1265 = vmatpush.bf16.msrb.mxu1 %v2540_v3  ;;  %v2041_v1 = vor.u32 %v2470_v59, %v2040_v58  ;;  %v2049_v3 = vor.u32 %v2471_v63, %v2048_v62  ;;  %v2487_v62 = vld [vmem:[%s2805_s7 + $0x11c] sm:$0xf]  ;;  %v2114_v63 = vld [vmem:[%s2805_s7 + $0x12c] sm:$0xf0] }
  0x4c   : > { %1207 = vmatmul.bf16.gmra.mxu1 %v2093_v4  ;;  %1227 = vmatmul.bf16.gmra.mxu2 %v2173_v5  ;;  %v2472_v4 = vld [vmem:[%s2805_s7 + $0xa4] sm:$0xf]  ;;  %v2054_v5 = vld [vmem:[%s2805_s7 + $0xb4] sm:$0xf0]  ;;  %v2117_v8 = vor.u32 %v2487_v62, %v2114_v63  ;;  %v2497_v63 = vld [vmem:[%s2805_s7 + $0x16c] sm:$0xf] }
  0x4d   : > { %1247 = vmatmul.bf16.gmra.mxu3 %v2253_v6  ;;  %v2060_v6 = vld [vmem:[%s2805_s7 + $0xa8] sm:$0xf]  ;;  %v2057_v12 = vor.u32 %v2472_v4, %v2054_v5  ;;  %v2491_v5 = vld [vmem:[%s2805_s7 + $0x138] sm:$0xf0] }
  0x4e   : > { %1187 = vmatmul.bf16.gmra.mxu0 %v2013_v7  ;;  %v2475_v7 = vld [vmem:[%s2805_s7 + $0xb8] sm:$0xf0]  ;;  %v2128_v4 = vld [vmem:[%s2805_s7 + $0x128] sm:$0xf] }
  0x4f   : > { %v2061_v13 = vor.u32 %v2475_v7, %v2060_v6 }
  0x5c   : > { %1212 = vmatmul.bf16.gmra.mxu1 %v2113_v16  ;;  %1232 = vmatmul.bf16.gmra.mxu2 %v2193_v17  ;;  %v2069_v16 = vor.u32 %v2476_v11, %v2068_v10 }
  0x5d   : > { %1252 = vmatmul.bf16.gmra.mxu3 %v2273_v18 }
  0x5e   : > { %1192 = vmatmul.bf16.gmra.mxu0 %v2033_v19 }
  0x6c   : > { %1266 = vmatmul.bf16.vlgmr.msrb.gmra.mxu1 %v1977_v28  ;;  %1355 = vmatmul.bf16.vlgmr.msrb.gmra.mxu2 %v1981_v29  ;;  %v2088_v28 = vld [vmem:[%s2805_s7 + $0xd8] sm:$0xf]  ;;  %v2481_v29 = vld [vmem:[%s2805_s7 + $0xe8] sm:$0xf0] }
  0x6d   : > { %1444 = vmatmul.bf16.vlgmr.msrb.gmra.mxu3 %v1985_v30  ;;  %v2089_v36 = vor.u32 %v2481_v29, %v2088_v28  ;;  %v2493_v28 = vld [vmem:[%s2805_s7 + $0x14c] sm:$0xf]  ;;  %v2142_v29 = vld [vmem:[%s2805_s7 + $0x15c] sm:$0xf0] }
  0x6e   : > { %2434 = vmatmul.msk.bf16.vlgmr.msrb.gmra.mxu0 %vm1120_vm0, %v1989_v31 }
  0x7c   : > { %1271 = vmatmul.bf16.gmra.mxu1 %v1997_v40  ;;  %1360 = vmatmul.bf16.gmra.mxu2 %v2001_v41 }
  0x7d   : > { %1449 = vmatmul.bf16.gmra.mxu3 %v2005_v42  ;;  %v2482_v42 = vld [vmem:[%s2805_s7 + $0xf4] sm:$0xf] }
  0x7e   : > { %2435 = vmatmul.msk.bf16.gmra.mxu0 %vm1120_vm0, %v2009_v43  ;;  %v2094_v43 = vld [vmem:[%s2805_s7 + $0x104] sm:$0xf0] }
  0x8c   : > { %1276 = vmatmul.bf16.gmra.mxu1 %v2017_v52  ;;  %1365 = vmatmul.bf16.gmra.mxu2 %v2021_v53  ;;  %v2097_v52 = vor.u32 %v2482_v42, %v2094_v43  ;;  %v2101_v53 = vor.u32 %v2485_v45, %v2100_v44  ;;  %v2137_v42 = vor.u32 %v2492_v24, %v2134_v25 }
  0x8d   : > { %1454 = vmatmul.bf16.gmra.mxu3 %v2025_v54  ;;  %v2141_v43 = vor.u32 %v2495_v27, %v2140_v26  ;;  %v2145_v45 = vor.u32 %v2493_v28, %v2142_v29 }
  0x8e   : > { %2436 = vmatmul.msk.bf16.gmra.mxu0 %vm1120_vm0, %v2029_v55  ;;  %v2105_v55 = vor.u32 %v2483_v46, %v2102_v47 }
  0x9c   : > { %1281 = vmatmul.bf16.gmra.mxu1 %v2037_v0  ;;  %1370 = vmatmul.bf16.gmra.mxu2 %v2041_v1  ;;  %v2120_v0 = vld [vmem:[%s2805_s7 + $0x120] sm:$0xf]  ;;  %v2490_v1 = vld [vmem:[%s2805_s7 + $0x130] sm:$0xf0] }
  0x9d   : > { %1459 = vmatmul.bf16.gmra.mxu3 %v2045_v2  ;;  %v2488_v2 = vld [vmem:[%s2805_s7 + $0x124] sm:$0xf]  ;;  %v2121_v9 = vor.u32 %v2490_v1, %v2120_v0  ;;  %v2154_v0 = vld [vmem:[%s2805_s7 + $0x17c] sm:$0xf0]  ;;  %v2160_v1 = vld [vmem:[%s2805_s7 + $0x170] sm:$0xf] }
  0x9e   : > { %2437 = vmatmul.msk.bf16.gmra.mxu0 %vm1120_vm0, %v2049_v3  ;;  %v2122_v3 = vld [vmem:[%s2805_s7 + $0x134] sm:$0xf0]  ;;  %v2157_v26 = vor.u32 %v2497_v63, %v2154_v0  ;;  %v2174_v63 = vld [vmem:[%s2805_s7 + $0x1a4] sm:$0xf0] }
  0x9f   : > { %v2125_v11 = vor.u32 %v2488_v2, %v2122_v3  ;;  %v2500_v2 = vld [vmem:[%s2805_s7 + $0x180] sm:$0xf0]  ;;  %v2498_v3 = vld [vmem:[%s2805_s7 + $0x174] sm:$0xf]  ;;  %v2180_v0 = vld [vmem:[%s2805_s7 + $0x198] sm:$0xf] }
  0xa0   : > { %v2161_v27 = vor.u32 %v2500_v2, %v2160_v1  ;;  %v2505_v1 = vld [vmem:[%s2805_s7 + $0x1a8] sm:$0xf0]  ;;  %v2503_v2 = vld [vmem:[%s2805_s7 + $0x19c] sm:$0xf] }
  0xa9   : > { %v2970_v14 = vpop.f32.mrf.mxu1 }
  0xab   : > { %v2972_v17 = vpop.f32.mrf.mxu0 }
  0xac   : > { %1286 = vmatmul.bf16.gmra.mxu1 %v2057_v12  ;;  %1375 = vmatmul.bf16.gmra.mxu2 %v2061_v13  ;;  %v2129_v12 = vor.u32 %v2491_v5, %v2128_v4  ;;  %v2162_v5 = vld [vmem:[%s2805_s7 + $0x184] sm:$0xf0] }
  0xad   : > { %1464 = vmatmul.bf16.gmra.mxu3 %v2065_v15  ;;  %v2165_v29 = vor.u32 %v2498_v3, %v2162_v5  ;;  %v2188_v5 = vld [vmem:[%s2805_s7 + $0x1a0] sm:$0xf] }
  0xae   : > { %2438 = vmatmul.msk.bf16.gmra.mxu0 %vm1120_vm0, %v2069_v16 }
  0xaf   : > { %v2975_v18 = vpop.f32.mrf.mxu2 }
  0xb0   : > { %v2977_v19 = vpop.f32.mrf.mxu3 }
  0xb1   : > { %v2979_v20 = vpop.f32.mrf.mxu1 }
  0xb3   : > { %v2981_v21 = vpop.f32.mrf.mxu0 }
  0xb7   : > { %v2991_v30 = vpop.f32.mrf.mxu2 }
  0xb8   : > { %v2993_v31 = vpop.f32.mrf.mxu3 }
  0xb9   : > { %v2995_v34 = vpop.f32.mrf.mxu1 }
  0xbb   : > { %v2997_v37 = vpop.f32.mrf.mxu0 }
  0xbc   : > { %1291 = vmatmul.bf16.gmra.mxu1 %v2077_v32  ;;  %1380 = vmatmul.bf16.gmra.mxu2 %v2081_v33  ;;  %v2148_v32 = vld [vmem:[%s2805_s7 + $0x150] sm:$0xf]  ;;  %v2496_v33 = vld [vmem:[%s2805_s7 + $0x160] sm:$0xf0] }
  0xbd   : > { %1469 = vmatmul.bf16.gmra.mxu3 %v2085_v35  ;;  %v2149_v46 = vor.u32 %v2496_v33, %v2148_v32 }
  0xbe   : > { %2439 = vmatmul.msk.bf16.gmra.mxu0 %vm1120_vm0, %v2089_v36 }
  0xbf   : > { %v3000_v38 = vpop.f32.mrf.mxu2 }
  0xc0   : > { %v3002_v39 = vpop.f32.mrf.mxu3 }
  0xc1   : > { %v3004_v40 = vpop.f32.mrf.mxu1 }
  0xc3   : > { %v3006_v41 = vpop.f32.mrf.mxu0 }
  0xc7   : > { %v3016_v50 = vpop.f32.mrf.mxu2 }
  0xc8   : > { %v3018_v51 = vpop.f32.mrf.mxu3 }
  0xc9   : > { %v3020_v54 = vpop.f32.mrf.mxu1 }
  0xcb   : > { %v3022_v57 = vpop.f32.mrf.mxu0 }
  0xcc   : > { %1296 = vmatmul.bf16.gmra.mxu1 %v2097_v52  ;;  %1385 = vmatmul.bf16.gmra.mxu2 %v2101_v53 }
  0xcd   : > { %1474 = vmatmul.bf16.gmra.mxu3 %v2105_v55 }
  0xce   : > { %2440 = vmatmul.msk.bf16.gmra.mxu0 %vm1120_vm0, %v2109_v56 }
  0xcf   : > { %v3025_v58 = vpop.f32.mrf.mxu2 }
  0xd0   : > { %v3027_v59 = vpop.f32.mrf.mxu3 }
  0xd1   : > { %v3029_v60 = vpop.f32.mrf.mxu1 }
  0xd3   : > { %v3031_v61 = vpop.f32.mrf.mxu0 }
  0xd7   : > { %v3041_v6 = vpop.f32.mrf.mxu2 }
  0xd8   : > { %v3043_v7 = vpop.f32.mrf.mxu3 }
  0xd9   : > { %v3045_v10 = vpop.f32.mrf.mxu1 }
  0xdb   : > { %v3047_v13 = vpop.f32.mrf.mxu0 }
  0xdc   : > { %1301 = vmatmul.bf16.gmra.mxu1 %v2117_v8  ;;  %1390 = vmatmul.bf16.gmra.mxu2 %v2121_v9  ;;  %v2168_v8 = vld [vmem:[%s2805_s7 + $0x178] sm:$0xf]  ;;  %v2501_v9 = vld [vmem:[%s2805_s7 + $0x188] sm:$0xf0] }
  0xdd   : > { %1479 = vmatmul.bf16.gmra.mxu3 %v2125_v11  ;;  %v2169_v32 = vor.u32 %v2501_v9, %v2168_v8  ;;  %v2506_v8 = vld [vmem:[%s2805_s7 + $0x1b0] sm:$0xf0] }
  0xde   : > { %2441 = vmatmul.msk.bf16.gmra.mxu0 %vm1120_vm0, %v2129_v12 }
  0xdf   : > { %v3050_v15 = vpop.f32.mrf.mxu2 }
  0xe0   : > { %v3052_v16 = vpop.f32.mrf.mxu3 }
  0xe1   : > { %v3054_v22 = vpop.f32.mrf.mxu1 }
  0xe3   : > { %v3056_v23 = vpop.f32.mrf.mxu0 }
  0xe7   : > { %v3066_v35 = vpop.f32.mrf.mxu2 }
  0xe8   : > { %v3068_v36 = vpop.f32.mrf.mxu3 }
  0xe9   : > { %v1267_v44 = vpop.f32.mrf.mxu1 }
  0xea   : > { %v1268_v48 = vadd.f32 %v1267_v44, %v2972_v17  ;;  %v3084_v17 = vld [vmem:[%s3236_s2] ss:$0 sm:$0xff] }
  0xeb   : > { %v1534_v47 = vpop.f32.mrf.mxu0 }
  0xec   : > { %1306 = vmatmul.bf16.gmra.mxu1 %v2137_v42  ;;  %1395 = vmatmul.bf16.gmra.mxu2 %v2141_v43 }
  0xed   : > { %1484 = vmatmul.bf16.gmra.mxu3 %v2145_v45 }
  0xee   : > { %2442 = vmatmul.msk.bf16.gmra.mxu0 %vm1120_vm0, %v2149_v46 }
  0xef   : > { %v1356_v49 = vpop.f32.mrf.mxu2 }
  0xf0   : > { %v1357_v52 = vadd.f32 %v1356_v49, %v1268_v48  ;;  %v1445_v53 = vpop.f32.mrf.mxu3 }
  0xf1   : > { %v1269_v55 = vpop.f32.mrf.mxu1 }
  0xf2   : > { %v1446_v62 = vadd.f32 %v1445_v53, %v1357_v52  ;;  %v1270_v4 = vadd.f32 %v1269_v55, %v2981_v21 }
  0xf3   : > { %v1536_v56 = vpop.f32.mrf.mxu0 }
  0xf4   : > { %v1535_v12 = vadd.f32 %v1534_v47, %v1446_v62  ;;  %v2502_v62 = vld [vmem:[%s2805_s7 + $0x194] sm:$0xf] }
  0xf6   : > { %v1717_v42 = vadd.f32 %v3084_v17, %v1535_v12 }
  0xf7   : > { %v1358_v11 = vpop.f32.mrf.mxu2 }
  0xf8   : > { %v1359_v24 = vadd.f32 %v1358_v11, %v1270_v4  ;;  %v1447_v25 = vpop.f32.mrf.mxu3  ;;  %v1749_v47 = vmax.f32 %v1717_v42, 0.0  ;;  %v2182_v4 = vld [vmem:[%s2805_s7 + $0x1ac] sm:$0xf0] }
  0xf9   : > { %v1272_v28 = vpop.f32.mrf.mxu1 }
  0xfa   : > { %v1448_v33 = vadd.f32 %v1447_v25, %v1359_v24  ;;  %v1273_v45 = vadd.f32 %v1272_v28, %v2997_v37  ;;  %v2177_v25 = vor.u32 %v2502_v62, %v2174_v63  ;;  %v2185_v28 = vor.u32 %v2503_v2, %v2182_v4  ;;  %v2200_v62 = vld [vmem:[%s2805_s7 + $0x1c0] sm:$0xf]  ;;  %v2510_v63 = vld [vmem:[%s2805_s7 + $0x1d0] sm:$0xf0]  ;;  %v2208_v2 = vld [vmem:[%s2805_s7 + $0x1c8] sm:$0xf] }
  0xfb   : > { %v1539_v21 = vpop.f32.mrf.mxu0 }
  0xfc   : > { %v1537_v43 = vadd.f32 %v1536_v56, %v1448_v33  ;;  %1311 = vmatmul.bf16.gmra.mxu1 %v2157_v26  ;;  %1400 = vmatmul.bf16.gmra.mxu2 %v2161_v27  ;;  %v2181_v26 = vor.u32 %v2505_v1, %v2180_v0  ;;  %v2508_v0 = vld [vmem:[%s2805_s7 + $0x1c4] sm:$0xf]  ;;  %v2202_v1 = vld [vmem:[%s2805_s7 + $0x1d4] sm:$0xf0] }
  0xfd   : > { %1489 = vmatmul.bf16.gmra.mxu3 %v2165_v29  ;;  %v2189_v29 = vor.u32 %v2506_v8, %v2188_v5 }
  0xfe   : > { %2443 = vmatmul.msk.bf16.gmra.mxu0 %vm1120_vm0, %v2169_v32  ;;  %v1718_v44 = vadd.f32 %v3084_v17, %v1537_v43 }
  0xff   : > { %v1361_v46 = vpop.f32.mrf.mxu2 }
 0x100   : > { %v1750_v48 = vmax.f32 %v1718_v44, 0.0  ;;  %v1362_v49 = vadd.f32 %v1361_v46, %v1273_v45  ;;  %v1450_v52 = vpop.f32.mrf.mxu3 }
 0x101   : > { %v1274_v53 = vpop.f32.mrf.mxu1 }
 0x102   : > { %v2571_v55 = vpack.c.bf16 %v1750_v48, %v1749_v47  ;;  %v1451_v37 = vadd.f32 %v1450_v52, %v1362_v49  ;;  %v1275_v3 = vadd.f32 %v1274_v53, %v3006_v41 }
 0x103   : > { %v1541_v56 = vpop.f32.mrf.mxu0 }
 0x104   : > { %2572 = vst [vmem:[%s3094_s4] sm:$0xff] %v2571_v55   ;;  %v1540_v11 = vadd.f32 %v1539_v21, %v1451_v37  ;;  %v2194_v37 = vld [vmem:[%s2805_s7 + $0x1cc] sm:$0xf0] }
 0x106   : > { %v1719_v42 = vadd.f32 %v3084_v17, %v1540_v11 }
 0x107   : > { %v1363_v9 = vpop.f32.mrf.mxu2 }
 0x108   : > { %v1364_v12 = vadd.f32 %v1363_v9, %v1275_v3  ;;  %v1452_v24 = vpop.f32.mrf.mxu3  ;;  %v1751_v45 = vmax.f32 %v1719_v42, 0.0  ;;  %v2511_v3 = vld [vmem:[%s2805_s7 + $0x1d8] sm:$0xf0] }
 0x109   : > { %v1277_v27 = vpop.f32.mrf.mxu1 }
 0x10a   : > { %v1453_v32 = vadd.f32 %v1452_v24, %v1364_v12  ;;  %v1278_v21 = vadd.f32 %v1277_v27, %v3022_v57  ;;  %v2201_v12 = vor.u32 %v2510_v63, %v2200_v62  ;;  %v2228_v62 = vld [vmem:[%s2805_s7 + $0x1f0] sm:$0xf]  ;;  %v2516_v63 = vld [vmem:[%s2805_s7 + $0x200] sm:$0xf0] }
 0x10b   : > { %v1544_v33 = vpop.f32.mrf.mxu0 }
 0x10c   : > { %v1542_v43 = vadd.f32 %v1541_v56, %v1453_v32  ;;  %1316 = vmatmul.bf16.gmra.mxu1 %v2177_v25  ;;  %1405 = vmatmul.bf16.gmra.mxu2 %v2181_v26  ;;  %v2507_v56 = vld [vmem:[%s2805_s7 + $0x1bc] sm:$0xf]  ;;  %v2205_v25 = vor.u32 %v2508_v0, %v2202_v1  ;;  %v2209_v26 = vor.u32 %v2511_v3, %v2208_v2 }
 0x10d   : > { %1494 = vmatmul.bf16.gmra.mxu3 %v2185_v28  ;;  %v2197_v11 = vor.u32 %v2507_v56, %v2194_v37  ;;  %v2513_v56 = vld [vmem:[%s2805_s7 + $0x1ec] sm:$0xf]  ;;  %v2222_v37 = vld [vmem:[%s2805_s7 + $0x1fc] sm:$0xf0] }
 0x10e   : > { %2444 = vmatmul.msk.bf16.gmra.mxu0 %vm1120_vm0, %v2189_v29  ;;  %v1720_v41 = vadd.f32 %v3084_v17, %v1542_v43 }
 0x10f   : > { %v1366_v44 = vpop.f32.mrf.mxu2 }
 0x110   : > { %v1752_v46 = vmax.f32 %v1720_v41, 0.0  ;;  %v1367_v47 = vadd.f32 %v1366_v44, %v1278_v21  ;;  %v1455_v48 = vpop.f32.mrf.mxu3 }
 0x111   : > { %v1279_v49 = vpop.f32.mrf.mxu1 }
 0x112   : > { %v2576_v52 = vpack.c.bf16 %v1752_v46, %v1751_v45  ;;  %v1456_v55 = vadd.f32 %v1455_v48, %v1367_v47  ;;  %v1280_v57 = vadd.f32 %v1279_v49, %v3031_v61  ;;  %v2512_v49 = vld [vmem:[%s2805_s7 + $0x1e4] sm:$0xf] }
 0x113   : > { %v1546_v53 = vpop.f32.mrf.mxu0 }
 0x114   : > { %2648 = vst [vmem:[%s3094_s4 + $0x8] sm:$0xff] %v2576_v52   ;;  %v1545_v5 = vadd.f32 %v1544_v33, %v1456_v55  ;;  %v2214_v52 = vld [vmem:[%s2805_s7 + $0x1f4] sm:$0xf0]  ;;  %v2515_v55 = vld [vmem:[%s2805_s7 + $0x1f8] sm:$0xf0] }
 0x115   : > { %v2217_v3 = vor.u32 %v2512_v49, %v2214_v52  ;;  %v2248_v49 = vld [vmem:[%s2805_s7 + $0x218] sm:$0xf]  ;;  %v2521_v52 = vld [vmem:[%s2805_s7 + $0x228] sm:$0xf0] }
 0x116   : > { %v1721_v29 = vadd.f32 %v3084_v17, %v1545_v5 }
 0x117   : > { %v1368_v4 = vpop.f32.mrf.mxu2 }
 0x118   : > { %v1369_v8 = vadd.f32 %v1368_v4, %v1280_v57  ;;  %v1457_v9 = vpop.f32.mrf.mxu3  ;;  %v1753_v43 = vmax.f32 %v1721_v29, 0.0 }
 0x119   : > { %v1282_v24 = vpop.f32.mrf.mxu1 }
 0x11a   : > { %v1458_v27 = vadd.f32 %v1457_v9, %v1369_v8  ;;  %v1283_v33 = vadd.f32 %v1282_v24, %v3047_v13  ;;  %v2225_v8 = vor.u32 %v2513_v56, %v2222_v37  ;;  %v2229_v9 = vor.u32 %v2516_v63, %v2228_v62 }
 0x11b   : > { %v1549_v28 = vpop.f32.mrf.mxu0 }
 0x11c   : > { %v1547_v32 = vadd.f32 %v1546_v53, %v1458_v27  ;;  %1321 = vmatmul.bf16.gmra.mxu1 %v2197_v11  ;;  %1410 = vmatmul.bf16.gmra.mxu2 %v2201_v12  ;;  %v2220_v53 = vld [vmem:[%s2805_s7 + $0x1e8] sm:$0xf] }
 0x11d   : > { %1499 = vmatmul.bf16.gmra.mxu3 %v2205_v25  ;;  %v2221_v4 = vor.u32 %v2515_v55, %v2220_v53 }
 0x11e   : > { %2445 = vmatmul.msk.bf16.gmra.mxu0 %vm1120_vm0, %v2209_v26  ;;  %v1722_v61 = vadd.f32 %v3084_v17, %v1547_v32 }
 0x11f   : > { %v1371_v42 = vpop.f32.mrf.mxu2 }
 0x120   : > { %v1754_v41 = vmax.f32 %v1722_v61, 0.0  ;;  %v1372_v21 = vadd.f32 %v1371_v42, %v1283_v33  ;;  %v1460_v44 = vpop.f32.mrf.mxu3 }
 0x121   : > { %v1284_v45 = vpop.f32.mrf.mxu1 }
 0x122   : > { %v2581_v46 = vpack.c.bf16 %v1754_v41, %v1753_v43  ;;  %v1461_v48 = vadd.f32 %v1460_v44, %v1372_v21  ;;  %v1285_v13 = vadd.f32 %v1284_v45, %v3056_v23  ;;  %v2517_v21 = vld [vmem:[%s2805_s7 + $0x20c] sm:$0xf]  ;;  %v2234_v44 = vld [vmem:[%s2805_s7 + $0x21c] sm:$0xf0]  ;;  %v2240_v45 = vld [vmem:[%s2805_s7 + $0x210] sm:$0xf] }
 0x123   : > { %v1551_v47 = vpop.f32.mrf.mxu0  ;;  %v2237_v37 = vor.u32 %v2517_v21, %v2234_v44 }
 0x124   : > { %2649 = vst [vmem:[%s3094_s4 + $0x10] sm:$0xff] %v2581_v46   ;;  %v1550_v57 = vadd.f32 %v1549_v28, %v1461_v48  ;;  %v2520_v46 = vld [vmem:[%s2805_s7 + $0x220] sm:$0xf0]  ;;  %v2242_v48 = vld [vmem:[%s2805_s7 + $0x224] sm:$0xf0] }
 0x125   : > { %v2241_v62 = vor.u32 %v2520_v46, %v2240_v45 }
 0x126   : > { %v1723_v24 = vadd.f32 %v3084_v17, %v1550_v57  ;;  %v2249_v57 = vor.u32 %v2521_v52, %v2248_v49 }
 0x127   : > { %v1373_v0 = vpop.f32.mrf.mxu2 }
 0x128   : > { %v1374_v1 = vadd.f32 %v1373_v0, %v1285_v13  ;;  %v1462_v2 = vpop.f32.mrf.mxu3  ;;  %v1755_v28 = vmax.f32 %v1723_v24, 0.0 }
 0x129   : > { %v1287_v5 = vpop.f32.mrf.mxu1 }
 0x12a   : > { %v1463_v11 = vadd.f32 %v1462_v2, %v1374_v1  ;;  %v1288_v26 = vadd.f32 %v1287_v5, %v2970_v14 }
 0x12b   : > { %v1554_v12 = vpop.f32.mrf.mxu0 }
 0x12c   : > { %v1552_v25 = vadd.f32 %v1551_v47, %v1463_v11  ;;  %1326 = vmatmul.bf16.gmra.mxu1 %v2217_v3  ;;  %1415 = vmatmul.bf16.gmra.mxu2 %v2221_v4  ;;  %v2518_v47 = vld [vmem:[%s2805_s7 + $0x214] sm:$0xf] }
 0x12d   : > { %1504 = vmatmul.bf16.gmra.mxu3 %v2225_v8  ;;  %v2245_v0 = vor.u32 %v2518_v47, %v2242_v48 }
 0x12e   : > { %2446 = vmatmul.msk.bf16.gmra.mxu0 %vm1120_vm0, %v2229_v9  ;;  %v1724_v23 = vadd.f32 %v3084_v17, %v1552_v25 }
 0x12f   : > { %v1376_v27 = vpop.f32.mrf.mxu2 }
 0x130   : > { %v1756_v29 = vmax.f32 %v1724_v23, 0.0  ;;  %v1377_v32 = vadd.f32 %v1376_v27, %v1288_v26  ;;  %v1465_v61 = vpop.f32.mrf.mxu3 }
 0x131   : > { %v1289_v33 = vpop.f32.mrf.mxu1 }
 0x132   : > { %v2586_v42 = vpack.c.bf16 %v1756_v29, %v1755_v28  ;;  %v1466_v41 = vadd.f32 %v1465_v61, %v1377_v32  ;;  %v1290_v14 = vadd.f32 %v1289_v33, %v2979_v20  ;;  %v2522_v28 = vld [vmem:[%s2805_s7 + $0x234] sm:$0xf]  ;;  %v2254_v29 = vld [vmem:[%s2805_s7 + $0x244] sm:$0xf0]  ;;  %v2260_v32 = vld [vmem:[%s2805_s7 + $0x238] sm:$0xf] }
 0x133   : > { %v1556_v43 = vpop.f32.mrf.mxu0  ;;  %v2525_v61 = vld [vmem:[%s2805_s7 + $0x248] sm:$0xf0]  ;;  %v2523_v33 = vld [vmem:[%s2805_s7 + $0x23c] sm:$0xf]  ;;  %v2257_v47 = vor.u32 %v2522_v28, %v2254_v29 }
 0x134   : > { %2650 = vst [vmem:[%s3094_s4 + $0x18] sm:$0xff] %v2586_v42   ;;  %v1555_v55 = vadd.f32 %v1554_v12, %v1466_v41  ;;  %v2262_v42 = vld [vmem:[%s2805_s7 + $0x24c] sm:$0xf0]  ;;  %v2526_v41 = vld [vmem:[%s2805_s7 + $0x250] sm:$0xf0] }
 0x135   : > { %v2265_v49 = vor.u32 %v2523_v33, %v2262_v42 }
 0x136   : > { %v1725_v3 = vadd.f32 %v3084_v17, %v1555_v55 }
 0x137   : > { %v1378_v53 = vpop.f32.mrf.mxu2 }
 0x138   : > { %v1379_v56 = vadd.f32 %v1378_v53, %v1290_v14  ;;  %v1467_v13 = vpop.f32.mrf.mxu3  ;;  %v1757_v9 = vmax.f32 %v1725_v3, 0.0  ;;  %v2261_v14 = vor.u32 %v2525_v61, %v2260_v32 }
 0x139   : > { %v1292_v63 = vpop.f32.mrf.mxu1 }
 0x13a   : > { %v1468_v1 = vadd.f32 %v1467_v13, %v1379_v56  ;;  %v1293_v5 = vadd.f32 %v1292_v63, %v2995_v34 }
 0x13b   : > { %v1559_v2 = vpop.f32.mrf.mxu0 }
 0x13c   : > { %v1557_v4 = vadd.f32 %v1556_v43, %v1468_v1  ;;  %1331 = vmatmul.bf16.gmra.mxu1 %v2237_v37  ;;  %1420 = vmatmul.bf16.gmra.mxu2 %v2241_v62  ;;  %v2268_v43 = vld [vmem:[%s2805_s7 + $0x240] sm:$0xf] }
 0x13d   : > { %1509 = vmatmul.bf16.gmra.mxu3 %v2245_v0  ;;  %v2269_v52 = vor.u32 %v2526_v41, %v2268_v43 }
 0x13e   : > { %2447 = vmatmul.msk.bf16.gmra.mxu0 %vm1120_vm0, %v2249_v57  ;;  %v1726_v20 = vadd.f32 %v3084_v17, %v1557_v4 }
 0x13f   : > { %v1381_v8 = vpop.f32.mrf.mxu2 }
 0x140   : > { %v1758_v11 = vmax.f32 %v1726_v20, 0.0  ;;  %v1382_v12 = vadd.f32 %v1381_v8, %v1293_v5  ;;  %v1470_v24 = vpop.f32.mrf.mxu3  ;;  %v2527_v5 = vld [vmem:[%s2805_s7 + $0x25c] sm:$0xf]  ;;  %v2274_v8 = vld [vmem:[%s2805_s7 + $0x26c] sm:$0xf0] }
 0x141   : > { %v1294_v25 = vpop.f32.mrf.mxu1  ;;  %v2277_v32 = vor.u32 %v2527_v5, %v2274_v8 }
 0x142   : > { %v2591_v23 = vpack.c.bf16 %v1758_v11, %v1757_v9  ;;  %v1471_v27 = vadd.f32 %v1470_v24, %v1382_v12  ;;  %v1295_v34 = vadd.f32 %v1294_v25, %v3004_v40  ;;  %v2280_v9 = vld [vmem:[%s2805_s7 + $0x260] sm:$0xf]  ;;  %v2530_v11 = vld [vmem:[%s2805_s7 + $0x270] sm:$0xf0]  ;;  %v2528_v12 = vld [vmem:[%s2805_s7 + $0x264] sm:$0xf] }
 0x143   : > { %v1561_v26 = vpop.f32.mrf.mxu0  ;;  %v2282_v24 = vld [vmem:[%s2805_s7 + $0x274] sm:$0xf0]  ;;  %v2288_v25 = vld [vmem:[%s2805_s7 + $0x268] sm:$0xf]  ;;  %v2281_v61 = vor.u32 %v2530_v11, %v2280_v9 }
 0x144   : > { %2651 = vst [vmem:[%s3094_s4 + $0x20] sm:$0xff] %v2591_v23   ;;  %v1560_v44 = vadd.f32 %v1559_v2, %v1471_v27  ;;  %v2531_v23 = vld [vmem:[%s2805_s7 + $0x278] sm:$0xf0] }
 0x145   : > { %v2289_v42 = vor.u32 %v2531_v23, %v2288_v25 }
 0x146   : > { %v1727_v56 = vadd.f32 %v3084_v17, %v1560_v44 }
 0x147   : > { %v1383_v21 = vpop.f32.mrf.mxu2 }
 0x148   : > { %v1384_v45 = vadd.f32 %v1383_v21, %v1295_v34  ;;  %v1472_v46 = vpop.f32.mrf.mxu3  ;;  %v1759_v63 = vmax.f32 %v1727_v56, 0.0  ;;  %v2285_v34 = vor.u32 %v2528_v12, %v2282_v24 }
 0x149   : > { %v1297_v48 = vpop.f32.mrf.mxu1 }
 0x14a   : > { %v1473_v53 = vadd.f32 %v1472_v46, %v1384_v45  ;;  %v1298_v37 = vadd.f32 %v1297_v48, %v3020_v54 }
 0x14b   : > { %v1564_v55 = vpop.f32.mrf.mxu0 }
 0x14c   : > { %v1562_v13 = vadd.f32 %v1561_v26, %v1473_v53  ;;  %1336 = vmatmul.bf16.gmra.mxu1 %v2257_v47  ;;  %1425 = vmatmul.bf16.gmra.mxu2 %v2261_v14 }
 0x14d   : > { %1514 = vmatmul.bf16.gmra.mxu3 %v2265_v49 }
 0x14e   : > { %2448 = vmatmul.msk.bf16.gmra.mxu0 %vm1120_vm0, %v2269_v52  ;;  %v1728_v40 = vadd.f32 %v3084_v17, %v1562_v13 }
 0x14f   : > { %v1386_v62 = vpop.f32.mrf.mxu2 }
 0x150   : > { %v1760_v0 = vmax.f32 %v1728_v40, 0.0  ;;  %v1387_v57 = vadd.f32 %v1386_v62, %v1298_v37  ;;  %v1475_v1 = vpop.f32.mrf.mxu3 }
 0x151   : > { %v1299_v2 = vpop.f32.mrf.mxu1 }
 0x152   : > { %v2596_v3 = vpack.c.bf16 %v1760_v0, %v1759_v63  ;;  %v1476_v20 = vadd.f32 %v1475_v1, %v1387_v57  ;;  %v1300_v54 = vadd.f32 %v1299_v2, %v3029_v60 }
 0x153   : > { %v1566_v4 = vpop.f32.mrf.mxu0 }
 0x154   : > { %2652 = vst [vmem:[%s3094_s4 + $0x28] sm:$0xff] %v2596_v3   ;;  %v1565_v27 = vadd.f32 %v1564_v55, %v1476_v20 }
 0x156   : > { %v1729_v21 = vadd.f32 %v3084_v17, %v1565_v27 }
 0x157   : > { %v1388_v26 = vpop.f32.mrf.mxu2 }
 0x158   : > { %v1389_v28 = vadd.f32 %v1388_v26, %v1300_v54  ;;  %v1477_v29 = vpop.f32.mrf.mxu3  ;;  %v1761_v47 = vmax.f32 %v1729_v21, 0.0 }
 0x159   : > { %v1302_v33 = vpop.f32.mrf.mxu1 }
 0x15a   : > { %v1478_v43 = vadd.f32 %v1477_v29, %v1389_v28  ;;  %v1303_v45 = vadd.f32 %v1302_v33, %v3045_v10 }
 0x15b   : > { %v1569_v41 = vpop.f32.mrf.mxu0 }
 0x15c   : > { %v1567_v44 = vadd.f32 %v1566_v4, %v1478_v43  ;;  %1341 = vmatmul.bf16.gmra.mxu1 %v2277_v32  ;;  %1430 = vmatmul.bf16.gmra.mxu2 %v2281_v61 }
 0x15d   : > { %1519 = vmatmul.bf16.gmra.mxu3 %v2285_v34 }
 0x15e   : > { %2449 = vmatmul.msk.bf16.gmra.mxu0 %vm1120_vm0, %v2289_v42  ;;  %v1730_v60 = vadd.f32 %v3084_v17, %v1567_v44 }
 0x15f   : > { %v1391_v46 = vpop.f32.mrf.mxu2 }
 0x160   : > { %v1762_v14 = vmax.f32 %v1730_v60, 0.0  ;;  %v1392_v48 = vadd.f32 %v1391_v46, %v1303_v45  ;;  %v1480_v49 = vpop.f32.mrf.mxu3 }
 0x161   : > { %v1304_v52 = vpop.f32.mrf.mxu1 }
 0x162   : > { %v2601_v53 = vpack.c.bf16 %v1762_v14, %v1761_v47  ;;  %v1481_v56 = vadd.f32 %v1480_v49, %v1392_v48  ;;  %v1305_v13 = vadd.f32 %v1304_v52, %v3054_v22 }
 0x163   : > { %v1571_v55 = vpop.f32.mrf.mxu0 }
 0x164   : > { %2653 = vst [vmem:[%s3094_s4 + $0x30] sm:$0xff] %v2601_v53   ;;  %v1570_v37 = vadd.f32 %v1569_v41, %v1481_v56 }
 0x166   : > { %v1731_v1 = vadd.f32 %v3084_v17, %v1570_v37 }
 0x167   : > { %v1393_v40 = vpop.f32.mrf.mxu2 }
 0x168   : > { %v1394_v62 = vadd.f32 %v1393_v40, %v1305_v13  ;;  %v1482_v63 = vpop.f32.mrf.mxu3  ;;  %v1763_v5 = vmax.f32 %v1731_v1, 0.0 }
 0x169   : > { %v1307_v0 = vpop.f32.mrf.mxu1 }
 0x16a   : > { %v1483_v57 = vadd.f32 %v1482_v63, %v1394_v62  ;;  %v1308_v4 = vadd.f32 %v1307_v0, %v2975_v18 }
 0x16b   : > { %v1574_v10 = vpop.f32.mrf.mxu0 }
 0x16c   : > { %v1572_v2 = vadd.f32 %v1571_v55, %v1483_v57 }
 0x16e   : > { %v1732_v3 = vadd.f32 %v3084_v17, %v1572_v2 }
 0x16f   : > { %v1396_v20 = vpop.f32.mrf.mxu2 }
 0x170   : > { %v1764_v8 = vmax.f32 %v1732_v3, 0.0  ;;  %v1397_v9 = vadd.f32 %v1396_v20, %v1308_v4  ;;  %v1485_v22 = vpop.f32.mrf.mxu3 }
 0x171   : > { %v1309_v11 = vpop.f32.mrf.mxu1 }
 0x172   : > { %v2606_v12 = vpack.c.bf16 %v1764_v8, %v1763_v5  ;;  %v1486_v24 = vadd.f32 %v1485_v22, %v1397_v9  ;;  %v1310_v25 = vadd.f32 %v1309_v11, %v2991_v30 }
 0x173   : > { %v1576_v54 = vpop.f32.mrf.mxu0 }
 0x174   : > { %2654 = vst [vmem:[%s3094_s4 + $0x38] sm:$0xff] %v2606_v12   ;;  %v1575_v26 = vadd.f32 %v1574_v10, %v1486_v24 }
 0x176   : > { %v1733_v61 = vadd.f32 %v3084_v17, %v1575_v26 }
 0x177   : > { %v1398_v23 = vpop.f32.mrf.mxu2 }
 0x178   : > { %v1399_v27 = vadd.f32 %v1398_v23, %v1310_v25  ;;  %v1487_v28 = vpop.f32.mrf.mxu3  ;;  %v1765_v41 = vmax.f32 %v1733_v61, 0.0 }
 0x179   : > { %v1312_v29 = vpop.f32.mrf.mxu1 }
 0x17a   : > { %v1488_v32 = vadd.f32 %v1487_v28, %v1399_v27  ;;  %v1313_v42 = vadd.f32 %v1312_v29, %v3000_v38 }
 0x17b   : > { %v1579_v18 = vpop.f32.mrf.mxu0 }
 0x17c   : > { %v1577_v33 = vadd.f32 %v1576_v54, %v1488_v32 }
 0x17e   : > { %v1734_v34 = vadd.f32 %v3084_v17, %v1577_v33 }
 0x17f   : > { %v1401_v43 = vpop.f32.mrf.mxu2 }
 0x180   : > { %v1766_v21 = vmax.f32 %v1734_v34, 0.0  ;;  %v1402_v44 = vadd.f32 %v1401_v43, %v1313_v42  ;;  %v1490_v30 = vpop.f32.mrf.mxu3 }
 0x181   : > { %v1314_v60 = vpop.f32.mrf.mxu1 }
 0x182   : > { %v2611_v45 = vpack.c.bf16 %v1766_v21, %v1765_v41  ;;  %v1491_v47 = vadd.f32 %v1490_v30, %v1402_v44  ;;  %v1315_v14 = vadd.f32 %v1314_v60, %v3016_v50 }
 0x183   : > { %v1581_v46 = vpop.f32.mrf.mxu0 }
 0x184   : > { %2655 = vst [vmem:[%s3094_s4 + $0x40] sm:$0xff] %v2611_v45   ;;  %v1580_v49 = vadd.f32 %v1579_v18, %v1491_v47 }
 0x186   : > { %v1735_v13 = vadd.f32 %v3084_v17, %v1580_v49 }
 0x187   : > { %v1403_v48 = vpop.f32.mrf.mxu2 }
 0x188   : > { %v1404_v52 = vadd.f32 %v1403_v48, %v1315_v14  ;;  %v1492_v53 = vpop.f32.mrf.mxu3  ;;  %v1767_v0 = vmax.f32 %v1735_v13, 0.0 }
 0x189   : > { %v1317_v55 = vpop.f32.mrf.mxu1 }
 0x18a   : > { %v1493_v56 = vadd.f32 %v1492_v53, %v1404_v52  ;;  %v1318_v62 = vadd.f32 %v1317_v55, %v3025_v58 }
 0x18b   : > { %v1584_v38 = vpop.f32.mrf.mxu0 }
 0x18c   : > { %v1582_v40 = vadd.f32 %v1581_v46, %v1493_v56 }
 0x18e   : > { %v1736_v37 = vadd.f32 %v3084_v17, %v1582_v40 }
 0x18f   : > { %v1406_v63 = vpop.f32.mrf.mxu2 }
 0x190   : > { %v1768_v57 = vmax.f32 %v1736_v37, 0.0  ;;  %v1407_v10 = vadd.f32 %v1406_v63, %v1318_v62  ;;  %v1495_v50 = vpop.f32.mrf.mxu3 }
 0x191   : > { %v1319_v1 = vpop.f32.mrf.mxu1 }
 0x192   : > { %v2616_v2 = vpack.c.bf16 %v1768_v57, %v1767_v0  ;;  %v1496_v4 = vadd.f32 %v1495_v50, %v1407_v10  ;;  %v1320_v20 = vadd.f32 %v1319_v1, %v3041_v6 }
 0x193   : > { %v1586_v3 = vpop.f32.mrf.mxu0 }
 0x194   : > { %2656 = vst [vmem:[%s3094_s4 + $0x48] sm:$0xff] %v2616_v2   ;;  %v1585_v8 = vadd.f32 %v1584_v38, %v1496_v4 }
 0x196   : > { %v1737_v54 = vadd.f32 %v3084_v17, %v1585_v8 }
 0x197   : > { %v1408_v5 = vpop.f32.mrf.mxu2 }
 0x198   : > { %v1409_v9 = vadd.f32 %v1408_v5, %v1320_v20  ;;  %v1497_v22 = vpop.f32.mrf.mxu3  ;;  %v1769_v27 = vmax.f32 %v1737_v54, 0.0 }
 0x199   : > { %v1322_v11 = vpop.f32.mrf.mxu1 }
 0x19a   : > { %v1498_v12 = vadd.f32 %v1497_v22, %v1409_v9  ;;  %v1323_v23 = vadd.f32 %v1322_v11, %v3050_v15 }
 0x19b   : > { %v1589_v58 = vpop.f32.mrf.mxu0 }
 0x19c   : > { %v1587_v24 = vadd.f32 %v1586_v3, %v1498_v12 }
 0x19e   : > { %v1738_v25 = vadd.f32 %v3084_v17, %v1587_v24 }
 0x19f   : > { %v1411_v26 = vpop.f32.mrf.mxu2 }
 0x1a0   : > { %v1770_v28 = vmax.f32 %v1738_v25, 0.0  ;;  %v1412_v29 = vadd.f32 %v1411_v26, %v1323_v23  ;;  %v1500_v6 = vpop.f32.mrf.mxu3 }
 0x1a1   : > { %v1324_v32 = vpop.f32.mrf.mxu1 }
 0x1a2   : > { %v2621_v18 = vpack.c.bf16 %v1770_v28, %v1769_v27  ;;  %v1501_v33 = vadd.f32 %v1500_v6, %v1412_v29  ;;  %v1325_v34 = vadd.f32 %v1324_v32, %v3066_v35 }
 0x1a3   : > { %v1591_v61 = vpop.f32.mrf.mxu0 }
 0x1a4   : > { %2657 = vst [vmem:[%s3094_s4 + $0x50] sm:$0xff] %v2621_v18   ;;  %v1590_v43 = vadd.f32 %v1589_v58, %v1501_v33 }
 0x1a6   : > { %v1739_v60 = vadd.f32 %v3084_v17, %v1590_v43 }
 0x1a7   : > { %v1413_v42 = vpop.f32.mrf.mxu2 }
 0x1a8   : > { %v1414_v41 = vadd.f32 %v1413_v42, %v1325_v34  ;;  %v1502_v21 = vpop.f32.mrf.mxu3  ;;  %v1771_v48 = vmax.f32 %v1739_v60, 0.0 }
 0x1a9   : > { %v1327_v44 = vpop.f32.mrf.mxu1 }
 0x1aa   : > { %v1503_v30 = vadd.f32 %v1502_v21, %v1414_v41  ;;  %v1328_v47 = vadd.f32 %v1327_v44, %v2977_v19 }
 0x1ab   : > { %v1594_v15 = vpop.f32.mrf.mxu0 }
 0x1ac   : > { %v1592_v45 = vadd.f32 %v1591_v61, %v1503_v30 }
 0x1ae   : > { %v1740_v46 = vadd.f32 %v3084_v17, %v1592_v45 }
 0x1af   : > { %v1416_v14 = vpop.f32.mrf.mxu2 }
 0x1b0   : > { %v1772_v49 = vmax.f32 %v1740_v46, 0.0  ;;  %v1417_v52 = vadd.f32 %v1416_v14, %v1328_v47  ;;  %v1505_v35 = vpop.f32.mrf.mxu3 }
 0x1b1   : > { %v1329_v53 = vpop.f32.mrf.mxu1 }
 0x1b2   : > { %v2626_v55 = vpack.c.bf16 %v1772_v49, %v1771_v48  ;;  %v1506_v38 = vadd.f32 %v1505_v35, %v1417_v52  ;;  %v1330_v13 = vadd.f32 %v1329_v53, %v2993_v31 }
 0x1b3   : > { %v1596_v56 = vpop.f32.mrf.mxu0 }
 0x1b4   : > { %2658 = vst [vmem:[%s3094_s4 + $0x58] sm:$0xff] %v2626_v55   ;;  %v1595_v37 = vadd.f32 %v1594_v15, %v1506_v38 }
 0x1b6   : > { %v1741_v10 = vadd.f32 %v3084_v17, %v1595_v37 }
 0x1b7   : > { %v1418_v40 = vpop.f32.mrf.mxu2 }
 0x1b8   : > { %v1419_v62 = vadd.f32 %v1418_v40, %v1330_v13  ;;  %v1507_v63 = vpop.f32.mrf.mxu3  ;;  %v1773_v4 = vmax.f32 %v1741_v10, 0.0 }
 0x1b9   : > { %v1332_v0 = vpop.f32.mrf.mxu1 }
 0x1ba   : > { %v1508_v57 = vadd.f32 %v1507_v63, %v1419_v62  ;;  %v1333_v2 = vadd.f32 %v1332_v0, %v3002_v39 }
 0x1bb   : > { %v1599_v19 = vpop.f32.mrf.mxu0 }
 0x1bc   : > { %v1597_v50 = vadd.f32 %v1596_v56, %v1508_v57 }
 0x1be   : > { %v1742_v1 = vadd.f32 %v3084_v17, %v1597_v50 }
 0x1bf   : > { %v1421_v3 = vpop.f32.mrf.mxu2 }
 0x1c0   : > { %v1774_v20 = vmax.f32 %v1742_v1, 0.0  ;;  %v1422_v5 = vadd.f32 %v1421_v3, %v1333_v2  ;;  %v1510_v31 = vpop.f32.mrf.mxu3 }
 0x1c1   : > { %v1334_v8 = vpop.f32.mrf.mxu1 }
 0x1c2   : > { %v2631_v9 = vpack.c.bf16 %v1774_v20, %v1773_v4  ;;  %v1511_v11 = vadd.f32 %v1510_v31, %v1422_v5  ;;  %v1335_v12 = vadd.f32 %v1334_v8, %v3018_v51 }
 0x1c3   : > { %v1601_v22 = vpop.f32.mrf.mxu0 }
 0x1c4   : > { %2659 = vst [vmem:[%s3094_s4 + $0x60] sm:$0xff] %v2631_v9   ;;  %v1600_v54 = vadd.f32 %v1599_v19, %v1511_v11 }
 0x1c6   : > { %v1743_v39 = vadd.f32 %v3084_v17, %v1600_v54 }
 0x1c7   : > { %v1423_v58 = vpop.f32.mrf.mxu2 }
 0x1c8   : > { %v1424_v24 = vadd.f32 %v1423_v58, %v1335_v12  ;;  %v1512_v25 = vpop.f32.mrf.mxu3  ;;  %v1775_v18 = vmax.f32 %v1743_v39, 0.0 }
 0x1c9   : > { %v1337_v23 = vpop.f32.mrf.mxu1 }
 0x1ca   : > { %v1513_v26 = vadd.f32 %v1512_v25, %v1424_v24  ;;  %v1338_v6 = vadd.f32 %v1337_v23, %v3027_v59 }
 0x1cb   : > { %v1604_v28 = vpop.f32.mrf.mxu0 }
 0x1cc   : > { %v1602_v27 = vadd.f32 %v1601_v22, %v1513_v26 }
 0x1ce   : > { %v1744_v29 = vadd.f32 %v3084_v17, %v1602_v27 }
 0x1cf   : > { %v1426_v32 = vpop.f32.mrf.mxu2 }
 0x1d0   : > { %v1776_v61 = vmax.f32 %v1744_v29, 0.0  ;;  %v1427_v33 = vadd.f32 %v1426_v32, %v1338_v6  ;;  %v1515_v51 = vpop.f32.mrf.mxu3 }
 0x1d1   : > { %v1339_v34 = vpop.f32.mrf.mxu1 }
 0x1d2   : > { %v2636_v42 = vpack.c.bf16 %v1776_v61, %v1775_v18  ;;  %v1516_v43 = vadd.f32 %v1515_v51, %v1427_v33  ;;  %v1340_v41 = vadd.f32 %v1339_v34, %v3043_v7 }
 0x1d3   : > { %v1606_v21 = vpop.f32.mrf.mxu0 }
 0x1d4   : > { %2660 = vst [vmem:[%s3094_s4 + $0x68] sm:$0xff] %v2636_v42   ;;  %v1605_v30 = vadd.f32 %v1604_v28, %v1516_v43 }
 0x1d6   : > { %v1745_v59 = vadd.f32 %v3084_v17, %v1605_v30 }
 0x1d7   : > { %v1428_v44 = vpop.f32.mrf.mxu2 }
 0x1d8   : > { %v1429_v15 = vadd.f32 %v1428_v44, %v1340_v41  ;;  %v1517_v60 = vpop.f32.mrf.mxu3  ;;  %v1777_v52 = vmax.f32 %v1745_v59, 0.0 }
 0x1d9   : > { %v1342_v45 = vpop.f32.mrf.mxu1 }
 0x1da   : > { %v1518_v46 = vadd.f32 %v1517_v60, %v1429_v15  ;;  %v1343_v48 = vadd.f32 %v1342_v45, %v3052_v16 }
 0x1db   : > { %v1609_v55 = vpop.f32.mrf.mxu0 }
 0x1dc   : > { %v1607_v47 = vadd.f32 %v1606_v21, %v1518_v46 }
 0x1de   : > { %v1746_v14 = vadd.f32 %v3084_v17, %v1607_v47 }
 0x1df   : > { %v1431_v49 = vpop.f32.mrf.mxu2 }
 0x1e0   : > { %v1778_v35 = vmax.f32 %v1746_v14, 0.0  ;;  %v1432_v53 = vadd.f32 %v1431_v49, %v1343_v48  ;;  %v1520_v7 = vpop.f32.mrf.mxu3 }
 0x1e1   : > { %v1344_v38 = vpop.f32.mrf.mxu1 }
 0x1e2   : > { %v2641_v56 = vpack.c.bf16 %v1778_v35, %v1777_v52  ;;  %v1521_v13 = vadd.f32 %v1520_v7, %v1432_v53  ;;  %v1345_v40 = vadd.f32 %v1344_v38, %v3068_v36 }
 0x1e3   : > { %v1611_v19 = vpop.f32.mrf.mxu0 }
 0x1e4   : > { %2661 = vst [vmem:[%s3094_s4 + $0x70] sm:$0xff] %v2641_v56   ;;  %v1610_v62 = vadd.f32 %v1609_v55, %v1521_v13 }
 0x1e6   : > { %v1747_v16 = vadd.f32 %v3084_v17, %v1610_v62 }
 0x1e7   : > { %v1433_v37 = vpop.f32.mrf.mxu2 }
 0x1e8   : > { %v1434_v63 = vadd.f32 %v1433_v37, %v1345_v40  ;;  %v1522_v0 = vpop.f32.mrf.mxu3  ;;  %v1779_v1 = vmax.f32 %v1747_v16, 0.0 }
 0x1ea   : > { %v1523_v57 = vadd.f32 %v1522_v0, %v1434_v63 }
 0x1ec   : > { %v1612_v10 = vadd.f32 %v1611_v19, %v1523_v57 }
 0x1ee   : > { %v1748_v50 = vadd.f32 %v3084_v17, %v1612_v10 }
 0x1f0   : > { %v1780_v2 = vmax.f32 %v1748_v50, 0.0 }
 0x1f2   : > { %v2646_v3 = vpack.c.bf16 %v1780_v2, %v1779_v1 }
 0x1f4   : > { %2662 = vst [vmem:[%s3094_s4 + $0x78] sm:$0xff] %v2646_v3  }
 0x1f5 PF: > { %s13_s14 = sadd.s32 1, %s2735_s14   ;;  %s3238_s12 = smov %s2731_s13 }
 0x1f6   : > { %p10_p5 = scmp.ge.s32.totalorder %s13_s14, 4   ;;  %s3239_s13 = smov %s3241_s15 }
 0x1f8   :  { %12 = sbr.rel (!%p10_p5) target bundleno = 2 (0x2), region = 76 }

// kernel: _lambda_.17
= control target key start
LH: loop header
LB: loop body
LE: loop exit
PB: predicated region body
PF: predicated region fallthrough
CT: control target
= control target key end

     0   :  { %s4206_s12 = smov 0   ;;  %s4208_s13 = smov 0   ;;  %s5303_s0 = inlined_call_operand.vmem [shape: bf16[2048,800], index: 0, kind: input, shape index: {}]   ;;  %s5304_s1 = inlined_call_operand.vmem [shape: bf16[800,128], index: 1, kind: input, shape index: {}]   ;;  %s5305_s2 = inlined_call_operand.vmem [shape: f32[1,128], index: 2, kind: input, shape index: {}]   ;;  %s5306_s3 = inlined_call_operand.vmem [shape: bf16[2048,128], index: 3, kind: output, shape index: {}]  }
   0x1   :  { %s4210_s14 = smov 0  }
   0x2 LB: > { %s32_s15 = sadd.s32 1, %s4180_s13  ;;  %p3023_p0 = scmp.ge.s32.totalorder %s4184_s14, 1  ;;  %s4184_s14 = sphi %s4210_s14, %s13_s14   ;;  %s4180_s13 = sphi %s4208_s13, %s5340_s13   ;;  %s4176_s12 = sphi %s4206_s12, %s5339_s12  }
   0x3   : > { %p34_p1 = scmp.ge.s32.totalorder %s32_s15, 8  ;;  %p191_p2 = scmp.lt.s32.totalorder %s4184_s14, 9 }
   0x5   : > { %s5342_s15 = smov (%p34_p1, %s32_s15), 0  ;;  %p192_p3 = pnand %p3023_p0, %p191_p2 }
   0x6   : > { %s3024_s7 = sshll.u32 (!%p192_p3), %s4176_s12, 5 }
   0x7   : > { %195 = sbr.rel (%p192_p3) target bundleno = 657 (0x291), region = 32  ;;  %p236_p4 = scmp.lt.s32.totalorder (!%p192_p3), %s3024_s7, 255 }
   0xc   : > { %v3845_v0 = vld [vmem:[%s5304_s1 + $0x38] sm:$0xff]  ;;  %v3844_v3 = vld [vmem:[%s5304_s1 + $0x30] sm:$0xff]  ;;  %v3843_v6 = vld [vmem:[%s5304_s1 + $0x28] sm:$0xff]  ;;  %s5344_s7 = smov (!%p236_p4, %s3024_s7), 255  ;;  %vm1424_vm0 = vcmask 261120  }
   0xd   : > { %v4232_v1 = vld [vmem:[%s5304_s1 + $0x78] sm:$0xff]  ;;  %1473 = vmatpush.bf16.msra.mxu0 %v3845_v0  ;;  %3983 = vmatpush.bf16.msra.mxu3 %v3845_v0  ;;  %v4247_v4 = vld [vmem:[%s5304_s1 + $0x70] sm:$0xff]  ;;  %v4262_v7 = vld [vmem:[%s5304_s1 + $0x68] sm:$0xff]  ;;  %s4007_s25 = smul.u32 28, %s5344_s7  ;;  %s3027_s5 = sshll.u32 %s5344_s7, 2 }
   0xe   : > { %v4237_v2 = vld [vmem:[%s5304_s1 + $0xb8] sm:$0xff]  ;;  %1562 = vmatpush.bf16.msra.mxu1 %v4232_v1  ;;  %v4252_v5 = vld [vmem:[%s5304_s1 + $0xb0] sm:$0xff]  ;;  %v4267_v8 = vld [vmem:[%s5304_s1 + $0xa8] sm:$0xff]  ;;  %s4829_s9 = scalar_lea.vmem %s5306_s3, %s3027_s5 }
   0xf   : > { %1651 = vmatpush.bf16.msra.mxu2 %v4237_v2  ;;  %v3842_v9 = vld [vmem:[%s5304_s1 + $0x20] sm:$0xff]  ;;  %v3841_v12 = vld [vmem:[%s5304_s1 + $0x18] sm:$0xff]  ;;  %v3840_v15 = vld [vmem:[%s5304_s1 + $0x10] sm:$0xff]  ;;  %s4324_s8 = scalar_lea.vmem %s5303_s0, %s4007_s25 }
  0x10   : > { %v4278_v10 = vld [vmem:[%s5304_s1 + $0x60] sm:$0xff]  ;;  %v4295_v13 = vld [vmem:[%s5304_s1 + $0x58] sm:$0xff]  ;;  %v4311_v16 = vld [vmem:[%s5304_s1 + $0x50] sm:$0xff] }
  0x11   : > { %1474 = vmatpush.bf16.msra.mxu0 %v3844_v3  ;;  %3984 = vmatpush.bf16.msra.mxu3 %v3844_v3  ;;  %v4283_v11 = vld [vmem:[%s5304_s1 + $0xa0] sm:$0xff]  ;;  %v4300_v14 = vld [vmem:[%s5304_s1 + $0x98] sm:$0xff]  ;;  %v4316_v17 = vld [vmem:[%s5304_s1 + $0x90] sm:$0xff] }
  0x12   : > { %1563 = vmatpush.bf16.msra.mxu1 %v4247_v4  ;;  %v3839_v18 = vld [vmem:[%s5304_s1 + $0x8] sm:$0xff]  ;;  %v3838_v21 = vld [vmem:[%s5304_s1] sm:$0xff]  ;;  %v3729_v25 = vld [vmem:[%s4324_s8 + $0x18] sm:$0xf0] }
  0x13   : > { %1652 = vmatpush.bf16.msra.mxu2 %v4252_v5  ;;  %v4331_v19 = vld [vmem:[%s5304_s1 + $0x48] sm:$0xff]  ;;  %v4344_v22 = vld [vmem:[%s5304_s1 + $0x40] sm:$0xff]  ;;  %v3813_v27 = vld [vmem:[%s4324_s8 + $0x2b8] sm:$0xf0] }
  0x14   : > { %v4336_v20 = vld [vmem:[%s5304_s1 + $0x88] sm:$0xff]  ;;  %v4349_v23 = vld [vmem:[%s5304_s1 + $0x80] sm:$0xff]  ;;  %v3877_v37 = vld [vmem:[%s5304_s1 + $0x138] sm:$0xff] }
  0x15   : > { %1475 = vmatpush.bf16.msra.mxu0 %v3843_v6  ;;  %3985 = vmatpush.bf16.msra.mxu3 %v3843_v6  ;;  %v3030_v24 = vld [vmem:[%s4324_s8] sm:$0xf]  ;;  %v3726_v28 = vld [vmem:[%s4324_s8 + $0x4] sm:$0xf]  ;;  %v3038_v30 = vld [vmem:[%s4324_s8 + $0x8] sm:$0xf] }
  0x16   : > { %1564 = vmatpush.bf16.msra.mxu1 %v4262_v7  ;;  %v3366_v26 = vld [vmem:[%s4324_s8 + $0x2a0] sm:$0xf]  ;;  %v3730_v31 = vld [vmem:[%s4324_s8 + $0x20] sm:$0xf0]  ;;  %v3887_v32 = vld [vmem:[%s5304_s1 + $0x188] sm:$0xff]  ;;  %v3031_v33 = vor.u32 %v3729_v25, %v3030_v24 }
  0x17   : > { %1653 = vmatpush.bf16.msra.mxu2 %v4267_v8  ;;  %v3032_v29 = vld [vmem:[%s4324_s8 + $0x1c] sm:$0xf0]  ;;  %v3367_v34 = vor.u32 %v3813_v27, %v3366_v26  ;;  %v3039_v36 = vor.u32 %v3730_v31, %v3038_v30  ;;  %v3885_v38 = vld [vmem:[%s5304_s1 + $0x178] sm:$0xff]  ;;  %v3876_v39 = vld [vmem:[%s5304_s1 + $0x130] sm:$0xff] }
  0x18   : > { %v3035_v35 = vor.u32 %v3726_v28, %v3032_v29  ;;  %v3884_v40 = vld [vmem:[%s5304_s1 + $0x170] sm:$0xff]  ;;  %v3058_v41 = vld [vmem:[%s4324_s8 + $0x38] sm:$0xf]  ;;  %v3733_v45 = vld [vmem:[%s4324_s8 + $0x3c] sm:$0xf] }
  0x19   : > { %1476 = vmatpush.bf16.msra.mxu0 %v3842_v9  ;;  %3986 = vmatpush.bf16.msra.mxu3 %v3842_v9  ;;  %v3736_v42 = vld [vmem:[%s4324_s8 + $0x50] sm:$0xf0]  ;;  %v3394_v43 = vld [vmem:[%s4324_s8 + $0x2d8] sm:$0xf]  ;;  %v3066_v47 = vld [vmem:[%s4324_s8 + $0x40] sm:$0xf] }
  0x1a   : > { %1565 = vmatpush.bf16.msra.mxu1 %v4278_v10  ;;  %v3820_v44 = vld [vmem:[%s4324_s8 + $0x2f0] sm:$0xf0]  ;;  %v3060_v46 = vld [vmem:[%s4324_s8 + $0x54] sm:$0xf0]  ;;  %v3737_v48 = vld [vmem:[%s4324_s8 + $0x58] sm:$0xf0]  ;;  %v3059_v49 = vor.u32 %v3736_v42, %v3058_v41 }
  0x1b   : > { %1654 = vmatpush.bf16.msra.mxu2 %v4283_v11  ;;  %v3395_v50 = vor.u32 %v3820_v44, %v3394_v43  ;;  %v3063_v51 = vor.u32 %v3733_v45, %v3060_v46  ;;  %v3067_v52 = vor.u32 %v3737_v48, %v3066_v47  ;;  %v3875_v53 = vld [vmem:[%s5304_s1 + $0x128] sm:$0xff]  ;;  %v3086_v55 = vld [vmem:[%s4324_s8 + $0x70] sm:$0xf]  ;;  %v3740_v59 = vld [vmem:[%s4324_s8 + $0x74] sm:$0xf] }
  0x1c   : > { %v3883_v54 = vld [vmem:[%s5304_s1 + $0x168] sm:$0xff]  ;;  %v3422_v57 = vld [vmem:[%s4324_s8 + $0x310] sm:$0xf]  ;;  %v3094_v61 = vld [vmem:[%s4324_s8 + $0x78] sm:$0xf] }
  0x1d   : > { %1477 = vmatpush.bf16.msra.mxu0 %v3841_v12  ;;  %3987 = vmatpush.bf16.msra.mxu3 %v3841_v12  ;;  %v3743_v56 = vld [vmem:[%s4324_s8 + $0x88] sm:$0xf0]  ;;  %v3088_v60 = vld [vmem:[%s4324_s8 + $0x8c] sm:$0xf0]  ;;  %v3744_v62 = vld [vmem:[%s4324_s8 + $0x90] sm:$0xf0] }
  0x1e   : > { %1566 = vmatpush.bf16.msra.mxu1 %v4295_v13  ;;  %v3827_v58 = vld [vmem:[%s4324_s8 + $0x328] sm:$0xf0]  ;;  %v3087_v63 = vor.u32 %v3743_v56, %v3086_v55  ;;  %v3095_v3 = vor.u32 %v3744_v62, %v3094_v61  ;;  %v3750_v6 = vld [vmem:[%s4324_s8 + $0xc0] sm:$0xf0]  ;;  %v3116_v12 = vld [vmem:[%s4324_s8 + $0xc4] sm:$0xf0] }
  0x1f   : > { %1655 = vmatpush.bf16.msra.mxu2 %v4300_v14  ;;  %v3423_v0 = vor.u32 %v3827_v58, %v3422_v57  ;;  %v3834_v9 = vld [vmem:[%s4324_s8 + $0x360] sm:$0xf0]  ;;  %v3368_v24 = vld [vmem:[%s4324_s8 + $0x2bc] sm:$0xf0]  ;;  %v3150_v26 = vld [vmem:[%s4324_s8 + $0xe8] sm:$0xf] }
  0x20   : > { %v3144_v25 = vld [vmem:[%s4324_s8 + $0xfc] sm:$0xf0]  ;;  %v3758_v27 = vld [vmem:[%s4324_s8 + $0x100] sm:$0xf0]  ;;  %v3881_v31 = vld [vmem:[%s5304_s1 + $0x158] sm:$0xff] }
  0x21   : > { %1478 = vmatpush.bf16.msra.mxu0 %v3840_v15  ;;  %3988 = vmatpush.bf16.msra.mxu3 %v3840_v15  ;;  %v3751_v15 = vld [vmem:[%s4324_s8 + $0xc8] sm:$0xf0]  ;;  %v3151_v30 = vor.u32 %v3758_v27, %v3150_v26  ;;  %v3198_v44 = vld [vmem:[%s4324_s8 + $0x150] sm:$0xf]  ;;  %v3768_v46 = vld [vmem:[%s4324_s8 + $0x154] sm:$0xf] }
  0x22   : > { %1567 = vmatpush.bf16.msra.mxu1 %v4311_v16  ;;  %v3771_v45 = vld [vmem:[%s4324_s8 + $0x168] sm:$0xf0]  ;;  %v3824_v47 = vld [vmem:[%s4324_s8 + $0x314] sm:$0xf]  ;;  %v3424_v48 = vld [vmem:[%s4324_s8 + $0x32c] sm:$0xf0] }
  0x23   : > { %1656 = vmatpush.bf16.msra.mxu2 %v4316_v17  ;;  %v3869_v56 = vld [vmem:[%s5304_s1 + $0xf8] sm:$0xff]  ;;  %v3872_v57 = vld [vmem:[%s5304_s1 + $0x110] sm:$0xff]  ;;  %v3778_v61 = vld [vmem:[%s4324_s8 + $0x1a0] sm:$0xf0] }
  0x24   : > { %v3880_v58 = vld [vmem:[%s5304_s1 + $0x150] sm:$0xff]  ;;  %v3775_v62 = vld [vmem:[%s4324_s8 + $0x18c] sm:$0xf] }
  0x25   : > { %1479 = vmatpush.bf16.msra.mxu0 %v3839_v18  ;;  %3989 = vmatpush.bf16.msra.mxu3 %v3839_v18 }
  0x26   : > { %1568 = vmatpush.bf16.msra.mxu1 %v4331_v19 }
  0x27   : > { %1657 = vmatpush.bf16.msra.mxu2 %v4336_v20 }
  0x29   : > { %1480 = vmatpush.bf16.msra.mxu0 %v3838_v21  ;;  %3990 = vmatpush.bf16.msra.mxu3 %v3838_v21  ;;  %v3754_v21 = vld [vmem:[%s4324_s8 + $0xe4] sm:$0xf] }
  0x2a   : > { %1569 = vmatpush.bf16.msra.mxu1 %v4344_v22 }
  0x2b   : > { %1658 = vmatpush.bf16.msra.mxu2 %v4349_v23 }
  0x2c   : > { %1481 = vmatmul.bf16.vlgmr.msra.gmra.mxu0 %v3031_v33  ;;  %1541 = vmatmul.bf16.vlgmr.msra.gmra.mxu3 %v3367_v34  ;;  %v3764_v33 = vld [vmem:[%s4324_s8 + $0x130] sm:$0xf0]  ;;  %v3761_v34 = vld [vmem:[%s4324_s8 + $0x11c] sm:$0xf] }
  0x2d   : > { %3991 = vmatpush.bf16.msrb.mxu3 %v4232_v1  ;;  %1570 = vmatmul.bf16.vlgmr.msra.gmra.mxu1 %v3035_v35  ;;  %v3091_v1 = vor.u32 %v3740_v59, %v3088_v60  ;;  %v3817_v35 = vld [vmem:[%s4324_s8 + $0x2dc] sm:$0xf]  ;;  %v3868_v59 = vld [vmem:[%s5304_s1 + $0xf0] sm:$0xff]  ;;  %v3226_v60 = vld [vmem:[%s4324_s8 + $0x188] sm:$0xf] }
  0x2e   : > { %1659 = vmatmul.bf16.vlgmr.msra.gmra.mxu2 %v3039_v36  ;;  %1829 = vmatpush.bf16.msrb.mxu0 %v3877_v37  ;;  %v3396_v36 = vld [vmem:[%s4324_s8 + $0x2f4] sm:$0xf0] }
  0x2f   : > { %2013 = vmatpush.bf16.msrb.mxu2 %v3887_v32  ;;  %1918 = vmatpush.bf16.msrb.mxu1 %v3885_v38  ;;  %v3170_v32 = vld [vmem:[%s4324_s8 + $0x118] sm:$0xf]  ;;  %v3178_v38 = vld [vmem:[%s4324_s8 + $0x120] sm:$0xf]  ;;  %v3399_v41 = vor.u32 %v3817_v35, %v3396_v36  ;;  %v3792_v36 = vld [vmem:[%s4324_s8 + $0x210] sm:$0xf0] }
  0x30   : > { %v3172_v37 = vld [vmem:[%s4324_s8 + $0x134] sm:$0xf0] }
  0x31   : > { %3992 = vmatpush.bf16.msrb.mxu3 %v4247_v4  ;;  %v3114_v4 = vld [vmem:[%s4324_s8 + $0xa8] sm:$0xf]  ;;  %v3175_v42 = vor.u32 %v3761_v34, %v3172_v37  ;;  %v3864_v34 = vld [vmem:[%s5304_s1 + $0xd0] sm:$0xff]  ;;  %v3282_v35 = vld [vmem:[%s4324_s8 + $0x1f8] sm:$0xf] }
  0x32   : > { %1830 = vmatpush.bf16.msrb.mxu0 %v3876_v39  ;;  %v3765_v39 = vld [vmem:[%s4324_s8 + $0x138] sm:$0xf0] }
  0x33   : > { %1919 = vmatpush.bf16.msrb.mxu1 %v3884_v40  ;;  %v3171_v40 = vor.u32 %v3764_v33, %v3170_v32  ;;  %v3179_v43 = vor.u32 %v3765_v39, %v3178_v38  ;;  %v3789_v37 = vld [vmem:[%s4324_s8 + $0x1fc] sm:$0xf]  ;;  %v3402_v38 = vld [vmem:[%s4324_s8 + $0x2e0] sm:$0xf] }
  0x34   : > { %v3821_v39 = vld [vmem:[%s4324_s8 + $0x2f8] sm:$0xf0] }
  0x35   : > { %3993 = vmatpush.bf16.msrb.mxu3 %v4262_v7  ;;  %v3450_v7 = vld [vmem:[%s4324_s8 + $0x348] sm:$0xf] }
  0x36   : > { %1831 = vmatpush.bf16.msrb.mxu0 %v3875_v53  ;;  %v3427_v53 = vor.u32 %v3824_v47, %v3424_v48 }
  0x37   : > { %1920 = vmatpush.bf16.msrb.mxu1 %v3883_v54 }
  0x39   : > { %3994 = vmatpush.bf16.msrb.mxu3 %v4278_v10  ;;  %v3747_v10 = vld [vmem:[%s4324_s8 + $0xac] sm:$0xf] }
  0x3a   : > { %v3119_v18 = vor.u32 %v3747_v10, %v3116_v12  ;;  %v3867_v12 = vld [vmem:[%s5304_s1 + $0xe8] sm:$0xff] }
  0x3c   : > { %1486 = vmatmul.bf16.gmra.mxu0 %v3059_v49  ;;  %1546 = vmatmul.bf16.gmra.mxu3 %v3395_v50  ;;  %v3200_v49 = vld [vmem:[%s4324_s8 + $0x16c] sm:$0xf0]  ;;  %v3206_v50 = vld [vmem:[%s4324_s8 + $0x158] sm:$0xf] }
  0x3d   : > { %3995 = vmatpush.bf16.msrb.mxu3 %v4295_v13  ;;  %1575 = vmatmul.bf16.gmra.mxu1 %v3063_v51  ;;  %v3122_v13 = vld [vmem:[%s4324_s8 + $0xb0] sm:$0xf]  ;;  %v3772_v51 = vld [vmem:[%s4324_s8 + $0x170] sm:$0xf0]  ;;  %v3203_v54 = vor.u32 %v3768_v46, %v3200_v49  ;;  %v3403_v46 = vor.u32 %v3821_v39, %v3402_v38 }
  0x3e   : > { %1664 = vmatmul.bf16.gmra.mxu2 %v3067_v52  ;;  %v3199_v52 = vor.u32 %v3771_v45, %v3198_v44  ;;  %v3207_v55 = vor.u32 %v3772_v51, %v3206_v50  ;;  %v3283_v45 = vor.u32 %v3792_v36, %v3282_v35 }
  0x41   : > { %3996 = vmatpush.bf16.msrb.mxu3 %v4311_v16  ;;  %v3451_v16 = vor.u32 %v3834_v9, %v3450_v7 }
  0x45   : > { %3997 = vmatpush.bf16.msrb.mxu3 %v4331_v19  ;;  %v3757_v19 = vld [vmem:[%s4324_s8 + $0xf8] sm:$0xf0] }
  0x49   : > { %3998 = vmatpush.bf16.msrb.mxu3 %v4344_v22  ;;  %v3810_v22 = vld [vmem:[%s4324_s8 + $0x2a4] sm:$0xf] }
  0x4a   : > { %v3371_v29 = vor.u32 %v3810_v22, %v3368_v24 }
  0x4c   : > { %1491 = vmatmul.bf16.gmra.mxu0 %v3087_v63  ;;  %1551 = vmatmul.bf16.gmra.mxu3 %v3423_v0  ;;  %v3831_v63 = vld [vmem:[%s4324_s8 + $0x34c] sm:$0xf]  ;;  %v3452_v0 = vld [vmem:[%s4324_s8 + $0x364] sm:$0xf0] }
  0x4d   : > { %3999 = vmatpush.bf16.msra.mxu3 %v4237_v2  ;;  %1580 = vmatmul.bf16.gmra.mxu1 %v3091_v1  ;;  %v3115_v2 = vor.u32 %v3750_v6, %v3114_v4  ;;  %v3228_v1 = vld [vmem:[%s4324_s8 + $0x1a4] sm:$0xf0]  ;;  %v3779_v4 = vld [vmem:[%s4324_s8 + $0x1a8] sm:$0xf0]  ;;  %v3227_v6 = vor.u32 %v3778_v61, %v3226_v60  ;;  %v3455_v7 = vor.u32 %v3831_v63, %v3452_v0  ;;  %v3310_v63 = vld [vmem:[%s4324_s8 + $0x230] sm:$0xf] }
  0x4e   : > { %1669 = vmatmul.bf16.gmra.mxu2 %v3095_v3  ;;  %v3234_v3 = vld [vmem:[%s4324_s8 + $0x190] sm:$0xf]  ;;  %v3231_v9 = vor.u32 %v3775_v62, %v3228_v1  ;;  %v3862_v62 = vld [vmem:[%s5304_s1 + $0xc0] sm:$0xff]  ;;  %v3799_v0 = vld [vmem:[%s4324_s8 + $0x248] sm:$0xf0] }
  0x4f   : > { %v3235_v10 = vor.u32 %v3779_v4, %v3234_v3  ;;  %v3796_v1 = vld [vmem:[%s4324_s8 + $0x234] sm:$0xf]  ;;  %v3430_v3 = vld [vmem:[%s4324_s8 + $0x318] sm:$0xf] }
  0x50   : > { %v3828_v4 = vld [vmem:[%s4324_s8 + $0x330] sm:$0xf0] }
  0x51   : > { %4000 = vmatpush.bf16.msra.mxu3 %v4252_v5  ;;  %v3123_v5 = vor.u32 %v3751_v15, %v3122_v13  ;;  %v3866_v13 = vld [vmem:[%s5304_s1 + $0xe0] sm:$0xff]  ;;  %v3871_v15 = vld [vmem:[%s5304_s1 + $0x108] sm:$0xff] }
  0x55   : > { %4001 = vmatpush.bf16.msra.mxu3 %v4267_v8  ;;  %v3874_v8 = vld [vmem:[%s5304_s1 + $0x120] sm:$0xff] }
  0x56   : > { %1832 = vmatpush.bf16.msrb.mxu0 %v3874_v8  ;;  %v3374_v8 = vld [vmem:[%s4324_s8 + $0x2a8] sm:$0xf] }
  0x59   : > { %4002 = vmatpush.bf16.msra.mxu3 %v4283_v11  ;;  %v3882_v11 = vld [vmem:[%s5304_s1 + $0x160] sm:$0xff] }
  0x5a   : > { %1921 = vmatpush.bf16.msrb.mxu1 %v3882_v11  ;;  %v3814_v11 = vld [vmem:[%s4324_s8 + $0x2c0] sm:$0xf0] }
  0x5b   : > { %v3375_v24 = vor.u32 %v3814_v11, %v3374_v8 }
  0x5c   : > { %1496 = vmatmul.bf16.gmra.mxu0 %v3115_v2  ;;  %1556 = vmatmul.bf16.gmra.mxu3 %v3451_v16  ;;  %v3879_v2 = vld [vmem:[%s5304_s1 + $0x148] sm:$0xff]  ;;  %v3254_v16 = vld [vmem:[%s4324_s8 + $0x1c0] sm:$0xf] }
  0x5d   : > { %4003 = vmatpush.bf16.msra.mxu3 %v4300_v14  ;;  %1585 = vmatmul.bf16.gmra.mxu1 %v3119_v18  ;;  %v3142_v14 = vld [vmem:[%s4324_s8 + $0xe0] sm:$0xf]  ;;  %v3785_v18 = vld [vmem:[%s4324_s8 + $0x1d8] sm:$0xf0] }
  0x5e   : > { %1674 = vmatmul.bf16.gmra.mxu2 %v3123_v5  ;;  %v3143_v28 = vor.u32 %v3757_v19, %v3142_v14  ;;  %1922 = vmatpush.bf16.msrb.mxu1 %v3881_v31  ;;  %v3782_v5 = vld [vmem:[%s4324_s8 + $0x1c4] sm:$0xf]  ;;  %v3256_v14 = vld [vmem:[%s4324_s8 + $0x1dc] sm:$0xf0]  ;;  %v3262_v19 = vld [vmem:[%s4324_s8 + $0x1c8] sm:$0xf]  ;;  %v3255_v22 = vor.u32 %v3785_v18, %v3254_v16 }
  0x5f   : > { %v3259_v26 = vor.u32 %v3782_v5, %v3256_v14 }
  0x61   : > { %4004 = vmatpush.bf16.msra.mxu3 %v4316_v17  ;;  %v3147_v17 = vor.u32 %v3754_v21, %v3144_v25  ;;  %v3786_v21 = vld [vmem:[%s4324_s8 + $0x1e0] sm:$0xf0] }
  0x62   : > { %1923 = vmatpush.bf16.msrb.mxu1 %v3880_v58  ;;  %v3263_v27 = vor.u32 %v3786_v21, %v3262_v19 }
  0x65   : > { %4005 = vmatpush.bf16.msra.mxu3 %v4336_v20  ;;  %v3886_v20 = vld [vmem:[%s5304_s1 + $0x180] sm:$0xff] }
  0x66   : > { %2014 = vmatpush.bf16.msrb.mxu2 %v3886_v20  ;;  %1924 = vmatpush.bf16.msrb.mxu1 %v3879_v2 }
  0x69   : > { %4006 = vmatpush.bf16.msra.mxu3 %v4349_v23  ;;  %v3873_v23 = vld [vmem:[%s5304_s1 + $0x118] sm:$0xff] }
  0x6a   : > { %1833 = vmatpush.bf16.msrb.mxu0 %v3873_v23 }
  0x6c   : > { %1501 = vmatmul.bf16.gmra.mxu0 %v3143_v28  ;;  %1630 = vmatmul.bf16.vlgmr.msrb.gmra.mxu3 %v3371_v29 }
  0x6d   : > { %1590 = vmatmul.bf16.gmra.mxu1 %v3147_v17  ;;  %1740 = vmatpush.bf16.msrb.mxu3 %v3869_v56  ;;  %v3865_v17 = vld [vmem:[%s5304_s1 + $0xd8] sm:$0xff] }
  0x6e   : > { %1679 = vmatmul.bf16.gmra.mxu2 %v3151_v30  ;;  %1834 = vmatpush.bf16.msrb.mxu0 %v3872_v57 }
  0x71   : > { %1741 = vmatpush.bf16.msrb.mxu3 %v3868_v59 }
  0x72   : > { %1835 = vmatpush.bf16.msrb.mxu0 %v3871_v15  ;;  %v3431_v15 = vor.u32 %v3828_v4, %v3430_v3 }
  0x75   : > { %1742 = vmatpush.bf16.msrb.mxu3 %v3867_v12 }
  0x79   : > { %1743 = vmatpush.bf16.msrb.mxu3 %v3866_v13  ;;  %v3311_v13 = vor.u32 %v3799_v0, %v3310_v63 }
  0x7c   : > { %1506 = vmatmul.bf16.gmra.mxu0 %v3171_v40  ;;  %1635 = vmatmul.bf16.gmra.mxu3 %v3399_v41  ;;  %v3284_v40 = vld [vmem:[%s4324_s8 + $0x214] sm:$0xf0]  ;;  %v3290_v41 = vld [vmem:[%s4324_s8 + $0x200] sm:$0xf] }
  0x7d   : > { %1595 = vmatmul.bf16.gmra.mxu1 %v3175_v42  ;;  %1744 = vmatpush.bf16.msrb.mxu3 %v3865_v17  ;;  %v3793_v42 = vld [vmem:[%s4324_s8 + $0x218] sm:$0xf0]  ;;  %v3287_v49 = vor.u32 %v3789_v37, %v3284_v40  ;;  %v3835_v17 = vld [vmem:[%s4324_s8 + $0x368] sm:$0xf0] }
  0x7e   : > { %1684 = vmatmul.bf16.gmra.mxu2 %v3179_v43  ;;  %v3291_v50 = vor.u32 %v3793_v42, %v3290_v41 }
  0x81   : > { %1745 = vmatpush.bf16.msrb.mxu3 %v3864_v34 }
  0x8c   : > { %1511 = vmatmul.bf16.gmra.mxu0 %v3199_v52  ;;  %1640 = vmatmul.bf16.gmra.mxu3 %v3427_v53  ;;  %v3863_v53 = vld [vmem:[%s5304_s1 + $0xc8] sm:$0xff] }
  0x8d   : > { %1600 = vmatmul.bf16.gmra.mxu1 %v3203_v54  ;;  %v3870_v54 = vld [vmem:[%s5304_s1 + $0x100] sm:$0xff]  ;;  %1746 = vmatpush.bf16.msrb.mxu3 %v3863_v53  ;;  %v3046_v53 = vld [vmem:[%s4324_s8 + $0x10] sm:$0xf] }
  0x8e   : > { %1689 = vmatmul.bf16.gmra.mxu2 %v3207_v55  ;;  %v3878_v55 = vld [vmem:[%s5304_s1 + $0x140] sm:$0xff]  ;;  %1836 = vmatpush.bf16.msrb.mxu0 %v3870_v54  ;;  %v3731_v54 = vld [vmem:[%s4324_s8 + $0x28] sm:$0xf0] }
  0x8f   : > { %1925 = vmatpush.bf16.msrb.mxu1 %v3878_v55  ;;  %v3054_v55 = vld [vmem:[%s4324_s8 + $0x18] sm:$0xf]  ;;  %v3047_v0 = vor.u32 %v3731_v54, %v3046_v53  ;;  %v3745_v53 = vld [vmem:[%s4324_s8 + $0x98] sm:$0xf0]  ;;  %v3110_v54 = vld [vmem:[%s4324_s8 + $0x88] sm:$0xf] }
  0x91   : > { %1747 = vmatpush.bf16.msrb.mxu3 %v3862_v62 }
  0x9c   : > { %1516 = vmatmul.bf16.gmra.mxu0 %v3227_v6  ;;  %1645 = vmatmul.bf16.gmra.mxu3 %v3455_v7  ;;  %v3312_v6 = vld [vmem:[%s4324_s8 + $0x24c] sm:$0xf0]  ;;  %v3318_v7 = vld [vmem:[%s4324_s8 + $0x238] sm:$0xf] }
  0x9d   : > { %1605 = vmatmul.bf16.gmra.mxu1 %v3231_v9  ;;  %v3800_v9 = vld [vmem:[%s4324_s8 + $0x250] sm:$0xf0]  ;;  %v3315_v18 = vor.u32 %v3796_v1, %v3312_v6 }
  0x9e   : > { %1694 = vmatmul.bf16.gmra.mxu2 %v3235_v10  ;;  %v3319_v5 = vor.u32 %v3800_v9, %v3318_v7 }
  0xa9   : > { %v1482_v25 = vpop.f32.mrf.mxu0 }
  0xaa   : > { %v1571_v28 = vpop.f32.mrf.mxu1 }
  0xab   : > { %v1572_v29 = vadd.f32 %v1571_v28, %v1482_v25  ;;  %v3803_v28 = vld [vmem:[%s4324_s8 + $0x26c] sm:$0xf] }
  0xac   : > { %1521 = vmatmul.bf16.gmra.mxu0 %v3255_v22  ;;  %1719 = vmatmul.bf16.vlgmr.msra.gmra.mxu3 %v3375_v24 }
  0xad   : > { %1610 = vmatmul.bf16.gmra.mxu1 %v3259_v26  ;;  %v3338_v26 = vld [vmem:[%s4324_s8 + $0x268] sm:$0xf] }
  0xae   : > { %1699 = vmatmul.bf16.gmra.mxu2 %v3263_v27  ;;  %v3806_v27 = vld [vmem:[%s4324_s8 + $0x280] sm:$0xf0] }
  0xaf   : > { %v4506_v30 = vpop.f32.mrf.mxu3  ;;  %v3339_v35 = vor.u32 %v3806_v27, %v3338_v26  ;;  %v3739_v26 = vld [vmem:[%s4324_s8 + $0x68] sm:$0xf0] }
  0xb0   : > { %v3735_v27 = vld [vmem:[%s4324_s8 + $0x4c] sm:$0xf] }
  0xb1   : > { %v1660_v20 = vpop.f32.mrf.mxu2  ;;  %v1484_v31 = vpop.f32.mrf.mxu0 }
  0xb2   : > { %v4508_v23 = vadd.f32 %v1660_v20, %v1572_v29  ;;  %v1573_v32 = vpop.f32.mrf.mxu1  ;;  %v3458_v29 = vld [vmem:[%s4324_s8 + $0x350] sm:$0xf]  ;;  %v3340_v20 = vld [vmem:[%s4324_s8 + $0x284] sm:$0xf0] }
  0xb3   : > { %v1574_v33 = vadd.f32 %v1573_v32, %v1484_v31  ;;  %v3346_v31 = vld [vmem:[%s4324_s8 + $0x270] sm:$0xf]  ;;  %v3807_v32 = vld [vmem:[%s4324_s8 + $0x288] sm:$0xf0]  ;;  %v3459_v36 = vor.u32 %v3835_v17, %v3458_v29  ;;  %v3343_v39 = vor.u32 %v3803_v28, %v3340_v20  ;;  %v3076_v28 = vld [vmem:[%s4324_s8 + $0x64] sm:$0xf0] }
  0xb4   : > { %v3347_v40 = vor.u32 %v3807_v32, %v3346_v31 }
  0xb7   : > { %v4521_v43 = vpop.f32.mrf.mxu3 }
  0xb9   : > { %v1662_v44 = vpop.f32.mrf.mxu2  ;;  %v1487_v48 = vpop.f32.mrf.mxu0 }
  0xba   : > { %v4523_v47 = vadd.f32 %v1662_v44, %v1574_v33  ;;  %v1576_v51 = vpop.f32.mrf.mxu1 }
  0xbb   : > { %v1577_v52 = vadd.f32 %v1576_v51, %v1487_v48  ;;  %v3727_v51 = vld [vmem:[%s4324_s8 + $0xc] sm:$0xf] }
  0xbc   : > { %1526 = vmatmul.bf16.gmra.mxu0 %v3283_v45  ;;  %1724 = vmatmul.bf16.gmra.mxu3 %v3403_v46 }
  0xbd   : > { %1615 = vmatmul.bf16.gmra.mxu1 %v3287_v49 }
  0xbe   : > { %1704 = vmatmul.bf16.gmra.mxu2 %v3291_v50 }
  0xbf   : > { %v4534_v56 = vpop.f32.mrf.mxu3 }
  0xc1   : > { %v1665_v57 = vpop.f32.mrf.mxu2  ;;  %v1489_v59 = vpop.f32.mrf.mxu0 }
  0xc2   : > { %v4536_v58 = vadd.f32 %v1665_v57, %v1577_v52  ;;  %v1578_v60 = vpop.f32.mrf.mxu1  ;;  %v3040_v52 = vld [vmem:[%s4324_s8 + $0x24] sm:$0xf0]  ;;  %v3732_v57 = vld [vmem:[%s4324_s8 + $0x30] sm:$0xf0] }
  0xc3   : > { %v1579_v61 = vadd.f32 %v1578_v60, %v1489_v59  ;;  %v3728_v59 = vld [vmem:[%s4324_s8 + $0x14] sm:$0xf]  ;;  %v3048_v60 = vld [vmem:[%s4324_s8 + $0x2c] sm:$0xf0]  ;;  %v3043_v63 = vor.u32 %v3727_v51, %v3040_v52  ;;  %v3055_v4 = vor.u32 %v3732_v57, %v3054_v55  ;;  %v3096_v51 = vld [vmem:[%s4324_s8 + $0x94] sm:$0xf0] }
  0xc4   : > { %v3051_v6 = vor.u32 %v3728_v59, %v3048_v60  ;;  %v3102_v52 = vld [vmem:[%s4324_s8 + $0x80] sm:$0xf]  ;;  %v3746_v55 = vld [vmem:[%s4324_s8 + $0xa0] sm:$0xf0] }
  0xc5   : > { %v3742_v57 = vld [vmem:[%s4324_s8 + $0x84] sm:$0xf]  ;;  %v3104_v59 = vld [vmem:[%s4324_s8 + $0x9c] sm:$0xf0] }
  0xc7   : > { %v4549_v10 = vpop.f32.mrf.mxu3 }
  0xc9   : > { %v1667_v12 = vpop.f32.mrf.mxu2  ;;  %v1492_v16 = vpop.f32.mrf.mxu0 }
  0xca   : > { %v4551_v2 = vadd.f32 %v1667_v12, %v1579_v61  ;;  %v1581_v8 = vpop.f32.mrf.mxu1 }
  0xcb   : > { %v1582_v11 = vadd.f32 %v1581_v8, %v1492_v16 }
  0xcc   : > { %1531 = vmatmul.bf16.gmra.mxu0 %v3311_v13  ;;  %1729 = vmatmul.bf16.gmra.mxu3 %v3431_v15 }
  0xcd   : > { %1620 = vmatmul.bf16.gmra.mxu1 %v3315_v18 }
  0xce   : > { %1709 = vmatmul.bf16.gmra.mxu2 %v3319_v5 }
  0xcf   : > { %v4553_v14 = vpop.f32.mrf.mxu3 }
  0xd1   : > { %v1670_v19 = vpop.f32.mrf.mxu2  ;;  %v1494_v22 = vpop.f32.mrf.mxu0 }
  0xd2   : > { %v4555_v21 = vadd.f32 %v1670_v19, %v1582_v11  ;;  %v1583_v24 = vpop.f32.mrf.mxu1  ;;  %v3734_v11 = vld [vmem:[%s4324_s8 + $0x44] sm:$0xf]  ;;  %v3068_v19 = vld [vmem:[%s4324_s8 + $0x5c] sm:$0xf0] }
  0xd3   : > { %v1584_v25 = vadd.f32 %v1583_v24, %v1494_v22  ;;  %v3074_v22 = vld [vmem:[%s4324_s8 + $0x48] sm:$0xf]  ;;  %v3738_v24 = vld [vmem:[%s4324_s8 + $0x60] sm:$0xf0]  ;;  %v3071_v20 = vor.u32 %v3734_v11, %v3068_v19 }
  0xd4   : > { %v3075_v31 = vor.u32 %v3738_v24, %v3074_v22  ;;  %v3748_v22 = vld [vmem:[%s4324_s8 + $0xb4] sm:$0xf]  ;;  %v3124_v24 = vld [vmem:[%s4324_s8 + $0xcc] sm:$0xf0] }
  0xd7   : > { %v4565_v33 = vpop.f32.mrf.mxu3 }
  0xd9   : > { %v1672_v34 = vpop.f32.mrf.mxu2  ;;  %v1497_v38 = vpop.f32.mrf.mxu0 }
  0xda   : > { %v4567_v37 = vadd.f32 %v1672_v34, %v1584_v25  ;;  %v1586_v41 = vpop.f32.mrf.mxu1  ;;  %v3082_v25 = vld [vmem:[%s4324_s8 + $0x50] sm:$0xf] }
  0xdb   : > { %v1587_v42 = vadd.f32 %v1586_v41, %v1497_v38 }
  0xdc   : > { %1536 = vmatmul.bf16.gmra.mxu0 %v3339_v35  ;;  %1734 = vmatmul.bf16.gmra.mxu3 %v3459_v36  ;;  %v3083_v35 = vor.u32 %v3739_v26, %v3082_v25  ;;  %v3079_v36 = vor.u32 %v3735_v27, %v3076_v28  ;;  %v3130_v25 = vld [vmem:[%s4324_s8 + $0xb8] sm:$0xf]  ;;  %v3752_v26 = vld [vmem:[%s4324_s8 + $0xd0] sm:$0xf0]  ;;  %v3138_v27 = vld [vmem:[%s4324_s8 + $0xc0] sm:$0xf] }
  0xdd   : > { %1625 = vmatmul.bf16.gmra.mxu1 %v3343_v39  ;;  %v3753_v28 = vld [vmem:[%s4324_s8 + $0xd8] sm:$0xf0] }
  0xde   : > { %1714 = vmatmul.bf16.gmra.mxu2 %v3347_v40 }
  0xdf   : > { %v4569_v44 = vpop.f32.mrf.mxu3 }
  0xe1   : > { %v1675_v45 = vpop.f32.mrf.mxu2  ;;  %v1499_v48 = vpop.f32.mrf.mxu0 }
  0xe2   : > { %v4571_v46 = vadd.f32 %v1675_v45, %v1587_v42  ;;  %v1588_v49 = vpop.f32.mrf.mxu1 }
  0xe3   : > { %v1589_v50 = vadd.f32 %v1588_v49, %v1499_v48 }
  0xe7   : > { %v4581_v61 = vpop.f32.mrf.mxu3 }
  0xe9   : > { %v1677_v62 = vpop.f32.mrf.mxu2  ;;  %v1502_v3 = vpop.f32.mrf.mxu0 }
  0xea   : > { %v4583_v1 = vadd.f32 %v1677_v62, %v1589_v50  ;;  %v1591_v7 = vpop.f32.mrf.mxu1  ;;  %v3741_v50 = vld [vmem:[%s4324_s8 + $0x7c] sm:$0xf] }
  0xeb   : > { %v1592_v9 = vadd.f32 %v1591_v7, %v1502_v3  ;;  %v3107_v7 = vor.u32 %v3742_v57, %v3104_v59  ;;  %v3158_v57 = vld [vmem:[%s4324_s8 + $0xf0] sm:$0xf]  ;;  %v3759_v59 = vld [vmem:[%s4324_s8 + $0x108] sm:$0xf0] }
  0xec   : > { %1748 = vmatmul.bf16.vlgmr.msrb.gmra.mxu3 %v3043_v63  ;;  %1837 = vmatmul.bf16.vlgmr.msrb.gmra.mxu0 %v3047_v0  ;;  %v3099_v63 = vor.u32 %v3741_v50, %v3096_v51  ;;  %v3103_v0 = vor.u32 %v3745_v53, %v3102_v52 }
  0xed   : > { %1926 = vmatmul.bf16.vlgmr.msrb.gmra.mxu1 %v3051_v6  ;;  %v3111_v6 = vor.u32 %v3746_v55, %v3110_v54  ;;  %v3755_v54 = vld [vmem:[%s4324_s8 + $0xec] sm:$0xf]  ;;  %v3152_v55 = vld [vmem:[%s4324_s8 + $0x104] sm:$0xf0] }
  0xee   : > { %3676 = vmatmul.msk.bf16.vlgmr.msrb.gmra.mxu2 %vm1424_vm0, %v3055_v4 }
  0xef   : > { %v1631_v12 = vpop.f32.mrf.mxu3 }
  0xf0   : > { %v4587_v13 = vadd.f32 %v1631_v12, %v4506_v30 }
  0xf1   : > { %v1680_v15 = vpop.f32.mrf.mxu2  ;;  %v1504_v18 = vpop.f32.mrf.mxu0 }
  0xf2   : > { %v4589_v16 = vadd.f32 %v1680_v15, %v1592_v9  ;;  %v1593_v5 = vpop.f32.mrf.mxu1 }
  0xf3   : > { %v1594_v8 = vadd.f32 %v1593_v5, %v1504_v18 }
  0xf7   : > { %v1633_v29 = vpop.f32.mrf.mxu3 }
  0xf8   : > { %v4600_v17 = vadd.f32 %v1633_v29, %v4521_v43  ;;  %v3749_v29 = vld [vmem:[%s4324_s8 + $0xbc] sm:$0xf] }
  0xf9   : > { %v1682_v30 = vpop.f32.mrf.mxu2  ;;  %v1507_v34 = vpop.f32.mrf.mxu0 }
  0xfa   : > { %v4602_v32 = vadd.f32 %v1682_v30, %v1594_v8  ;;  %v1596_v38 = vpop.f32.mrf.mxu1  ;;  %v3132_v30 = vld [vmem:[%s4324_s8 + $0xd4] sm:$0xf0] }
  0xfb   : > { %v1597_v39 = vadd.f32 %v1596_v38, %v1507_v34  ;;  %v3127_v34 = vor.u32 %v3748_v22, %v3124_v24 }
  0xfc   : > { %1753 = vmatmul.bf16.gmra.mxu3 %v3071_v20  ;;  %1842 = vmatmul.bf16.gmra.mxu0 %v3075_v31 }
  0xfd   : > { %1931 = vmatmul.bf16.gmra.mxu1 %v3079_v36 }
  0xfe   : > { %3677 = vmatmul.msk.bf16.gmra.mxu2 %vm1424_vm0, %v3083_v35  ;;  %v3131_v35 = vor.u32 %v3752_v26, %v3130_v25 }
  0xff   : > { %v1636_v43 = vpop.f32.mrf.mxu3 }
 0x100   : > { %v4606_v40 = vadd.f32 %v1636_v43, %v4534_v56  ;;  %v3135_v43 = vor.u32 %v3749_v29, %v3132_v30  ;;  %v3762_v29 = vld [vmem:[%s4324_s8 + $0x124] sm:$0xf]  ;;  %v3180_v30 = vld [vmem:[%s4324_s8 + $0x13c] sm:$0xf0] }
 0x101   : > { %v1685_v41 = vpop.f32.mrf.mxu2  ;;  %v1509_v45 = vpop.f32.mrf.mxu0 }
 0x102   : > { %v4608_v42 = vadd.f32 %v1685_v41, %v1597_v39  ;;  %v1598_v48 = vpop.f32.mrf.mxu1  ;;  %v3139_v39 = vor.u32 %v3753_v28, %v3138_v27 }
 0x103   : > { %v1599_v49 = vadd.f32 %v1598_v48, %v1509_v45 }
 0x107   : > { %v1638_v60 = vpop.f32.mrf.mxu3 }
 0x108   : > { %v4619_v62 = vadd.f32 %v1638_v60, %v4549_v10  ;;  %v3166_v60 = vld [vmem:[%s4324_s8 + $0xf8] sm:$0xf] }
 0x109   : > { %v1687_v56 = vpop.f32.mrf.mxu2  ;;  %v1512_v4 = vpop.f32.mrf.mxu0 }
 0x10a   : > { %v4621_v3 = vadd.f32 %v1687_v56, %v1599_v49  ;;  %v1601_v9 = vpop.f32.mrf.mxu1  ;;  %v3760_v56 = vld [vmem:[%s4324_s8 + $0x110] sm:$0xf0] }
 0x10b   : > { %v1602_v12 = vadd.f32 %v1601_v9, %v1512_v4  ;;  %v3159_v9 = vor.u32 %v3759_v59, %v3158_v57 }
 0x10c   : > { %1758 = vmatmul.bf16.gmra.mxu3 %v3099_v63  ;;  %1847 = vmatmul.bf16.gmra.mxu0 %v3103_v0  ;;  %v3756_v63 = vld [vmem:[%s4324_s8 + $0xf4] sm:$0xf]  ;;  %v3160_v0 = vld [vmem:[%s4324_s8 + $0x10c] sm:$0xf0] }
 0x10d   : > { %1936 = vmatmul.bf16.gmra.mxu1 %v3107_v7  ;;  %v3155_v7 = vor.u32 %v3755_v54, %v3152_v55 }
 0x10e   : > { %3678 = vmatmul.msk.bf16.gmra.mxu2 %vm1424_vm0, %v3111_v6 }
 0x10f   : > { %v1641_v10 = vpop.f32.mrf.mxu3 }
 0x110   : > { %v4625_v15 = vadd.f32 %v1641_v10, %v4553_v14 }
 0x111   : > { %v1690_v18 = vpop.f32.mrf.mxu2  ;;  %v1514_v8 = vpop.f32.mrf.mxu0 }
 0x112   : > { %v4627_v5 = vadd.f32 %v1690_v18, %v1602_v12  ;;  %v1603_v11 = vpop.f32.mrf.mxu1  ;;  %v3167_v18 = vor.u32 %v3760_v56, %v3166_v60 }
 0x113   : > { %v1604_v19 = vadd.f32 %v1603_v11, %v1514_v8  ;;  %v3163_v8 = vor.u32 %v3756_v63, %v3160_v0 }
 0x117   : > { %v1643_v20 = vpop.f32.mrf.mxu3 }
 0x118   : > { %v4638_v31 = vadd.f32 %v1643_v20, %v4565_v33  ;;  %v3186_v20 = vld [vmem:[%s4324_s8 + $0x128] sm:$0xf] }
 0x119   : > { %v1692_v14 = vpop.f32.mrf.mxu2  ;;  %v1517_v38 = vpop.f32.mrf.mxu0 }
 0x11a   : > { %v4640_v36 = vadd.f32 %v1692_v14, %v1604_v19  ;;  %v1606_v41 = vpop.f32.mrf.mxu1  ;;  %v3766_v14 = vld [vmem:[%s4324_s8 + $0x140] sm:$0xf0] }
 0x11b   : > { %v1607_v45 = vadd.f32 %v1606_v41, %v1517_v38  ;;  %v3763_v38 = vld [vmem:[%s4324_s8 + $0x12c] sm:$0xf] }
 0x11c   : > { %1763 = vmatmul.bf16.gmra.mxu3 %v3127_v34  ;;  %1852 = vmatmul.bf16.gmra.mxu0 %v3131_v35  ;;  %v3194_v34 = vld [vmem:[%s4324_s8 + $0x130] sm:$0xf]  ;;  %v3767_v35 = vld [vmem:[%s4324_s8 + $0x148] sm:$0xf0] }
 0x11d   : > { %1941 = vmatmul.bf16.gmra.mxu1 %v3135_v43 }
 0x11e   : > { %3679 = vmatmul.msk.bf16.gmra.mxu2 %vm1424_vm0, %v3139_v39  ;;  %v3188_v39 = vld [vmem:[%s4324_s8 + $0x144] sm:$0xf0] }
 0x11f   : > { %v1646_v33 = vpop.f32.mrf.mxu3 }
 0x120   : > { %v4644_v48 = vadd.f32 %v1646_v33, %v4569_v44  ;;  %v3187_v33 = vor.u32 %v3766_v14, %v3186_v20 }
 0x121   : > { %v1695_v49 = vpop.f32.mrf.mxu2  ;;  %v1519_v51 = vpop.f32.mrf.mxu0 }
 0x122   : > { %v4646_v50 = vadd.f32 %v1695_v49, %v1607_v45  ;;  %v1608_v52 = vpop.f32.mrf.mxu1 }
 0x123   : > { %v1609_v53 = vadd.f32 %v1608_v52, %v1519_v51  ;;  %v3195_v52 = vor.u32 %v3767_v35, %v3194_v34 }
 0x127   : > { %v1648_v4 = vpop.f32.mrf.mxu3 }
 0x128   : > { %v4657_v6 = vadd.f32 %v1648_v4, %v4581_v61  ;;  %v3769_v4 = vld [vmem:[%s4324_s8 + $0x15c] sm:$0xf] }
 0x129   : > { %v1697_v44 = vpop.f32.mrf.mxu2  ;;  %v1522_v10 = vpop.f32.mrf.mxu0 }
 0x12a   : > { %v4659_v12 = vadd.f32 %v1697_v44, %v1609_v53  ;;  %v1611_v11 = vpop.f32.mrf.mxu1  ;;  %v3191_v53 = vor.u32 %v3763_v38, %v3188_v39  ;;  %v3208_v44 = vld [vmem:[%s4324_s8 + $0x174] sm:$0xf0] }
 0x12b   : > { %v1612_v19 = vadd.f32 %v1611_v11, %v1522_v10  ;;  %v3222_v10 = vld [vmem:[%s4324_s8 + $0x168] sm:$0xf]  ;;  %v3216_v11 = vld [vmem:[%s4324_s8 + $0x17c] sm:$0xf0] }
 0x12c   : > { %1768 = vmatmul.bf16.gmra.mxu3 %v3155_v7  ;;  %1857 = vmatmul.bf16.gmra.mxu0 %v3159_v9  ;;  %v3214_v7 = vld [vmem:[%s4324_s8 + $0x160] sm:$0xf]  ;;  %v3773_v9 = vld [vmem:[%s4324_s8 + $0x178] sm:$0xf0] }
 0x12d   : > { %1946 = vmatmul.bf16.gmra.mxu1 %v3163_v8  ;;  %v3770_v8 = vld [vmem:[%s4324_s8 + $0x164] sm:$0xf] }
 0x12e   : > { %3680 = vmatmul.msk.bf16.gmra.mxu2 %vm1424_vm0, %v3167_v18  ;;  %v3774_v18 = vld [vmem:[%s4324_s8 + $0x180] sm:$0xf0] }
 0x12f   : > { %v1720_v61 = vpop.f32.mrf.mxu3 }
 0x130   : > { %v4663_v24 = vadd.f32 %v1720_v61, %v4587_v13  ;;  %v3183_v13 = vor.u32 %v3762_v29, %v3180_v30  ;;  %v3223_v29 = vor.u32 %v3774_v18, %v3222_v10  ;;  %v3219_v30 = vor.u32 %v3770_v8, %v3216_v11 }
 0x131   : > { %v1700_v22 = vpop.f32.mrf.mxu2  ;;  %v1524_v26 = vpop.f32.mrf.mxu0 }
 0x132   : > { %v4665_v25 = vadd.f32 %v1700_v22, %v1612_v19  ;;  %v1613_v27 = vpop.f32.mrf.mxu1 }
 0x133   : > { %v1614_v28 = vadd.f32 %v1613_v27, %v1524_v26  ;;  %v3215_v26 = vor.u32 %v3773_v9, %v3214_v7 }
 0x137   : > { %v1722_v43 = vpop.f32.mrf.mxu3 }
 0x138   : > { %v4676_v45 = vadd.f32 %v1722_v43, %v4600_v17 }
 0x139   : > { %v1702_v41 = vpop.f32.mrf.mxu2  ;;  %v1527_v51 = vpop.f32.mrf.mxu0 }
 0x13a   : > { %v4678_v49 = vadd.f32 %v1702_v41, %v1614_v28  ;;  %v1616_v54 = vpop.f32.mrf.mxu1 }
 0x13b   : > { %v1617_v55 = vadd.f32 %v1616_v54, %v1527_v51  ;;  %v3242_v51 = vld [vmem:[%s4324_s8 + $0x198] sm:$0xf]  ;;  %v3781_v54 = vld [vmem:[%s4324_s8 + $0x1b8] sm:$0xf0] }
 0x13c   : > { %1773 = vmatmul.bf16.gmra.mxu3 %v3183_v13  ;;  %1862 = vmatmul.bf16.gmra.mxu0 %v3187_v33  ;;  %v3776_v13 = vld [vmem:[%s4324_s8 + $0x194] sm:$0xf]  ;;  %v3236_v33 = vld [vmem:[%s4324_s8 + $0x1ac] sm:$0xf0] }
 0x13d   : > { %1951 = vmatmul.bf16.gmra.mxu1 %v3191_v53  ;;  %v3250_v53 = vld [vmem:[%s4324_s8 + $0x1a0] sm:$0xf] }
 0x13e   : > { %3681 = vmatmul.msk.bf16.gmra.mxu2 %vm1424_vm0, %v3195_v52  ;;  %v3780_v52 = vld [vmem:[%s4324_s8 + $0x1b0] sm:$0xf0]  ;;  %v3251_v7 = vor.u32 %v3781_v54, %v3250_v53 }
 0x13f   : > { %v1725_v17 = vpop.f32.mrf.mxu3 }
 0x140   : > { %v4682_v59 = vadd.f32 %v1725_v17, %v4606_v40  ;;  %v3211_v40 = vor.u32 %v3769_v4, %v3208_v44  ;;  %v3244_v17 = vld [vmem:[%s4324_s8 + $0x1b4] sm:$0xf0] }
 0x141   : > { %v1705_v57 = vpop.f32.mrf.mxu2  ;;  %v1529_v56 = vpop.f32.mrf.mxu0 }
 0x142   : > { %v4684_v60 = vadd.f32 %v1705_v57, %v1617_v55  ;;  %v1618_v63 = vpop.f32.mrf.mxu1  ;;  %v3777_v55 = vld [vmem:[%s4324_s8 + $0x19c] sm:$0xf] }
 0x143   : > { %v1619_v0 = vadd.f32 %v1618_v63, %v1529_v56  ;;  %v3247_v9 = vor.u32 %v3777_v55, %v3244_v17 }
 0x147   : > { %v1727_v19 = vpop.f32.mrf.mxu3 }
 0x148   : > { %v4695_v22 = vadd.f32 %v1727_v19, %v4619_v62 }
 0x149   : > { %v1707_v61 = vpop.f32.mrf.mxu2  ;;  %v1532_v28 = vpop.f32.mrf.mxu0 }
 0x14a   : > { %v4697_v27 = vadd.f32 %v1707_v61, %v1619_v0  ;;  %v1621_v20 = vpop.f32.mrf.mxu1  ;;  %v3243_v0 = vor.u32 %v3780_v52, %v3242_v51 }
 0x14b   : > { %v1622_v14 = vadd.f32 %v1621_v20, %v1532_v28  ;;  %v3783_v28 = vld [vmem:[%s4324_s8 + $0x1cc] sm:$0xf] }
 0x14c   : > { %1778 = vmatmul.bf16.gmra.mxu3 %v3211_v40  ;;  %1867 = vmatmul.bf16.gmra.mxu0 %v3215_v26  ;;  %v3787_v20 = vld [vmem:[%s4324_s8 + $0x1e8] sm:$0xf0] }
 0x14d   : > { %1956 = vmatmul.bf16.gmra.mxu1 %v3219_v30  ;;  %v3270_v30 = vld [vmem:[%s4324_s8 + $0x1d0] sm:$0xf] }
 0x14e   : > { %3682 = vmatmul.msk.bf16.gmra.mxu2 %vm1424_vm0, %v3223_v29  ;;  %v3264_v29 = vld [vmem:[%s4324_s8 + $0x1e4] sm:$0xf0] }
 0x14f   : > { %v1730_v62 = vpop.f32.mrf.mxu3 }
 0x150   : > { %v4701_v35 = vadd.f32 %v1730_v62, %v4625_v15  ;;  %v3239_v15 = vor.u32 %v3776_v13, %v3236_v33  ;;  %v3788_v62 = vld [vmem:[%s4324_s8 + $0x1f0] sm:$0xf0]  ;;  %v3271_v33 = vor.u32 %v3787_v20, %v3270_v30 }
 0x151   : > { %v1710_v34 = vpop.f32.mrf.mxu2  ;;  %v1534_v39 = vpop.f32.mrf.mxu0 }
 0x152   : > { %v4703_v38 = vadd.f32 %v1710_v34, %v1622_v14  ;;  %v1623_v43 = vpop.f32.mrf.mxu1  ;;  %v3278_v14 = vld [vmem:[%s4324_s8 + $0x1d8] sm:$0xf]  ;;  %v3784_v34 = vld [vmem:[%s4324_s8 + $0x1d4] sm:$0xf] }
 0x153   : > { %v1624_v41 = vadd.f32 %v1623_v43, %v1534_v39  ;;  %v3272_v39 = vld [vmem:[%s4324_s8 + $0x1ec] sm:$0xf0]  ;;  %v3279_v53 = vor.u32 %v3788_v62, %v3278_v14 }
 0x154   : > { %v3275_v54 = vor.u32 %v3784_v34, %v3272_v39 }
 0x157   : > { %v1732_v57 = vpop.f32.mrf.mxu3 }
 0x158   : > { %v4714_v63 = vadd.f32 %v1732_v57, %v4638_v31 }
 0x159   : > { %v1712_v56 = vpop.f32.mrf.mxu2  ;;  %v1537_v44 = vpop.f32.mrf.mxu0 }
 0x15a   : > { %v4716_v4 = vadd.f32 %v1712_v56, %v1624_v41  ;;  %v1626_v10 = vpop.f32.mrf.mxu1 }
 0x15b   : > { %v1627_v18 = vadd.f32 %v1626_v10, %v1537_v44  ;;  %v3292_v10 = vld [vmem:[%s4324_s8 + $0x21c] sm:$0xf0] }
 0x15c   : > { %1783 = vmatmul.bf16.gmra.mxu3 %v3239_v15  ;;  %1872 = vmatmul.bf16.gmra.mxu0 %v3243_v0 }
 0x15d   : > { %1961 = vmatmul.bf16.gmra.mxu1 %v3247_v9  ;;  %v3790_v9 = vld [vmem:[%s4324_s8 + $0x204] sm:$0xf] }
 0x15e   : > { %3683 = vmatmul.msk.bf16.gmra.mxu2 %vm1424_vm0, %v3251_v7  ;;  %v4742_v7 = vld [vmem:[%s5305_s2] ss:$0 sm:$0xff]  ;;  %v3295_v14 = vor.u32 %v3790_v9, %v3292_v10  ;;  %v3797_v10 = vld [vmem:[%s4324_s8 + $0x23c] sm:$0xf] }
 0x15f   : > { %v1735_v31 = vpop.f32.mrf.mxu3 }
 0x160   : > { %v4720_v11 = vadd.f32 %v1735_v31, %v4644_v48  ;;  %v3267_v48 = vor.u32 %v3783_v28, %v3264_v29  ;;  %v3794_v31 = vld [vmem:[%s4324_s8 + $0x220] sm:$0xf0]  ;;  %v3300_v28 = vld [vmem:[%s4324_s8 + $0x224] sm:$0xf0] }
 0x161   : > { %v1715_v8 = vpop.f32.mrf.mxu2  ;;  %v1539_v61 = vpop.f32.mrf.mxu0 }
 0x162   : > { %v4722_v19 = vadd.f32 %v1715_v8, %v1627_v18  ;;  %v1628_v40 = vpop.f32.mrf.mxu1  ;;  %v3298_v18 = vld [vmem:[%s4324_s8 + $0x208] sm:$0xf]  ;;  %v3306_v8 = vld [vmem:[%s4324_s8 + $0x210] sm:$0xf] }
 0x163   : > { %v1629_v26 = vadd.f32 %v1628_v40, %v1539_v61  ;;  %v3795_v40 = vld [vmem:[%s4324_s8 + $0x228] sm:$0xf0]  ;;  %v3299_v62 = vor.u32 %v3794_v31, %v3298_v18  ;;  %v3320_v18 = vld [vmem:[%s4324_s8 + $0x254] sm:$0xf0]  ;;  %v3326_v31 = vld [vmem:[%s4324_s8 + $0x240] sm:$0xf] }
 0x164   : > { %v3307_v39 = vor.u32 %v3795_v40, %v3306_v8  ;;  %v3801_v8 = vld [vmem:[%s4324_s8 + $0x258] sm:$0xf0]  ;;  %v3802_v40 = vld [vmem:[%s4324_s8 + $0x260] sm:$0xf0] }
 0x167   : > { %v1737_v43 = vpop.f32.mrf.mxu3 }
 0x168   : > { %v4733_v13 = vadd.f32 %v1737_v43, %v4657_v6 }
 0x169   : > { %v1717_v41 = vpop.f32.mrf.mxu2  ;;  %v1838_v52 = vpop.f32.mrf.mxu0 }
 0x16a   : > { %v4735_v51 = vadd.f32 %v1717_v41, %v1629_v26  ;;  %v1927_v55 = vpop.f32.mrf.mxu1  ;;  %v3791_v26 = vld [vmem:[%s4324_s8 + $0x20c] sm:$0xf] }
 0x16b   : > { %v3303_v43 = vor.u32 %v3791_v26, %v3300_v28  ;;  %v3798_v26 = vld [vmem:[%s4324_s8 + $0x244] sm:$0xf]  ;;  %v3328_v28 = vld [vmem:[%s4324_s8 + $0x25c] sm:$0xf0] }
 0x16c   : > { %1788 = vmatmul.bf16.gmra.mxu3 %v3267_v48  ;;  %1877 = vmatmul.bf16.gmra.mxu0 %v3271_v33 }
 0x16d   : > { %1966 = vmatmul.bf16.gmra.mxu1 %v3275_v54 }
 0x16e   : > { %3684 = vmatmul.msk.bf16.gmra.mxu2 %vm1424_vm0, %v3279_v53 }
 0x16f   : > { %v1749_v6 = vpop.f32.mrf.mxu3 }
 0x170   : > { %v1750_v17 = vadd.f32 %v1749_v6, %v4508_v23 }
 0x171   : > { %v2016_v57 = vpop.f32.mrf.mxu2  ;;  %v1840_v56 = vpop.f32.mrf.mxu0 }
 0x172   : > { %v1839_v15 = vadd.f32 %v1838_v52, %v1750_v17  ;;  %v1929_v0 = vpop.f32.mrf.mxu1 }
 0x174   : > { %v1928_v44 = vadd.f32 %v1927_v55, %v1839_v15 }
 0x176   : > { %v2017_v61 = vadd.f32 %v2016_v57, %v1928_v44 }
 0x177   : > { %v1751_v23 = vpop.f32.mrf.mxu3 }
 0x178   : > { %v2199_v29 = vadd.f32 %v4742_v7, %v2017_v61  ;;  %v1752_v30 = vadd.f32 %v1751_v23, %v4523_v47 }
 0x179   : > { %v2018_v20 = vpop.f32.mrf.mxu2  ;;  %v1843_v34 = vpop.f32.mrf.mxu0 }
 0x17a   : > { %v3692_v41 = vmul.f32 -1.442695, %v2199_v29  ;;  %v1841_v48 = vadd.f32 %v1840_v56, %v1752_v30  ;;  %v1932_v33 = vpop.f32.mrf.mxu1 }
 0x17c   : > { %4033 = vpow2.f32 %v3692_v41  ;;  %v1930_v52 = vadd.f32 %v1929_v0, %v1841_v48  ;;  %1793 = vmatmul.bf16.gmra.mxu3 %v3295_v14  ;;  %1882 = vmatmul.bf16.gmra.mxu0 %v3299_v62  ;;  %v3323_v14 = vor.u32 %v3797_v10, %v3320_v18  ;;  %v3327_v62 = vor.u32 %v3801_v8, %v3326_v31  ;;  %v3804_v10 = vld [vmem:[%s4324_s8 + $0x274] sm:$0xf] }
 0x17d   : > { %1971 = vmatmul.bf16.gmra.mxu1 %v3303_v43  ;;  %v3331_v43 = vor.u32 %v3798_v26, %v3328_v28  ;;  %v3808_v26 = vld [vmem:[%s4324_s8 + $0x290] sm:$0xf0] }
 0x17e   : > { %3685 = vmatmul.msk.bf16.gmra.mxu2 %vm1424_vm0, %v3307_v39  ;;  %v2019_v53 = vadd.f32 %v2018_v20, %v1930_v52 }
 0x17f   : > { %v1754_v47 = vpop.f32.mrf.mxu3 }
 0x180   : > { %v2200_v54 = vadd.f32 %v4742_v7, %v2019_v53  ;;  %v1755_v55 = vadd.f32 %v1754_v47, %v4536_v58  ;;  %v3334_v58 = vld [vmem:[%s4324_s8 + $0x248] sm:$0xf] }
 0x181   : > { %v2021_v6 = vpop.f32.mrf.mxu2  ;;  %v1845_v17 = vpop.f32.mrf.mxu0  ;;  %v3335_v39 = vor.u32 %v3802_v40, %v3334_v58  ;;  %v3354_v40 = vld [vmem:[%s4324_s8 + $0x278] sm:$0xf] }
 0x182   : > { %v4034_v57 = vpop.eup %4033  ;;  %v3693_v56 = vmul.f32 -1.442695, %v2200_v54  ;;  %v1844_v15 = vadd.f32 %v1843_v34, %v1755_v55  ;;  %v1934_v0 = vpop.f32.mrf.mxu1 }
 0x183   : > { %v4757_v44 = vadd.f32 1.0, %v4034_v57 }
 0x184   : > { %4035 = vpow2.f32 %v3693_v56  ;;  %v1933_v9 = vadd.f32 %v1932_v33, %v1844_v15 }
 0x185   : > { %4037 = vrcp.f32 %v4757_v44  ;;  %vm2364_vm2 = vweird.f32 %v4757_v44 }
 0x186   : > { %v2022_v61 = vadd.f32 %v2021_v6, %v1933_v9 }
 0x187   : > { %v1756_v23 = vpop.f32.mrf.mxu3 }
 0x188   : > { %v2201_v29 = vadd.f32 %v4742_v7, %v2022_v61  ;;  %v1757_v30 = vadd.f32 %v1756_v23, %v4551_v2 }
 0x189   : > { %v2023_v20 = vpop.f32.mrf.mxu2  ;;  %v1848_v34 = vpop.f32.mrf.mxu0 }
 0x18a   : > { %v4036_v41 = vpop.eup %4035  ;;  %v3694_v48 = vmul.f32 -1.442695, %v2201_v29  ;;  %v1846_v33 = vadd.f32 %v1845_v17, %v1757_v30  ;;  %v1937_v52 = vpop.f32.mrf.mxu1  ;;  %v2368_v29 = vand.u32 2147483647, %v4757_v44 }
 0x18b   : > { %v4770_v53 = vpop.eup %4037  ;;  %v4772_v47 = vadd.f32 1.0, %v4036_v41  ;;  %v3805_v41 = vld [vmem:[%s4324_s8 + $0x27c] sm:$0xf] }
 0x18c   : > { %v2360_v54 = vmul.f32 %v4770_v53, %v4757_v44  ;;  %4039 = vpow2.f32 %v3694_v48  ;;  %v1935_v2 = vadd.f32 %v1934_v0, %v1846_v33  ;;  %1798 = vmatmul.bf16.gmra.mxu3 %v3323_v14  ;;  %1887 = vmatmul.bf16.gmra.mxu0 %v3327_v62  ;;  %v3348_v0 = vld [vmem:[%s4324_s8 + $0x28c] sm:$0xf0]  ;;  %v3362_v14 = vld [vmem:[%s4324_s8 + $0x280] sm:$0xf]  ;;  %v3809_v62 = vld [vmem:[%s4324_s8 + $0x298] sm:$0xf0]  ;;  %vm2365_vm1 = vweird.f32 %v4770_v53 }
 0x18d   : > { %4041 = vrcp.f32 %v4772_v47  ;;  %1976 = vmatmul.bf16.gmra.mxu1 %v3331_v43  ;;  %v3351_v30 = vor.u32 %v3804_v10, %v3348_v0  ;;  %v3356_v48 = vld [vmem:[%s4324_s8 + $0x294] sm:$0xf0]  ;;  %v2370_v33 = vand.u32 2147483648, %v4757_v44  ;;  %vm4803_vm4 = vmor %vm2364_vm2, %vm2365_vm1  ;;  %vm4807_vm5 = vcmp.eq.f32.partialorder %v2368_v29, 8.507059e+37 }
 0x18e   : > { %3686 = vmatmul.msk.bf16.gmra.mxu2 %vm1424_vm0, %v3335_v39  ;;  %v2361_v55 = vsub.f32 1.0, %v2360_v54  ;;  %v2024_v6 = vadd.f32 %v2023_v20, %v1935_v2  ;;  %v3355_v20 = vor.u32 %v3808_v26, %v3354_v40  ;;  %v2383_v54 = vand.u32 2147483647, %v4772_v47 }
 0x18f   : > { %v1759_v17 = vpop.f32.mrf.mxu3  ;;  %v2385_v2 = vand.u32 2147483648, %v4772_v47  ;;  %v3363_v0 = vor.u32 %v3809_v62, %v3362_v14  ;;  %vm2379_vm6 = vweird.f32 %v4772_v47  ;;  %v2371_v26 = vor.u32 1.1754944e-38, %v2370_v33  ;;  %v3376_v33 = vld [vmem:[%s4324_s8 + $0x2c4] sm:$0xf0] }
 0x190   : > { %v2202_v57 = vadd.f32 %v4742_v7, %v2024_v6  ;;  %v1760_v56 = vadd.f32 %v1759_v17, %v4555_v21  ;;  %v2362_v31 = vmul.f32 %v4770_v53, %v2361_v55  ;;  %vm2384_vm8 = vcmp.eq.f32.partialorder %v2383_v54, 8.507059e+37 }
 0x191   : > { %v2026_v15 = vpop.f32.mrf.mxu2  ;;  %v1850_v9 = vpop.f32.mrf.mxu0 }
 0x192   : > { %v4040_v18 = vpop.eup %4039  ;;  %v3695_v8 = vmul.f32 -1.442695, %v2202_v57  ;;  %v1849_v58 = vadd.f32 %v1848_v34, %v1760_v56  ;;  %v1939_v61 = vpop.f32.mrf.mxu1  ;;  %v2363_v34 = vadd.f32 %v4770_v53, %v2362_v31 }
 0x193   : > { %v4042_v28 = vpop.eup %4041  ;;  %v4785_v23 = vadd.f32 1.0, %v4040_v18  ;;  %v3359_v18 = vor.u32 %v3805_v41, %v3356_v48  ;;  %v3811_v48 = vld [vmem:[%s4324_s8 + $0x2ac] sm:$0xf] }
 0x194   : > { %v2375_v21 = vmul.f32 %v4042_v28, %v4772_v47  ;;  %4043 = vpow2.f32 %v3695_v8  ;;  %v1938_v43 = vadd.f32 %v1937_v52, %v1849_v58  ;;  %vm2380_vm3 = vweird.f32 %v4042_v28 }
 0x195   : > { %4045 = vrcp.f32 %v4785_v23  ;;  %vm2381_vm7 = vmor %vm2379_vm6, %vm2380_vm3  ;;  %vm2394_vm9 = vweird.f32 %v4785_v23 }
 0x196   : > { %v2376_v39 = vsub.f32 1.0, %v2375_v21  ;;  %v2027_v17 = vadd.f32 %v2026_v15, %v1938_v43  ;;  %v2367_v15 = vsel %vm4803_vm4, %v4770_v53, %v2363_v34  ;;  %v2386_v21 = vor.u32 1.1754944e-38, %v2385_v2 }
 0x197   : > { %v1761_v55 = vpop.f32.mrf.mxu3  ;;  %v2372_v47 = vsel %vm4807_vm5, %v2371_v26, %v2367_v15  ;;  %v3390_v15 = vld [vmem:[%s4324_s8 + $0x2b8] sm:$0xf] }
 0x198   : > { %v2377_v6 = vmul.f32 %v4042_v28, %v2376_v39  ;;  %v1762_v57 = vadd.f32 %v1761_v55, %v4567_v37  ;;  %v2203_v8 = vadd.f32 %v4742_v7, %v2027_v17  ;;  %v3382_v55 = vld [vmem:[%s4324_s8 + $0x2b0] sm:$0xf] }
 0x199   : > { %v2028_v56 = vpop.f32.mrf.mxu2  ;;  %v1853_v10 = vpop.f32.mrf.mxu0 }
 0x19a   : > { %v4044_v31 = vpop.eup %4043  ;;  %v2378_v37 = vadd.f32 %v4042_v28, %v2377_v6  ;;  %v1942_v58 = vpop.f32.mrf.mxu1  ;;  %v1851_v14 = vadd.f32 %v1850_v9, %v1762_v57  ;;  %v3696_v34 = vmul.f32 -1.442695, %v2203_v8  ;;  %v3815_v6 = vld [vmem:[%s4324_s8 + $0x2c8] sm:$0xf0]  ;;  %v2398_v8 = vand.u32 2147483647, %v4785_v23 }
 0x19b   : > { %v4817_v40 = vpop.eup %4045  ;;  %v4820_v29 = vadd.f32 1.0, %v4044_v31  ;;  %v3383_v31 = vor.u32 %v3815_v6, %v3382_v55 }
 0x19c   : > { %v2382_v62 = vsel %vm2381_vm7, %v4042_v28, %v2378_v37  ;;  %v2390_v53 = vmul.f32 %v4817_v40, %v4785_v23  ;;  %1803 = vmatmul.bf16.gmra.mxu3 %v3351_v30  ;;  %1892 = vmatmul.bf16.gmra.mxu0 %v3355_v20  ;;  %v1940_v20 = vadd.f32 %v1939_v61, %v1851_v14  ;;  %v3816_v37 = vld [vmem:[%s4324_s8 + $0x2d0] sm:$0xf0]  ;;  %vm2395_vm10 = vweird.f32 %v4817_v40 }
 0x19d   : > { %v2387_v9 = vsel %vm2384_vm8, %v2386_v21, %v2382_v62  ;;  %4047 = vrcp.f32 %v4820_v29  ;;  %1981 = vmatmul.bf16.gmra.mxu1 %v3359_v18  ;;  %vm4862_vm12 = vmor %vm2394_vm9, %vm2395_vm10  ;;  %vm2409_vm13 = vweird.f32 %v4820_v29  ;;  %vm2399_vm14 = vcmp.eq.f32.partialorder %v2398_v8, 8.507059e+37 }
 0x19e   : > { %3687 = vmatmul.msk.bf16.gmra.mxu2 %vm1424_vm0, %v3363_v0  ;;  %v3891_v28 = vpack.c.bf16 %v2387_v9, %v2372_v47  ;;  %v2391_v30 = vsub.f32 1.0, %v2390_v53  ;;  %4049 = vpow2.f32 %v3696_v34  ;;  %v2029_v54 = vadd.f32 %v2028_v56, %v1940_v20  ;;  %v3812_v34 = vld [vmem:[%s4324_s8 + $0x2b4] sm:$0xf]  ;;  %v3384_v47 = vld [vmem:[%s4324_s8 + $0x2cc] sm:$0xf0] }
 0x19f   : > { %v1764_v39 = vpop.f32.mrf.mxu3  ;;  %v3379_v0 = vor.u32 %v3811_v48, %v3376_v33  ;;  %v2415_v9 = vand.u32 2147483648, %v4820_v29  ;;  %v3391_v33 = vor.u32 %v3816_v37, %v3390_v15 }
 0x1a0   : > { %3892 = vst [vmem:[%s4829_s9] sm:$0xff] %v3891_v28   ;;  %v1765_v43 = vadd.f32 %v1764_v39, %v4571_v46  ;;  %v2392_v17 = vmul.f32 %v4817_v40, %v2391_v30  ;;  %v2204_v61 = vadd.f32 %v4742_v7, %v2029_v54  ;;  %v3387_v54 = vor.u32 %v3812_v34, %v3384_v47 }
 0x1a1   : > { %v2031_v41 = vpop.f32.mrf.mxu2  ;;  %v1855_v2 = vpop.f32.mrf.mxu0 }
 0x1a2   : > { %v1854_v57 = vadd.f32 %v1853_v10, %v1765_v43  ;;  %v1944_v52 = vpop.f32.mrf.mxu1  ;;  %v2400_v10 = vand.u32 2147483648, %v4785_v23  ;;  %v3697_v21 = vmul.f32 -1.442695, %v2204_v61  ;;  %v2393_v14 = vadd.f32 %v4817_v40, %v2392_v17 }
 0x1a3   : > { %v4048_v44 = vpop.eup %4047  ;;  %v2416_v23 = vor.u32 1.1754944e-38, %v2415_v9  ;;  %v3818_v9 = vld [vmem:[%s4324_s8 + $0x2e4] sm:$0xf] }
 0x1a4   : > { %v4050_v18 = vpop.eup %4049  ;;  %v2405_v46 = vmul.f32 %v4048_v44, %v4820_v29  ;;  %v1943_v56 = vadd.f32 %v1942_v58, %v1854_v57  ;;  %vm2410_vm11 = vweird.f32 %v4048_v44  ;;  %v2413_v58 = vand.u32 2147483647, %v4820_v29 }
 0x1a5   : > { %v4847_v26 = vadd.f32 1.0, %v4050_v18  ;;  %v2397_v55 = vsel %vm4862_vm12, %v4817_v40, %v2393_v14  ;;  %v2401_v61 = vor.u32 1.1754944e-38, %v2400_v10  ;;  %vm2411_vm15 = vmor %vm2409_vm13, %vm2410_vm11 }
 0x1a6   : > { %v2406_v62 = vsub.f32 1.0, %v2405_v46  ;;  %v2032_v53 = vadd.f32 %v2031_v41, %v1943_v56  ;;  %vm2414_vm1 = vcmp.eq.f32.partialorder %v2413_v58, 8.507059e+37 }
 0x1a7   : > { %4051 = vrcp.f32 %v4847_v26  ;;  %v1766_v28 = vpop.f32.mrf.mxu3  ;;  %v2402_v56 = vsel %vm2399_vm14, %v2401_v61, %v2397_v55  ;;  %v3412_v55 = vld [vmem:[%s4324_s8 + $0x304] sm:$0xf0]  ;;  %vm2424_vm2 = vweird.f32 %v4847_v26 }
 0x1a8   : > { %v2407_v30 = vmul.f32 %v4048_v44, %v2406_v62  ;;  %4053 = vpow2.f32 %v3697_v21  ;;  %v2205_v20 = vadd.f32 %v4742_v7, %v2032_v53  ;;  %v1767_v39 = vadd.f32 %v1766_v28, %v4583_v1 }
 0x1a9   : > { %v2033_v43 = vpop.f32.mrf.mxu2  ;;  %v1858_v48 = vpop.f32.mrf.mxu0 }
 0x1aa   : > { %v2408_v6 = vadd.f32 %v4048_v44, %v2407_v30  ;;  %v3698_v1 = vmul.f32 -1.442695, %v2205_v20  ;;  %v1856_v17 = vadd.f32 %v1855_v2, %v1767_v39  ;;  %v1947_v57 = vpop.f32.mrf.mxu1  ;;  %v3404_v30 = vld [vmem:[%s4324_s8 + $0x2fc] sm:$0xf0]  ;;  %v3822_v20 = vld [vmem:[%s4324_s8 + $0x300] sm:$0xf0] }
 0x1ab   : > { %v3418_v39 = vld [vmem:[%s4324_s8 + $0x2f0] sm:$0xf] }
 0x1ac   : > { %v2412_v18 = vsel %vm2411_vm15, %v4048_v44, %v2408_v6  ;;  %4055 = vpow2.f32 %v3698_v1  ;;  %v1945_v29 = vadd.f32 %v1944_v52, %v1856_v17  ;;  %1808 = vmatmul.bf16.gmra.mxu3 %v3379_v0  ;;  %1897 = vmatmul.bf16.gmra.mxu0 %v3383_v31  ;;  %v3407_v1 = vor.u32 %v3818_v9, %v3404_v30 }
 0x1ad   : > { %v4871_v46 = vpop.eup %4051  ;;  %v2417_v40 = vsel %vm2414_vm1, %v2416_v23, %v2412_v18  ;;  %1986 = vmatmul.bf16.gmra.mxu1 %v3387_v54  ;;  %v3819_v54 = vld [vmem:[%s4324_s8 + $0x2ec] sm:$0xf] }
 0x1ae   : > { %3688 = vmatmul.msk.bf16.gmra.mxu2 %vm1424_vm0, %v3391_v33  ;;  %v4054_v2 = vpop.eup %4053  ;;  %v3896_v15 = vpack.c.bf16 %v2417_v40, %v2402_v56  ;;  %v2420_v37 = vmul.f32 %v4871_v46, %v4847_v26  ;;  %v2034_v44 = vadd.f32 %v2033_v43, %v1945_v29  ;;  %v3823_v43 = vld [vmem:[%s4324_s8 + $0x308] sm:$0xf0]  ;;  %vm2425_vm3 = vweird.f32 %v4871_v46 }
 0x1af   : > { %v4876_v8 = vadd.f32 1.0, %v4054_v2  ;;  %v1769_v10 = vpop.f32.mrf.mxu3  ;;  %v3419_v29 = vor.u32 %v3823_v43, %v3418_v39  ;;  %v2428_v56 = vand.u32 2147483647, %v4847_v26  ;;  %v3415_v2 = vor.u32 %v3819_v54, %v3412_v55  ;;  %vm4914_vm5 = vmor %vm2424_vm2, %vm2425_vm3 }
 0x1b0   : > { %3968 = vst [vmem:[%s4829_s9 + $0x8] sm:$0xff] %v3896_v15   ;;  %v2206_v52 = vadd.f32 %v4742_v7, %v2034_v44  ;;  %v1770_v0 = vadd.f32 %v1769_v10, %v4589_v16  ;;  %v2421_v62 = vsub.f32 1.0, %v2420_v37  ;;  %v3410_v16 = vld [vmem:[%s4324_s8 + $0x2e8] sm:$0xf] }
 0x1b1   : > { %v2036_v31 = vpop.f32.mrf.mxu2  ;;  %4057 = vrcp.f32 %v4876_v8  ;;  %v1860_v21 = vpop.f32.mrf.mxu0  ;;  %v3411_v17 = vor.u32 %v3822_v20, %v3410_v16  ;;  %vm2439_vm6 = vweird.f32 %v4876_v8  ;;  %vm2429_vm7 = vcmp.eq.f32.partialorder %v2428_v56, 8.507059e+37  ;;  %v3829_v56 = vld [vmem:[%s4324_s8 + $0x338] sm:$0xf0] }
 0x1b2   : > { %v4056_v14 = vpop.eup %4055  ;;  %v3699_v53 = vmul.f32 -1.442695, %v2206_v52  ;;  %v1859_v34 = vadd.f32 %v1858_v48, %v1770_v0  ;;  %v1949_v47 = vpop.f32.mrf.mxu1  ;;  %v2422_v41 = vmul.f32 %v4871_v46, %v2421_v62  ;;  %v2445_v62 = vand.u32 2147483648, %v4876_v8 }
 0x1b3   : > { %v4882_v58 = vadd.f32 1.0, %v4056_v14  ;;  %v2443_v14 = vand.u32 2147483647, %v4876_v8 }
 0x1b4   : > { %4059 = vpow2.f32 %v3699_v53  ;;  %v1948_v28 = vadd.f32 %v1947_v57, %v1859_v34  ;;  %v2423_v37 = vadd.f32 %v4871_v46, %v2422_v41  ;;  %v2446_v39 = vor.u32 1.1754944e-38, %v2445_v62 }
 0x1b5   : > { %4061 = vrcp.f32 %v4882_v58  ;;  %vm2444_vm9 = vcmp.eq.f32.partialorder %v2443_v14, 8.507059e+37  ;;  %vm2454_vm10 = vweird.f32 %v4882_v58 }
 0x1b6   : > { %v2037_v33 = vadd.f32 %v2036_v31, %v1948_v28  ;;  %v2427_v28 = vsel %vm4914_vm5, %v4871_v46, %v2423_v37 }
 0x1b7   : > { %v4058_v6 = vpop.eup %4057  ;;  %v1771_v48 = vpop.f32.mrf.mxu3 }
 0x1b8   : > { %v2435_v61 = vmul.f32 %v4058_v6, %v4876_v8  ;;  %v2207_v57 = vadd.f32 %v4742_v7, %v2037_v33  ;;  %v1772_v23 = vadd.f32 %v1771_v48, %v4602_v32  ;;  %v2430_v32 = vand.u32 2147483648, %v4847_v26 }
 0x1b9   : > { %v2038_v18 = vpop.f32.mrf.mxu2  ;;  %v1863_v40 = vpop.f32.mrf.mxu0  ;;  %vm2440_vm4 = vweird.f32 %v4058_v6 }
 0x1ba   : > { %v4060_v15 = vpop.eup %4059  ;;  %v2436_v44 = vsub.f32 1.0, %v2435_v61  ;;  %v3700_v10 = vmul.f32 -1.442695, %v2207_v57  ;;  %v1861_v52 = vadd.f32 %v1860_v21, %v1772_v23  ;;  %v1952_v0 = vpop.f32.mrf.mxu1  ;;  %v2431_v20 = vor.u32 1.1754944e-38, %v2430_v32  ;;  %vm2441_vm8 = vmor %vm2439_vm6, %vm2440_vm4 }
 0x1bb   : > { %v4901_v31 = vpop.eup %4061  ;;  %v4906_v53 = vadd.f32 1.0, %v4060_v15  ;;  %v2458_v21 = vand.u32 2147483647, %v4882_v58 }
 0x1bc   : > { %v2437_v34 = vmul.f32 %v4058_v6, %v2436_v44  ;;  %v2450_v9 = vmul.f32 %v4901_v31, %v4882_v58  ;;  %4063 = vpow2.f32 %v3700_v10  ;;  %1813 = vmatmul.bf16.gmra.mxu3 %v3407_v1  ;;  %1902 = vmatmul.bf16.gmra.mxu0 %v3411_v17  ;;  %v1950_v26 = vadd.f32 %v1949_v47, %v1861_v52  ;;  %v3825_v1 = vld [vmem:[%s4324_s8 + $0x31c] sm:$0xf]  ;;  %v3432_v47 = vld [vmem:[%s4324_s8 + $0x334] sm:$0xf0]  ;;  %v3446_v10 = vld [vmem:[%s4324_s8 + $0x328] sm:$0xf] }
 0x1bd   : > { %4065 = vrcp.f32 %v4906_v53  ;;  %1991 = vmatmul.bf16.gmra.mxu1 %v3415_v2  ;;  %v2432_v46 = vsel %vm2429_vm7, %v2431_v20, %v2427_v28  ;;  %v3435_v44 = vor.u32 %v3825_v1, %v3432_v47  ;;  %vm2455_vm11 = vweird.f32 %v4901_v31  ;;  %v3830_v52 = vld [vmem:[%s4324_s8 + $0x340] sm:$0xf0] }
 0x1be   : > { %3689 = vmatmul.msk.bf16.gmra.mxu2 %vm1424_vm0, %v3419_v29  ;;  %v2438_v30 = vadd.f32 %v4058_v6, %v2437_v34  ;;  %v2451_v16 = vsub.f32 1.0, %v2450_v9  ;;  %v2039_v41 = vadd.f32 %v2038_v18, %v1950_v26  ;;  %v3438_v18 = vld [vmem:[%s4324_s8 + $0x320] sm:$0xf]  ;;  %v3826_v34 = vld [vmem:[%s4324_s8 + $0x324] sm:$0xf]  ;;  %v2460_v28 = vand.u32 2147483648, %v4882_v58  ;;  %vm4953_vm13 = vmor %vm2454_vm10, %vm2455_vm11 }
 0x1bf   : > { %v1774_v8 = vpop.f32.mrf.mxu3  ;;  %v3440_v9 = vld [vmem:[%s4324_s8 + $0x33c] sm:$0xf0]  ;;  %vm2469_vm14 = vweird.f32 %v4906_v53  ;;  %vm2459_vm15 = vcmp.eq.f32.partialorder %v2458_v21, 8.507059e+37  ;;  %v3836_v21 = vld [vmem:[%s4324_s8 + $0x370] sm:$0xf0] }
 0x1c0   : > { %v2442_v43 = vsel %vm2441_vm8, %v4058_v6, %v2438_v30  ;;  %v1775_v33 = vadd.f32 %v1774_v8, %v4608_v42  ;;  %v2452_v57 = vmul.f32 %v4901_v31, %v2451_v16  ;;  %v2208_v6 = vadd.f32 %v4742_v7, %v2039_v41 }
 0x1c1   : > { %v2041_v54 = vpop.f32.mrf.mxu2  ;;  %v2447_v55 = vsel %vm2444_vm9, %v2446_v39, %v2442_v43  ;;  %v1865_v48 = vpop.f32.mrf.mxu0  ;;  %v2473_v30 = vand.u32 2147483647, %v4906_v53  ;;  %v2475_v16 = vand.u32 2147483648, %v4906_v53  ;;  %v2461_v58 = vor.u32 1.1754944e-38, %v2460_v28  ;;  %v3474_v28 = vld [vmem:[%s4324_s8 + $0x360] sm:$0xf] }
 0x1c2   : > { %v4064_v17 = vpop.eup %4063  ;;  %v3901_v61 = vpack.c.bf16 %v2447_v55, %v2432_v46  ;;  %v1864_v23 = vadd.f32 %v1863_v40, %v1775_v33  ;;  %v1954_v29 = vpop.f32.mrf.mxu1  ;;  %v3701_v37 = vmul.f32 -1.442695, %v2208_v6  ;;  %v3439_v40 = vor.u32 %v3829_v56, %v3438_v18 }
 0x1c3   : > { %v4066_v42 = vpop.eup %4065  ;;  %v4932_v2 = vadd.f32 1.0, %v4064_v17  ;;  %v2453_v32 = vadd.f32 %v4901_v31, %v2452_v57  ;;  %v3447_v33 = vor.u32 %v3830_v52, %v3446_v10  ;;  %v3443_v46 = vor.u32 %v3826_v34, %v3440_v9  ;;  %v3832_v52 = vld [vmem:[%s4324_s8 + $0x354] sm:$0xf]  ;;  %v3460_v34 = vld [vmem:[%s4324_s8 + $0x36c] sm:$0xf0] }
 0x1c4   : > { %3969 = vst [vmem:[%s4829_s9 + $0x10] sm:$0xff] %v3901_v61   ;;  %v2465_v15 = vmul.f32 %v4066_v42, %v4906_v53  ;;  %v1953_v62 = vadd.f32 %v1952_v0, %v1864_v23  ;;  %vm2470_vm12 = vweird.f32 %v4066_v42  ;;  %v2476_v61 = vor.u32 1.1754944e-38, %v2475_v16  ;;  %v3466_v9 = vld [vmem:[%s4324_s8 + $0x358] sm:$0xf] }
 0x1c5   : > { %4067 = vrcp.f32 %v4932_v2  ;;  %vm2471_vm1 = vmor %vm2469_vm14, %vm2470_vm12  ;;  %vm2474_vm2 = vcmp.eq.f32.partialorder %v2473_v30, 8.507059e+37  ;;  %v3837_v30 = vld [vmem:[%s4324_s8 + $0x378] sm:$0xf0]  ;;  %vm2484_vm3 = vweird.f32 %v4932_v2 }
 0x1c6   : > { %v2466_v14 = vsub.f32 1.0, %v2465_v15  ;;  %4069 = vpow2.f32 %v3701_v37  ;;  %v2042_v39 = vadd.f32 %v2041_v54, %v1953_v62  ;;  %v2457_v54 = vsel %vm4953_vm13, %v4901_v31, %v2453_v32 }
 0x1c7   : > { %v1776_v26 = vpop.f32.mrf.mxu3  ;;  %v2462_v23 = vsel %vm2459_vm15, %v2461_v58, %v2457_v54 }
 0x1c8   : > { %v2467_v20 = vmul.f32 %v4066_v42, %v2466_v14  ;;  %v1777_v8 = vadd.f32 %v1776_v26, %v4621_v3  ;;  %v2209_v3 = vadd.f32 %v4742_v7, %v2042_v39 }
 0x1c9   : > { %v2043_v43 = vpop.f32.mrf.mxu2  ;;  %v1868_v41 = vpop.f32.mrf.mxu0 }
 0x1ca   : > { %v2468_v55 = vadd.f32 %v4066_v42, %v2467_v20  ;;  %v1866_v1 = vadd.f32 %v1865_v48, %v1777_v8  ;;  %v1957_v47 = vpop.f32.mrf.mxu1  ;;  %v3702_v31 = vmul.f32 -1.442695, %v2209_v3  ;;  %v3468_v8 = vld [vmem:[%s4324_s8 + $0x374] sm:$0xf0] }
 0x1cb   : > { %v4962_v17 = vpop.eup %4067 }
 0x1cc   : > { %v4070_v53 = vpop.eup %4069  ;;  %v2472_v57 = vsel %vm2471_vm1, %v4066_v42, %v2468_v55  ;;  %v2480_v6 = vmul.f32 %v4962_v17, %v4932_v2  ;;  %1818 = vmatmul.bf16.gmra.mxu3 %v3435_v44  ;;  %1907 = vmatmul.bf16.gmra.mxu0 %v3439_v40  ;;  %v1955_v56 = vadd.f32 %v1954_v29, %v1866_v1  ;;  %4071 = vpow2.f32 %v3702_v31 }
 0x1cd   : > { %v2477_v48 = vsel %vm2474_vm2, %v2476_v61, %v2472_v57  ;;  %v4967_v18 = vadd.f32 1.0, %v4070_v53  ;;  %1996 = vmatmul.bf16.gmra.mxu1 %v3443_v46  ;;  %v3467_v46 = vor.u32 %v3836_v21, %v3466_v9  ;;  %v3475_v55 = vor.u32 %v3837_v30, %v3474_v28 }
 0x1ce   : > { %3690 = vmatmul.msk.bf16.gmra.mxu2 %vm1424_vm0, %v3447_v33  ;;  %v3906_v42 = vpack.c.bf16 %v2477_v48, %v2462_v23  ;;  %v2481_v37 = vsub.f32 1.0, %v2480_v6  ;;  %v2044_v44 = vadd.f32 %v2043_v43, %v1955_v56  ;;  %v3463_v33 = vor.u32 %v3832_v52, %v3460_v34 }
 0x1cf   : > { %4073 = vrcp.f32 %v4967_v18  ;;  %v1779_v15 = vpop.f32.mrf.mxu3  ;;  %vm2485_vm4 = vweird.f32 %v4962_v17  ;;  %v2488_v6 = vand.u32 2147483647, %v4932_v2  ;;  %v2490_v31 = vand.u32 2147483648, %v4932_v2 }
 0x1d0   : > { %3970 = vst [vmem:[%s4829_s9 + $0x18] sm:$0xff] %v3906_v42   ;;  %v1780_v40 = vadd.f32 %v1779_v15, %v4627_v5  ;;  %v2210_v32 = vadd.f32 %v4742_v7, %v2044_v44  ;;  %v2482_v26 = vmul.f32 %v4962_v17, %v2481_v37  ;;  %v3833_v5 = vld [vmem:[%s4324_s8 + $0x35c] sm:$0xf]  ;;  %v2503_v23 = vand.u32 2147483647, %v4967_v18  ;;  %vm5000_vm6 = vmor %vm2484_vm3, %vm2485_vm4 }
 0x1d1   : > { %v2046_v29 = vpop.f32.mrf.mxu2  ;;  %v1870_v10 = vpop.f32.mrf.mxu0  ;;  %v3471_v1 = vor.u32 %v3833_v5, %v3468_v8  ;;  %v2505_v48 = vand.u32 2147483648, %v4967_v18  ;;  %vm2499_vm7 = vweird.f32 %v4967_v18  ;;  %vm2489_vm8 = vcmp.eq.f32.partialorder %v2488_v6, 8.507059e+37 }
 0x1d2   : > { %v1869_v14 = vadd.f32 %v1868_v41, %v1780_v40  ;;  %v1959_v62 = vpop.f32.mrf.mxu1  ;;  %v4072_v16 = vpop.eup %4071  ;;  %v3703_v20 = vmul.f32 -1.442695, %v2210_v32  ;;  %v2491_v2 = vor.u32 1.1754944e-38, %v2490_v31  ;;  %vm2504_vm10 = vcmp.eq.f32.partialorder %v2503_v23, 8.507059e+37 }
 0x1d3   : > { %v4983_v0 = vadd.f32 1.0, %v4072_v16 }
 0x1d4   : > { %v1958_v39 = vadd.f32 %v1957_v47, %v1869_v14  ;;  %4075 = vpow2.f32 %v3703_v20  ;;  %v2483_v47 = vadd.f32 %v4962_v17, %v2482_v26  ;;  %v2506_v14 = vor.u32 1.1754944e-38, %v2505_v48 }
 0x1d5   : > { %v4074_v43 = vpop.eup %4073  ;;  %4077 = vrcp.f32 %v4983_v0  ;;  %vm2514_vm11 = vweird.f32 %v4983_v0  ;;  %v2520_v31 = vand.u32 2147483648, %v4983_v0 }
 0x1d6   : > { %v2495_v41 = vmul.f32 %v4074_v43, %v4967_v18  ;;  %v2047_v54 = vadd.f32 %v2046_v29, %v1958_v39  ;;  %vm2500_vm5 = vweird.f32 %v4074_v43  ;;  %v2487_v29 = vsel %vm5000_vm6, %v4962_v17, %v2483_v47 }
 0x1d7   : > { %v1781_v3 = vpop.f32.mrf.mxu3  ;;  %vm2501_vm9 = vmor %vm2499_vm7, %vm2500_vm5  ;;  %v2492_v9 = vsel %vm2489_vm8, %v2491_v2, %v2487_v29 }
 0x1d8   : > { %v2496_v58 = vsub.f32 1.0, %v2495_v41  ;;  %v2211_v61 = vadd.f32 %v4742_v7, %v2047_v54  ;;  %v1782_v53 = vadd.f32 %v1781_v3, %v4640_v36 }
 0x1d9   : > { %v2048_v57 = vpop.f32.mrf.mxu2  ;;  %v1873_v56 = vpop.f32.mrf.mxu0 }
 0x1da   : > { %v2497_v42 = vmul.f32 %v4074_v43, %v2496_v58  ;;  %v3704_v15 = vmul.f32 -1.442695, %v2211_v61  ;;  %v1871_v37 = vadd.f32 %v1870_v10, %v1782_v53  ;;  %v1962_v44 = vpop.f32.mrf.mxu1  ;;  %v4076_v40 = vpop.eup %4075 }
 0x1db   : > { %v5008_v10 = vpop.eup %4077  ;;  %v2338_v34 = vadd.f32 1.0, %v4076_v40 }
 0x1dc   : > { %v2498_v52 = vadd.f32 %v4074_v43, %v2497_v42  ;;  %4079 = vpow2.f32 %v3704_v15  ;;  %v1960_v32 = vadd.f32 %v1959_v62, %v1871_v37  ;;  %1823 = vmatmul.bf16.gmra.mxu3 %v3463_v33  ;;  %1912 = vmatmul.bf16.gmra.mxu0 %v3467_v46  ;;  %v2510_v17 = vmul.f32 %v5008_v10, %v4983_v0 }
 0x1dd   : > { %2001 = vmatmul.bf16.gmra.mxu1 %v3471_v1  ;;  %4081 = vrcp.f32 %v2338_v34  ;;  %v2533_v23 = vand.u32 2147483647, %v2338_v34  ;;  %v2535_v48 = vand.u32 2147483648, %v2338_v34  ;;  %vm2529_vm15 = vweird.f32 %v2338_v34 }
 0x1de   : > { %3691 = vmatmul.msk.bf16.gmra.mxu2 %vm1424_vm0, %v3475_v55  ;;  %v2502_v18 = vsel %vm2501_vm9, %v4074_v43, %v2498_v52  ;;  %v2049_v62 = vadd.f32 %v2048_v57, %v1960_v32  ;;  %v2511_v16 = vsub.f32 1.0, %v2510_v17  ;;  %vm2515_vm0 = vweird.f32 %v5008_v10 }
 0x1df   : > { %v2507_v21 = vsel %vm2504_vm10, %v2506_v14, %v2502_v18  ;;  %v1784_v28 = vpop.f32.mrf.mxu3  ;;  %vm5032_vm13 = vmor %vm2514_vm11, %vm2515_vm0  ;;  %v2521_v18 = vor.u32 1.1754944e-38, %v2520_v31  ;;  %vm2534_vm2 = vcmp.eq.f32.partialorder %v2533_v23, 8.507059e+37  ;;  %v2536_v17 = vor.u32 1.1754944e-38, %v2535_v48 }
 0x1e0   : > { %v3911_v30 = vpack.c.bf16 %v2507_v21, %v2492_v9  ;;  %v2212_v26 = vadd.f32 %v4742_v7, %v2049_v62  ;;  %v1785_v39 = vadd.f32 %v1784_v28, %v4646_v50  ;;  %v2512_v54 = vmul.f32 %v5008_v10, %v2511_v16 }
 0x1e1   : > { %v2051_v20 = vpop.f32.mrf.mxu2  ;;  %v1875_v5 = vpop.f32.mrf.mxu0  ;;  %v2518_v50 = vand.u32 2147483647, %v4983_v0 }
 0x1e2   : > { %v4080_v8 = vpop.eup %4079  ;;  %3971 = vst [vmem:[%s4829_s9 + $0x20] sm:$0xff] %v3911_v30   ;;  %v3705_v43 = vmul.f32 -1.442695, %v2212_v26  ;;  %v1964_v33 = vpop.f32.mrf.mxu1  ;;  %v1874_v41 = vadd.f32 %v1873_v56, %v1785_v39  ;;  %v2513_v58 = vadd.f32 %v5008_v10, %v2512_v54 }
 0x1e3   : > { %v5017_v46 = vadd.f32 1.0, %v4080_v8  ;;  %v4082_v55 = vpop.eup %4081  ;;  %vm5036_vm14 = vcmp.eq.f32.partialorder %v2518_v50, 8.507059e+37 }
 0x1e4   : > { %4083 = vpow2.f32 %v3705_v43  ;;  %v2525_v3 = vmul.f32 %v4082_v55, %v2338_v34  ;;  %v1963_v1 = vadd.f32 %v1962_v44, %v1874_v41  ;;  %vm2530_vm12 = vweird.f32 %v4082_v55 }
 0x1e5   : > { %4085 = vrcp.f32 %v5017_v46  ;;  %v2517_v52 = vsel %vm5032_vm13, %v5008_v10, %v2513_v58  ;;  %vm2531_vm1 = vmor %vm2529_vm15, %vm2530_vm12  ;;  %vm2544_vm3 = vweird.f32 %v5017_v46 }
 0x1e6   : > { %v2526_v61 = vsub.f32 1.0, %v2525_v3  ;;  %v2052_v53 = vadd.f32 %v2051_v20, %v1963_v1  ;;  %v2522_v21 = vsel %vm5036_vm14, %v2521_v18, %v2517_v52  ;;  %v2548_v1 = vand.u32 2147483647, %v5017_v46 }
 0x1e7   : > { %v1786_v47 = vpop.f32.mrf.mxu3 }
 0x1e8   : > { %v1787_v57 = vadd.f32 %v1786_v47, %v4659_v12  ;;  %v2527_v15 = vmul.f32 %v4082_v55, %v2526_v61  ;;  %v2213_v37 = vadd.f32 %v4742_v7, %v2052_v53  ;;  %vm2549_vm8 = vcmp.eq.f32.partialorder %v2548_v1, 8.507059e+37 }
 0x1e9   : > { %v2053_v6 = vpop.f32.mrf.mxu2  ;;  %v1878_v56 = vpop.f32.mrf.mxu0 }
 0x1ea   : > { %v4084_v42 = vpop.eup %4083  ;;  %v1876_v44 = vadd.f32 %v1875_v5, %v1787_v57  ;;  %v1967_v36 = vpop.f32.mrf.mxu1  ;;  %v2528_v32 = vadd.f32 %v4082_v55, %v2527_v15  ;;  %v3706_v14 = vmul.f32 -1.442695, %v2213_v37 }
 0x1eb   : > { %v5028_v40 = vpop.eup %4085  ;;  %v5040_v29 = vadd.f32 1.0, %v4084_v42 }
 0x1ec   : > { %v2540_v2 = vmul.f32 %v5028_v40, %v5017_v46  ;;  %v2532_v62 = vsel %vm2531_vm1, %v4082_v55, %v2528_v32  ;;  %v1965_v9 = vadd.f32 %v1964_v33, %v1876_v44  ;;  %vm2545_vm4 = vweird.f32 %v5028_v40  ;;  %v5079_v44 = vld [vmem:[%s5305_s2] ss:$0 sm:$0xff] }
 0x1ed   : > { %4087 = vrcp.f32 %v5040_v29  ;;  %v2537_v10 = vsel %vm2534_vm2, %v2536_v17, %v2532_v62  ;;  %v2563_v61 = vand.u32 2147483647, %v5040_v29  ;;  %v2565_v53 = vand.u32 2147483648, %v5040_v29  ;;  %vm5068_vm6 = vmor %vm2544_vm3, %vm2545_vm4 }
 0x1ee   : > { %v2541_v34 = vsub.f32 1.0, %v2540_v2  ;;  %4089 = vpow2.f32 %v3706_v14  ;;  %v3916_v30 = vpack.c.bf16 %v2537_v10, %v2522_v21  ;;  %v2054_v16 = vadd.f32 %v2053_v6, %v1965_v9 }
 0x1ef   : > { %v1789_v28 = vpop.f32.mrf.mxu3  ;;  %vm2559_vm7 = vweird.f32 %v5040_v29  ;;  %v2566_v0 = vor.u32 1.1754944e-38, %v2565_v53  ;;  %vm2564_vm10 = vcmp.eq.f32.partialorder %v2563_v61, 8.507059e+37 }
 0x1f0   : > { %v1790_v26 = vadd.f32 %v1789_v28, %v4665_v25  ;;  %3972 = vst [vmem:[%s4829_s9 + $0x28] sm:$0xff] %v3916_v30   ;;  %v2542_v5 = vmul.f32 %v5028_v40, %v2541_v34  ;;  %v2214_v8 = vadd.f32 %v4742_v7, %v2054_v16  ;;  %v2550_v7 = vand.u32 2147483648, %v5017_v46 }
 0x1f1   : > { %v2056_v20 = vpop.f32.mrf.mxu2  ;;  %v1880_v39 = vpop.f32.mrf.mxu0 }
 0x1f2   : > { %v1879_v43 = vadd.f32 %v1878_v56, %v1790_v26  ;;  %v1969_v41 = vpop.f32.mrf.mxu1  ;;  %v3707_v3 = vmul.f32 -1.442695, %v2214_v8  ;;  %v2543_v47 = vadd.f32 %v5028_v40, %v2542_v5  ;;  %v2551_v12 = vor.u32 1.1754944e-38, %v2550_v7 }
 0x1f3   : > { %v4088_v54 = vpop.eup %4087 }
 0x1f4   : > { %v4090_v33 = vpop.eup %4089  ;;  %v2555_v55 = vmul.f32 %v4088_v54, %v5040_v29  ;;  %v1968_v25 = vadd.f32 %v1967_v36, %v1879_v43  ;;  %4091 = vpow2.f32 %v3707_v3  ;;  %vm2560_vm5 = vweird.f32 %v4088_v54 }
 0x1f5   : > { %v5057_v50 = vadd.f32 1.0, %v4090_v33  ;;  %v2547_v15 = vsel %vm5068_vm6, %v5028_v40, %v2543_v47  ;;  %vm2561_vm9 = vmor %vm2559_vm7, %vm2560_vm5 }
 0x1f6   : > { %v2556_v58 = vsub.f32 1.0, %v2555_v55  ;;  %v2057_v31 = vadd.f32 %v2056_v20, %v1968_v25  ;;  %v2552_v14 = vsel %vm2549_vm8, %v2551_v12, %v2547_v15 }
 0x1f7   : > { %4093 = vrcp.f32 %v5057_v50  ;;  %v1791_v57 = vpop.f32.mrf.mxu3  ;;  %vm2574_vm0 = vweird.f32 %v5057_v50  ;;  %v2578_v7 = vand.u32 2147483647, %v5057_v50  ;;  %v2580_v61 = vand.u32 2147483648, %v5057_v50 }
 0x1f8   : > { %v2557_v6 = vmul.f32 %v4088_v54, %v2556_v58  ;;  %v1792_v23 = vadd.f32 %v1791_v57, %v4678_v49  ;;  %v2215_v49 = vadd.f32 %v5079_v44, %v2057_v31 }
 0x1f9   : > { %v2058_v48 = vpop.f32.mrf.mxu2  ;;  %v1883_v42 = vpop.f32.mrf.mxu0  ;;  %vm2579_vm15 = vcmp.eq.f32.partialorder %v2578_v7, 8.507059e+37  ;;  %v2581_v12 = vor.u32 1.1754944e-38, %v2580_v61 }
 0x1fa   : > { %v2558_v37 = vadd.f32 %v4088_v54, %v2557_v6  ;;  %v1881_v46 = vadd.f32 %v1880_v39, %v1792_v23  ;;  %v1972_v36 = vpop.f32.mrf.mxu1  ;;  %v4092_v29 = vpop.eup %4091  ;;  %v3708_v40 = vmul.f32 -1.442695, %v2215_v49 }
 0x1fb   : > { %v2342_v17 = vadd.f32 1.0, %v4092_v29 }
 0x1fc   : > { %v2562_v52 = vsel %vm2561_vm9, %v4088_v54, %v2558_v37  ;;  %v1970_v32 = vadd.f32 %v1969_v41, %v1881_v46  ;;  %4095 = vpow2.f32 %v3708_v40 }
 0x1fd   : > { %v5083_v2 = vpop.eup %4093  ;;  %v2567_v18 = vsel %vm2564_vm10, %v2566_v0, %v2562_v52  ;;  %4097 = vrcp.f32 %v2342_v17  ;;  %v2593_v53 = vand.u32 2147483647, %v2342_v17  ;;  %v2595_v57 = vand.u32 2147483648, %v2342_v17 }
 0x1fe   : > { %v3921_v62 = vpack.c.bf16 %v2567_v18, %v2552_v14  ;;  %v2570_v34 = vmul.f32 %v5083_v2, %v5057_v50  ;;  %v2059_v10 = vadd.f32 %v2058_v48, %v1970_v32  ;;  %vm2575_vm11 = vweird.f32 %v5083_v2 }
 0x1ff   : > { %v1794_v9 = vpop.f32.mrf.mxu3  ;;  %vm5105_vm13 = vmor %vm2574_vm0, %vm2575_vm11  ;;  %vm2589_vm14 = vweird.f32 %v2342_v17  ;;  %v2596_v0 = vor.u32 1.1754944e-38, %v2595_v57  ;;  %vm2594_vm2 = vcmp.eq.f32.partialorder %v2593_v53, 8.507059e+37 }
 0x200   : > { %3973 = vst [vmem:[%s4829_s9 + $0x30] sm:$0xff] %v3921_v62   ;;  %v2571_v21 = vsub.f32 1.0, %v2570_v34  ;;  %v1795_v28 = vadd.f32 %v1794_v9, %v4684_v60  ;;  %v2216_v26 = vadd.f32 %v5079_v44, %v2059_v10 }
 0x201   : > { %v2061_v30 = vpop.f32.mrf.mxu2  ;;  %v1885_v16 = vpop.f32.mrf.mxu0 }
 0x202   : > { %v1884_v20 = vadd.f32 %v1883_v42, %v1795_v28  ;;  %v1974_v39 = vpop.f32.mrf.mxu1  ;;  %v4096_v5 = vpop.eup %4095  ;;  %v2572_v8 = vmul.f32 %v5083_v2, %v2571_v21  ;;  %v3709_v43 = vmul.f32 -1.442695, %v2216_v26 }
 0x203   : > { %v4098_v54 = vpop.eup %4097  ;;  %v5091_v33 = vadd.f32 1.0, %v4096_v5 }
 0x204   : > { %v1973_v41 = vadd.f32 %v1972_v36, %v1884_v20  ;;  %v2585_v55 = vmul.f32 %v4098_v54, %v2342_v17  ;;  %4099 = vpow2.f32 %v3709_v43  ;;  %v2573_v3 = vadd.f32 %v5083_v2, %v2572_v8 }
 0x205   : > { %4101 = vrcp.f32 %v5091_v33  ;;  %vm2590_vm12 = vweird.f32 %v4098_v54  ;;  %vm2604_vm3 = vweird.f32 %v5091_v33 }
 0x206   : > { %v2586_v1 = vsub.f32 1.0, %v2585_v55  ;;  %v2062_v25 = vadd.f32 %v2061_v30, %v1973_v41  ;;  %v2577_v15 = vsel %vm5105_vm13, %v5083_v2, %v2573_v3  ;;  %vm2591_vm1 = vmor %vm2589_vm14, %vm2590_vm12  ;;  %v2608_v3 = vand.u32 2147483647, %v5091_v33 }
 0x207   : > { %v1796_v60 = vpop.f32.mrf.mxu3  ;;  %v2582_v40 = vsel %vm2579_vm15, %v2581_v12, %v2577_v15 }
 0x208   : > { %v1797_v47 = vadd.f32 %v1796_v60, %v4697_v27  ;;  %v2587_v31 = vmul.f32 %v4098_v54, %v2586_v1  ;;  %v2217_v23 = vadd.f32 %v5079_v44, %v2062_v25  ;;  %v2610_v1 = vand.u32 2147483648, %v5091_v33 }
 0x209   : > { %v2063_v58 = vpop.f32.mrf.mxu2  ;;  %v1888_v6 = vpop.f32.mrf.mxu0  ;;  %vm2609_vm8 = vcmp.eq.f32.partialorder %v2608_v3, 8.507059e+37 }
 0x20a   : > { %v1886_v48 = vadd.f32 %v1885_v16, %v1797_v47  ;;  %v1977_v56 = vpop.f32.mrf.mxu1  ;;  %v4100_v42 = vpop.eup %4099  ;;  %v2588_v37 = vadd.f32 %v4098_v54, %v2587_v31  ;;  %v3710_v49 = vmul.f32 -1.442695, %v2217_v23 }
 0x20b   : > { %v5112_v36 = vpop.eup %4101  ;;  %v2344_v50 = vadd.f32 1.0, %v4100_v42  ;;  %v2611_v42 = vor.u32 1.1754944e-38, %v2610_v1 }
 0x20c   : > { %v1975_v46 = vadd.f32 %v1974_v39, %v1886_v48  ;;  %v2592_v29 = vsel %vm2591_vm1, %v4098_v54, %v2588_v37  ;;  %v2600_v52 = vmul.f32 %v5112_v36, %v5091_v33  ;;  %4103 = vpow2.f32 %v3710_v49 }
 0x20d   : > { %v2597_v32 = vsel %vm2594_vm2, %v2596_v0, %v2592_v29  ;;  %4105 = vrcp.f32 %v2344_v50  ;;  %vm2605_vm4 = vweird.f32 %v5112_v36  ;;  %v2623_v25 = vand.u32 2147483647, %v2344_v50 }
 0x20e   : > { %v3926_v14 = vpack.c.bf16 %v2597_v32, %v2582_v40  ;;  %v2601_v18 = vsub.f32 1.0, %v2600_v52  ;;  %v2064_v17 = vadd.f32 %v2063_v58, %v1975_v46  ;;  %v2625_v47 = vand.u32 2147483648, %v2344_v50  ;;  %vm5134_vm6 = vmor %vm2604_vm3, %vm2605_vm4 }
 0x20f   : > { %v1799_v2 = vpop.f32.mrf.mxu3  ;;  %vm2619_vm7 = vweird.f32 %v2344_v50  ;;  %vm2624_vm10 = vcmp.eq.f32.partialorder %v2623_v25, 8.507059e+37 }
 0x210   : > { %v1800_v34 = vadd.f32 %v1799_v2, %v4703_v38  ;;  %3974 = vst [vmem:[%s4829_s9 + $0x38] sm:$0xff] %v3926_v14   ;;  %v2218_v21 = vadd.f32 %v5079_v44, %v2064_v17  ;;  %v2602_v16 = vmul.f32 %v5112_v36, %v2601_v18  ;;  %v2626_v15 = vor.u32 1.1754944e-38, %v2625_v47 }
 0x211   : > { %v2066_v62 = vpop.f32.mrf.mxu2  ;;  %v1890_v9 = vpop.f32.mrf.mxu0 }
 0x212   : > { %v1979_v10 = vpop.f32.mrf.mxu1  ;;  %v1889_v28 = vadd.f32 %v1888_v6, %v1800_v34  ;;  %v4104_v30 = vpop.eup %4103  ;;  %v3711_v26 = vmul.f32 -1.442695, %v2218_v21  ;;  %v2603_v43 = vadd.f32 %v5112_v36, %v2602_v16 }
 0x213   : > { %v4106_v20 = vpop.eup %4105  ;;  %v5120_v39 = vadd.f32 1.0, %v4104_v30 }
 0x214   : > { %v1978_v5 = vadd.f32 %v1977_v56, %v1889_v28  ;;  %v2615_v8 = vmul.f32 %v4106_v20, %v2344_v50  ;;  %4107 = vpow2.f32 %v3711_v26  ;;  %vm2620_vm5 = vweird.f32 %v4106_v20 }
 0x215   : > { %4109 = vrcp.f32 %v5120_v39  ;;  %v2607_v31 = vsel %vm5134_vm6, %v5112_v36, %v2603_v43  ;;  %vm2621_vm9 = vmor %vm2619_vm7, %vm2620_vm5  ;;  %vm2634_vm0 = vweird.f32 %v5120_v39 }
 0x216   : > { %v2616_v41 = vsub.f32 1.0, %v2615_v8  ;;  %v2067_v54 = vadd.f32 %v2066_v62, %v1978_v5  ;;  %v2612_v46 = vsel %vm2609_vm8, %v2611_v42, %v2607_v31  ;;  %v2638_v8 = vand.u32 2147483647, %v5120_v39 }
 0x217   : > { %v1801_v38 = vpop.f32.mrf.mxu3 }
 0x218   : > { %v1802_v55 = vadd.f32 %v1801_v38, %v4716_v4  ;;  %v2617_v7 = vmul.f32 %v4106_v20, %v2616_v41  ;;  %v2219_v61 = vadd.f32 %v5079_v44, %v2067_v54  ;;  %v2640_v38 = vand.u32 2147483648, %v5120_v39 }
 0x219   : > { %v2068_v60 = vpop.f32.mrf.mxu2  ;;  %v1893_v58 = vpop.f32.mrf.mxu0  ;;  %vm2639_vm15 = vcmp.eq.f32.partialorder %v2638_v8, 8.507059e+37 }
 0x21a   : > { %v1891_v53 = vadd.f32 %v1890_v9, %v1802_v55  ;;  %v1982_v57 = vpop.f32.mrf.mxu1  ;;  %v4108_v6 = vpop.eup %4107  ;;  %v2618_v23 = vadd.f32 %v4106_v20, %v2617_v7  ;;  %v3712_v48 = vmul.f32 -1.442695, %v2219_v61 }
 0x21b   : > { %v5141_v27 = vpop.eup %4109  ;;  %v2346_v33 = vadd.f32 1.0, %v4108_v6 }
 0x21c   : > { %v1980_v56 = vadd.f32 %v1979_v10, %v1891_v53  ;;  %v2622_v37 = vsel %vm2621_vm9, %v4106_v20, %v2618_v23  ;;  %v2630_v49 = vmul.f32 %v5141_v27, %v5120_v39  ;;  %4111 = vpow2.f32 %v3712_v48 }
 0x21d   : > { %v2627_v12 = vsel %vm2624_vm10, %v2626_v15, %v2622_v37  ;;  %4113 = vrcp.f32 %v2346_v33  ;;  %vm2635_vm11 = vweird.f32 %v5141_v27  ;;  %v2653_v43 = vand.u32 2147483647, %v2346_v33 }
 0x21e   : > { %v3931_v0 = vpack.c.bf16 %v2627_v12, %v2612_v46  ;;  %v2631_v50 = vsub.f32 1.0, %v2630_v49  ;;  %v2069_v29 = vadd.f32 %v2068_v60, %v1980_v56  ;;  %v2655_v41 = vand.u32 2147483648, %v2346_v33  ;;  %vm5163_vm13 = vmor %vm2634_vm0, %vm2635_vm11 }
 0x21f   : > { %v1804_v36 = vpop.f32.mrf.mxu3  ;;  %vm2649_vm14 = vweird.f32 %v2346_v33  ;;  %vm2654_vm2 = vcmp.eq.f32.partialorder %v2653_v43, 8.507059e+37 }
 0x220   : > { %v1805_v40 = vadd.f32 %v1804_v36, %v4722_v19  ;;  %3975 = vst [vmem:[%s4829_s9 + $0x40] sm:$0xff] %v3931_v0   ;;  %v2220_v2 = vadd.f32 %v5079_v44, %v2069_v29  ;;  %v2632_v62 = vmul.f32 %v5141_v27, %v2631_v50  ;;  %v2656_v4 = vor.u32 1.1754944e-38, %v2655_v41 }
 0x221   : > { %v2071_v52 = vpop.f32.mrf.mxu2  ;;  %v1895_v32 = vpop.f32.mrf.mxu0 }
 0x222   : > { %v1984_v14 = vpop.f32.mrf.mxu1  ;;  %v1894_v18 = vadd.f32 %v1893_v58, %v1805_v40  ;;  %v4112_v17 = vpop.eup %4111  ;;  %v3713_v34 = vmul.f32 -1.442695, %v2220_v2  ;;  %v2633_v30 = vadd.f32 %v5141_v27, %v2632_v62 }
 0x223   : > { %v4114_v9 = vpop.eup %4113  ;;  %v5149_v21 = vadd.f32 1.0, %v4112_v17 }
 0x224   : > { %v1983_v10 = vadd.f32 %v1982_v57, %v1894_v18  ;;  %v2645_v28 = vmul.f32 %v4114_v9, %v2346_v33  ;;  %4115 = vpow2.f32 %v3713_v34  ;;  %vm2650_vm12 = vweird.f32 %v4114_v9 }
 0x225   : > { %4117 = vrcp.f32 %v5149_v21  ;;  %v2637_v47 = vsel %vm5163_vm13, %v5141_v27, %v2633_v30  ;;  %v2641_v57 = vor.u32 1.1754944e-38, %v2640_v38  ;;  %vm2651_vm1 = vmor %vm2649_vm14, %vm2650_vm12  ;;  %vm2664_vm3 = vweird.f32 %v5149_v21 }
 0x226   : > { %v2646_v16 = vsub.f32 1.0, %v2645_v28  ;;  %v2072_v26 = vadd.f32 %v2071_v52, %v1983_v10  ;;  %v2670_v10 = vand.u32 2147483648, %v5149_v21 }
 0x227   : > { %v1806_v19 = vpop.f32.mrf.mxu3  ;;  %v2642_v23 = vsel %vm2639_vm15, %v2641_v57, %v2637_v47 }
 0x228   : > { %v1807_v20 = vadd.f32 %v1806_v19, %v4735_v51  ;;  %v2647_v55 = vmul.f32 %v4114_v9, %v2646_v16  ;;  %v2221_v60 = vadd.f32 %v5079_v44, %v2072_v26 }
 0x229   : > { %v2073_v5 = vpop.f32.mrf.mxu2  ;;  %v1898_v54 = vpop.f32.mrf.mxu0 }
 0x22a   : > { %v1896_v3 = vadd.f32 %v1895_v32, %v1807_v20  ;;  %v1987_v1 = vpop.f32.mrf.mxu1  ;;  %v4116_v25 = vpop.eup %4115  ;;  %v2648_v58 = vadd.f32 %v4114_v9, %v2647_v55  ;;  %v3714_v7 = vmul.f32 -1.442695, %v2221_v60  ;;  %v2671_v60 = vor.u32 1.1754944e-38, %v2670_v10 }
 0x22b   : > { %v5170_v53 = vpop.eup %4117  ;;  %v2348_v39 = vadd.f32 1.0, %v4116_v25 }
 0x22c   : > { %v1985_v61 = vadd.f32 %v1984_v14, %v1896_v3  ;;  %v2652_v6 = vsel %vm2651_vm1, %v4114_v9, %v2648_v58  ;;  %v2660_v31 = vmul.f32 %v5170_v53, %v5149_v21  ;;  %4119 = vpow2.f32 %v3714_v7 }
 0x22d   : > { %v2657_v48 = vsel %vm2654_vm2, %v2656_v4, %v2652_v6  ;;  %4121 = vrcp.f32 %v2348_v39  ;;  %vm2665_vm4 = vweird.f32 %v5170_v53  ;;  %v2668_v9 = vand.u32 2147483647, %v5149_v21 }
 0x22e   : > { %v3936_v27 = vpack.c.bf16 %v2657_v48, %v2642_v23  ;;  %v2661_v42 = vsub.f32 1.0, %v2660_v31  ;;  %v2074_v15 = vadd.f32 %v2073_v5, %v1985_v61  ;;  %v2683_v28 = vand.u32 2147483647, %v2348_v39  ;;  %vm5192_vm6 = vmor %vm2664_vm3, %vm2665_vm4 }
 0x22f   : > { %v1809_v56 = vpop.f32.mrf.mxu3  ;;  %v2685_v19 = vand.u32 2147483648, %v2348_v39  ;;  %vm2679_vm7 = vweird.f32 %v2348_v39  ;;  %vm2669_vm8 = vcmp.eq.f32.partialorder %v2668_v9, 8.507059e+37 }
 0x230   : > { %v1810_v37 = vadd.f32 %v1809_v56, %v4663_v24  ;;  %3976 = vst [vmem:[%s4829_s9 + $0x48] sm:$0xff] %v3936_v27   ;;  %v2222_v46 = vadd.f32 %v5079_v44, %v2074_v15  ;;  %v2662_v50 = vmul.f32 %v5170_v53, %v2661_v42  ;;  %vm2684_vm10 = vcmp.eq.f32.partialorder %v2683_v28, 8.507059e+37 }
 0x231   : > { %v2076_v33 = vpop.f32.mrf.mxu2  ;;  %v1900_v49 = vpop.f32.mrf.mxu0  ;;  %v2686_v3 = vor.u32 1.1754944e-38, %v2685_v19 }
 0x232   : > { %v1989_v12 = vpop.f32.mrf.mxu1  ;;  %v1899_v36 = vadd.f32 %v1898_v54, %v1810_v37  ;;  %v4120_v0 = vpop.eup %4119  ;;  %v3715_v29 = vmul.f32 -1.442695, %v2222_v46  ;;  %v2663_v14 = vadd.f32 %v5170_v53, %v2662_v50 }
 0x233   : > { %v4122_v52 = vpop.eup %4121  ;;  %v5178_v40 = vadd.f32 1.0, %v4120_v0 }
 0x234   : > { %v1988_v32 = vadd.f32 %v1987_v1, %v1899_v36  ;;  %v2675_v2 = vmul.f32 %v4122_v52, %v2348_v39  ;;  %4123 = vpow2.f32 %v3715_v29  ;;  %vm2680_vm5 = vweird.f32 %v4122_v52 }
 0x235   : > { %4125 = vrcp.f32 %v5178_v40  ;;  %v2667_v38 = vsel %vm5192_vm6, %v5170_v53, %v2663_v14  ;;  %vm2681_vm9 = vmor %vm2679_vm7, %vm2680_vm5  ;;  %vm2694_vm0 = vweird.f32 %v5178_v40  ;;  %v2698_v50 = vand.u32 2147483647, %v5178_v40 }
 0x236   : > { %v2676_v18 = vsub.f32 1.0, %v2675_v2  ;;  %v2077_v17 = vadd.f32 %v2076_v33, %v1988_v32  ;;  %v2672_v25 = vsel %vm2669_vm8, %v2671_v60, %v2667_v38  ;;  %v2700_v29 = vand.u32 2147483648, %v5178_v40 }
 0x237   : > { %v1811_v24 = vpop.f32.mrf.mxu3  ;;  %vm2699_vm15 = vcmp.eq.f32.partialorder %v2698_v50, 8.507059e+37 }
 0x238   : > { %v1812_v62 = vadd.f32 %v1811_v24, %v4676_v45  ;;  %v2677_v16 = vmul.f32 %v4122_v52, %v2676_v18  ;;  %v2223_v26 = vadd.f32 %v5079_v44, %v2077_v17  ;;  %v2701_v19 = vor.u32 1.1754944e-38, %v2700_v29 }
 0x239   : > { %v2078_v34 = vpop.f32.mrf.mxu2  ;;  %v1903_v30 = vpop.f32.mrf.mxu0 }
 0x23a   : > { %v1901_v20 = vadd.f32 %v1900_v49, %v1812_v62  ;;  %v1992_v5 = vpop.f32.mrf.mxu1  ;;  %v4124_v8 = vpop.eup %4123  ;;  %v2678_v43 = vadd.f32 %v4122_v52, %v2677_v16  ;;  %v3716_v41 = vmul.f32 -1.442695, %v2223_v26 }
 0x23b   : > { %v5199_v55 = vpop.eup %4125  ;;  %v2350_v21 = vadd.f32 1.0, %v4124_v8 }
 0x23c   : > { %v1990_v54 = vadd.f32 %v1989_v12, %v1901_v20  ;;  %v2682_v1 = vsel %vm2681_vm9, %v4122_v52, %v2678_v43  ;;  %v2690_v51 = vmul.f32 %v5199_v55, %v5178_v40  ;;  %4127 = vpow2.f32 %v3716_v41 }
 0x23d   : > { %v2687_v47 = vsel %vm2684_vm10, %v2686_v3, %v2682_v1  ;;  %4129 = vrcp.f32 %v2350_v21  ;;  %vm2695_vm11 = vweird.f32 %v5199_v55  ;;  %v2713_v52 = vand.u32 2147483647, %v2350_v21 }
 0x23e   : > { %v3941_v7 = vpack.c.bf16 %v2687_v47, %v2672_v25  ;;  %v2691_v61 = vsub.f32 1.0, %v2690_v51  ;;  %v2079_v53 = vadd.f32 %v2078_v34, %v1990_v54  ;;  %v2715_v32 = vand.u32 2147483648, %v2350_v21  ;;  %vm5221_vm13 = vmor %vm2694_vm0, %vm2695_vm11 }
 0x23f   : > { %v1814_v58 = vpop.f32.mrf.mxu3  ;;  %vm2709_vm14 = vweird.f32 %v2350_v21  ;;  %vm2714_vm2 = vcmp.eq.f32.partialorder %v2713_v52, 8.507059e+37 }
 0x240   : > { %v1815_v4 = vadd.f32 %v1814_v58, %v4682_v59  ;;  %3977 = vst [vmem:[%s4829_s9 + $0x50] sm:$0xff] %v3941_v7   ;;  %v2224_v6 = vadd.f32 %v5079_v44, %v2079_v53  ;;  %v2692_v56 = vmul.f32 %v5199_v55, %v2691_v61  ;;  %v2716_v40 = vor.u32 1.1754944e-38, %v2715_v32 }
 0x241   : > { %v2081_v57 = vpop.f32.mrf.mxu2  ;;  %v1905_v39 = vpop.f32.mrf.mxu0 }
 0x242   : > { %v1904_v31 = vadd.f32 %v1903_v30, %v1815_v4  ;;  %v1994_v23 = vpop.f32.mrf.mxu1  ;;  %v4128_v48 = vpop.eup %4127  ;;  %v3717_v27 = vmul.f32 -1.442695, %v2224_v6  ;;  %v2693_v49 = vadd.f32 %v5199_v55, %v2692_v56 }
 0x243   : > { %v4130_v42 = vpop.eup %4129  ;;  %v5207_v15 = vadd.f32 1.0, %v4128_v48 }
 0x244   : > { %v1993_v33 = vadd.f32 %v1992_v5, %v1904_v31  ;;  %v2705_v37 = vmul.f32 %v4130_v42, %v2350_v21  ;;  %4131 = vpow2.f32 %v3717_v27  ;;  %vm2710_vm12 = vweird.f32 %v4130_v42 }
 0x245   : > { %4133 = vrcp.f32 %v5207_v15  ;;  %v2697_v62 = vsel %vm5221_vm13, %v5199_v55, %v2693_v49  ;;  %vm2711_vm1 = vmor %vm2709_vm14, %vm2710_vm12  ;;  %vm2724_vm3 = vweird.f32 %v5207_v15  ;;  %v2728_v31 = vand.u32 2147483647, %v5207_v15 }
 0x246   : > { %v2706_v46 = vsub.f32 1.0, %v2705_v37  ;;  %v2082_v12 = vadd.f32 %v2081_v57, %v1993_v33  ;;  %v2702_v5 = vsel %vm2699_vm15, %v2701_v19, %v2697_v62 }
 0x247   : > { %v1816_v59 = vpop.f32.mrf.mxu3  ;;  %vm2729_vm8 = vcmp.eq.f32.partialorder %v2728_v31, 8.507059e+37 }
 0x248   : > { %v1817_v36 = vadd.f32 %v1816_v59, %v4695_v22  ;;  %v2707_v2 = vmul.f32 %v4130_v42, %v2706_v46  ;;  %v2225_v24 = vadd.f32 %v5079_v44, %v2082_v12 }
 0x249   : > { %v2083_v0 = vpop.f32.mrf.mxu2  ;;  %v1908_v22 = vpop.f32.mrf.mxu0 }
 0x24a   : > { %v1906_v14 = vadd.f32 %v1905_v39, %v1817_v36  ;;  %v4132_v17 = vpop.eup %4131  ;;  %v2708_v34 = vadd.f32 %v4130_v42, %v2707_v2  ;;  %v3718_v9 = vmul.f32 -1.442695, %v2225_v24  ;;  %v1997_v16 = vpop.f32.mrf.mxu1 }
 0x24b   : > { %v5228_v28 = vpop.eup %4133  ;;  %v2352_v30 = vadd.f32 1.0, %v4132_v17 }
 0x24c   : > { %v1995_v10 = vadd.f32 %v1994_v23, %v1906_v14  ;;  %v2712_v26 = vsel %vm2711_vm1, %v4130_v42, %v2708_v34  ;;  %v2720_v20 = vmul.f32 %v5228_v28, %v5207_v15  ;;  %4135 = vpow2.f32 %v3718_v9 }
 0x24d   : > { %v2717_v45 = vsel %vm2714_vm2, %v2716_v40, %v2712_v26  ;;  %4137 = vrcp.f32 %v2352_v30  ;;  %vm2725_vm4 = vweird.f32 %v5228_v28  ;;  %v2730_v23 = vand.u32 2147483648, %v5207_v15 }
 0x24e   : > { %v3946_v38 = vpack.c.bf16 %v2717_v45, %v2702_v5  ;;  %v2721_v43 = vsub.f32 1.0, %v2720_v20  ;;  %v2084_v41 = vadd.f32 %v2083_v0, %v1995_v10  ;;  %v2743_v48 = vand.u32 2147483647, %v2352_v30  ;;  %vm5250_vm6 = vmor %vm2724_vm3, %vm2725_vm4 }
 0x24f   : > { %v1819_v8 = vpop.f32.mrf.mxu3  ;;  %v2745_v56 = vand.u32 2147483648, %v2352_v30  ;;  %vm2739_vm7 = vweird.f32 %v2352_v30  ;;  %v2731_v50 = vor.u32 1.1754944e-38, %v2730_v23 }
 0x250   : > { %v1820_v54 = vadd.f32 %v1819_v8, %v4701_v35  ;;  %3978 = vst [vmem:[%s4829_s9 + $0x58] sm:$0xff] %v3946_v38   ;;  %v2226_v60 = vadd.f32 %v5079_v44, %v2084_v41  ;;  %v2722_v1 = vmul.f32 %v5228_v28, %v2721_v43  ;;  %vm2744_vm10 = vcmp.eq.f32.partialorder %v2743_v48, 8.507059e+37 }
 0x251   : > { %v2086_v55 = vpop.f32.mrf.mxu2  ;;  %v1910_v7 = vpop.f32.mrf.mxu0  ;;  %v2746_v15 = vor.u32 1.1754944e-38, %v2745_v56 }
 0x252   : > { %v1909_v3 = vadd.f32 %v1908_v22, %v1820_v54  ;;  %v4136_v21 = vpop.eup %4135  ;;  %v3719_v51 = vmul.f32 -1.442695, %v2226_v60  ;;  %v1999_v35 = vpop.f32.mrf.mxu1  ;;  %v2723_v57 = vadd.f32 %v5228_v28, %v2722_v1 }
 0x253   : > { %v4138_v25 = vpop.eup %4137  ;;  %v5236_v47 = vadd.f32 1.0, %v4136_v21 }
 0x254   : > { %v1998_v58 = vadd.f32 %v1997_v16, %v1909_v3  ;;  %v2735_v61 = vmul.f32 %v4138_v25, %v2352_v30  ;;  %4139 = vpow2.f32 %v3719_v51  ;;  %vm2740_vm5 = vweird.f32 %v4138_v25 }
 0x255   : > { %4141 = vrcp.f32 %v5236_v47  ;;  %v2727_v49 = vsel %vm5250_vm6, %v5228_v28, %v2723_v57  ;;  %vm2741_vm9 = vmor %vm2739_vm7, %vm2740_vm5  ;;  %vm2754_vm0 = vweird.f32 %v5236_v47  ;;  %v2758_v54 = vand.u32 2147483647, %v5236_v47 }
 0x256   : > { %v2736_v4 = vsub.f32 1.0, %v2735_v61  ;;  %v2087_v39 = vadd.f32 %v2086_v55, %v1998_v58  ;;  %v2732_v2 = vsel %vm2729_vm8, %v2731_v50, %v2727_v49  ;;  %v2760_v55 = vand.u32 2147483648, %v5236_v47 }
 0x257   : > { %v1821_v53 = vpop.f32.mrf.mxu3  ;;  %vm2759_vm15 = vcmp.eq.f32.partialorder %v2758_v54, 8.507059e+37 }
 0x258   : > { %v1822_v6 = vadd.f32 %v1821_v53, %v4714_v63  ;;  %v2737_v27 = vmul.f32 %v4138_v25, %v2736_v4  ;;  %v2227_v42 = vadd.f32 %v5079_v44, %v2087_v39  ;;  %v2761_v39 = vor.u32 1.1754944e-38, %v2760_v55 }
 0x259   : > { %v2088_v63 = vpop.f32.mrf.mxu2  ;;  %v1913_v14 = vpop.f32.mrf.mxu0 }
 0x25a   : > { %v1911_v33 = vadd.f32 %v1910_v7, %v1822_v6  ;;  %v4140_v59 = vpop.eup %4139  ;;  %v2738_v46 = vadd.f32 %v4138_v25, %v2737_v27  ;;  %v3720_v12 = vmul.f32 -1.442695, %v2227_v42  ;;  %v2002_v34 = vpop.f32.mrf.mxu1 }
 0x25b   : > { %v5257_v0 = vpop.eup %4141  ;;  %v2354_v29 = vadd.f32 1.0, %v4140_v59 }
 0x25c   : > { %v2000_v36 = vadd.f32 %v1999_v35, %v1911_v33  ;;  %v2742_v52 = vsel %vm2741_vm9, %v4138_v25, %v2738_v46  ;;  %v2750_v32 = vmul.f32 %v5257_v0, %v5236_v47  ;;  %4143 = vpow2.f32 %v3720_v12 }
 0x25d   : > { %v2747_v24 = vsel %vm2744_vm10, %v2746_v15, %v2742_v52  ;;  %4145 = vrcp.f32 %v2354_v29  ;;  %vm2755_vm11 = vweird.f32 %v5257_v0  ;;  %v2773_v60 = vand.u32 2147483647, %v2354_v29 }
 0x25e   : > { %v3951_v22 = vpack.c.bf16 %v2747_v24, %v2732_v2  ;;  %v2751_v17 = vsub.f32 1.0, %v2750_v32  ;;  %v2089_v62 = vadd.f32 %v2088_v63, %v2000_v36  ;;  %v2775_v3 = vand.u32 2147483648, %v2354_v29  ;;  %vm5279_vm13 = vmor %vm2754_vm0, %vm2755_vm11 }
 0x25f   : > { %v1824_v18 = vpop.f32.mrf.mxu3  ;;  %vm2769_vm14 = vweird.f32 %v2354_v29  ;;  %vm2774_vm2 = vcmp.eq.f32.partialorder %v2773_v60, 8.507059e+37 }
 0x260   : > { %v1825_v9 = vadd.f32 %v1824_v18, %v4720_v11  ;;  %3979 = vst [vmem:[%s4829_s9 + $0x60] sm:$0xff] %v3951_v22   ;;  %v2228_v10 = vadd.f32 %v5079_v44, %v2089_v62  ;;  %v2752_v40 = vmul.f32 %v5257_v0, %v2751_v17  ;;  %v2776_v47 = vor.u32 1.1754944e-38, %v2775_v3 }
 0x261   : > { %v2091_v5 = vpop.f32.mrf.mxu2  ;;  %v1915_v21 = vpop.f32.mrf.mxu0 }
 0x262   : > { %v1914_v28 = vadd.f32 %v1913_v14, %v1825_v9  ;;  %v4144_v19 = vpop.eup %4143  ;;  %v3721_v30 = vmul.f32 -1.442695, %v2228_v10  ;;  %v2753_v8 = vadd.f32 %v5257_v0, %v2752_v40 }
 0x263   : > { %v4146_v16 = vpop.eup %4145  ;;  %v5265_v26 = vadd.f32 1.0, %v4144_v19 }
 0x264   : > { %v2003_v20 = vadd.f32 %v2002_v34, %v1914_v28  ;;  %v2765_v45 = vmul.f32 %v4146_v16, %v2354_v29  ;;  %4147 = vpow2.f32 %v3721_v30  ;;  %vm2770_vm12 = vweird.f32 %v4146_v16 }
 0x265   : > { %4149 = vrcp.f32 %v5265_v26  ;;  %v2757_v61 = vsel %vm5279_vm13, %v5257_v0, %v2753_v8  ;;  %vm2771_vm1 = vmor %vm2769_vm14, %vm2770_vm12  ;;  %vm2784_vm4 = vweird.f32 %v5265_v26  ;;  %v2790_v29 = vand.u32 2147483648, %v5265_v26 }
 0x266   : > { %v2766_v38 = vsub.f32 1.0, %v2765_v45  ;;  %v2092_v43 = vadd.f32 %v2091_v5, %v2003_v20  ;;  %v2762_v48 = vsel %vm2759_vm15, %v2761_v39, %v2757_v61  ;;  %v2788_v32 = vand.u32 2147483647, %v5265_v26 }
 0x267   : > { %v1826_v11 = vpop.f32.mrf.mxu3  ;;  %v2791_v17 = vor.u32 1.1754944e-38, %v2790_v29 }
 0x268   : > { %v1827_v41 = vadd.f32 %v1826_v11, %v4733_v13  ;;  %v2767_v1 = vmul.f32 %v4146_v16, %v2766_v38  ;;  %v2229_v51 = vadd.f32 %v5079_v44, %v2092_v43  ;;  %v2004_v13 = vpop.f32.mrf.mxu1  ;;  %vm2789_vm9 = vcmp.eq.f32.partialorder %v2788_v32, 8.507059e+37 }
 0x269   : > { %v2093_v27 = vpop.f32.mrf.mxu2 }
 0x26a   : > { %v1916_v25 = vadd.f32 %v1915_v21, %v1827_v41  ;;  %v4148_v7 = vpop.eup %4147  ;;  %v2768_v35 = vadd.f32 %v4146_v16, %v2767_v1  ;;  %v3722_v53 = vmul.f32 -1.442695, %v2229_v51 }
 0x26b   : > { %v4150_v4 = vpop.eup %4149  ;;  %v2356_v6 = vadd.f32 1.0, %v4148_v7 }
 0x26c   : > { %v2005_v57 = vadd.f32 %v2004_v13, %v1916_v25  ;;  %v2772_v31 = vsel %vm2771_vm1, %v4146_v16, %v2768_v35  ;;  %v2780_v23 = vmul.f32 %v4150_v4, %v5265_v26  ;;  %4151 = vpow2.f32 %v3722_v53 }
 0x26d   : > { %v2777_v56 = vsel %vm2774_vm2, %v2776_v47, %v2772_v31  ;;  %4153 = vrcp.f32 %v2356_v6  ;;  %vm2785_vm3 = vweird.f32 %v4150_v4  ;;  %v2805_v52 = vand.u32 2147483648, %v2356_v6 }
 0x26e   : > { %v3956_v42 = vpack.c.bf16 %v2777_v56, %v2762_v48  ;;  %v2781_v33 = vsub.f32 1.0, %v2780_v23  ;;  %v2094_v37 = vadd.f32 %v2093_v27, %v2005_v57  ;;  %vm2786_vm6 = vmor %vm2784_vm4, %vm2785_vm3  ;;  %vm2799_vm7 = vweird.f32 %v2356_v6 }
 0x26f   : > { %v2806_v62 = vor.u32 1.1754944e-38, %v2805_v52 }
 0x270   : > { %3980 = vst [vmem:[%s4829_s9 + $0x68] sm:$0xff] %v3956_v42   ;;  %v2230_v63 = vadd.f32 %v5079_v44, %v2094_v37  ;;  %v2782_v49 = vmul.f32 %v4150_v4, %v2781_v33  ;;  %v2803_v44 = vand.u32 2147483647, %v2356_v6 }
 0x272   : > { %v4152_v59 = vpop.eup %4151  ;;  %v3723_v46 = vmul.f32 -1.442695, %v2230_v63  ;;  %v2783_v50 = vadd.f32 %v4150_v4, %v2782_v49  ;;  %vm2804_vm10 = vcmp.eq.f32.partialorder %v2803_v44, 8.507059e+37 }
 0x273   : > { %v4154_v12 = vpop.eup %4153  ;;  %v2357_v36 = vadd.f32 1.0, %v4152_v59 }
 0x274   : > { %v2795_v0 = vmul.f32 %v4154_v12, %v2356_v6  ;;  %4155 = vpow2.f32 %v3723_v46  ;;  %vm2800_vm5 = vweird.f32 %v4154_v12  ;;  %v2787_v14 = vsel %vm2786_vm6, %v4150_v4, %v2783_v50 }
 0x275   : > { %4157 = vrcp.f32 %v2357_v36  ;;  %vm2801_vm8 = vmor %vm2799_vm7, %vm2800_vm5  ;;  %v2792_v28 = vsel %vm2789_vm9, %v2791_v17, %v2787_v14  ;;  %vm2814_vm11 = vweird.f32 %v2357_v36  ;;  %v2820_v11 = vand.u32 2147483648, %v2357_v36 }
 0x276   : > { %v2796_v15 = vsub.f32 1.0, %v2795_v0  ;;  %v2818_v38 = vand.u32 2147483647, %v2357_v36 }
 0x277   : > { %v2821_v60 = vor.u32 1.1754944e-38, %v2820_v11 }
 0x278   : > { %v2797_v2 = vmul.f32 %v4154_v12, %v2796_v15  ;;  %vm2819_vm1 = vcmp.eq.f32.partialorder %v2818_v38, 8.507059e+37 }
 0x27a   : > { %v4156_v24 = vpop.eup %4155  ;;  %v2798_v18 = vadd.f32 %v4154_v12, %v2797_v2 }
 0x27b   : > { %v4158_v22 = vpop.eup %4157  ;;  %v2358_v34 = vadd.f32 1.0, %v4156_v24 }
 0x27c   : > { %v2802_v9 = vsel %vm2801_vm8, %v4154_v12, %v2798_v18  ;;  %v2810_v10 = vmul.f32 %v4158_v22, %v2357_v36  ;;  %vm2815_vm0 = vweird.f32 %v4158_v22 }
 0x27d   : > { %v2807_v19 = vsel %vm2804_vm10, %v2806_v62, %v2802_v9  ;;  %4159 = vrcp.f32 %v2358_v34  ;;  %v2835_v8 = vand.u32 2147483648, %v2358_v34  ;;  %v2833_v41 = vand.u32 2147483647, %v2358_v34  ;;  %vm2816_vm13 = vmor %vm2814_vm11, %vm2815_vm0 }
 0x27e   : > { %v3961_v40 = vpack.c.bf16 %v2807_v19, %v2792_v28  ;;  %v2811_v30 = vsub.f32 1.0, %v2810_v10  ;;  %vm2829_vm14 = vweird.f32 %v2358_v34 }
 0x27f   : > { %v2836_v3 = vor.u32 1.1754944e-38, %v2835_v8  ;;  %vm2834_vm2 = vcmp.eq.f32.partialorder %v2833_v41, 8.507059e+37 }
 0x280   : > { %3981 = vst [vmem:[%s4829_s9 + $0x70] sm:$0xff] %v3961_v40   ;;  %v2812_v16 = vmul.f32 %v4158_v22, %v2811_v30 }
 0x282   : > { %v2813_v5 = vadd.f32 %v4158_v22, %v2812_v16 }
 0x283   : > { %v4160_v26 = vpop.eup %4159 }
 0x284   : > { %v2825_v20 = vmul.f32 %v4160_v26, %v2358_v34  ;;  %vm2830_vm12 = vweird.f32 %v4160_v26  ;;  %v2817_v54 = vsel %vm2816_vm13, %v4158_v22, %v2813_v5 }
 0x285   : > { %vm2831_vm15 = vmor %vm2829_vm14, %vm2830_vm12  ;;  %v2822_v1 = vsel %vm2819_vm1, %v2821_v60, %v2817_v54 }
 0x286   : > { %v2826_v45 = vsub.f32 1.0, %v2825_v20 }
 0x288   : > { %v2827_v43 = vmul.f32 %v4160_v26, %v2826_v45 }
 0x28a   : > { %v2828_v55 = vadd.f32 %v4160_v26, %v2827_v43 }
 0x28c   : > { %v2832_v21 = vsel %vm2831_vm15, %v4160_v26, %v2828_v55 }
 0x28d   : > { %v2837_v51 = vsel %vm2834_vm2, %v2836_v3, %v2832_v21 }
 0x28e   : > { %v3966_v25 = vpack.c.bf16 %v2837_v51, %v2822_v1 }
 0x290   : > { %3982 = vst [vmem:[%s4829_s9 + $0x78] sm:$0xff] %v3966_v25  }
 0x291 PF: > { %s13_s14 = sadd.s32 1, %s4184_s14   ;;  %s5339_s12 = smov %s4180_s13 }
 0x292   : > { %p10_p5 = scmp.ge.s32.totalorder %s13_s14, 10   ;;  %s5340_s13 = smov %s5342_s15 }
 0x294   :  { %12 = sbr.rel (!%p10_p5) target bundleno = 2 (0x2), region = 76 }

</bundles_post_ra>
